<compile_context>
chip_gen: v5e
topology: v5e:2x2
jax: 0.10.0
libtpu: 0.0.40
codegen_flags: <defaults>
</compile_context>

<pallas_src>
import functools

import jax
import jax.numpy as jnp
from jax.experimental import pallas as pl
from jax.experimental.pallas import tpu as pltpu


# Row order of the pre-built conv1 im2col: t = ty*12 + r*6 + p encodes the
# conv1 output row i1 = 4*p + 2*r + ty (ty = height-pool tap, r = pooled-row
# parity, p = pooled-row half-index).
_I1_ORDER = [4 * p + 2 * r + ty for ty in (0, 1) for r in (0, 1) for p in range(6)]


# ----------------------------------------------------------------------------
# Fused Pallas kernel: conv1+pool+relu -> conv2+pool+relu -> fc1
# ----------------------------------------------------------------------------
def _mnist_fused_kernel(x_ref, w1_ref, b1_ref, w2_ref, b2_ref,
                        wfc_ref, bfc_ref, out_ref):
    # x_ref  : (24, Bt, 128) bf16  x[t, b, dy*14+xw] = img[b, i1(t)+dy, xw] (K pad->128)
    # w1_ref : (128, 768) bf16     rows dy*14+xw ; cols tx*384 + jp*64 + c
    # b1_ref : (1, 384)  f32       cols jp*64 + c
    # w2_ref : (1920, 256) bf16    rows dy*384+jw*64+cin ; cols tx2*128+jp2*64+c2
    # b2_ref : (1, 128)  f32       cols jp2*64 + c2
    # wfc_ref: (4, 128, 256) bf16  [q2][jp2*64+c2, n]
    # bfc_ref: (1, 256)  f32
    # out_ref: (Bt, 256) f32
    Bt = x_ref.shape[1]

    # ---- conv1 (single GEMM) + 2x2 maxpool + bias + relu ------------------
    xim1 = x_ref[...].reshape(24 * Bt, 128)                    # rows (ty, r, p, b)
    r1 = jnp.dot(xim1, w1_ref[...],
                 preferred_element_type=jnp.float32)           # (24*Bt, 768)
    h1 = jnp.maximum(r1[:12 * Bt], r1[12 * Bt:])               # height pool (ty halves)
    h1 = jnp.maximum(h1[:, :384], h1[:, 384:])                 # width pool (tx halves)
    a1 = jnp.maximum(h1 + b1_ref[...], 0.0).astype(jnp.bfloat16)
    # a1[(r*6+p)*Bt + b, jw*64 + cin] = act1[b, cin, row=2p+r, col=jw]   (12*Bt, 384)

    # ---- conv2 (single GEMM) + 2x2 maxpool + bias + relu ------------------
    # For input row offset e = ty2 + dy, the rows needed over q2 = 0..3 are a
    # contiguous (4*Bt, 384) slice of a1 thanks to the (r, p, b) row order.
    def lhs(e):
        s = ((e % 2) * 6 + e // 2) * Bt
        return a1[s:s + 4 * Bt]                                # (4*Bt, 384), tile-aligned

    xim2 = jnp.concatenate(
        [jnp.concatenate([lhs(dy) for dy in range(5)], axis=1),       # ty2 = 0
         jnp.concatenate([lhs(dy + 1) for dy in range(5)], axis=1)],  # ty2 = 1
        axis=0)                                                # (8*Bt, 1920)
    r2 = jnp.dot(xim2, w2_ref[...],
                 preferred_element_type=jnp.float32)           # (8*Bt, 256)
    h2 = jnp.maximum(r2[:4 * Bt], r2[4 * Bt:])                 # height pool (ty2 halves)
    h2 = jnp.maximum(h2[:, :128], h2[:, 128:])                 # width pool (tx2 halves)
    a2 = jnp.maximum(h2 + b2_ref[...], 0.0).astype(jnp.bfloat16)
    # a2[q2*Bt + b, jp2*64 + c2] = act2[b, c2, row=q2, col=jp2]          (4*Bt, 128)

    # ---- fc1 ---------------------------------------------------------------
    acc = jnp.dot(a2[:Bt], wfc_ref[0], preferred_element_type=jnp.float32)
    for q2 in range(1, 4):
        acc = acc + jnp.dot(a2[q2 * Bt:(q2 + 1) * Bt], wfc_ref[q2],
                            preferred_element_type=jnp.float32)
    out_ref[...] = acc + bfc_ref[...]


# ----------------------------------------------------------------------------
# One-time parameter preparation (hoisted out of the per-call forward)
# ----------------------------------------------------------------------------
def prepare_params(params, gemm_dtype=jnp.bfloat16):
    W1, b1 = params["W1"], params["b1"]        # (64,1,5,3), (64,)
    W2, b2 = params["W2"], params["b2"]        # (64,64,5,3), (64,)
    Wfc, bfc = params["Wfc"], params["bfc"]    # (256,512), (256,)

    # conv1: fold width taps; w1[dy*14+xw, tx*384+jp*64+c] = W1[c,0,dy, xw-(2jp+tx)].
    k1 = jnp.transpose(W1[:, 0], (1, 2, 0))                 # (dy, dx, c)
    A1 = jnp.zeros((5, 14, 12, 64), jnp.float32)            # (dy, xw, j, c)
    for j in range(12):
        A1 = A1.at[:, j:j + 3, j, :].set(k1)
    A1 = A1.reshape(5, 14, 6, 2, 64)                        # (dy, xw, jp, tx, c)
    A1 = jnp.transpose(A1, (0, 1, 3, 2, 4))                 # (dy, xw, tx, jp, c)
    w1 = A1.reshape(70, 768)
    w1 = jnp.pad(w1, ((0, 128 - 70), (0, 0))).astype(gemm_dtype)   # K pad 70 -> 128
    b1w = jnp.tile(b1, 6).reshape(1, 384).astype(jnp.float32)

    # conv2: w2[dy*384+jw*64+cin, tx2*128+jp2*64+c2] = W2[c2,cin,dy, jw-(2jp2+tx2)].
    k2 = jnp.transpose(W2, (2, 3, 1, 0))                    # (dy, dx, cin, c2)
    A2 = jnp.zeros((5, 6, 64, 4, 64), jnp.float32)          # (dy, jw, cin, j2, c2)
    for j2 in range(4):
        A2 = A2.at[:, j2:j2 + 3, :, j2, :].set(k2)
    A2 = A2.reshape(5, 6, 64, 2, 2, 64)                     # (dy, jw, cin, jp2, tx2, c2)
    A2 = jnp.transpose(A2, (0, 1, 2, 4, 3, 5))              # (dy, jw, cin, tx2, jp2, c2)
    w2 = A2.reshape(1920, 256).astype(gemm_dtype)
    b2w = jnp.tile(b2, 2).reshape(1, 128).astype(jnp.float32)

    # fc1: PyTorch flatten order (c2, q2, jp2) -> per-row-q2 (jp2*64+c2, n) blocks.
    Wr = jnp.transpose(Wfc.reshape(256, 64, 4, 2), (2, 3, 1, 0))   # (q2, jp2, c2, n)
    wfc = Wr.reshape(4, 128, 256).astype(gemm_dtype)
    bfcw = bfc.reshape(1, 256).astype(jnp.float32)

    return {"w1": w1, "b1": b1w, "w2": w2, "b2": b2w, "wfc": wfc, "bfc": bfcw}


# ----------------------------------------------------------------------------
# Forward pass wrapper (single fused pallas_call, batch-tiled)
# ----------------------------------------------------------------------------
@functools.partial(jax.jit, static_argnames=("block_b",))
def mnist_net_forward(x, prepped, *, block_b=128):
    # x: (B, 1, 28, 14) float32 NCHW — same layout the PyTorch module consumes.
    B = x.shape[0]
    # Keep >= 2 grid steps when possible (v7x has 2 TensorCores) and Bt % 8 == 0;
    # cap at block_b (=128: near-full MXU rows, fits v7x's 64 MiB VMEM).
    half = -(-B // 2)
    Bt = min(block_b, max(8, -(-half // 8) * 8))
    Bp = pl.cdiv(B, Bt) * Bt

    # Hoisted conv1 im2col (lane-dense bf16 GEMM operand, K zero-padded to 128):
    # xim1[t, b, dy*14+xw] = img[b, i1(t)+dy, xw]  with t = (ty, r, p).
    img = x[:, 0]                                             # (B, 28, 14)
    if Bp != B:
        img = jnp.pad(img, ((0, Bp - B), (0, 0), (0, 0)))
    slabs = [img[:, i1:i1 + 5, :] for i1 in _I1_ORDER]        # 24 x (Bp, 5, 14)
    xim1 = jnp.stack(slabs, axis=0).reshape(24, Bp, 70)
    xim1 = jnp.pad(xim1, ((0, 0), (0, 0), (0, 128 - 70))).astype(jnp.bfloat16)

    p = prepped
    out = pl.pallas_call(
        _mnist_fused_kernel,
        out_shape=jax.ShapeDtypeStruct((Bp, 256), jnp.float32),
        grid=(Bp // Bt,),
        in_specs=[
            pl.BlockSpec((24, Bt, 128), lambda i: (0, i, 0)),
            pl.BlockSpec((128, 768), lambda i: (0, 0)),
            pl.BlockSpec((1, 384), lambda i: (0, 0)),
            pl.BlockSpec((1920, 256), lambda i: (0, 0)),
            pl.BlockSpec((1, 128), lambda i: (0, 0)),
            pl.BlockSpec((4, 128, 256), lambda i: (0, 0, 0)),
            pl.BlockSpec((1, 256), lambda i: (0, 0)),
        ],
        out_specs=pl.BlockSpec((Bt, 256), lambda i: (i, 0)),
        compiler_params=pltpu.CompilerParams(
            dimension_semantics=("parallel",),
            vmem_limit_bytes=40 * 1024 * 1024),
    )(xim1, p["w1"], p["b1"], p["w2"], p["b2"], p["wfc"], p["bfc"])
    return out[:B]


# ----------------------------------------------------------------------------
# Pure-JAX reference (mirrors the PyTorch forward exactly) + init
# ----------------------------------------------------------------------------
def ref_forward(x, params):
    def conv(a, W, b):
        o = jax.lax.conv_general_dilated(
            a, W, window_strides=(1, 1), padding="VALID",
            dimension_numbers=("NCHW", "OIHW", "NCHW"))
        return o + b[None, :, None, None]

    def pool2(a):
        return jax.lax.reduce_window(a, -jnp.inf, jax.lax.max,
                                     (1, 1, 2, 2), (1, 1, 2, 2), "VALID")

    h = jax.nn.relu(pool2(conv(x, params["W1"], params["b1"])))
    h = jax.nn.relu(pool2(conv(h, params["W2"], params["b2"])))
    h = h.reshape(-1, 64 * 4 * 2)
    return h @ params["Wfc"].T + params["bfc"]


def init_params(key):
    ks = jax.random.split(key, 6)

    def u(k, shape, fan_in):
        bound = 1.0 / jnp.sqrt(float(fan_in))
        return jax.random.uniform(k, shape, jnp.float32, -bound, bound)

    return {
        "W1": u(ks[0], (64, 1, 5, 3), 1 * 5 * 3),
        "b1": u(ks[1], (64,), 1 * 5 * 3),
        "W2": u(ks[2], (64, 64, 5, 3), 64 * 5 * 3),
        "b2": u(ks[3], (64,), 64 * 5 * 3),
        "Wfc": u(ks[4], (256, 512), 512),
        "bfc": u(ks[5], (256,), 512),
    }


if __name__ == "__main__":
    key = jax.random.PRNGKey(0)
    kx, kp = jax.random.split(key)
    # fc1 expects 64*4*2 features => a (1, 28, 14) image under this architecture.
    B = 32
    x = jax.random.normal(kx, (B, 1, 28, 14), jnp.float32)
    params = init_params(kp)

    prepped = prepare_params(params)          # one-time weight layout prep

    out = mnist_net_forward(x, prepped)       # small B -> Bt=16, 2 parallel steps
    out = jax.block_until_ready(out)
    assert out.shape == (B, 256), out.shape

    ref = ref_forward(x, params)
    max_err = float(jnp.max(jnp.abs(out - ref)))
    # bf16 GEMM operands with f32 accumulation -> loosened tolerance.
    assert jnp.allclose(out, ref, atol=2e-2, rtol=2e-2), max_err

    print("KERNEL_OK")
</pallas_src>

<mosaic_0001>
module attributes {stable_mosaic.version = 11 : i64} {
  func.func @_mnist_fused_kernel(%arg0: i32, %arg1: memref<24x16x128xbf16, #tpu.memory_space<vmem>>, %arg2: memref<128x768xbf16, #tpu.memory_space<vmem>>, %arg3: memref<1x384xf32, #tpu.memory_space<vmem>>, %arg4: memref<1920x256xbf16, #tpu.memory_space<vmem>>, %arg5: memref<1x128xf32, #tpu.memory_space<vmem>>, %arg6: memref<4x128x256xbf16, #tpu.memory_space<vmem>>, %arg7: memref<1x256xf32, #tpu.memory_space<vmem>>, %arg8: memref<16x256xf32, #tpu.memory_space<vmem>>) attributes {dimension_semantics = [#tpu.dimension_semantics<parallel>], iteration_bounds = array<i64: 2>, scalar_prefetch = 0 : i64, scratch_operands = 0 : i64, tpu.core_type = #tpu.core_type<tc>, window_params = [{transform_indices = @transform_0, window_bounds = array<i64: 24, 16, 128>}, {pipeline_mode = #tpu.pipeline_mode<synchronous>, transform_indices = @transform_1, window_bounds = array<i64: 128, 768>}, {pipeline_mode = #tpu.pipeline_mode<synchronous>, transform_indices = @transform_2, window_bounds = array<i64: 1, 384>}, {pipeline_mode = #tpu.pipeline_mode<synchronous>, transform_indices = @transform_3, window_bounds = array<i64: 1920, 256>}, {pipeline_mode = #tpu.pipeline_mode<synchronous>, transform_indices = @transform_4, window_bounds = array<i64: 1, 128>}, {pipeline_mode = #tpu.pipeline_mode<synchronous>, transform_indices = @transform_5, window_bounds = array<i64: 4, 128, 256>}, {pipeline_mode = #tpu.pipeline_mode<synchronous>, transform_indices = @transform_6, window_bounds = array<i64: 1, 256>}, {transform_indices = @transform_7, window_bounds = array<i64: 16, 256>}]} {
    %c0 = arith.constant 0 : index
    %c0_0 = arith.constant 0 : index
    %c0_1 = arith.constant 0 : index
    %0 = vector.load %arg1[%c0, %c0_0, %c0_1] : memref<24x16x128xbf16, #tpu.memory_space<vmem>>, vector<24x16x128xbf16>
    %1 = vector.shape_cast %0 : vector<24x16x128xbf16> to vector<384x128xbf16>
    %c0_2 = arith.constant 0 : index
    %c0_3 = arith.constant 0 : index
    %2 = vector.load %arg2[%c0_2, %c0_3] : memref<128x768xbf16, #tpu.memory_space<vmem>>, vector<128x768xbf16>
    %cst = arith.constant dense<0.000000e+00> : vector<384x768xf32>
    %3 = tpu.matmul %1, %2, %cst {dimension_numbers = #tpu.dot_dimension_numbers<[1], [0], [0], [1], [0, 0, 1, 1], [], []>} : vector<384x128xbf16>, vector<128x768xbf16>, vector<384x768xf32> -> vector<384x768xf32>
    %4 = vector.extract_strided_slice %3 {offsets = [0, 0], sizes = [192, 768], strides = [1, 1]} : vector<384x768xf32> to vector<192x768xf32>
    %5 = vector.extract_strided_slice %3 {offsets = [192, 0], sizes = [192, 768], strides = [1, 1]} : vector<384x768xf32> to vector<192x768xf32>
    %6 = arith.maximumf %4, %5 : vector<192x768xf32>
    %7 = vector.extract_strided_slice %6 {offsets = [0, 0], sizes = [192, 384], strides = [1, 1]} : vector<192x768xf32> to vector<192x384xf32>
    %8 = vector.extract_strided_slice %6 {offsets = [0, 384], sizes = [192, 384], strides = [1, 1]} : vector<192x768xf32> to vector<192x384xf32>
    %9 = arith.maximumf %7, %8 : vector<192x384xf32>
    %c0_4 = arith.constant 0 : index
    %c0_5 = arith.constant 0 : index
    %10 = vector.load %arg3[%c0_4, %c0_5] : memref<1x384xf32, #tpu.memory_space<vmem>>, vector<1x384xf32>
    %11 = vector.broadcast %10 : vector<1x384xf32> to vector<192x384xf32>
    %12 = arith.addf %9, %11 : vector<192x384xf32>
    %cst_6 = arith.constant 0.000000e+00 : f32
    %13 = vector.broadcast %cst_6 : f32 to vector<192x384xf32>
    %14 = arith.maximumf %12, %13 : vector<192x384xf32>
    %15 = arith.truncf %14 : vector<192x384xf32> to vector<192x384xbf16>
    %16 = vector.extract_strided_slice %15 {offsets = [0, 0], sizes = [64, 384], strides = [1, 1]} : vector<192x384xbf16> to vector<64x384xbf16>
    %17 = vector.extract_strided_slice %15 {offsets = [96, 0], sizes = [64, 384], strides = [1, 1]} : vector<192x384xbf16> to vector<64x384xbf16>
    %18 = vector.extract_strided_slice %15 {offsets = [16, 0], sizes = [64, 384], strides = [1, 1]} : vector<192x384xbf16> to vector<64x384xbf16>
    %19 = vector.extract_strided_slice %15 {offsets = [112, 0], sizes = [64, 384], strides = [1, 1]} : vector<192x384xbf16> to vector<64x384xbf16>
    %20 = vector.extract_strided_slice %15 {offsets = [32, 0], sizes = [64, 384], strides = [1, 1]} : vector<192x384xbf16> to vector<64x384xbf16>
    %21 = tpu.concatenate %16, %17, %18, %19, %20 in 1 : vector<64x384xbf16>, vector<64x384xbf16>, vector<64x384xbf16>, vector<64x384xbf16>, vector<64x384xbf16> -> vector<64x1920xbf16>
    %22 = vector.extract_strided_slice %15 {offsets = [96, 0], sizes = [64, 384], strides = [1, 1]} : vector<192x384xbf16> to vector<64x384xbf16>
    %23 = vector.extract_strided_slice %15 {offsets = [16, 0], sizes = [64, 384], strides = [1, 1]} : vector<192x384xbf16> to vector<64x384xbf16>
    %24 = vector.extract_strided_slice %15 {offsets = [112, 0], sizes = [64, 384], strides = [1, 1]} : vector<192x384xbf16> to vector<64x384xbf16>
    %25 = vector.extract_strided_slice %15 {offsets = [32, 0], sizes = [64, 384], strides = [1, 1]} : vector<192x384xbf16> to vector<64x384xbf16>
    %26 = vector.extract_strided_slice %15 {offsets = [128, 0], sizes = [64, 384], strides = [1, 1]} : vector<192x384xbf16> to vector<64x384xbf16>
    %27 = tpu.concatenate %22, %23, %24, %25, %26 in 1 : vector<64x384xbf16>, vector<64x384xbf16>, vector<64x384xbf16>, vector<64x384xbf16>, vector<64x384xbf16> -> vector<64x1920xbf16>
    %28 = tpu.concatenate %21, %27 in 0 : vector<64x1920xbf16>, vector<64x1920xbf16> -> vector<128x1920xbf16>
    %c0_7 = arith.constant 0 : index
    %c0_8 = arith.constant 0 : index
    %29 = vector.load %arg4[%c0_7, %c0_8] : memref<1920x256xbf16, #tpu.memory_space<vmem>>, vector<1920x256xbf16>
    %cst_9 = arith.constant dense<0.000000e+00> : vector<128x256xf32>
    %30 = tpu.matmul %28, %29, %cst_9 {dimension_numbers = #tpu.dot_dimension_numbers<[1], [0], [0], [1], [0, 0, 1, 1], [], []>} : vector<128x1920xbf16>, vector<1920x256xbf16>, vector<128x256xf32> -> vector<128x256xf32>
    %31 = vector.extract_strided_slice %30 {offsets = [0, 0], sizes = [64, 256], strides = [1, 1]} : vector<128x256xf32> to vector<64x256xf32>
    %32 = vector.extract_strided_slice %30 {offsets = [64, 0], sizes = [64, 256], strides = [1, 1]} : vector<128x256xf32> to vector<64x256xf32>
    %33 = arith.maximumf %31, %32 : vector<64x256xf32>
    %34 = vector.extract_strided_slice %33 {offsets = [0, 0], sizes = [64, 128], strides = [1, 1]} : vector<64x256xf32> to vector<64x128xf32>
    %35 = vector.extract_strided_slice %33 {offsets = [0, 128], sizes = [64, 128], strides = [1, 1]} : vector<64x256xf32> to vector<64x128xf32>
    %36 = arith.maximumf %34, %35 : vector<64x128xf32>
    %c0_10 = arith.constant 0 : index
    %c0_11 = arith.constant 0 : index
    %37 = vector.load %arg5[%c0_10, %c0_11] : memref<1x128xf32, #tpu.memory_space<vmem>>, vector<1x128xf32>
    %38 = vector.broadcast %37 : vector<1x128xf32> to vector<64x128xf32>
    %39 = arith.addf %36, %38 : vector<64x128xf32>
    %cst_12 = arith.constant 0.000000e+00 : f32
    %40 = vector.broadcast %cst_12 : f32 to vector<64x128xf32>
    %41 = arith.maximumf %39, %40 : vector<64x128xf32>
    %42 = arith.truncf %41 : vector<64x128xf32> to vector<64x128xbf16>
    %43 = vector.extract_strided_slice %42 {offsets = [0, 0], sizes = [16, 128], strides = [1, 1]} : vector<64x128xbf16> to vector<16x128xbf16>
    %c0_13 = arith.constant 0 : index
    %c0_14 = arith.constant 0 : index
    %c0_15 = arith.constant 0 : index
    %44 = vector.load %arg6[%c0_13, %c0_14, %c0_15] : memref<4x128x256xbf16, #tpu.memory_space<vmem>>, vector<1x128x256xbf16>
    %45 = vector.shape_cast %44 : vector<1x128x256xbf16> to vector<128x256xbf16>
    %cst_16 = arith.constant dense<0.000000e+00> : vector<16x256xf32>
    %46 = tpu.matmul %43, %45, %cst_16 {dimension_numbers = #tpu.dot_dimension_numbers<[1], [0], [0], [1], [0, 0, 1, 1], [], []>} : vector<16x128xbf16>, vector<128x256xbf16>, vector<16x256xf32> -> vector<16x256xf32>
    %47 = vector.extract_strided_slice %42 {offsets = [16, 0], sizes = [16, 128], strides = [1, 1]} : vector<64x128xbf16> to vector<16x128xbf16>
    %c1 = arith.constant 1 : index
    %c0_17 = arith.constant 0 : index
    %c0_18 = arith.constant 0 : index
    %48 = vector.load %arg6[%c1, %c0_17, %c0_18] : memref<4x128x256xbf16, #tpu.memory_space<vmem>>, vector<1x128x256xbf16>
    %49 = vector.shape_cast %48 : vector<1x128x256xbf16> to vector<128x256xbf16>
    %cst_19 = arith.constant dense<0.000000e+00> : vector<16x256xf32>
    %50 = tpu.matmul %47, %49, %cst_19 {dimension_numbers = #tpu.dot_dimension_numbers<[1], [0], [0], [1], [0, 0, 1, 1], [], []>} : vector<16x128xbf16>, vector<128x256xbf16>, vector<16x256xf32> -> vector<16x256xf32>
    %51 = arith.addf %46, %50 : vector<16x256xf32>
    %52 = vector.extract_strided_slice %42 {offsets = [32, 0], sizes = [16, 128], strides = [1, 1]} : vector<64x128xbf16> to vector<16x128xbf16>
    %c2 = arith.constant 2 : index
    %c0_20 = arith.constant 0 : index
    %c0_21 = arith.constant 0 : index
    %53 = vector.load %arg6[%c2, %c0_20, %c0_21] : memref<4x128x256xbf16, #tpu.memory_space<vmem>>, vector<1x128x256xbf16>
    %54 = vector.shape_cast %53 : vector<1x128x256xbf16> to vector<128x256xbf16>
    %cst_22 = arith.constant dense<0.000000e+00> : vector<16x256xf32>
    %55 = tpu.matmul %52, %54, %cst_22 {dimension_numbers = #tpu.dot_dimension_numbers<[1], [0], [0], [1], [0, 0, 1, 1], [], []>} : vector<16x128xbf16>, vector<128x256xbf16>, vector<16x256xf32> -> vector<16x256xf32>
    %56 = arith.addf %51, %55 : vector<16x256xf32>
    %57 = vector.extract_strided_slice %42 {offsets = [48, 0], sizes = [16, 128], strides = [1, 1]} : vector<64x128xbf16> to vector<16x128xbf16>
    %c3 = arith.constant 3 : index
    %c0_23 = arith.constant 0 : index
    %c0_24 = arith.constant 0 : index
    %58 = vector.load %arg6[%c3, %c0_23, %c0_24] : memref<4x128x256xbf16, #tpu.memory_space<vmem>>, vector<1x128x256xbf16>
    %59 = vector.shape_cast %58 : vector<1x128x256xbf16> to vector<128x256xbf16>
    %cst_25 = arith.constant dense<0.000000e+00> : vector<16x256xf32>
    %60 = tpu.matmul %57, %59, %cst_25 {dimension_numbers = #tpu.dot_dimension_numbers<[1], [0], [0], [1], [0, 0, 1, 1], [], []>} : vector<16x128xbf16>, vector<128x256xbf16>, vector<16x256xf32> -> vector<16x256xf32>
    %61 = arith.addf %56, %60 : vector<16x256xf32>
    %c0_26 = arith.constant 0 : index
    %c0_27 = arith.constant 0 : index
    %62 = vector.load %arg7[%c0_26, %c0_27] : memref<1x256xf32, #tpu.memory_space<vmem>>, vector<1x256xf32>
    %63 = vector.broadcast %62 : vector<1x256xf32> to vector<16x256xf32>
    %64 = arith.addf %61, %63 : vector<16x256xf32>
    %c0_28 = arith.constant 0 : index
    %c0_29 = arith.constant 0 : index
    %65 = vector.load %arg8[%c0_28, %c0_29] : memref<16x256xf32, #tpu.memory_space<vmem>>, vector<16x256xf32>
    tpu.vector_store %arg8[%c0_28, %c0_29], %64 {strides = array<i32>} : memref<16x256xf32, #tpu.memory_space<vmem>>, vector<16x256xf32>,
    return
  }
  func.func @transform_0(%arg0: i32) -> (i32, i32, i32) {
    %c0_i32 = arith.constant 0 : i32
    %c0_i32_0 = arith.constant 0 : i32
    %c0_i32_1 = arith.constant 0 : i32
    return %c0_i32, %arg0, %c0_i32_0 : i32, i32, i32
  }
  func.func @transform_1(%arg0: i32) -> (i32, i32) {
    %c0_i32 = arith.constant 0 : i32
    %c0_i32_0 = arith.constant 0 : i32
    %c0_i32_1 = arith.constant 0 : i32
    return %c0_i32, %c0_i32_0 : i32, i32
  }
  func.func @transform_2(%arg0: i32) -> (i32, i32) {
    %c0_i32 = arith.constant 0 : i32
    %c0_i32_0 = arith.constant 0 : i32
    %c0_i32_1 = arith.constant 0 : i32
    return %c0_i32, %c0_i32_0 : i32, i32
  }
  func.func @transform_3(%arg0: i32) -> (i32, i32) {
    %c0_i32 = arith.constant 0 : i32
    %c0_i32_0 = arith.constant 0 : i32
    %c0_i32_1 = arith.constant 0 : i32
    return %c0_i32, %c0_i32_0 : i32, i32
  }
  func.func @transform_4(%arg0: i32) -> (i32, i32) {
    %c0_i32 = arith.constant 0 : i32
    %c0_i32_0 = arith.constant 0 : i32
    %c0_i32_1 = arith.constant 0 : i32
    return %c0_i32, %c0_i32_0 : i32, i32
  }
  func.func @transform_5(%arg0: i32) -> (i32, i32, i32) {
    %c0_i32 = arith.constant 0 : i32
    %c0_i32_0 = arith.constant 0 : i32
    %c0_i32_1 = arith.constant 0 : i32
    %c0_i32_2 = arith.constant 0 : i32
    return %c0_i32, %c0_i32_0, %c0_i32_1 : i32, i32, i32
  }
  func.func @transform_6(%arg0: i32) -> (i32, i32) {
    %c0_i32 = arith.constant 0 : i32
    %c0_i32_0 = arith.constant 0 : i32
    %c0_i32_1 = arith.constant 0 : i32
    return %c0_i32, %c0_i32_0 : i32, i32
  }
  func.func @transform_7(%arg0: i32) -> (i32, i32) {
    %c0_i32 = arith.constant 0 : i32
    %c0_i32_0 = arith.constant 0 : i32
    return %arg0, %c0_i32 : i32, i32
  }
}

</mosaic_0001>

<bundles_post_ra>
// kernel: mnist_net_forward.1
= control target key start
LH: loop header
LB: loop body
LE: loop exit
PB: predicated region body
PF: predicated region fallthrough
CT: control target
= control target key end

     0   :  { %12 = vsyncpa [#allocation4], 0  ;;  %s12665_s0 = inlined_call_operand.vmem [shape: bf16[24,32,128], index: 0, kind: input, shape index: {}]   ;;  %s12666_s1 = inlined_call_operand.vmem [shape: bf16[128,768], index: 1, kind: input, shape index: {}]   ;;  %s12667_s2 = inlined_call_operand.vmem [shape: f32[1,384], index: 2, kind: input, shape index: {}]   ;;  %s12668_s3 = inlined_call_operand.vmem [shape: bf16[1920,256], index: 3, kind: input, shape index: {}]   ;;  %s12669_s4 = inlined_call_operand.vmem [shape: f32[1,128], index: 4, kind: input, shape index: {}]   ;;  %s12670_s5 = inlined_call_operand.vmem [shape: bf16[4,128,256], index: 5, kind: input, shape index: {}]   ;;  %s12671_s6 = inlined_call_operand.vmem [shape: f32[1,256], index: 6, kind: input, shape index: {}]   ;;  %s12672_s7 = inlined_call_operand.hbm [shape: f32[32,256], index: 7, kind: output, shape index: {}]  }
   0x1   :  { %14 = vsyncpa [#allocation4 + $0x1], 0  ;;  %s8059_s24 = smov 0   ;;  %s8061_s25 = smov 0  }
   0x2   :  { %s8063_s26 = smov 0   ;;  %s8065_s27 = smov 0  }
   0x3 LB: > { %s5964_s28 = sadd.s32 4294967295, %s8015_s27   ;;  %s5965_s29 = sadd.s32 4294967294, %s8015_s27   ;;  %s8015_s27 = sphi %s8065_s27, %s13377_s27   ;;  %s8011_s26 = sphi %s8063_s26, %s13376_s26   ;;  %s8007_s25 = sphi %s8061_s25, %s13375_s25   ;;  %s8003_s24 = sphi %s8059_s24, %s13374_s24  }
   0x4   : > { %s8082_s30 = sadd.s32 1, %s8015_s27   ;;  %s27_s8 = sadd.s32 1, %s8011_s26 }
   0x5   : > { %s24_s9 = ssub.s32 %s8015_s27, %s8082_s30  ;;  %p34_p0 = scmp.ne.s32.totalorder %s8011_s26, %s8007_s25 }
   0x6   : > { %p25_p1 = scmp.eq.s32.totalorder %s24_s9, 0  ;;  %p35_p2 = scmp.eq.s32.totalorder %s8015_s27, 0 }
   0x7   : > { %p190_p3 = scmp.eq.s32.totalorder %s5964_s28, 1  ;;  %p195_p4 = scmp.ne.s32.totalorder %s8007_s25, %s8003_s24 }
   0x8   : > { %s8095_s10 = scalar_select %p25_p1, %s8011_s26, %s27_s8  }
   0x9   : > { %p36_p5 = por %p35_p2, %p34_p0  ;;  %p8097_p6 = por %p190_p3, %p34_p0 }
   0xa   : > { %p196_p7 = scmp.eq.s32.totalorder %s5965_s29, 1  ;;  %p5967_p9 = scmp.ge.s32.totalorder %s8015_s27, 2 }
   0xc   : > { %p8101_p8 = por %p196_p7, %p195_p4  ;;  %230 = sbr.rel (%p5967_p9) target bundleno = 45 (0x2d), region = 40 }
  0x11   : > { %233 = sbr.rel (!%p36_p5) target bundleno = 45 (0x2d), region = 44  ;;  %s235_s13 = sand.u32 (%p36_p5), 1, %s8011_s26  }
  0x12   : > { %s7530_s14 = sshll.u32 (%p36_p5), %s8015_s27, 3  ;;  %s7909_s15 = smul.u32 (%p36_p5), 192, %s235_s13 }
  0x13   : > { %s8113_s18 = scalar_lea.vmem (%p36_p5), %s12665_s0, %s7530_s14 }
  0x14   : > { %v257_v0 = vld [vmem:[%s8113_s18] sm:$0xff] (%p36_p5)   ;;  %v261_v1 = vld [vmem:[%s8113_s18 + $0x10] sm:$0xff] (%p36_p5)   ;;  %s8118_s19 = scalar_lea.vmem (%p36_p5), [#allocation2], %s7909_s15 }
  0x15   : > { %v265_v2 = vld [vmem:[%s8113_s18 + $0x20] sm:$0xff] (%p36_p5)   ;;  %258 = vst [vmem:[%s8118_s19] sm:$0xff] (%p36_p5), %v257_v0   ;;  %v269_v3 = vld [vmem:[%s8113_s18 + $0x30] sm:$0xff] (%p36_p5)  }
  0x16   : > { %262 = vst [vmem:[%s8118_s19 + $0x8] sm:$0xff] %v261_v1   ;;  %v273_v4 = vld [vmem:[%s8113_s18 + $0x40] sm:$0xff]   ;;  %v277_v5 = vld [vmem:[%s8113_s18 + $0x50] sm:$0xff]  }
  0x17   : > { %266 = vst [vmem:[%s8118_s19 + $0x10] sm:$0xff] %v265_v2   ;;  %v281_v6 = vld [vmem:[%s8113_s18 + $0x60] sm:$0xff]   ;;  %v285_v7 = vld [vmem:[%s8113_s18 + $0x70] sm:$0xff]  }
  0x18   : > { %270 = vst [vmem:[%s8118_s19 + $0x18] sm:$0xff] %v269_v3   ;;  %v289_v8 = vld [vmem:[%s8113_s18 + $0x80] sm:$0xff]   ;;  %v293_v9 = vld [vmem:[%s8113_s18 + $0x90] sm:$0xff]  }
  0x19   : > { %274 = vst [vmem:[%s8118_s19 + $0x20] sm:$0xff] %v273_v4   ;;  %v297_v10 = vld [vmem:[%s8113_s18 + $0xa0] sm:$0xff]   ;;  %v301_v11 = vld [vmem:[%s8113_s18 + $0xb0] sm:$0xff]  }
  0x1a   : > { %278 = vst [vmem:[%s8118_s19 + $0x28] sm:$0xff] %v277_v5   ;;  %v305_v12 = vld [vmem:[%s8113_s18 + $0xc0] sm:$0xff]   ;;  %v309_v13 = vld [vmem:[%s8113_s18 + $0xd0] sm:$0xff]  }
  0x1b   : > { %282 = vst [vmem:[%s8118_s19 + $0x30] sm:$0xff] %v281_v6   ;;  %v313_v14 = vld [vmem:[%s8113_s18 + $0xe0] sm:$0xff]   ;;  %v317_v15 = vld [vmem:[%s8113_s18 + $0xf0] sm:$0xff]  }
  0x1c   : > { %286 = vst [vmem:[%s8118_s19 + $0x38] sm:$0xff] %v285_v7   ;;  %v321_v16 = vld [vmem:[%s8113_s18 + $0x100] sm:$0xff]   ;;  %v325_v17 = vld [vmem:[%s8113_s18 + $0x110] sm:$0xff]  }
  0x1d   : > { %290 = vst [vmem:[%s8118_s19 + $0x40] sm:$0xff] %v289_v8   ;;  %v329_v18 = vld [vmem:[%s8113_s18 + $0x120] sm:$0xff]   ;;  %v333_v19 = vld [vmem:[%s8113_s18 + $0x130] sm:$0xff]  }
  0x1e   : > { %294 = vst [vmem:[%s8118_s19 + $0x48] sm:$0xff] %v293_v9   ;;  %v337_v20 = vld [vmem:[%s8113_s18 + $0x140] sm:$0xff]   ;;  %v341_v21 = vld [vmem:[%s8113_s18 + $0x150] sm:$0xff]  }
  0x1f   : > { %298 = vst [vmem:[%s8118_s19 + $0x50] sm:$0xff] %v297_v10   ;;  %v345_v22 = vld [vmem:[%s8113_s18 + $0x160] sm:$0xff]   ;;  %v349_v23 = vld [vmem:[%s8113_s18 + $0x170] sm:$0xff]  }
  0x20   : > { %302 = vst [vmem:[%s8118_s19 + $0x58] sm:$0xff] %v301_v11  }
  0x21   : > { %306 = vst [vmem:[%s8118_s19 + $0x60] sm:$0xff] %v305_v12  }
  0x22   : > { %310 = vst [vmem:[%s8118_s19 + $0x68] sm:$0xff] %v309_v13  }
  0x23   : > { %314 = vst [vmem:[%s8118_s19 + $0x70] sm:$0xff] %v313_v14  }
  0x24   : > { %318 = vst [vmem:[%s8118_s19 + $0x78] sm:$0xff] %v317_v15  }
  0x25   : > { %322 = vst [vmem:[%s8118_s19 + $0x80] sm:$0xff] %v321_v16  }
  0x26   : > { %326 = vst [vmem:[%s8118_s19 + $0x88] sm:$0xff] %v325_v17  }
  0x27   : > { %330 = vst [vmem:[%s8118_s19 + $0x90] sm:$0xff] %v329_v18  }
  0x28   : > { %334 = vst [vmem:[%s8118_s19 + $0x98] sm:$0xff] %v333_v19  }
  0x29   : > { %338 = vst [vmem:[%s8118_s19 + $0xa0] sm:$0xff] %v337_v20  }
  0x2a   : > { %342 = vst [vmem:[%s8118_s19 + $0xa8] sm:$0xff] %v341_v21  }
  0x2b   : > { %346 = vst [vmem:[%s8118_s19 + $0xb0] sm:$0xff] %v345_v22  }
  0x2c   : > { %350 = vst [vmem:[%s8118_s19 + $0xb8] sm:$0xff] %v349_v23  }
  0x2d PF: > { %p5970_p10 = scmp.ge.s32.totalorder %s8015_s27, 1  ;;  %p471_p11 = scmp.lt.s32.totalorder %s8015_s27, 3 }
  0x2f   : > { %p472_p12 = pnand %p5970_p10, %p471_p11 }
  0x31   : > { %475 = sbr.rel (%p472_p12) target bundleno = 2287 (0x8ef), region = 85 }
  0x36   : > { %v6238_v24 = vld [vmem:[%s12666_s1 + $0x150] sm:$0xf]  ;;  %v7600_v25 = vld [vmem:[%s12666_s1 + $0x164] sm:$0xf0]  ;;  %v7597_v26 = vld [vmem:[%s12666_s1 + $0x154] sm:$0xf] }
  0x37   : > { %v6239_v27 = vor.u32 %v7600_v25, %v6238_v24  ;;  %v6240_v28 = vld [vmem:[%s12666_s1 + $0x168] sm:$0xf0]  ;;  %v7598_v29 = vld [vmem:[%s12666_s1 + $0x15c] sm:$0xf]  ;;  %v6248_v30 = vld [vmem:[%s12666_s1 + $0x170] sm:$0xf0] }
  0x38   : > { %v6243_v31 = vor.u32 %v7597_v26, %v6240_v28  ;;  %v6251_v32 = vor.u32 %v7598_v29, %v6248_v30  ;;  %v6214_v33 = vld [vmem:[%s12666_s1 + $0x120] sm:$0xf]  ;;  %v7594_v34 = vld [vmem:[%s12666_s1 + $0x134] sm:$0xf0]  ;;  %v7591_v35 = vld [vmem:[%s12666_s1 + $0x124] sm:$0xf] }
  0x39   : > { %991 = vmatpush.bf16.msra.mxu0 %v6239_v27  ;;  %v6215_v36 = vor.u32 %v7594_v34, %v6214_v33  ;;  %v6216_v37 = vld [vmem:[%s12666_s1 + $0x138] sm:$0xf0]  ;;  %v7592_v38 = vld [vmem:[%s12666_s1 + $0x12c] sm:$0xf]  ;;  %v6224_v39 = vld [vmem:[%s12666_s1 + $0x140] sm:$0xf0] }
  0x3a   : > { %1120 = vmatpush.bf16.msra.mxu1 %v6243_v31  ;;  %1378 = vmatpush.bf16.msra.mxu3 %v6251_v32  ;;  %v6219_v40 = vor.u32 %v7591_v35, %v6216_v37  ;;  %v6227_v41 = vor.u32 %v7592_v38, %v6224_v39  ;;  %v6190_v42 = vld [vmem:[%s12666_s1 + $0xf0] sm:$0xf]  ;;  %v7588_v43 = vld [vmem:[%s12666_s1 + $0x104] sm:$0xf0]  ;;  %v7585_v44 = vld [vmem:[%s12666_s1 + $0xf4] sm:$0xf] }
  0x3b   : > { %v6192_v45 = vld [vmem:[%s12666_s1 + $0x108] sm:$0xf0]  ;;  %v7586_v46 = vld [vmem:[%s12666_s1 + $0xfc] sm:$0xf]  ;;  %v6200_v47 = vld [vmem:[%s12666_s1 + $0x110] sm:$0xf0]  ;;  %v6191_v48 = vor.u32 %v7588_v43, %v6190_v42 }
  0x3c   : > { %v6195_v49 = vor.u32 %v7585_v44, %v6192_v45  ;;  %v6203_v50 = vor.u32 %v7586_v46, %v6200_v47  ;;  %v6166_v51 = vld [vmem:[%s12666_s1 + $0xc0] sm:$0xf]  ;;  %v7582_v52 = vld [vmem:[%s12666_s1 + $0xd4] sm:$0xf0]  ;;  %v7579_v53 = vld [vmem:[%s12666_s1 + $0xc4] sm:$0xf] }
  0x3d   : > { %992 = vmatpush.bf16.msra.mxu0 %v6215_v36  ;;  %v6168_v54 = vld [vmem:[%s12666_s1 + $0xd8] sm:$0xf0]  ;;  %v7580_v55 = vld [vmem:[%s12666_s1 + $0xcc] sm:$0xf]  ;;  %v6176_v56 = vld [vmem:[%s12666_s1 + $0xe0] sm:$0xf0]  ;;  %v6167_v57 = vor.u32 %v7582_v52, %v6166_v51 }
  0x3e   : > { %1121 = vmatpush.bf16.msra.mxu1 %v6219_v40  ;;  %1379 = vmatpush.bf16.msra.mxu3 %v6227_v41  ;;  %v6171_v58 = vor.u32 %v7579_v53, %v6168_v54  ;;  %v6179_v59 = vor.u32 %v7580_v55, %v6176_v56  ;;  %v6142_v60 = vld [vmem:[%s12666_s1 + $0x90] sm:$0xf]  ;;  %v7576_v61 = vld [vmem:[%s12666_s1 + $0xa4] sm:$0xf0]  ;;  %v7573_v62 = vld [vmem:[%s12666_s1 + $0x94] sm:$0xf] }
  0x3f   : > { %v6144_v63 = vld [vmem:[%s12666_s1 + $0xa8] sm:$0xf0]  ;;  %v7574_v0 = vld [vmem:[%s12666_s1 + $0x9c] sm:$0xf]  ;;  %v6152_v1 = vld [vmem:[%s12666_s1 + $0xb0] sm:$0xf0]  ;;  %v6143_v2 = vor.u32 %v7576_v61, %v6142_v60 }
  0x40   : > { %v6118_v3 = vld [vmem:[%s12666_s1 + $0x60] sm:$0xf]  ;;  %v6147_v4 = vor.u32 %v7573_v62, %v6144_v63  ;;  %v6155_v5 = vor.u32 %v7574_v0, %v6152_v1  ;;  %v7570_v6 = vld [vmem:[%s12666_s1 + $0x74] sm:$0xf0]  ;;  %v7567_v7 = vld [vmem:[%s12666_s1 + $0x64] sm:$0xf] }
  0x41   : > { %993 = vmatpush.bf16.msra.mxu0 %v6191_v48  ;;  %v6120_v8 = vld [vmem:[%s12666_s1 + $0x78] sm:$0xf0]  ;;  %v7568_v9 = vld [vmem:[%s12666_s1 + $0x6c] sm:$0xf]  ;;  %v6128_v10 = vld [vmem:[%s12666_s1 + $0x80] sm:$0xf0]  ;;  %v6119_v11 = vor.u32 %v7570_v6, %v6118_v3 }
  0x42   : > { %1122 = vmatpush.bf16.msra.mxu1 %v6195_v49  ;;  %1380 = vmatpush.bf16.msra.mxu3 %v6203_v50  ;;  %v6094_v12 = vld [vmem:[%s12666_s1 + $0x30] sm:$0xf]  ;;  %v6123_v13 = vor.u32 %v7567_v7, %v6120_v8  ;;  %v6131_v14 = vor.u32 %v7568_v9, %v6128_v10  ;;  %v7564_v15 = vld [vmem:[%s12666_s1 + $0x44] sm:$0xf0]  ;;  %v7561_v16 = vld [vmem:[%s12666_s1 + $0x34] sm:$0xf] }
  0x43   : > { %s8285_s14 = sand.u32 1, %s8007_s25   ;;  %v6096_v17 = vld [vmem:[%s12666_s1 + $0x48] sm:$0xf0]  ;;  %v7562_v18 = vld [vmem:[%s12666_s1 + $0x3c] sm:$0xf]  ;;  %v6095_v20 = vor.u32 %v7564_v15, %v6094_v12  ;;  %s7908_s23 = sshll.u32 %s5964_s28, 5 }
  0x44   : > { %v6104_v19 = vld [vmem:[%s12666_s1 + $0x50] sm:$0xf0]  ;;  %s7910_s21 = smul.u32 192, %s8285_s14  ;;  %v6099_v21 = vor.u32 %v7561_v16, %v6096_v17  ;;  %v6070_v23 = vld [vmem:[%s12666_s1] sm:$0xf]  ;;  %s5971_s22 = sshll.u32 %s8285_s14, 5 }
  0x45   : > { %994 = vmatpush.bf16.msra.mxu0 %v6167_v57  ;;  %v6107_v22 = vor.u32 %v7562_v18, %v6104_v19  ;;  %v7558_v24 = vld [vmem:[%s12666_s1 + $0x14] sm:$0xf0]  ;;  %v7555_v25 = vld [vmem:[%s12666_s1 + $0x4] sm:$0xf]  ;;  %v6072_v26 = vld [vmem:[%s12666_s1 + $0x18] sm:$0xf0]  ;;  %s5893_s13 = scalar_lea.hbm %s12672_s7, %s7908_s23 }
  0x46   : > { %1123 = vmatpush.bf16.msra.mxu1 %v6171_v58  ;;  %1381 = vmatpush.bf16.msra.mxu3 %v6179_v59  ;;  %v7556_v27 = vld [vmem:[%s12666_s1 + $0xc] sm:$0xf]  ;;  %v6080_v28 = vld [vmem:[%s12666_s1 + $0x20] sm:$0xf0]  ;;  %v6254_v29 = vld [vmem:[%s12666_s1 + $0x160] sm:$0xf]  ;;  %v6071_v31 = vor.u32 %v7558_v24, %v6070_v23  ;;  %v6075_v32 = vor.u32 %v7555_v25, %v6072_v26 }
  0x47   : > { %v7602_v30 = vld [vmem:[%s12666_s1 + $0x174] sm:$0xf0]  ;;  %v6083_v33 = vor.u32 %v7556_v27, %v6080_v28  ;;  %s8321_s9 = scalar_lea.vmem [#allocation2], %s7910_s21  ;;  %v6230_v37 = vld [vmem:[%s12666_s1 + $0x130] sm:$0xf]  ;;  %s508_s29 = scalar_lea.vmem [#allocation3], %s5971_s22 }
  0x48   : > { %v6255_v34 = vor.u32 %v7602_v30, %v6254_v29  ;;  %v8324_v35 = vld [vmem:[%s8321_s9] sm:$0xff]  ;;  %v8330_v36 = vld [vmem:[%s8321_s9 + $0x8] sm:$0xff]  ;;  %v8342_v40 = vld [vmem:[%s8321_s9 + $0x10] sm:$0xff]  ;;  %s5894_s15 = sshll.u32 %s508_s29, 4  ;;  %s12633_s28 = sshll.u32 %s5893_s13, 4  ;;  %s5895_s15 = int_to_ptr.vmem [resolvable:$true] %s5894_s15  ;;  %s5897_s28 = int_to_ptr.hbm [resolvable:$true] %s12633_s28 }
  0x49   : > { %995 = vmatpush.bf16.msra.mxu0 %v6143_v2  ;;  %v7596_v38 = vld [vmem:[%s12666_s1 + $0x144] sm:$0xf0]  ;;  %v8348_v41 = vld [vmem:[%s8321_s9 + $0x18] sm:$0xff]  ;;  %v8354_v42 = vld [vmem:[%s8321_s9 + $0x20] sm:$0xff]  ;;  %s5881_s16 = scalar_lea.sflag [#allocation4], %s8285_s14  ;;  %s7973_s20 = scalar_lea.hbm %s12672_s7, 64 }
  0x4a   : > { %1124 = vmatpush.bf16.msra.mxu1 %v6147_v4  ;;  %1382 = vmatpush.bf16.msra.mxu3 %v6155_v5  ;;  %v6231_v39 = vor.u32 %v7596_v38, %v6230_v37  ;;  %v6206_v43 = vld [vmem:[%s12666_s1 + $0x100] sm:$0xf]  ;;  %v7590_v44 = vld [vmem:[%s12666_s1 + $0x114] sm:$0xf0]  ;;  %v8366_v46 = vld [vmem:[%s8321_s9 + $0x28] sm:$0xff] }
  0x4b   : > { %v6207_v45 = vor.u32 %v7590_v44, %v6206_v43  ;;  %v8372_v47 = vld [vmem:[%s8321_s9 + $0x30] sm:$0xff]  ;;  %v7599_v48 = vld [vmem:[%s12666_s1 + $0x164] sm:$0xf]  ;;  %v6256_v49 = vld [vmem:[%s12666_s1 + $0x178] sm:$0xf0] }
  0x4c   : > { %v6259_v50 = vor.u32 %v7599_v48, %v6256_v49  ;;  %v6246_v51 = vld [vmem:[%s12666_s1 + $0x158] sm:$0xf]  ;;  %v7601_v52 = vld [vmem:[%s12666_s1 + $0x16c] sm:$0xf0]  ;;  %v6222_v55 = vld [vmem:[%s12666_s1 + $0x128] sm:$0xf] }
  0x4d   : > { %996 = vmatpush.bf16.msra.mxu0 %v6119_v11  ;;  %v8390_v53 = vld [vmem:[%s8321_s9 + $0x38] sm:$0xff]  ;;  %v6247_v54 = vor.u32 %v7601_v52, %v6246_v51  ;;  %v7595_v56 = vld [vmem:[%s12666_s1 + $0x13c] sm:$0xf0]  ;;  %v6182_v58 = vld [vmem:[%s12666_s1 + $0xd0] sm:$0xf] }
  0x4e   : > { %1125 = vmatpush.bf16.msra.mxu1 %v6123_v13  ;;  %1383 = vmatpush.bf16.msra.mxu3 %v6131_v14  ;;  %v6223_v57 = vor.u32 %v7595_v56, %v6222_v55  ;;  %v7584_v59 = vld [vmem:[%s12666_s1 + $0xe4] sm:$0xf0]  ;;  %v6198_v61 = vld [vmem:[%s12666_s1 + $0xf8] sm:$0xf]  ;;  %v7589_v62 = vld [vmem:[%s12666_s1 + $0x10c] sm:$0xf0] }
  0x4f   : > { %1249 = vmatpush.bf16.msra.mxu2 %v6247_v54  ;;  %v6183_v60 = vor.u32 %v7584_v59, %v6182_v58  ;;  %v6199_v63 = vor.u32 %v7589_v62, %v6198_v61  ;;  %v6174_v0 = vld [vmem:[%s12666_s1 + $0xc8] sm:$0xf]  ;;  %v7583_v1 = vld [vmem:[%s12666_s1 + $0xdc] sm:$0xf0]  ;;  %v6150_v3 = vld [vmem:[%s12666_s1 + $0x98] sm:$0xf] }
  0x50   : > { %v6175_v2 = vor.u32 %v7583_v1, %v6174_v0  ;;  %v7577_v4 = vld [vmem:[%s12666_s1 + $0xac] sm:$0xf0]  ;;  %v8426_v5 = vld [vmem:[%s8321_s9 + $0x40] sm:$0xff]  ;;  %v6126_v9 = vld [vmem:[%s12666_s1 + $0x68] sm:$0xf] }
  0x51   : > { %997 = vmatpush.bf16.msra.mxu0 %v6095_v20  ;;  %v6151_v6 = vor.u32 %v7577_v4, %v6150_v3  ;;  %v7571_v10 = vld [vmem:[%s12666_s1 + $0x7c] sm:$0xf0]  ;;  %v6102_v12 = vld [vmem:[%s12666_s1 + $0x38] sm:$0xf]  ;;  %v7565_v13 = vld [vmem:[%s12666_s1 + $0x4c] sm:$0xf0] }
  0x52   : > { %1126 = vmatpush.bf16.msra.mxu1 %v6099_v21  ;;  %1384 = vmatpush.bf16.msra.mxu3 %v6107_v22  ;;  %v6127_v11 = vor.u32 %v7571_v10, %v6126_v9  ;;  %v6103_v15 = vor.u32 %v7565_v13, %v6102_v12  ;;  %v6078_v18 = vld [vmem:[%s12666_s1 + $0x8] sm:$0xf]  ;;  %v7559_v19 = vld [vmem:[%s12666_s1 + $0x1c] sm:$0xf0]  ;;  %v7593_v25 = vld [vmem:[%s12666_s1 + $0x134] sm:$0xf] }
  0x53   : > { %1250 = vmatpush.bf16.msra.mxu2 %v6223_v57  ;;  %v6079_v20 = vor.u32 %v7559_v19, %v6078_v18  ;;  %v8462_v22 = vld [vmem:[%s8321_s9 + $0x48] sm:$0xff]  ;;  %v6158_v37 = vld [vmem:[%s12666_s1 + $0xa0] sm:$0xf]  ;;  %v7578_v38 = vld [vmem:[%s12666_s1 + $0xb4] sm:$0xf0] }
  0x54   : > { %v6232_v26 = vld [vmem:[%s12666_s1 + $0x148] sm:$0xf0]  ;;  %v8512_v49 = vld [vmem:[%s8321_s9 + $0x58] sm:$0xff]  ;;  %v8531_v57 = vld [vmem:[%s8321_s9 + $0x60] sm:$0xff] }
  0x55   : > { %998 = vmatpush.bf16.msra.mxu0 %v6071_v31  ;;  %v6235_v27 = vor.u32 %v7593_v25, %v6232_v26  ;;  %v6208_v61 = vld [vmem:[%s12666_s1 + $0x118] sm:$0xf0]  ;;  %v8556_v3 = vld [vmem:[%s8321_s9 + $0x68] sm:$0xff]  ;;  %v6134_v9 = vld [vmem:[%s12666_s1 + $0x70] sm:$0xf] }
  0x56   : > { %1127 = vmatpush.bf16.msra.mxu1 %v6075_v32  ;;  %1385 = vmatpush.bf16.msra.mxu3 %v6083_v33  ;;  %v8487_v32 = vld [vmem:[%s8321_s9 + $0x50] sm:$0xff]  ;;  %v7572_v10 = vld [vmem:[%s12666_s1 + $0x84] sm:$0xf0] }
  0x57   : > { %1251 = vmatpush.bf16.msra.mxu2 %v6199_v63  ;;  %v8581_v19 = vld [vmem:[%s8321_s9 + $0x70] sm:$0xff] }
  0x58   : > { %999 = vmatmul.bf16.vlgmr.msra.gmra.mxu0 %v8324_v35 }
  0x59   : > { %1507 = vmatpush.bf16.msrb.mxu0 %v6255_v34  ;;  %1128 = vmatmul.bf16.vlgmr.msra.gmra.mxu1 %v8324_v35 }
  0x5a   : > { %1386 = vmatmul.bf16.vlgmr.msra.gmra.mxu3 %v8324_v35  ;;  %1636 = vmatpush.bf16.msrb.mxu1 %v6259_v50 }
  0x5b   : > { %1252 = vmatpush.bf16.msra.mxu2 %v6175_v2 }
  0x5d   : > { %1508 = vmatpush.bf16.msrb.mxu0 %v6231_v39  ;;  %v6159_v39 = vor.u32 %v7578_v38, %v6158_v37 }
  0x5e   : > { %1637 = vmatpush.bf16.msrb.mxu1 %v6235_v27 }
  0x5f   : > { %1253 = vmatpush.bf16.msra.mxu2 %v6151_v6 }
  0x61   : > { %1509 = vmatpush.bf16.msrb.mxu0 %v6207_v45 }
  0x63   : > { %1254 = vmatpush.bf16.msra.mxu2 %v6127_v11  ;;  %v6135_v11 = vor.u32 %v7572_v10, %v6134_v9  ;;  %v6184_v9 = vld [vmem:[%s12666_s1 + $0xe8] sm:$0xf0] }
  0x65   : > { %1510 = vmatpush.bf16.msrb.mxu0 %v6183_v60  ;;  %v7587_v60 = vld [vmem:[%s12666_s1 + $0x104] sm:$0xf] }
  0x66   : > { %v6211_v62 = vor.u32 %v7587_v60, %v6208_v61 }
  0x67   : > { %1255 = vmatpush.bf16.msra.mxu2 %v6103_v15 }
  0x68   : > { %1004 = vmatmul.bf16.gmra.mxu0 %v8330_v36  ;;  %1638 = vmatpush.bf16.msrb.mxu1 %v6211_v62  ;;  %v7581_v62 = vld [vmem:[%s12666_s1 + $0xd4] sm:$0xf] }
  0x69   : > { %1133 = vmatmul.bf16.gmra.mxu1 %v8330_v36  ;;  %1511 = vmatpush.bf16.msrb.mxu0 %v6159_v39  ;;  %v8600_v39 = vld [vmem:[%s8321_s9 + $0x78] sm:$0xff]  ;;  %v6187_v10 = vor.u32 %v7581_v62, %v6184_v9  ;;  %v6110_v62 = vld [vmem:[%s12666_s1 + $0x40] sm:$0xf] }
  0x6a   : > { %1391 = vmatmul.bf16.gmra.mxu3 %v8330_v36  ;;  %v7566_v9 = vld [vmem:[%s12666_s1 + $0x54] sm:$0xf0] }
  0x6b   : > { %1256 = vmatpush.bf16.msra.mxu2 %v6079_v20 }
  0x6c   : > { %1639 = vmatpush.bf16.msrb.mxu1 %v6187_v10  ;;  %v6111_v10 = vor.u32 %v7566_v9, %v6110_v62 }
  0x6d   : > { %1512 = vmatpush.bf16.msrb.mxu0 %v6135_v11 }
  0x6e   : > { %1257 = vmatmul.bf16.vlgmr.msra.gmra.mxu2 %v8324_v35 }
  0x71   : > { %1513 = vmatpush.bf16.msrb.mxu0 %v6111_v10 }
  0x78   : > { %1009 = vmatmul.bf16.gmra.mxu0 %v8342_v40 }
  0x79   : > { %1138 = vmatmul.bf16.gmra.mxu1 %v8342_v40 }
  0x7a   : > { %1396 = vmatmul.bf16.gmra.mxu3 %v8342_v40 }
  0x7e   : > { %1262 = vmatmul.bf16.gmra.mxu2 %v8330_v36 }
  0x88   : > { %1014 = vmatmul.bf16.gmra.mxu0 %v8348_v41 }
  0x89   : > { %1143 = vmatmul.bf16.gmra.mxu1 %v8348_v41 }
  0x8a   : > { %1401 = vmatmul.bf16.gmra.mxu3 %v8348_v41 }
  0x8e   : > { %1267 = vmatmul.bf16.gmra.mxu2 %v8342_v40 }
  0x98   : > { %1019 = vmatmul.bf16.gmra.mxu0 %v8354_v42 }
  0x99   : > { %1148 = vmatmul.bf16.gmra.mxu1 %v8354_v42 }
  0x9a   : > { %1406 = vmatmul.bf16.gmra.mxu3 %v8354_v42 }
  0x9e   : > { %1272 = vmatmul.bf16.gmra.mxu2 %v8348_v41 }
  0xa8   : > { %1024 = vmatmul.bf16.gmra.mxu0 %v8366_v46 }
  0xa9   : > { %1153 = vmatmul.bf16.gmra.mxu1 %v8366_v46 }
  0xaa   : > { %1411 = vmatmul.bf16.gmra.mxu3 %v8366_v46 }
  0xae   : > { %1277 = vmatmul.bf16.gmra.mxu2 %v8354_v42 }
  0xb8   : > { %1029 = vmatmul.bf16.gmra.mxu0 %v8372_v47 }
  0xb9   : > { %1158 = vmatmul.bf16.gmra.mxu1 %v8372_v47 }
  0xba   : > { %1416 = vmatmul.bf16.gmra.mxu3 %v8372_v47 }
  0xbe   : > { %1282 = vmatmul.bf16.gmra.mxu2 %v8366_v46 }
  0xc8   : > { %1034 = vmatmul.bf16.gmra.mxu0 %v8390_v53 }
  0xc9   : > { %1163 = vmatmul.bf16.gmra.mxu1 %v8390_v53 }
  0xca   : > { %1421 = vmatmul.bf16.gmra.mxu3 %v8390_v53 }
  0xce   : > { %1287 = vmatmul.bf16.gmra.mxu2 %v8372_v47 }
  0xd5   : > { %v8428_v7 = vpop.f32.mrf.mxu0 }
  0xd6   : > { %v8430_v8 = vpop.f32.mrf.mxu1 }
  0xd8   : > { %1039 = vmatmul.bf16.gmra.mxu0 %v8426_v5 }
  0xd9   : > { %1168 = vmatmul.bf16.gmra.mxu1 %v8426_v5 }
  0xda   : > { %1426 = vmatmul.bf16.gmra.mxu3 %v8426_v5 }
  0xdd   : > { %v8447_v14 = vpop.f32.mrf.mxu3  ;;  %v8449_v16 = vpop.f32.mrf.mxu0 }
  0xde   : > { %v8451_v17 = vpop.f32.mrf.mxu1  ;;  %1292 = vmatmul.bf16.gmra.mxu2 %v8390_v53 }
  0xe5   : > { %v8459_v21 = vpop.f32.mrf.mxu3  ;;  %v8464_v23 = vpop.f32.mrf.mxu0 }
  0xe6   : > { %v8467_v24 = vpop.f32.mrf.mxu1 }
  0xe8   : > { %1044 = vmatmul.bf16.gmra.mxu0 %v8462_v22 }
  0xe9   : > { %1173 = vmatmul.bf16.gmra.mxu1 %v8462_v22 }
  0xea   : > { %1431 = vmatmul.bf16.gmra.mxu3 %v8462_v22 }
  0xed   : > { %v8478_v28 = vpop.f32.mrf.mxu3  ;;  %v8480_v29 = vpop.f32.mrf.mxu0 }
  0xee   : > { %v8482_v30 = vpop.f32.mrf.mxu1  ;;  %1297 = vmatmul.bf16.gmra.mxu2 %v8426_v5 }
  0xef   : > { %12715 = vst [vmem:[#allocation6_spill] sm:$0xff] %v8482_v30 }
  0xf5   : > { %v8484_v31 = vpop.f32.mrf.mxu3  ;;  %v8489_v33 = vpop.f32.mrf.mxu0 }
  0xf6   : > { %12716 = vst [vmem:[#allocation7_spill] sm:$0xff] %v8489_v33  ;;  %v8492_v34 = vpop.f32.mrf.mxu1 }
  0xf7   : > { %12717 = vst [vmem:[#allocation8_spill] sm:$0xff] %v8492_v34  ;;  %v6382_v34 = vld [vmem:[%s12668_s3 + $0xf0] sm:$0xf] }
  0xf8   : > { %1049 = vmatmul.bf16.gmra.mxu0 %v8487_v32 }
  0xf9   : > { %1178 = vmatmul.bf16.gmra.mxu1 %v8487_v32 }
  0xfa   : > { %1436 = vmatmul.bf16.gmra.mxu3 %v8487_v32 }
  0xfd   : > { %v8503_v43 = vpop.f32.mrf.mxu3  ;;  %v8505_v44 = vpop.f32.mrf.mxu0 }
  0xfe   : > { %12718 = vst [vmem:[#allocation9_spill] sm:$0xff] %v8503_v43  ;;  %v8507_v45 = vpop.f32.mrf.mxu1  ;;  %1302 = vmatmul.bf16.gmra.mxu2 %v8462_v22 }
  0xff   : > { %12719 = vst [vmem:[#allocation10_spill] sm:$0xff] %v8505_v44 }
 0x100   : > { %12720 = vst [vmem:[#allocation11_spill] sm:$0xff] %v8507_v45  ;;  %v6112_v45 = vld [vmem:[%s12666_s1 + $0x58] sm:$0xf0] }
 0x105   : > { %v8509_v48 = vpop.f32.mrf.mxu3  ;;  %v8514_v50 = vpop.f32.mrf.mxu0 }
 0x106   : > { %12721 = vst [vmem:[#allocation12_spill] sm:$0xff] %v8509_v48  ;;  %v8517_v51 = vpop.f32.mrf.mxu1 }
 0x107   : > { %12722 = vst [vmem:[#allocation13_spill] sm:$0xff] %v8514_v50 }
 0x108   : > { %12723 = vst [vmem:[#allocation14_spill] sm:$0xff] %v8517_v51  ;;  %1054 = vmatmul.bf16.gmra.mxu0 %v8512_v49 }
 0x109   : > { %1183 = vmatmul.bf16.gmra.mxu1 %v8512_v49 }
 0x10a   : > { %1441 = vmatmul.bf16.gmra.mxu3 %v8512_v49 }
 0x10d   : > { %v8522_v52 = vpop.f32.mrf.mxu3  ;;  %v8524_v54 = vpop.f32.mrf.mxu0 }
 0x10e   : > { %12724 = vst [vmem:[#allocation15_spill] sm:$0xff] %v8522_v52  ;;  %v8526_v55 = vpop.f32.mrf.mxu1  ;;  %1307 = vmatmul.bf16.gmra.mxu2 %v8487_v32 }
 0x10f   : > { %12725 = vst [vmem:[#allocation16_spill] sm:$0xff] %v8524_v54  ;;  %v7569_v54 = vld [vmem:[%s12666_s1 + $0x74] sm:$0xf] }
 0x110   : > { %12726 = vst [vmem:[#allocation17_spill] sm:$0xff] %v8526_v55 }
 0x115   : > { %v8528_v56 = vpop.f32.mrf.mxu3  ;;  %v8533_v58 = vpop.f32.mrf.mxu0 }
 0x116   : > { %12727 = vst [vmem:[#allocation18_spill] sm:$0xff] %v8528_v56  ;;  %v8536_v59 = vpop.f32.mrf.mxu1  ;;  %v6136_v56 = vld [vmem:[%s12666_s1 + $0x88] sm:$0xf0] }
 0x117   : > { %12728 = vst [vmem:[#allocation19_spill] sm:$0xff] %v8533_v58  ;;  %v6139_v50 = vor.u32 %v7569_v54, %v6136_v56  ;;  %v6318_v54 = vld [vmem:[%s12668_s3 + $0x70] sm:$0xf] }
 0x118   : > { %12729 = vst [vmem:[#allocation20_spill] sm:$0xff] %v8536_v59  ;;  %1059 = vmatmul.bf16.gmra.mxu0 %v8531_v57 }
 0x119   : > { %1188 = vmatmul.bf16.gmra.mxu1 %v8531_v57 }
 0x11a   : > { %1446 = vmatmul.bf16.gmra.mxu3 %v8531_v57 }
 0x11d   : > { %v8547_v63 = vpop.f32.mrf.mxu3  ;;  %v8549_v0 = vpop.f32.mrf.mxu0 }
 0x11e   : > { %12730 = vst [vmem:[#allocation21_spill] sm:$0xff] %v8547_v63  ;;  %v8551_v1 = vpop.f32.mrf.mxu1  ;;  %1312 = vmatmul.bf16.gmra.mxu2 %v8512_v49 }
 0x11f   : > { %12731 = vst [vmem:[#allocation22_spill] sm:$0xff] %v8549_v0 }
 0x120   : > { %12732 = vst [vmem:[#allocation23_spill] sm:$0xff] %v8551_v1  ;;  %v8727_v1 = vld [vmem:[%s8321_s9 + $0xa0] sm:$0xff] }
 0x125   : > { %v8553_v2 = vpop.f32.mrf.mxu3  ;;  %v8558_v4 = vpop.f32.mrf.mxu0 }
 0x126   : > { %12733 = vst [vmem:[#allocation24_spill] sm:$0xff] %v8553_v2  ;;  %v8561_v6 = vpop.f32.mrf.mxu1 }
 0x127   : > { %12734 = vst [vmem:[#allocation25_spill] sm:$0xff] %v8561_v6 }
 0x128   : > { %1064 = vmatmul.bf16.gmra.mxu0 %v8556_v3 }
 0x129   : > { %1193 = vmatmul.bf16.gmra.mxu1 %v8556_v3 }
 0x12a   : > { %1451 = vmatmul.bf16.gmra.mxu3 %v8556_v3 }
 0x12d   : > { %v8572_v12 = vpop.f32.mrf.mxu3  ;;  %v8574_v13 = vpop.f32.mrf.mxu0 }
 0x12e   : > { %12735 = vst [vmem:[#allocation26_spill] sm:$0xff] %v8574_v13  ;;  %v8576_v15 = vpop.f32.mrf.mxu1  ;;  %v8700_v13 = vld [vmem:[%s8321_s9 + $0x98] sm:$0xff] }
 0x12f   : > { %12736 = vst [vmem:[#allocation27_spill] sm:$0xff] %v8576_v15 }
 0x135   : > { %v8578_v18 = vpop.f32.mrf.mxu3  ;;  %v8583_v20 = vpop.f32.mrf.mxu0 }
 0x136   : > { %12737 = vst [vmem:[#allocation28_spill] sm:$0xff] %v8578_v18  ;;  %v8586_v25 = vpop.f32.mrf.mxu1 }
 0x137   : > { %12738 = vst [vmem:[#allocation29_spill] sm:$0xff] %v8583_v20 }
 0x138   : > { %12739 = vst [vmem:[#allocation30_spill] sm:$0xff] %v8586_v25  ;;  %1069 = vmatmul.bf16.gmra.mxu0 %v8581_v19 }
 0x139   : > { %1198 = vmatmul.bf16.gmra.mxu1 %v8581_v19 }
 0x13a   : > { %1456 = vmatmul.bf16.gmra.mxu3 %v8581_v19 }
 0x13d   : > { %v8591_v26 = vpop.f32.mrf.mxu3  ;;  %v8593_v27 = vpop.f32.mrf.mxu0 }
 0x13e   : > { %12740 = vst [vmem:[#allocation31_spill] sm:$0xff] %v8591_v26  ;;  %v8595_v37 = vpop.f32.mrf.mxu1 }
 0x13f   : > { %12741 = vst [vmem:[#allocation32_spill] sm:$0xff] %v8593_v27  ;;  %v8625_v27 = vld [vmem:[%s8321_s9 + $0x80] sm:$0xff] }
 0x140   : > { %12742 = vst [vmem:[#allocation33_spill] sm:$0xff] %v8595_v37 }
 0x145   : > { %v8597_v38 = vpop.f32.mrf.mxu3  ;;  %v8602_v60 = vpop.f32.mrf.mxu0 }
 0x146   : > { %12743 = vst [vmem:[#allocation34_spill] sm:$0xff] %v8597_v38  ;;  %v8605_v61 = vpop.f32.mrf.mxu1 }
 0x147   : > { %12744 = vst [vmem:[#allocation35_spill] sm:$0xff] %v8602_v60 }
 0x148   : > { %12745 = vst [vmem:[#allocation36_spill] sm:$0xff] %v8605_v61  ;;  %1074 = vmatmul.bf16.gmra.mxu0 %v8600_v39 }
 0x149   : > { %1203 = vmatmul.bf16.gmra.mxu1 %v8600_v39 }
 0x14a   : > { %1461 = vmatmul.bf16.gmra.mxu3 %v8600_v39 }
 0x14d   : > { %v8616_v11 = vpop.f32.mrf.mxu3  ;;  %v8618_v60 = vpop.f32.mrf.mxu0 }
 0x14e   : > { %12746 = vst [vmem:[#allocation37_spill] sm:$0xff] %v8616_v11  ;;  %v8620_v61 = vpop.f32.mrf.mxu1 }
 0x14f   : > { %12747 = vst [vmem:[#allocation38_spill] sm:$0xff] %v8618_v60 }
 0x150   : > { %12748 = vst [vmem:[#allocation39_spill] sm:$0xff] %v8620_v61 }
 0x155   : > { %v8622_v37 = vpop.f32.mrf.mxu3  ;;  %v8627_v38 = vpop.f32.mrf.mxu0 }
 0x156   : > { %12749 = vst [vmem:[#allocation40_spill] sm:$0xff] %v8622_v37  ;;  %v8630_v25 = vpop.f32.mrf.mxu1  ;;  %v8650_v37 = vld [vmem:[%s8321_s9 + $0x88] sm:$0xff] }
 0x157   : > { %12750 = vst [vmem:[#allocation41_spill] sm:$0xff] %v8627_v38 }
 0x158   : > { %12751 = vst [vmem:[#allocation42_spill] sm:$0xff] %v8630_v25  ;;  %1079 = vmatmul.bf16.gmra.mxu0 %v8625_v27 }
 0x159   : > { %1208 = vmatmul.bf16.gmra.mxu1 %v8625_v27 }
 0x15a   : > { %1466 = vmatmul.bf16.gmra.mxu3 %v8625_v27 }
 0x15d   : > { %v8641_v38 = vpop.f32.mrf.mxu3  ;;  %v8643_v25 = vpop.f32.mrf.mxu0 }
 0x15e   : > { %12752 = vst [vmem:[#allocation43_spill] sm:$0xff] %v8641_v38  ;;  %v8645_v61 = vpop.f32.mrf.mxu1 }
 0x15f   : > { %12753 = vst [vmem:[#allocation44_spill] sm:$0xff] %v8643_v25 }
 0x160   : > { %12754 = vst [vmem:[#allocation45_spill] sm:$0xff] %v8645_v61  ;;  %v8666_v61 = vpop.f32.mrf.mxu2 }
 0x165   : > { %v8647_v60 = vpop.f32.mrf.mxu3  ;;  %v8652_v11 = vpop.f32.mrf.mxu0 }
 0x166   : > { %12755 = vst [vmem:[#allocation46_spill] sm:$0xff] %v8647_v60  ;;  %v8655_v20 = vpop.f32.mrf.mxu1 }
 0x167   : > { %12756 = vst [vmem:[#allocation47_spill] sm:$0xff] %v8652_v11  ;;  %v8671_v11 = vld [vmem:[%s8321_s9 + $0x90] sm:$0xff] }
 0x168   : > { %12757 = vst [vmem:[#allocation48_spill] sm:$0xff] %v8655_v20  ;;  %1084 = vmatmul.bf16.gmra.mxu0 %v8650_v37 }
 0x169   : > { %1213 = vmatmul.bf16.gmra.mxu1 %v8650_v37 }
 0x16a   : > { %1471 = vmatmul.bf16.gmra.mxu3 %v8650_v37 }
 0x16d   : > { %v8660_v62 = vpop.f32.mrf.mxu3  ;;  %v8662_v9 = vpop.f32.mrf.mxu0 }
 0x16e   : > { %12758 = vst [vmem:[#allocation49_spill] sm:$0xff] %v8660_v62  ;;  %v8664_v10 = vpop.f32.mrf.mxu1 }
 0x16f   : > { %12759 = vst [vmem:[#allocation50_spill] sm:$0xff] %v8662_v9 }
 0x170   : > { %12760 = vst [vmem:[#allocation51_spill] sm:$0xff] %v8664_v10  ;;  %v8681_v10 = vpop.f32.mrf.mxu2  ;;  %1317 = vmatmul.bf16.gmra.mxu2 %v8531_v57 }
 0x175   : > { %v8668_v25 = vpop.f32.mrf.mxu3  ;;  %v8673_v60 = vpop.f32.mrf.mxu0 }
 0x176   : > { %12761 = vst [vmem:[#allocation52_spill] sm:$0xff] %v8668_v25  ;;  %v8676_v20 = vpop.f32.mrf.mxu1  ;;  %v7575_v25 = vld [vmem:[%s12666_s1 + $0xa4] sm:$0xf] }
 0x177   : > { %12762 = vst [vmem:[#allocation53_spill] sm:$0xff] %v8673_v60  ;;  %v6160_v60 = vld [vmem:[%s12666_s1 + $0xb8] sm:$0xf0] }
 0x178   : > { %12763 = vst [vmem:[#allocation54_spill] sm:$0xff] %v8676_v20  ;;  %1089 = vmatmul.bf16.gmra.mxu0 %v8671_v11  ;;  %v6163_v9 = vor.u32 %v7575_v25, %v6160_v60  ;;  %v8695_v26 = vpop.f32.mrf.mxu2  ;;  %v6086_v25 = vld [vmem:[%s12666_s1 + $0x10] sm:$0xf]  ;;  %v7560_v60 = vld [vmem:[%s12666_s1 + $0x24] sm:$0xf0] }
 0x179   : > { %1218 = vmatmul.bf16.gmra.mxu1 %v8671_v11 }
 0x17a   : > { %1476 = vmatmul.bf16.gmra.mxu3 %v8671_v11  ;;  %1640 = vmatpush.bf16.msrb.mxu1 %v6163_v9 }
 0x17d   : > { %v8689_v62 = vpop.f32.mrf.mxu3  ;;  %v8691_v20 = vpop.f32.mrf.mxu0 }
 0x17e   : > { %12764 = vst [vmem:[#allocation55_spill] sm:$0xff] %v8689_v62  ;;  %v8693_v38 = vpop.f32.mrf.mxu1  ;;  %1641 = vmatpush.bf16.msrb.mxu1 %v6139_v50  ;;  %v7618_v50 = vld [vmem:[%s12668_s3 + $0x74] sm:$0xf0] }
 0x17f   : > { %12765 = vst [vmem:[#allocation56_spill] sm:$0xff] %v8691_v20  ;;  %v6319_v48 = vor.u32 %v7618_v50, %v6318_v54  ;;  %v6088_v54 = vld [vmem:[%s12666_s1 + $0x28] sm:$0xf0] }
 0x180   : > { %12766 = vst [vmem:[#allocation57_spill] sm:$0xff] %v8693_v38  ;;  %v6087_v38 = vor.u32 %v7560_v60, %v6086_v25 }
 0x181   : > { %3813 = vmatpush.bf16.msrb.mxu2 %v6319_v48  ;;  %v8824_v48 = vld [vmem:[%s8321_s9 + $0xb8] sm:$0xff] }
 0x182   : > { %1514 = vmatpush.bf16.msrb.mxu0 %v6087_v38 }
 0x185   : > { %v8697_v15 = vpop.f32.mrf.mxu3  ;;  %v8702_v18 = vpop.f32.mrf.mxu0 }
 0x186   : > { %12767 = vst [vmem:[#allocation58_spill] sm:$0xff] %v8697_v15  ;;  %v8705_v6 = vpop.f32.mrf.mxu1 }
 0x187   : > { %12768 = vst [vmem:[#allocation59_spill] sm:$0xff] %v8705_v6  ;;  %v8720_v6 = vpop.f32.mrf.mxu2  ;;  %1322 = vmatmul.bf16.gmra.mxu2 %v8556_v3 }
 0x188   : > { %1094 = vmatmul.bf16.gmra.mxu0 %v8700_v13  ;;  %12770 = vst [vmem:[#allocation61_spill] sm:$0xff] %v8720_v6 }
 0x189   : > { %1223 = vmatmul.bf16.gmra.mxu1 %v8700_v13 }
 0x18a   : > { %1481 = vmatmul.bf16.gmra.mxu3 %v8700_v13 }
 0x18d   : > { %v8716_v9 = vpop.f32.mrf.mxu3  ;;  %v8718_v15 = vpop.f32.mrf.mxu0 }
 0x18e   : > { %12769 = vst [vmem:[#allocation60_spill] sm:$0xff] %v8718_v15  ;;  %v8722_v20 = vpop.f32.mrf.mxu1 }
 0x18f   : > { %12771 = vst [vmem:[#allocation62_spill] sm:$0xff] %v8722_v20  ;;  %v8734_v59 = vpop.f32.mrf.mxu2 }
 0x190   : > { %12773 = vst [vmem:[#allocation64_spill] sm:$0xff] %v8734_v59  ;;  %v8781_v59 = vld [vmem:[%s8321_s9 + $0xb0] sm:$0xff] }
 0x195   : > { %v8724_v62 = vpop.f32.mrf.mxu3  ;;  %v8729_v0 = vpop.f32.mrf.mxu0 }
 0x196   : > { %12772 = vst [vmem:[#allocation63_spill] sm:$0xff] %v8724_v62  ;;  %v8732_v2 = vpop.f32.mrf.mxu1  ;;  %v8750_v62 = vld [vmem:[%s8321_s9 + $0xa8] sm:$0xff]  ;;  %s7967_s9 = sshra.s32 %s5897_s28, 4  ;;  %s7968_s9 = int_to_ptr.hbm [resolvable:$true] %s7967_s9 }
 0x197   : > { %v8745_v20 = vpop.f32.mrf.mxu2  ;;  %1327 = vmatmul.bf16.gmra.mxu2 %v8581_v19  ;;  %s7969_s17 = scalar_lea.hbm %s7968_s9, 32  ;;  %p7974_p2 = scmp.lt.s32.totalorder %s7968_s9, %s12672_s7 }
 0x198   : > { %1099 = vmatmul.bf16.gmra.mxu0 %v8727_v1  ;;  %12774 = vst [vmem:[#allocation65_spill] sm:$0xff] %v8745_v20  ;;  %p7970_p13 = scmp.ne.s32.totalorder %s7968_s9, %s7969_s17  ;;  %p7975_p3 = scmp.lt.s32.totalorder %s7973_s20, %s7969_s17 }
 0x199   : > { %1228 = vmatmul.bf16.gmra.mxu1 %v8727_v1 }
 0x19a   : > { %1486 = vmatmul.bf16.gmra.mxu3 %v8727_v1  ;;  %p7971_p0 = pnand %p7970_p13, %p8097_p6  ;;  %p7976_p4 = por %p7975_p3, %p7974_p2 }
 0x19c   : > { %p7972_p1 = pneg %p7971_p0 }
 0x19d   : > { %v8739_v25 = vpop.f32.mrf.mxu3  ;;  %v8741_v38 = vpop.f32.mrf.mxu0 }
 0x19e   : > { %v8743_v60 = vpop.f32.mrf.mxu1  ;;  %p7977_p5 = pnand %p7976_p4, %p7972_p1 }
 0x19f   : > { %v8760_v55 = vpop.f32.mrf.mxu2 }
 0x1a0   : > { %12775 = vst [vmem:[#allocation66_spill] sm:$0xff] %v8760_v55  ;;  %v7563_v55 = vld [vmem:[%s12666_s1 + $0x44] sm:$0xf] }
 0x1a1   : > { %v6115_v44 = vor.u32 %v7563_v55, %v6112_v45  ;;  %v7557_v45 = vld [vmem:[%s12666_s1 + $0x14] sm:$0xf] }
 0x1a2   : > { %v6091_v43 = vor.u32 %v7557_v45, %v6088_v54 }
 0x1a3   : > { %1642 = vmatpush.bf16.msrb.mxu1 %v6115_v44  ;;  %v7634_v44 = vld [vmem:[%s12668_s3 + $0xf4] sm:$0xf0] }
 0x1a4   : > { %v6383_v6 = vor.u32 %v7634_v44, %v6382_v34 }
 0x1a5   : > { %v8747_v15 = vpop.f32.mrf.mxu3  ;;  %v8752_v58 = vpop.f32.mrf.mxu0 }
 0x1a6   : > { %v8755_v63 = vpop.f32.mrf.mxu1  ;;  %3862 = vmatpush.bf16.msrb.mxu3 %v6383_v6 }
 0x1a7   : > { %v8802_v33 = vpop.f32.mrf.mxu2  ;;  %1643 = vmatpush.bf16.msrb.mxu1 %v6091_v43  ;;  %1332 = vmatmul.bf16.gmra.mxu2 %v8600_v39 }
 0x1a8   : > { %1104 = vmatmul.bf16.gmra.mxu0 %v8750_v62  ;;  %12777 = vst [vmem:[#allocation68_spill] sm:$0xff] %v8802_v33 }
 0x1a9   : > { %1233 = vmatmul.bf16.gmra.mxu1 %v8750_v62 }
 0x1aa   : > { %1491 = vmatmul.bf16.gmra.mxu3 %v8750_v62 }
 0x1ad   : > { %v8768_v51 = vpop.f32.mrf.mxu3  ;;  %v8770_v20 = vpop.f32.mrf.mxu0 }
 0x1ae   : > { %v8772_v52 = vpop.f32.mrf.mxu1 }
 0x1b5   : > { %v8789_v56 = vpop.f32.mrf.mxu3  ;;  %v8800_v55 = vpop.f32.mrf.mxu0 }
 0x1b6   : > { %12776 = vst [vmem:[#allocation67_spill] sm:$0xff] %v8800_v55  ;;  %v8808_v50 = vpop.f32.mrf.mxu1  ;;  %v8819_v55 = vpop.f32.mrf.mxu2 }
 0x1b7   : > { %12778 = vst [vmem:[#allocation69_spill] sm:$0xff] %v8808_v50 }
 0x1b8   : > { %1109 = vmatmul.bf16.gmra.mxu0 %v8781_v59  ;;  %12782 = vst [vmem:[#allocation73_spill] sm:$0xff] %v8819_v55 }
 0x1b9   : > { %1238 = vmatmul.bf16.gmra.mxu1 %v8781_v59 }
 0x1ba   : > { %1496 = vmatmul.bf16.gmra.mxu3 %v8781_v59 }
 0x1bd   : > { %v8813_v34 = vpop.f32.mrf.mxu3  ;;  %v8815_v44 = vpop.f32.mrf.mxu0 }
 0x1be   : > { %12779 = vst [vmem:[#allocation70_spill] sm:$0xff] %v8813_v34  ;;  %v8817_v33 = vpop.f32.mrf.mxu1  ;;  %v8834_v45 = vpop.f32.mrf.mxu2  ;;  %1337 = vmatmul.bf16.gmra.mxu2 %v8625_v27 }
 0x1bf   : > { %12780 = vst [vmem:[#allocation71_spill] sm:$0xff] %v8815_v44 }
 0x1c0   : > { %12781 = vst [vmem:[#allocation72_spill] sm:$0xff] %v8817_v33 }
 0x1c1   : > { %12786 = vst [vmem:[#allocation77_spill] sm:$0xff] %v8834_v45 }
 0x1c5   : > { %v8821_v30 = vpop.f32.mrf.mxu3  ;;  %v8826_v6 = vpop.f32.mrf.mxu0 }
 0x1c6   : > { %12783 = vst [vmem:[#allocation74_spill] sm:$0xff] %v8821_v30  ;;  %v8829_v43 = vpop.f32.mrf.mxu1  ;;  %v8842_v44 = vpop.f32.mrf.mxu2 }
 0x1c7   : > { %12784 = vst [vmem:[#allocation75_spill] sm:$0xff] %v8826_v6 }
 0x1c8   : > { %12785 = vst [vmem:[#allocation76_spill] sm:$0xff] %v8829_v43  ;;  %1114 = vmatmul.bf16.gmra.mxu0 %v8824_v48 }
 0x1c9   : > { %1243 = vmatmul.bf16.gmra.mxu1 %v8824_v48  ;;  %12790 = vst [vmem:[#allocation81_spill] sm:$0xff] %v8842_v44  ;;  %v6310_v44 = vld [vmem:[%s12668_s3 + $0x60] sm:$0xf] }
 0x1ca   : > { %1501 = vmatmul.bf16.gmra.mxu3 %v8824_v48 }
 0x1cd   : > { %v8836_v54 = vpop.f32.mrf.mxu3  ;;  %v8838_v55 = vpop.f32.mrf.mxu0 }
 0x1ce   : > { %12787 = vst [vmem:[#allocation78_spill] sm:$0xff] %v8836_v54  ;;  %v8840_v33 = vpop.f32.mrf.mxu1 }
 0x1cf   : > { %12788 = vst [vmem:[#allocation79_spill] sm:$0xff] %v8838_v55  ;;  %v8857_v55 = vpop.f32.mrf.mxu2  ;;  %1342 = vmatmul.bf16.gmra.mxu2 %v8650_v37 }
 0x1d0   : > { %12789 = vst [vmem:[#allocation80_spill] sm:$0xff] %v8840_v33 }
 0x1d1   : > { %12796 = vst [vmem:[#allocation87_spill] sm:$0xff] %v8857_v55  ;;  %v7632_v55 = vld [vmem:[%s12668_s3 + $0xe4] sm:$0xf0] }
 0x1d5   : > { %v8844_v6 = vpop.f32.mrf.mxu3  ;;  %v8846_v30 = vpop.f32.mrf.mxu0 }
 0x1d6   : > { %12791 = vst [vmem:[#allocation82_spill] sm:$0xff] %v8844_v6  ;;  %v8849_v43 = vpop.f32.mrf.mxu1 }
 0x1d7   : > { %12792 = vst [vmem:[#allocation83_spill] sm:$0xff] %v8846_v30  ;;  %v8878_v50 = vpop.f32.mrf.mxu2 }
 0x1d8   : > { %12793 = vst [vmem:[#allocation84_spill] sm:$0xff] %v8849_v43  ;;  %1515 = vmatmul.bf16.vlgmr.msrb.gmra.mxu0 %v8324_v35  ;;  %v7616_v43 = vld [vmem:[%s12668_s3 + $0x64] sm:$0xf0] }
 0x1d9   : > { %1644 = vmatmul.bf16.vlgmr.msrb.gmra.mxu1 %v8324_v35  ;;  %v6311_v6 = vor.u32 %v7616_v43, %v6310_v44  ;;  %v6374_v35 = vld [vmem:[%s12668_s3 + $0xe0] sm:$0xf]  ;;  %12800 = vst [vmem:[#allocation91_spill] sm:$0xff] %v8878_v50 }
 0x1db   : > { %3814 = vmatpush.bf16.msrb.mxu2 %v6311_v6 }
 0x1dd   : > { %v8853_v45 = vpop.f32.mrf.mxu3  ;;  %v8855_v54 = vpop.f32.mrf.mxu0 }
 0x1de   : > { %12794 = vst [vmem:[#allocation85_spill] sm:$0xff] %v8853_v45  ;;  %v8859_v33 = vpop.f32.mrf.mxu1 }
 0x1df   : > { %12795 = vst [vmem:[#allocation86_spill] sm:$0xff] %v8855_v54  ;;  %v6375_v54 = vor.u32 %v7632_v55, %v6374_v35 }
 0x1e0   : > { %12797 = vst [vmem:[#allocation88_spill] sm:$0xff] %v8859_v33 }
 0x1e1   : > { %3863 = vmatpush.bf16.msrb.mxu3 %v6375_v54 }
 0x1e5   : > { %v8867_v30 = vpop.f32.mrf.mxu3  ;;  %v1085_v33 = vpop.f32.mrf.mxu0 }
 0x1e6   : > { %12798 = vst [vmem:[#allocation89_spill] sm:$0xff] %v8867_v30  ;;  %v8876_v45 = vpop.f32.mrf.mxu1  ;;  %v1825_v43 = vmax.f32 %v8558_v4, %v1085_v33 }
 0x1e7   : > { %12799 = vst [vmem:[#allocation90_spill] sm:$0xff] %v8876_v45  ;;  %v8890_v45 = vpop.f32.mrf.mxu2  ;;  %1347 = vmatmul.bf16.gmra.mxu2 %v8671_v11 }
 0x1e8   : > { %1520 = vmatmul.bf16.gmra.mxu0 %v8330_v36  ;;  %12804 = vst [vmem:[#allocation95_spill] sm:$0xff] %v8890_v45 }
 0x1e9   : > { %1649 = vmatmul.bf16.gmra.mxu1 %v8330_v36 }
 0x1ed   : > { %v1472_v44 = vpop.f32.mrf.mxu3  ;;  %v8884_v34 = vpop.f32.mrf.mxu0 }
 0x1ee   : > { %v1828_v30 = vmax.f32 %v8572_v12, %v1472_v44  ;;  %12801 = vst [vmem:[#allocation92_spill] sm:$0xff] %v8884_v34  ;;  %v8886_v55 = vpop.f32.mrf.mxu1  ;;  %v6342_v34 = vld [vmem:[%s12668_s3 + $0xa0] sm:$0xf] }
 0x1ef   : > { %12802 = vst [vmem:[#allocation93_spill] sm:$0xff] %v8886_v55  ;;  %v8901_v33 = vpop.f32.mrf.mxu2 }
 0x1f0   : > { %v8888_v35 = vmax.f32 %v1825_v43, %v1828_v30  ;;  %12808 = vst [vmem:[#allocation99_spill] sm:$0xff] %v8901_v33 }
 0x1f2   : > { %12803 = vst [vmem:[#allocation94_spill] sm:$0xff] %v8888_v35 }
 0x1f5   : > { %v8892_v6 = vpop.f32.mrf.mxu3  ;;  %v8894_v54 = vpop.f32.mrf.mxu0 }
 0x1f6   : > { %12805 = vst [vmem:[#allocation96_spill] sm:$0xff] %v8892_v6  ;;  %v8897_v36 = vpop.f32.mrf.mxu1 }
 0x1f7   : > { %12806 = vst [vmem:[#allocation97_spill] sm:$0xff] %v8894_v54  ;;  %v8911_v43 = vpop.f32.mrf.mxu2  ;;  %1352 = vmatmul.bf16.gmra.mxu2 %v8700_v13 }
 0x1f8   : > { %12807 = vst [vmem:[#allocation98_spill] sm:$0xff] %v8897_v36  ;;  %1525 = vmatmul.bf16.gmra.mxu0 %v8342_v40 }
 0x1f9   : > { %1654 = vmatmul.bf16.gmra.mxu1 %v8342_v40  ;;  %12813 = vst [vmem:[#allocation104_spill] sm:$0xff] %v8911_v43  ;;  %v6302_v43 = vld [vmem:[%s12668_s3 + $0x50] sm:$0xf] }
 0x1fd   : > { %v8903_v4 = vpop.f32.mrf.mxu3  ;;  %v8905_v30 = vpop.f32.mrf.mxu0 }
 0x1fe   : > { %12809 = vst [vmem:[#allocation100_spill] sm:$0xff] %v8903_v4  ;;  %v8907_v12 = vpop.f32.mrf.mxu1 }
 0x1ff   : > { %12810 = vst [vmem:[#allocation101_spill] sm:$0xff] %v8905_v30 }
 0x200   : > { %12811 = vst [vmem:[#allocation102_spill] sm:$0xff] %v8907_v12  ;;  %v8926_v12 = vpop.f32.mrf.mxu2 }
 0x201   : > { %12819 = vst [vmem:[#allocation110_spill] sm:$0xff] %v8926_v12 }
 0x205   : > { %v8909_v44 = vpop.f32.mrf.mxu3  ;;  %v8913_v45 = vpop.f32.mrf.mxu0 }
 0x206   : > { %12812 = vst [vmem:[#allocation103_spill] sm:$0xff] %v8909_v44  ;;  %v8916_v50 = vpop.f32.mrf.mxu1 }
 0x207   : > { %12814 = vst [vmem:[#allocation105_spill] sm:$0xff] %v8913_v45 }
 0x208   : > { %12815 = vst [vmem:[#allocation106_spill] sm:$0xff] %v8916_v50  ;;  %1530 = vmatmul.bf16.gmra.mxu0 %v8348_v41  ;;  %v7614_v50 = vld [vmem:[%s12668_s3 + $0x54] sm:$0xf0] }
 0x209   : > { %1659 = vmatmul.bf16.gmra.mxu1 %v8348_v41  ;;  %v6303_v44 = vor.u32 %v7614_v50, %v6302_v43  ;;  %v6366_v41 = vld [vmem:[%s12668_s3 + $0xd0] sm:$0xf]  ;;  %v8948_v50 = vpop.f32.mrf.mxu2  ;;  %1357 = vmatmul.bf16.gmra.mxu2 %v8727_v1 }
 0x20a   : > { %12823 = vst [vmem:[#allocation114_spill] sm:$0xff] %v8948_v50 }
 0x20b   : > { %3815 = vmatpush.bf16.msrb.mxu2 %v6303_v44 }
 0x20d   : > { %v8920_v40 = vpop.f32.mrf.mxu3  ;;  %v8922_v33 = vpop.f32.mrf.mxu0 }
 0x20e   : > { %12816 = vst [vmem:[#allocation107_spill] sm:$0xff] %v8920_v40  ;;  %v8924_v30 = vpop.f32.mrf.mxu1 }
 0x20f   : > { %12817 = vst [vmem:[#allocation108_spill] sm:$0xff] %v8922_v33 }
 0x210   : > { %12818 = vst [vmem:[#allocation109_spill] sm:$0xff] %v8924_v30  ;;  %v7630_v30 = vld [vmem:[%s12668_s3 + $0xd4] sm:$0xf0] }
 0x211   : > { %v6367_v33 = vor.u32 %v7630_v30, %v6366_v41 }
 0x213   : > { %3864 = vmatpush.bf16.msrb.mxu3 %v6367_v33 }
 0x215   : > { %v8934_v45 = vpop.f32.mrf.mxu3  ;;  %v8942_v12 = vpop.f32.mrf.mxu0 }
 0x216   : > { %12820 = vst [vmem:[#allocation111_spill] sm:$0xff] %v8934_v45  ;;  %v8945_v40 = vpop.f32.mrf.mxu1 }
 0x217   : > { %12821 = vst [vmem:[#allocation112_spill] sm:$0xff] %v8942_v12  ;;  %v8957_v12 = vpop.f32.mrf.mxu2 }
 0x218   : > { %12822 = vst [vmem:[#allocation113_spill] sm:$0xff] %v8945_v40  ;;  %1535 = vmatmul.bf16.gmra.mxu0 %v8354_v42 }
 0x219   : > { %1664 = vmatmul.bf16.gmra.mxu1 %v8354_v42  ;;  %12827 = vst [vmem:[#allocation118_spill] sm:$0xff] %v8957_v12 }
 0x21d   : > { %v8951_v43 = vpop.f32.mrf.mxu3  ;;  %v8953_v45 = vpop.f32.mrf.mxu0 }
 0x21e   : > { %12824 = vst [vmem:[#allocation115_spill] sm:$0xff] %v8951_v43  ;;  %v8955_v36 = vpop.f32.mrf.mxu1 }
 0x21f   : > { %12825 = vst [vmem:[#allocation116_spill] sm:$0xff] %v8953_v45  ;;  %v8970_v44 = vpop.f32.mrf.mxu2  ;;  %1362 = vmatmul.bf16.gmra.mxu2 %v8750_v62 }
 0x220   : > { %12826 = vst [vmem:[#allocation117_spill] sm:$0xff] %v8955_v36 }
 0x221   : > { %12832 = vst [vmem:[#allocation123_spill] sm:$0xff] %v8970_v44  ;;  %v7612_v44 = vld [vmem:[%s12668_s3 + $0x44] sm:$0xf0] }
 0x225   : > { %v8959_v30 = vpop.f32.mrf.mxu3  ;;  %v8961_v41 = vpop.f32.mrf.mxu0 }
 0x226   : > { %12828 = vst [vmem:[#allocation119_spill] sm:$0xff] %v8959_v30  ;;  %v8964_v33 = vpop.f32.mrf.mxu1 }
 0x227   : > { %12829 = vst [vmem:[#allocation120_spill] sm:$0xff] %v8961_v41 }
 0x228   : > { %12830 = vst [vmem:[#allocation121_spill] sm:$0xff] %v8964_v33  ;;  %1540 = vmatmul.bf16.gmra.mxu0 %v8366_v46  ;;  %v8983_v33 = vpop.f32.mrf.mxu2 }
 0x229   : > { %1669 = vmatmul.bf16.gmra.mxu1 %v8366_v46  ;;  %12838 = vst [vmem:[#allocation129_spill] sm:$0xff] %v8983_v33  ;;  %v6294_v46 = vld [vmem:[%s12668_s3 + $0x40] sm:$0xf]  ;;  %v7628_v33 = vld [vmem:[%s12668_s3 + $0xc4] sm:$0xf0] }
 0x22d   : > { %v8968_v42 = vpop.f32.mrf.mxu3  ;;  %v8972_v50 = vpop.f32.mrf.mxu0 }
 0x22e   : > { %12831 = vst [vmem:[#allocation122_spill] sm:$0xff] %v8968_v42  ;;  %v8974_v36 = vpop.f32.mrf.mxu1 }
 0x22f   : > { %12833 = vst [vmem:[#allocation124_spill] sm:$0xff] %v8972_v50 }
 0x230   : > { %12834 = vst [vmem:[#allocation125_spill] sm:$0xff] %v8974_v36  ;;  %v9005_v42 = vpop.f32.mrf.mxu2  ;;  %1367 = vmatmul.bf16.gmra.mxu2 %v8781_v59 }
 0x231   : > { %12842 = vst [vmem:[#allocation133_spill] sm:$0xff] %v9005_v42 }
 0x235   : > { %v8976_v12 = vpop.f32.mrf.mxu3  ;;  %v8978_v45 = vpop.f32.mrf.mxu0 }
 0x236   : > { %12835 = vst [vmem:[#allocation126_spill] sm:$0xff] %v8976_v12  ;;  %v8981_v41 = vpop.f32.mrf.mxu1 }
 0x237   : > { %12836 = vst [vmem:[#allocation127_spill] sm:$0xff] %v8978_v45  ;;  %v6295_v45 = vor.u32 %v7612_v44, %v6294_v46 }
 0x238   : > { %12837 = vst [vmem:[#allocation128_spill] sm:$0xff] %v8981_v41  ;;  %1545 = vmatmul.bf16.gmra.mxu0 %v8372_v47 }
 0x239   : > { %1674 = vmatmul.bf16.gmra.mxu1 %v8372_v47  ;;  %3816 = vmatpush.bf16.msrb.mxu2 %v6295_v45  ;;  %v6358_v47 = vld [vmem:[%s12668_s3 + $0xc0] sm:$0xf]  ;;  %v9014_v45 = vpop.f32.mrf.mxu2 }
 0x23a   : > { %v6359_v50 = vor.u32 %v7628_v33, %v6358_v47  ;;  %12845 = vst [vmem:[#allocation136_spill] sm:$0xff] %v9014_v45 }
 0x23c   : > { %3865 = vmatpush.bf16.msrb.mxu3 %v6359_v50 }
 0x23d   : > { %v8993_v36 = vpop.f32.mrf.mxu3  ;;  %v8995_v12 = vpop.f32.mrf.mxu0 }
 0x23e   : > { %12839 = vst [vmem:[#allocation130_spill] sm:$0xff] %v8993_v36  ;;  %v8997_v41 = vpop.f32.mrf.mxu1 }
 0x23f   : > { %12840 = vst [vmem:[#allocation131_spill] sm:$0xff] %v8995_v12 }
 0x240   : > { %12841 = vst [vmem:[#allocation132_spill] sm:$0xff] %v8997_v41 }
 0x245   : > { %v9007_v30 = vpop.f32.mrf.mxu3  ;;  %v1115_v44 = vpop.f32.mrf.mxu0 }
 0x246   : > { %12843 = vst [vmem:[#allocation134_spill] sm:$0xff] %v9007_v30  ;;  %v9010_v46 = vpop.f32.mrf.mxu1  ;;  %v1897_v12 = vmax.f32 %v8702_v18, %v1115_v44  ;;  %v9024_v30 = vpop.f32.mrf.mxu2  ;;  %1372 = vmatmul.bf16.gmra.mxu2 %v8824_v48  ;;  %v6286_v44 = vld [vmem:[%s12668_s3 + $0x30] sm:$0xf] }
 0x247   : > { %12844 = vst [vmem:[#allocation135_spill] sm:$0xff] %v9010_v46 }
 0x248   : > { %1550 = vmatmul.bf16.gmra.mxu0 %v8390_v53  ;;  %12849 = vst [vmem:[#allocation140_spill] sm:$0xff] %v9024_v30 }
 0x249   : > { %1679 = vmatmul.bf16.gmra.mxu1 %v8390_v53 }
 0x24d   : > { %v1502_v41 = vpop.f32.mrf.mxu3  ;;  %v9018_v47 = vpop.f32.mrf.mxu0 }
 0x24e   : > { %v1900_v33 = vmax.f32 %v8716_v9, %v1502_v41  ;;  %12846 = vst [vmem:[#allocation137_spill] sm:$0xff] %v9018_v47  ;;  %v9020_v50 = vpop.f32.mrf.mxu1  ;;  %v6350_v47 = vld [vmem:[%s12668_s3 + $0xb0] sm:$0xf] }
 0x24f   : > { %12847 = vst [vmem:[#allocation138_spill] sm:$0xff] %v9020_v50 }
 0x250   : > { %v9022_v42 = vmax.f32 %v1897_v12, %v1900_v33 }
 0x252   : > { %12848 = vst [vmem:[#allocation139_spill] sm:$0xff] %v9022_v42 }
 0x255   : > { %v9026_v46 = vpop.f32.mrf.mxu0 }
 0x256   : > { %v9029_v53 = vpop.f32.mrf.mxu1 }
 0x258   : > { %1555 = vmatmul.bf16.gmra.mxu0 %v8426_v5 }
 0x259   : > { %1684 = vmatmul.bf16.gmra.mxu1 %v8426_v5  ;;  %v7610_v5 = vld [vmem:[%s12668_s3 + $0x34] sm:$0xf0] }
 0x25a   : > { %v6287_v33 = vor.u32 %v7610_v5, %v6286_v44 }
 0x25c   : > { %3817 = vmatpush.bf16.msrb.mxu2 %v6287_v33 }
 0x25d   : > { %v9033_v18 = vpop.f32.mrf.mxu0 }
 0x25e   : > { %v9035_v9 = vpop.f32.mrf.mxu1 }
 0x265   : > { %v9037_v41 = vpop.f32.mrf.mxu0 }
 0x266   : > { %v9039_v12 = vpop.f32.mrf.mxu1 }
 0x268   : > { %1560 = vmatmul.bf16.gmra.mxu0 %v8462_v22 }
 0x269   : > { %1689 = vmatmul.bf16.gmra.mxu1 %v8462_v22  ;;  %v7626_v22 = vld [vmem:[%s12668_s3 + $0xb4] sm:$0xf0] }
 0x26a   : > { %v6351_v45 = vor.u32 %v7626_v22, %v6350_v47 }
 0x26c   : > { %3866 = vmatpush.bf16.msrb.mxu3 %v6351_v45 }
 0x26d   : > { %v9049_v30 = vpop.f32.mrf.mxu0 }
 0x26e   : > { %v9051_v50 = vpop.f32.mrf.mxu1 }
 0x275   : > { %v9059_v42 = vpop.f32.mrf.mxu0 }
 0x276   : > { %v9061_v36 = vpop.f32.mrf.mxu1 }
 0x278   : > { %1565 = vmatmul.bf16.gmra.mxu0 %v8487_v32 }
 0x279   : > { %1694 = vmatmul.bf16.gmra.mxu1 %v8487_v32  ;;  %v6278_v32 = vld [vmem:[%s12668_s3 + $0x20] sm:$0xf] }
 0x27d   : > { %v9065_v44 = vpop.f32.mrf.mxu0 }
 0x27e   : > { %v9067_v5 = vpop.f32.mrf.mxu1 }
 0x285   : > { %v9069_v33 = vpop.f32.mrf.mxu0 }
 0x286   : > { %v9071_v40 = vpop.f32.mrf.mxu1 }
 0x288   : > { %1570 = vmatmul.bf16.gmra.mxu0 %v8512_v49 }
 0x289   : > { %1699 = vmatmul.bf16.gmra.mxu1 %v8512_v49  ;;  %v7608_v49 = vld [vmem:[%s12668_s3 + $0x24] sm:$0xf0] }
 0x28a   : > { %v6279_v54 = vor.u32 %v7608_v49, %v6278_v32 }
 0x28c   : > { %3818 = vmatpush.bf16.msrb.mxu2 %v6279_v54 }
 0x28d   : > { %v9075_v45 = vpop.f32.mrf.mxu0 }
 0x28e   : > { %v9077_v47 = vpop.f32.mrf.mxu1 }
 0x295   : > { %v9079_v22 = vpop.f32.mrf.mxu0 }
 0x296   : > { %12850 = vst [vmem:[#allocation141_spill] sm:$0xff] %v9079_v22  ;;  %v9081_v43 = vpop.f32.mrf.mxu1  ;;  %v1765_v22 = vmax.f32 %v8428_v7, %v8729_v0  ;;  %v6702_v7 = vld [vmem:[%s12668_s3 + $0x370] sm:$0xf]  ;;  %v7714_v0 = vld [vmem:[%s12668_s3 + $0x374] sm:$0xf0] }
 0x297   : > { %12851 = vst [vmem:[#allocation142_spill] sm:$0xff] %v9081_v43 }
 0x298   : > { %1575 = vmatmul.bf16.gmra.mxu0 %v8531_v57 }
 0x299   : > { %1704 = vmatmul.bf16.gmra.mxu1 %v8531_v57  ;;  %v7624_v57 = vld [vmem:[%s12668_s3 + $0xa4] sm:$0xf0] }
 0x29a   : > { %v6343_v6 = vor.u32 %v7624_v57, %v6342_v34  ;;  %v9121_v57 = vpop.f32.mrf.mxu2 }
 0x29c   : > { %3867 = vmatpush.bf16.msrb.mxu3 %v6343_v6 }
 0x29d   : > { %v9091_v4 = vpop.f32.mrf.mxu0 }
 0x29e   : > { %12852 = vst [vmem:[#allocation143_spill] sm:$0xff] %v9091_v4  ;;  %v9093_v55 = vpop.f32.mrf.mxu1 }
 0x29f   : > { %12853 = vst [vmem:[#allocation144_spill] sm:$0xff] %v9093_v55 }
 0x2a5   : > { %v9101_v35 = vpop.f32.mrf.mxu0 }
 0x2a6   : > { %12854 = vst [vmem:[#allocation145_spill] sm:$0xff] %v9101_v35  ;;  %v9103_v43 = vpop.f32.mrf.mxu1 }
 0x2a7   : > { %12855 = vst [vmem:[#allocation146_spill] sm:$0xff] %v9103_v43 }
 0x2a8   : > { %1580 = vmatmul.bf16.gmra.mxu0 %v8556_v3 }
 0x2a9   : > { %1709 = vmatmul.bf16.gmra.mxu1 %v8556_v3 }
 0x2ad   : > { %v9107_v54 = vpop.f32.mrf.mxu0 }
 0x2ae   : > { %12856 = vst [vmem:[#allocation147_spill] sm:$0xff] %v9107_v54  ;;  %v9109_v32 = vpop.f32.mrf.mxu1 }
 0x2af   : > { %12857 = vst [vmem:[#allocation148_spill] sm:$0xff] %v9109_v32 }
 0x2b5   : > { %v9111_v49 = vpop.f32.mrf.mxu0 }
 0x2b6   : > { %12858 = vst [vmem:[#allocation149_spill] sm:$0xff] %v9111_v49  ;;  %v9113_v55 = vpop.f32.mrf.mxu1 }
 0x2b7   : > { %12859 = vst [vmem:[#allocation150_spill] sm:$0xff] %v9113_v55  ;;  %v6270_v55 = vld [vmem:[%s12668_s3 + $0x10] sm:$0xf] }
 0x2b8   : > { %1585 = vmatmul.bf16.gmra.mxu0 %v8581_v19 }
 0x2b9   : > { %1714 = vmatmul.bf16.gmra.mxu1 %v8581_v19  ;;  %v7606_v19 = vld [vmem:[%s12668_s3 + $0x14] sm:$0xf0] }
 0x2bd   : > { %v9117_v34 = vpop.f32.mrf.mxu0 }
 0x2be   : > { %12860 = vst [vmem:[#allocation151_spill] sm:$0xff] %v9117_v34  ;;  %v9119_v6 = vpop.f32.mrf.mxu1  ;;  %v6271_v34 = vor.u32 %v7606_v19, %v6270_v55 }
 0x2bf   : > { %12861 = vst [vmem:[#allocation152_spill] sm:$0xff] %v9119_v6  ;;  %v9135_v6 = vpop.f32.mrf.mxu2 }
 0x2c0   : > { %3819 = vmatpush.bf16.msrb.mxu2 %v6271_v34 }
 0x2c5   : > { %v9123_v43 = vpop.f32.mrf.mxu0 }
 0x2c6   : > { %12862 = vst [vmem:[#allocation153_spill] sm:$0xff] %v9123_v43  ;;  %v9125_v3 = vpop.f32.mrf.mxu1 }
 0x2c7   : > { %12863 = vst [vmem:[#allocation154_spill] sm:$0xff] %v9125_v3  ;;  %v7622_v3 = vld [vmem:[%s12668_s3 + $0x94] sm:$0xf0]  ;;  %v9147_v54 = vpop.f32.mrf.mxu2 }
 0x2c8   : > { %1590 = vmatmul.bf16.gmra.mxu0 %v8600_v39 }
 0x2c9   : > { %1719 = vmatmul.bf16.gmra.mxu1 %v8600_v39  ;;  %v6334_v39 = vld [vmem:[%s12668_s3 + $0x90] sm:$0xf] }
 0x2ca   : > { %v6335_v32 = vor.u32 %v7622_v3, %v6334_v39 }
 0x2cc   : > { %3868 = vmatpush.bf16.msrb.mxu3 %v6335_v32 }
 0x2cd   : > { %v9137_v49 = vpop.f32.mrf.mxu0 }
 0x2ce   : > { %12864 = vst [vmem:[#allocation155_spill] sm:$0xff] %v9137_v49  ;;  %v9139_v43 = vpop.f32.mrf.mxu1 }
 0x2cf   : > { %12865 = vst [vmem:[#allocation156_spill] sm:$0xff] %v9139_v43  ;;  %v9159_v49 = vpop.f32.mrf.mxu2 }
 0x2d5   : > { %v9149_v55 = vpop.f32.mrf.mxu0 }
 0x2d6   : > { %12866 = vst [vmem:[#allocation157_spill] sm:$0xff] %v9149_v55  ;;  %v9151_v19 = vpop.f32.mrf.mxu1 }
 0x2d7   : > { %12867 = vst [vmem:[#allocation158_spill] sm:$0xff] %v9151_v19  ;;  %v9166_v32 = vpop.f32.mrf.mxu2 }
 0x2d8   : > { %1595 = vmatmul.bf16.gmra.mxu0 %v8625_v27 }
 0x2d9   : > { %1724 = vmatmul.bf16.gmra.mxu1 %v8625_v27 }
 0x2dd   : > { %v9155_v34 = vpop.f32.mrf.mxu0 }
 0x2de   : > { %12868 = vst [vmem:[#allocation159_spill] sm:$0xff] %v9155_v34  ;;  %v9157_v43 = vpop.f32.mrf.mxu1 }
 0x2df   : > { %12869 = vst [vmem:[#allocation160_spill] sm:$0xff] %v9157_v43  ;;  %v9173_v27 = vpop.f32.mrf.mxu2 }
 0x2e5   : > { %v9161_v35 = vpop.f32.mrf.mxu0 }
 0x2e6   : > { %12870 = vst [vmem:[#allocation161_spill] sm:$0xff] %v9161_v35  ;;  %v9163_v3 = vpop.f32.mrf.mxu1 }
 0x2e7   : > { %12871 = vst [vmem:[#allocation162_spill] sm:$0xff] %v9163_v3  ;;  %v9181_v3 = vpop.f32.mrf.mxu2 }
 0x2e8   : > { %1600 = vmatmul.bf16.gmra.mxu0 %v8650_v37 }
 0x2e9   : > { %1729 = vmatmul.bf16.gmra.mxu1 %v8650_v37  ;;  %v6262_v37 = vld [vmem:[%s12668_s3] sm:$0xf] }
 0x2ed   : > { %v9169_v39 = vpop.f32.mrf.mxu0 }
 0x2ee   : > { %12872 = vst [vmem:[#allocation163_spill] sm:$0xff] %v9169_v39  ;;  %v9171_v19 = vpop.f32.mrf.mxu1 }
 0x2ef   : > { %12873 = vst [vmem:[#allocation164_spill] sm:$0xff] %v9171_v19 }
 0x2f5   : > { %v9175_v34 = vpop.f32.mrf.mxu0 }
 0x2f6   : > { %12874 = vst [vmem:[#allocation165_spill] sm:$0xff] %v9175_v34  ;;  %v9177_v43 = vpop.f32.mrf.mxu1  ;;  %v7604_v34 = vld [vmem:[%s12668_s3 + $0x4] sm:$0xf0] }
 0x2f7   : > { %12875 = vst [vmem:[#allocation166_spill] sm:$0xff] %v9177_v43  ;;  %v6263_v19 = vor.u32 %v7604_v34, %v6262_v37  ;;  %v1768_v37 = vmax.f32 %v8447_v14, %v8739_v25  ;;  %v1767_v25 = vmax.f32 %v8666_v61, %v9121_v57 }
 0x2f8   : > { %1605 = vmatmul.bf16.gmra.mxu0 %v8671_v11 }
 0x2f9   : > { %1734 = vmatmul.bf16.gmra.mxu1 %v8671_v11  ;;  %3820 = vmatpush.bf16.msrb.mxu2 %v6263_v19  ;;  %v9197_v11 = vpop.f32.mrf.mxu2 }
 0x2fd   : > { %v9183_v35 = vpop.f32.mrf.mxu0 }
 0x2fe   : > { %12876 = vst [vmem:[#allocation167_spill] sm:$0xff] %v9183_v35  ;;  %v9185_v55 = vpop.f32.mrf.mxu1  ;;  %v7620_v35 = vld [vmem:[%s12668_s3 + $0x84] sm:$0xf0] }
 0x2ff   : > { %12877 = vst [vmem:[#allocation168_spill] sm:$0xff] %v9185_v55  ;;  %v6326_v55 = vld [vmem:[%s12668_s3 + $0x80] sm:$0xf] }
 0x300   : > { %v6327_v4 = vor.u32 %v7620_v35, %v6326_v55  ;;  %v1909_v35 = vmax.f32 %v1765_v22, %v1768_v37  ;;  %v7730_v22 = vld [vmem:[%s12668_s3 + $0x3f4] sm:$0xf0] }
 0x302   : > { %3869 = vmatpush.bf16.msrb.mxu3 %v6327_v4  ;;  %v1766_v4 = vmax.f32 %v8430_v8, %v8732_v2  ;;  %v6766_v8 = vld [vmem:[%s12668_s3 + $0x3f0] sm:$0xf] }
 0x305   : > { %v9193_v43 = vpop.f32.mrf.mxu0 }
 0x306   : > { %12878 = vst [vmem:[#allocation169_spill] sm:$0xff] %v9193_v43  ;;  %v9195_v39 = vpop.f32.mrf.mxu1  ;;  %v9216_v43 = vpop.f32.mrf.mxu2 }
 0x307   : > { %12879 = vst [vmem:[#allocation170_spill] sm:$0xff] %v9195_v39  ;;  %v1981_v39 = vld [vmem:[%s12667_s2] sm:$0x7] }
 0x308   : > { %1610 = vmatmul.bf16.gmra.mxu0 %v8700_v13  ;;  %12882 = vst [vmem:[#allocation173_spill] sm:$0xff] %v9216_v43  ;;  %v9220_v55 = vperm.slane %v1981_v39, 0  ;;  %v9246_v37 = vperm.slane %v1981_v39, 2 }
 0x309   : > { %1739 = vmatmul.bf16.gmra.mxu1 %v8700_v13 }
 0x30a   : > { %v1989_v2 = vadd.f32 %v9220_v55, %v1909_v35  ;;  %v1771_v35 = vmax.f32 %v8449_v16, %v8741_v38 }
 0x30d   : > { %v9207_v19 = vpop.f32.mrf.mxu0 }
 0x30e   : > { %12880 = vst [vmem:[#allocation171_spill] sm:$0xff] %v9207_v19  ;;  %v9209_v34 = vpop.f32.mrf.mxu1  ;;  %v9225_v19 = vperm.slane %v1981_v39, 1  ;;  %v2061_v39 = vmax.f32 %v1989_v2, 0.0 }
 0x30f   : > { %12881 = vst [vmem:[#allocation172_spill] sm:$0xff] %v9209_v34 }
 0x315   : > { %v1576_v13 = vpop.f32.mrf.mxu0 }
 0x316   : > { %v1769_v34 = vmax.f32 %v9026_v46, %v1576_v13  ;;  %v1705_v14 = vpop.f32.mrf.mxu1  ;;  %v1774_v46 = vmax.f32 %v8459_v21, %v8747_v15  ;;  %v6767_v13 = vor.u32 %v7730_v22, %v6766_v8  ;;  %v9252_v21 = vpop.f32.mrf.mxu2  ;;  %v6694_v15 = vld [vmem:[%s12668_s3 + $0x360] sm:$0xf]  ;;  %v1777_v22 = vmax.f32 %v8464_v23, %v8752_v58 }
 0x317   : > { %v1770_v43 = vmax.f32 %v9029_v53, %v1705_v14  ;;  %v6703_v53 = vor.u32 %v7714_v0, %v6702_v7 }
 0x318   : > { %v1910_v61 = vmax.f32 %v1766_v4, %v1769_v34  ;;  %1615 = vmatmul.bf16.gmra.mxu0 %v8727_v1  ;;  %4156 = vmatpush.bf16.msra.mxu1 %v6767_v13  ;;  %v1912_v16 = vmax.f32 %v1771_v35, %v1774_v46  ;;  %v7728_v4 = vld [vmem:[%s12668_s3 + $0x3e4] sm:$0xf0]  ;;  %v1773_v13 = vmax.f32 %v8681_v10, %v9135_v6  ;;  %v7726_v10 = vld [vmem:[%s12668_s3 + $0x3d4] sm:$0xf0] }
 0x319   : > { %v1911_v57 = vmax.f32 %v1767_v25, %v1770_v43  ;;  %1744 = vmatmul.bf16.gmra.mxu1 %v8727_v1  ;;  %4107 = vmatpush.bf16.msra.mxu0 %v6703_v53  ;;  %v7712_v43 = vld [vmem:[%s12668_s3 + $0x364] sm:$0xf0]  ;;  %v6758_v1 = vld [vmem:[%s12668_s3 + $0x3e0] sm:$0xf]  ;;  %v1780_v25 = vmax.f32 %v8478_v28, %v8768_v51  ;;  %v6686_v51 = vld [vmem:[%s12668_s3 + $0x350] sm:$0xf] }
 0x31a   : > { %v1990_v14 = vadd.f32 %v9225_v19, %v1910_v61  ;;  %v6695_v34 = vor.u32 %v7712_v43, %v6694_v15  ;;  %v6759_v8 = vor.u32 %v7728_v4, %v6758_v1  ;;  %v1772_v61 = vmax.f32 %v8451_v17, %v8743_v60  ;;  %v7710_v17 = vld [vmem:[%s12668_s3 + $0x354] sm:$0xf0]  ;;  %v6750_v60 = vld [vmem:[%s12668_s3 + $0x3d0] sm:$0xf]  ;;  %v6678_v43 = vld [vmem:[%s12668_s3 + $0x340] sm:$0xf] }
 0x31b   : > { %v1991_v7 = vadd.f32 %v9246_v37, %v1911_v57  ;;  %v1992_v23 = vadd.f32 %v9220_v55, %v1912_v16  ;;  %v6751_v35 = vor.u32 %v7726_v10, %v6750_v60  ;;  %v7708_v1 = vld [vmem:[%s12668_s3 + $0x344] sm:$0xf0] }
 0x31c   : > { %v2062_v38 = vmax.f32 %v1990_v14, 0.0  ;;  %4157 = vmatpush.bf16.msra.mxu1 %v6759_v8  ;;  %v6679_v4 = vor.u32 %v7708_v1, %v6678_v43  ;;  %v6662_v1 = vld [vmem:[%s12668_s3 + $0x320] sm:$0xf] }
 0x31d   : > { %v1578_v0 = vpop.f32.mrf.mxu0  ;;  %4108 = vmatpush.bf16.msra.mxu0 %v6695_v34  ;;  %v2063_v6 = vmax.f32 %v1991_v7, 0.0  ;;  %v2064_v16 = vmax.f32 %v1992_v23, 0.0 }
 0x31e   : > { %v9271_v53 = vpack.c.bf16 %v2062_v38, %v2061_v39  ;;  %v1775_v2 = vmax.f32 %v9033_v18, %v1578_v0  ;;  %v1707_v46 = vpop.f32.mrf.mxu1  ;;  %v6687_v18 = vor.u32 %v7710_v17, %v6686_v51  ;;  %v6742_v39 = vld [vmem:[%s12668_s3 + $0x3c0] sm:$0xf]  ;;  %v1778_v38 = vmax.f32 %v8467_v24, %v8755_v63  ;;  %v9309_v0 = vpop.f32.mrf.mxu2 }
 0x31f   : > { %v1776_v28 = vmax.f32 %v9035_v9, %v1707_v46  ;;  %v1915_v9 = vmax.f32 %v1777_v22, %v1780_v25  ;;  %v7724_v25 = vld [vmem:[%s12668_s3 + $0x3c4] sm:$0xf0]  ;;  %v2134_v8 = vpack.c.bf16 %v2063_v6, %v2063_v6  ;;  %v1786_v22 = vmax.f32 %v8484_v31, %v8789_v56  ;;  %v6670_v31 = vld [vmem:[%s12668_s3 + $0x330] sm:$0xf] }
 0x320   : > { %v1913_v58 = vmax.f32 %v1772_v61, %v1775_v2  ;;  %4158 = vmatpush.bf16.msra.mxu1 %v6751_v35  ;;  %v6743_v46 = vor.u32 %v7724_v25, %v6742_v39  ;;  %v1779_v24 = vmax.f32 %v8695_v26, %v9147_v54  ;;  %v2197_v51 = vunpack.c.l.b16 %v9271_v53  ;;  %v7706_v26 = vld [vmem:[%s12668_s3 + $0x334] sm:$0xf0]  ;;  %v6734_v56 = vld [vmem:[%s12668_s3 + $0x3b0] sm:$0xf] }
 0x321   : > { %v1914_v57 = vmax.f32 %v1773_v13, %v1776_v28  ;;  %4109 = vmatpush.bf16.msra.mxu0 %v6687_v18  ;;  %v1995_v7 = vadd.f32 %v9220_v55, %v1915_v9  ;;  %v2198_v17 = vunpack.c.h.b16 %v9271_v53  ;;  %v2199_v18 = vunpack.c.l.b16 %v2134_v8 }
 0x322   : > { %v1993_v14 = vadd.f32 %v9225_v19, %v1913_v58  ;;  %v6671_v58 = vor.u32 %v7706_v26, %v6670_v31  ;;  %v12890_v26 = vld [vmem:[#allocation7_spill] sm:$0xff] }
 0x323   : > { %v1994_v15 = vadd.f32 %v9246_v37, %v1914_v57  ;;  %v1783_v57 = vmax.f32 %v8480_v29, %v8770_v20  ;;  %v6726_v29 = vld [vmem:[%s12668_s3 + $0x3a0] sm:$0xf]  ;;  %v2067_v20 = vmax.f32 %v1995_v7, 0.0  ;;  %v12887_v7 = vld [vmem:[#allocation9_spill] sm:$0xff] }
 0x324   : > { %v2065_v34 = vmax.f32 %v1993_v14, 0.0  ;;  %4159 = vmatpush.bf16.msra.mxu1 %v6743_v46  ;;  %v12886_v46 = vld [vmem:[#allocation70_spill] sm:$0xff] }
 0x325   : > { %v2066_v61 = vmax.f32 %v1994_v15, 0.0  ;;  %v1581_v2 = vpop.f32.mrf.mxu0  ;;  %4110 = vmatpush.bf16.msra.mxu0 %v6679_v4  ;;  %v1918_v39 = vmax.f32 %v1783_v57, %v1786_v22  ;;  %v1792_v22 = vmax.f32 %v12887_v7, %v12886_v46 }
 0x326   : > { %v2135_v63 = vpack.c.bf16 %v2065_v34, %v2064_v16  ;;  %v1781_v13 = vmax.f32 %v9037_v41, %v1581_v2  ;;  %v1710_v28 = vpop.f32.mrf.mxu1  ;;  %v7720_v34 = vld [vmem:[%s12668_s3 + $0x3a4] sm:$0xf0] }
 0x327   : > { %v2136_v60 = vpack.c.bf16 %v2066_v61, %v2066_v61  ;;  %v1782_v23 = vmax.f32 %v9039_v12, %v1710_v28  ;;  %v7722_v12 = vld [vmem:[%s12668_s3 + $0x3b4] sm:$0xf0]  ;;  %v6727_v8 = vor.u32 %v7720_v34, %v6726_v29  ;;  %v12885_v61 = vld [vmem:[#allocation6_spill] sm:$0xff]  ;;  %v1998_v31 = vadd.f32 %v9220_v55, %v1918_v39 }
 0x328   : > { %v1916_v41 = vmax.f32 %v1778_v38, %v1781_v13  ;;  %1620 = vmatmul.bf16.gmra.mxu0 %v8750_v62  ;;  %v2200_v54 = vunpack.c.l.b16 %v2135_v63  ;;  %v2201_v53 = vunpack.c.h.b16 %v2135_v63  ;;  %v6735_v6 = vor.u32 %v7722_v12, %v6734_v56  ;;  %v12888_v28 = vld [vmem:[#allocation61_spill] sm:$0xff]  ;;  %v6446_v12 = vld [vmem:[%s12668_s3 + $0x170] sm:$0xf]  ;;  %v6710_v29 = vld [vmem:[%s12668_s3 + $0x380] sm:$0xf] }
 0x329   : > { %v2202_v10 = vunpack.c.l.b16 %v2136_v60  ;;  %v1917_v9 = vmax.f32 %v1779_v24, %v1782_v23  ;;  %1749 = vmatmul.bf16.gmra.mxu1 %v8750_v62  ;;  %4111 = vmatpush.bf16.msra.mxu0 %v6671_v58  ;;  %v7704_v62 = vld [vmem:[%s12668_s3 + $0x324] sm:$0xf0]  ;;  %v1784_v2 = vmax.f32 %v12885_v61, %v8772_v52  ;;  %v6654_v52 = vld [vmem:[%s12668_s3 + $0x310] sm:$0xf]  ;;  %v7702_v23 = vld [vmem:[%s12668_s3 + $0x314] sm:$0xf0] }
 0x32a   : > { %v1996_v35 = vadd.f32 %v9225_v19, %v1916_v41  ;;  %v9336_v14 = vpack.c.b16 %v2200_v54, %v2197_v51  ;;  %v9338_v15 = vpack.c.b16 %v2201_v53, %v2198_v17  ;;  %4160 = vmatpush.bf16.msra.mxu1 %v6735_v6  ;;  %v6663_v38 = vor.u32 %v7704_v62, %v6662_v1  ;;  %v9366_v17 = vpop.f32.mrf.mxu2  ;;  %v7718_v54 = vld [vmem:[%s12668_s3 + $0x394] sm:$0xf0]  ;;  %v6646_v1 = vld [vmem:[%s12668_s3 + $0x300] sm:$0xf]  ;;  %v7700_v62 = vld [vmem:[%s12668_s3 + $0x304] sm:$0xf0] }
 0x32b   : > { %v9340_v43 = vpack.c.b16 %v2202_v10, %v2199_v18  ;;  %v1997_v4 = vadd.f32 %v9246_v37, %v1917_v9  ;;  %v1785_v51 = vmax.f32 %v12888_v28, %v9159_v49  ;;  %v12889_v49 = vld [vmem:[#allocation67_spill] sm:$0xff]  ;;  %v7650_v18 = vld [vmem:[%s12668_s3 + $0x174] sm:$0xf0] }
 0x32c   : > { %12883 = vst [vmem:[#allocation174_spill] sm:$0xff] %v9338_v15  ;;  %v2068_v16 = vmax.f32 %v1996_v35, 0.0  ;;  %3821 = vmatmul.bf16.vlgmr.msrb.gmra.mxu2 %v9336_v14  ;;  %3870 = vmatmul.bf16.vlgmr.msrb.gmra.mxu3 %v9338_v15  ;;  %v1789_v56 = vmax.f32 %v12890_v26, %v12889_v49  ;;  %v6447_v57 = vor.u32 %v7650_v18, %v6446_v12  ;;  %v12891_v34 = vld [vmem:[#allocation69_spill] sm:$0xff]  ;;  %v12897_v12 = vld [vmem:[#allocation10_spill] sm:$0xff] }
 0x32d   : > { %12884 = vst [vmem:[#allocation175_spill] sm:$0xff] %v9340_v43  ;;  %v1583_v25 = vpop.f32.mrf.mxu0  ;;  %4112 = vmatpush.bf16.msra.mxu0 %v6663_v38  ;;  %v2069_v53 = vmax.f32 %v1997_v4, 0.0  ;;  %v7716_v38 = vld [vmem:[%s12668_s3 + $0x384] sm:$0xf0]  ;;  %v12892_v4 = vld [vmem:[#allocation8_spill] sm:$0xff] }
 0x32e   : > { %v9361_v24 = vpack.c.bf16 %v2068_v16, %v2067_v20  ;;  %v1787_v63 = vmax.f32 %v9049_v30, %v1583_v25  ;;  %v1712_v13 = vpop.f32.mrf.mxu1  ;;  %4161 = vmatpush.bf16.msra.mxu1 %v6727_v8  ;;  %v6718_v30 = vld [vmem:[%s12668_s3 + $0x390] sm:$0xf]  ;;  %v1921_v9 = vmax.f32 %v1789_v56, %v1792_v22  ;;  %v2070_v20 = vmax.f32 %v1998_v31, 0.0  ;;  %3911 = vmatpush.bf16.msra.mxu2 %v6447_v57  ;;  %v12893_v22 = vld [vmem:[#allocation74_spill] sm:$0xff]  ;;  %v7666_v57 = vld [vmem:[%s12668_s3 + $0x1f4] sm:$0xf0] }
 0x32f   : > { %v1788_v60 = vmax.f32 %v9051_v50, %v1712_v13  ;;  %v6655_v50 = vor.u32 %v7702_v23, %v6654_v52  ;;  %v6719_v10 = vor.u32 %v7718_v54, %v6718_v30  ;;  %v6647_v16 = vor.u32 %v7700_v62, %v6646_v1  ;;  %v12895_v52 = vld [vmem:[#allocation64_spill] sm:$0xff] }
 0x330   : > { %v1919_v41 = vmax.f32 %v1784_v2, %v1787_v63  ;;  %v1790_v25 = vmax.f32 %v12892_v4, %v12891_v34  ;;  %v2138_v8 = vpack.c.bf16 %v2069_v53, %v2069_v53  ;;  %v6711_v46 = vor.u32 %v7716_v38, %v6710_v29  ;;  %v12894_v63 = vld [vmem:[#allocation12_spill] sm:$0xff]  ;;  %v12902_v34 = vld [vmem:[#allocation78_spill] sm:$0xff]  ;;  %v12903_v4 = vld [vmem:[#allocation15_spill] sm:$0xff] }
 0x331   : > { %v1920_v58 = vmax.f32 %v1785_v51, %v1788_v60  ;;  %4113 = vmatpush.bf16.msra.mxu0 %v6655_v50  ;;  %v2001_v7 = vadd.f32 %v9220_v55, %v1921_v9  ;;  %v1798_v13 = vmax.f32 %v12894_v63, %v12893_v22  ;;  %v1791_v23 = vmax.f32 %v12895_v52, %v9166_v32  ;;  %v12896_v32 = vld [vmem:[#allocation71_spill] sm:$0xff] }
 0x332   : > { %v1999_v6 = vadd.f32 %v9225_v19, %v1919_v41  ;;  %4162 = vmatpush.bf16.msra.mxu1 %v6719_v10  ;;  %v2203_v30 = vunpack.c.l.b16 %v9361_v24  ;;  %v2204_v26 = vunpack.c.h.b16 %v9361_v24  ;;  %v9416_v54 = vpop.f32.mrf.mxu2  ;;  %v1795_v18 = vmax.f32 %v12897_v12, %v12896_v32 }
 0x333   : > { %v2000_v35 = vadd.f32 %v9246_v37, %v1920_v58 }
 0x334   : > { %v2071_v39 = vmax.f32 %v1999_v6, 0.0  ;;  %v6510_v6 = vld [vmem:[%s12668_s3 + $0x1f0] sm:$0xf] }
 0x335   : > { %v2072_v61 = vmax.f32 %v2000_v35, 0.0  ;;  %v1586_v2 = vpop.f32.mrf.mxu0  ;;  %4114 = vmatpush.bf16.msra.mxu0 %v6647_v16  ;;  %v1924_v35 = vmax.f32 %v1795_v18, %v1798_v13  ;;  %v6511_v62 = vor.u32 %v7666_v57, %v6510_v6  ;;  %v12901_v16 = vld [vmem:[#allocation11_spill] sm:$0xff]  ;;  %v12910_v6 = vld [vmem:[#allocation18_spill] sm:$0xff] }
 0x336   : > { %v2139_v28 = vpack.c.bf16 %v2071_v39, %v2070_v20  ;;  %v1793_v51 = vmax.f32 %v9059_v42, %v1586_v2  ;;  %v1715_v60 = vpop.f32.mrf.mxu1  ;;  %4163 = vmatpush.bf16.msra.mxu1 %v6711_v46  ;;  %v2205_v42 = vunpack.c.l.b16 %v2138_v8  ;;  %v12900_v39 = vld [vmem:[#allocation72_spill] sm:$0xff]  ;;  %v12904_v46 = vld [vmem:[#allocation65_spill] sm:$0xff]  ;;  %v12905_v13 = vld [vmem:[#allocation75_spill] sm:$0xff] }
 0x337   : > { %v2140_v31 = vpack.c.bf16 %v2072_v61, %v2072_v61  ;;  %v1794_v49 = vmax.f32 %v9061_v36, %v1715_v60  ;;  %v1796_v38 = vmax.f32 %v12901_v16, %v12900_v39  ;;  %3960 = vmatpush.bf16.msra.mxu3 %v6511_v62  ;;  %v2004_v63 = vadd.f32 %v9220_v55, %v1924_v35  ;;  %v12911_v62 = vld [vmem:[#allocation66_spill] sm:$0xff] }
 0x338   : > { %v2206_v56 = vunpack.c.l.b16 %v2139_v28  ;;  %v2207_v41 = vunpack.c.h.b16 %v2139_v28  ;;  %v1922_v50 = vmax.f32 %v1790_v25, %v1793_v51  ;;  %1625 = vmatmul.bf16.gmra.mxu0 %v8781_v59  ;;  %v1804_v25 = vmax.f32 %v12903_v4, %v12902_v34  ;;  %v12906_v28 = vld [vmem:[#allocation13_spill] sm:$0xff] }
 0x339   : > { %v2208_v53 = vunpack.c.l.b16 %v2140_v31  ;;  %v1923_v58 = vmax.f32 %v1791_v23, %v1794_v49  ;;  %1754 = vmatmul.bf16.gmra.mxu1 %v8781_v59  ;;  %v2073_v59 = vmax.f32 %v2001_v7, 0.0  ;;  %v1797_v7 = vmax.f32 %v12904_v46, %v9173_v27 }
 0x33a   : > { %v9421_v10 = vpack.c.b16 %v2206_v56, %v2203_v30  ;;  %v9423_v36 = vpack.c.b16 %v2207_v41, %v2204_v26  ;;  %v2002_v24 = vadd.f32 %v9225_v19, %v1922_v50  ;;  %v1801_v51 = vmax.f32 %v12906_v28, %v12905_v13  ;;  %v6438_v30 = vld [vmem:[%s12668_s3 + $0x160] sm:$0xf]  ;;  %v9455_v49 = vpop.f32.mrf.mxu2  ;;  %v12907_v50 = vld [vmem:[#allocation76_spill] sm:$0xff]  ;;  %v7664_v28 = vld [vmem:[%s12668_s3 + $0x1e4] sm:$0xf0] }
 0x33b   : > { %v9426_v9 = vpack.c.b16 %v2208_v53, %v2205_v42  ;;  %v2003_v29 = vadd.f32 %v9246_v37, %v1923_v58  ;;  %v2076_v56 = vmax.f32 %v2004_v63, 0.0  ;;  %v12908_v42 = vld [vmem:[#allocation14_spill] sm:$0xff] }
 0x33c   : > { %12898 = vst [vmem:[#allocation6_spill] sm:$0xff] %v9421_v10  ;;  %v2074_v1 = vmax.f32 %v2002_v24, 0.0  ;;  %3826 = vmatmul.bf16.gmra.mxu2 %v9421_v10  ;;  %3875 = vmatmul.bf16.gmra.mxu3 %v9423_v36  ;;  %v1927_v31 = vmax.f32 %v1801_v51, %v1804_v25  ;;  %v1802_v53 = vmax.f32 %v12908_v42, %v12907_v50  ;;  %v12909_v24 = vld [vmem:[#allocation82_spill] sm:$0xff] }
 0x33d   : > { %12899 = vst [vmem:[#allocation70_spill] sm:$0xff] %v9423_v36  ;;  %v1588_v20 = vpop.f32.mrf.mxu0  ;;  %v2075_v52 = vmax.f32 %v2003_v29, 0.0  ;;  %v1810_v57 = vmax.f32 %v12910_v6, %v12909_v24  ;;  %v1803_v29 = vmax.f32 %v12911_v62, %v9181_v3  ;;  %v6502_v13 = vld [vmem:[%s12668_s3 + $0x1e0] sm:$0xf]  ;;  %v12919_v24 = vld [vmem:[#allocation83_spill] sm:$0xff] }
 0x33e   : > { %v2141_v8 = vpack.c.bf16 %v2074_v1, %v2073_v59  ;;  %v1799_v61 = vmax.f32 %v9065_v44, %v1588_v20  ;;  %v1717_v2 = vpop.f32.mrf.mxu1  ;;  %v7648_v44 = vld [vmem:[%s12668_s3 + $0x164] sm:$0xf0]  ;;  %v2007_v18 = vadd.f32 %v9220_v55, %v1927_v31  ;;  %v12914_v31 = vld [vmem:[#allocation80_spill] sm:$0xff] }
 0x33f   : > { %v1800_v22 = vmax.f32 %v9067_v5, %v1717_v2  ;;  %v6439_v5 = vor.u32 %v7648_v44, %v6438_v30  ;;  %v2142_v58 = vpack.c.bf16 %v2075_v52, %v2075_v52  ;;  %v6503_v52 = vor.u32 %v7664_v28, %v6502_v13  ;;  %v12920_v6 = vld [vmem:[#allocation19_spill] sm:$0xff]  ;;  %v6430_v62 = vld [vmem:[%s12668_s3 + $0x150] sm:$0xf]  ;;  %v12925_v13 = vld [vmem:[#allocation141_spill] sm:$0xff] }
 0x340   : > { %v1925_v60 = vmax.f32 %v1796_v38, %v1799_v61  ;;  %v2209_v20 = vunpack.c.l.b16 %v2141_v8  ;;  %v2210_v38 = vunpack.c.h.b16 %v2141_v8 }
 0x341   : > { %v1926_v23 = vmax.f32 %v1797_v7, %v1800_v22  ;;  %3912 = vmatpush.bf16.msra.mxu2 %v6439_v5  ;;  %v2211_v61 = vunpack.c.l.b16 %v2142_v58  ;;  %v12913_v7 = vld [vmem:[#allocation16_spill] sm:$0xff]  ;;  %3961 = vmatpush.bf16.msra.mxu3 %v6503_v52 }
 0x342   : > { %v2005_v27 = vadd.f32 %v9225_v19, %v1925_v60  ;;  %v12918_v58 = vld [vmem:[#allocation68_spill] sm:$0xff] }
 0x343   : > { %v2006_v26 = vadd.f32 %v9246_v37, %v1926_v23  ;;  %v9486_v23 = vpop.f32.mrf.mxu2 }
 0x344   : > { %v2077_v41 = vmax.f32 %v2005_v27, 0.0  ;;  %v12915_v27 = vld [vmem:[#allocation17_spill] sm:$0xff] }
 0x345   : > { %v2078_v32 = vmax.f32 %v2006_v26, 0.0  ;;  %v1591_v12 = vpop.f32.mrf.mxu0  ;;  %v1808_v5 = vmax.f32 %v12915_v27, %v12914_v31  ;;  %v12916_v26 = vld [vmem:[#allocation85_spill] sm:$0xff]  ;;  %v12928_v27 = vld [vmem:[#allocation142_spill] sm:$0xff] }
 0x346   : > { %v2143_v59 = vpack.c.bf16 %v2077_v41, %v2076_v56  ;;  %v1805_v35 = vmax.f32 %v9069_v33, %v1591_v12  ;;  %v1720_v1 = vpop.f32.mrf.mxu1  ;;  %v12912_v33 = vld [vmem:[#allocation79_spill] sm:$0xff]  ;;  %v12917_v56 = vld [vmem:[#allocation21_spill] sm:$0xff] }
 0x347   : > { %v2144_v39 = vpack.c.bf16 %v2078_v32, %v2078_v32  ;;  %v1806_v16 = vmax.f32 %v9071_v40, %v1720_v1  ;;  %v1807_v22 = vmax.f32 %v12913_v7, %v12912_v33  ;;  %v1816_v41 = vmax.f32 %v12917_v56, %v12916_v26  ;;  %v12923_v33 = vld [vmem:[#allocation89_spill] sm:$0xff]  ;;  %v12924_v7 = vld [vmem:[#allocation24_spill] sm:$0xff] }
 0x348   : > { %v2212_v34 = vunpack.c.l.b16 %v2143_v59  ;;  %v2213_v4 = vunpack.c.h.b16 %v2143_v59  ;;  %v1928_v25 = vmax.f32 %v1802_v53, %v1805_v35  ;;  %1630 = vmatmul.bf16.gmra.mxu0 %v8824_v48  ;;  %v1809_v32 = vmax.f32 %v12918_v58, %v9197_v11  ;;  %v12930_v58 = vld [vmem:[#allocation22_spill] sm:$0xff] }
 0x349   : > { %v2214_v2 = vunpack.c.l.b16 %v2144_v39  ;;  %v1929_v46 = vmax.f32 %v1803_v29, %v1806_v16  ;;  %1759 = vmatmul.bf16.gmra.mxu1 %v8824_v48  ;;  %v2079_v48 = vmax.f32 %v2007_v18, 0.0  ;;  %v1930_v51 = vmax.f32 %v1807_v22, %v1810_v57 }
 0x34a   : > { %v9471_v63 = vpack.c.b16 %v2212_v34, %v2209_v20  ;;  %v9473_v3 = vpack.c.b16 %v2213_v4, %v2210_v38  ;;  %v2008_v40 = vadd.f32 %v9225_v19, %v1928_v25  ;;  %v1813_v57 = vmax.f32 %v12920_v6, %v12919_v24  ;;  %v12921_v38 = vld [vmem:[#allocation84_spill] sm:$0xff] }
 0x34b   : > { %v9476_v8 = vpack.c.b16 %v2214_v2, %v2211_v61  ;;  %v2009_v30 = vadd.f32 %v9246_v37, %v1929_v46  ;;  %v2010_v18 = vadd.f32 %v9220_v55, %v1930_v51  ;;  %v12922_v34 = vld [vmem:[#allocation20_spill] sm:$0xff]  ;;  %v1822_v22 = vmax.f32 %v12924_v7, %v12923_v33  ;;  %v12926_v51 = vld [vmem:[#allocation173_spill] sm:$0xff] }
 0x34c   : > { %v2080_v60 = vmax.f32 %v2008_v40, 0.0  ;;  %3831 = vmatmul.bf16.gmra.mxu2 %v9471_v63  ;;  %3880 = vmatmul.bf16.gmra.mxu3 %v9473_v3  ;;  %v1933_v29 = vmax.f32 %v1813_v57, %v1816_v41  ;;  %v1814_v4 = vmax.f32 %v12922_v34, %v12921_v38  ;;  %v6494_v6 = vld [vmem:[%s12668_s3 + $0x1d0] sm:$0xf] }
 0x34d   : > { %v1593_v44 = vpop.f32.mrf.mxu0  ;;  %v2081_v35 = vmax.f32 %v2009_v30, 0.0  ;;  %v2082_v39 = vmax.f32 %v2010_v18, 0.0  ;;  %v9516_v30 = vpop.f32.mrf.mxu2  ;;  %v12935_v33 = vld [vmem:[#allocation144_spill] sm:$0xff] }
 0x34e   : > { %v2145_v50 = vpack.c.bf16 %v2080_v60, %v2079_v48  ;;  %v1811_v42 = vmax.f32 %v9075_v45, %v1593_v44  ;;  %v1722_v53 = vpop.f32.mrf.mxu1  ;;  %v7646_v45 = vld [vmem:[%s12668_s3 + $0x154] sm:$0xf0]  ;;  %v2013_v46 = vadd.f32 %v9220_v55, %v1933_v29 }
 0x34f   : > { %v1812_v12 = vmax.f32 %v9077_v47, %v1722_v53  ;;  %v6431_v47 = vor.u32 %v7646_v45, %v6430_v62  ;;  %v2146_v25 = vpack.c.bf16 %v2081_v35, %v2081_v35  ;;  %v12927_v60 = vld [vmem:[#allocation73_spill] sm:$0xff]  ;;  %v12929_v53 = vld [vmem:[#allocation86_spill] sm:$0xff] }
 0x350   : > { %v1931_v59 = vmax.f32 %v1808_v5, %v1811_v42  ;;  %v1815_v52 = vmax.f32 %v12927_v60, %v12926_v51  ;;  %v2215_v44 = vunpack.c.l.b16 %v2145_v50  ;;  %v2216_v26 = vunpack.c.h.b16 %v2145_v50  ;;  %v7662_v50 = vld [vmem:[%s12668_s3 + $0x1d4] sm:$0xf0]  ;;  %v6422_v51 = vld [vmem:[%s12668_s3 + $0x140] sm:$0xf]  ;;  %v7644_v60 = vld [vmem:[%s12668_s3 + $0x144] sm:$0xf0] }
 0x351   : > { %v1932_v1 = vmax.f32 %v1809_v32, %v1812_v12  ;;  %3913 = vmatpush.bf16.msra.mxu2 %v6431_v47  ;;  %v1819_v32 = vmax.f32 %v12930_v58, %v12929_v53  ;;  %v2217_v12 = vunpack.c.l.b16 %v2146_v25  ;;  %v2085_v45 = vmax.f32 %v2013_v46, 0.0  ;;  %v12938_v58 = vld [vmem:[#allocation94_spill] sm:$0xff] }
 0x352   : > { %v2011_v11 = vadd.f32 %v9225_v19, %v1931_v59 }
 0x353   : > { %v2012_v20 = vadd.f32 %v9246_v37, %v1932_v1  ;;  %v6495_v1 = vor.u32 %v7662_v50, %v6494_v6  ;;  %v1936_v29 = vmax.f32 %v1819_v32, %v1822_v22  ;;  %v2019_v32 = vadd.f32 %v9220_v55, %v12938_v58  ;;  %v12941_v50 = vld [vmem:[#allocation145_spill] sm:$0xff] }
 0x354   : > { %v2083_v16 = vmax.f32 %v2011_v11, 0.0 }
 0x355   : > { %v2084_v61 = vmax.f32 %v2012_v20, 0.0  ;;  %v1596_v2 = vpop.f32.mrf.mxu0  ;;  %3962 = vmatpush.bf16.msra.mxu3 %v6495_v1  ;;  %v2016_v22 = vadd.f32 %v9220_v55, %v1936_v29 }
 0x356   : > { %v2147_v40 = vpack.c.bf16 %v2083_v16, %v2082_v39  ;;  %v1817_v28 = vmax.f32 %v12925_v13, %v1596_v2  ;;  %v1725_v48 = vpop.f32.mrf.mxu1  ;;  %v12931_v39 = vld [vmem:[#allocation88_spill] sm:$0xff]  ;;  %v12932_v16 = vld [vmem:[#allocation23_spill] sm:$0xff]  ;;  %v12934_v2 = vld [vmem:[#allocation77_spill] sm:$0xff]  ;;  %v9546_v13 = vpop.f32.mrf.mxu2 }
 0x357   : > { %v2148_v31 = vpack.c.bf16 %v2084_v61, %v2084_v61  ;;  %v1818_v5 = vmax.f32 %v12928_v27, %v1725_v48  ;;  %v1820_v38 = vmax.f32 %v12932_v16, %v12931_v39  ;;  %v1821_v46 = vmax.f32 %v12934_v2, %v9252_v21  ;;  %v12945_v2 = vld [vmem:[#allocation26_spill] sm:$0xff] }
 0x358   : > { %v2218_v56 = vunpack.c.l.b16 %v2147_v40  ;;  %v2219_v41 = vunpack.c.h.b16 %v2147_v40  ;;  %v1934_v42 = vmax.f32 %v1814_v4, %v1817_v28  ;;  %4115 = vmatmul.bf16.vlgmr.msra.gmra.mxu0 %v9421_v10  ;;  %v12933_v4 = vld [vmem:[#allocation143_spill] sm:$0xff]  ;;  %v6423_v21 = vor.u32 %v7644_v60, %v6422_v51 }
 0x359   : > { %v2220_v18 = vunpack.c.l.b16 %v2148_v31  ;;  %v1935_v24 = vmax.f32 %v1815_v52, %v1818_v5  ;;  %4164 = vmatmul.bf16.vlgmr.msra.gmra.mxu1 %v9423_v36  ;;  %v2088_v31 = vmax.f32 %v2016_v22, 0.0  ;;  %v12936_v5 = vld [vmem:[#allocation90_spill] sm:$0xff] }
 0x35a   : > { %v9529_v57 = vpack.c.b16 %v2218_v56, %v2215_v44  ;;  %v9531_v59 = vpack.c.b16 %v2219_v41, %v2216_v26  ;;  %v2014_v35 = vadd.f32 %v9225_v19, %v1934_v42  ;;  %3914 = vmatpush.bf16.msra.mxu2 %v6423_v21  ;;  %v12937_v26 = vld [vmem:[#allocation25_spill] sm:$0xff]  ;;  %v2091_v21 = vmax.f32 %v2019_v32, 0.0  ;;  %v12953_v32 = vld [vmem:[#allocation148_spill] sm:$0xff] }
 0x35b   : > { %v9534_v62 = vpack.c.b16 %v2220_v18, %v2217_v12  ;;  %v2015_v47 = vadd.f32 %v9246_v37, %v1935_v24  ;;  %v1826_v56 = vmax.f32 %v12937_v26, %v12936_v5  ;;  %v12939_v12 = vld [vmem:[#allocation96_spill] sm:$0xff]  ;;  %v12947_v26 = vld [vmem:[#allocation93_spill] sm:$0xff] }
 0x35c   : > { %v2086_v11 = vmax.f32 %v2014_v35, 0.0  ;;  %3836 = vmatmul.bf16.gmra.mxu2 %v9529_v57  ;;  %3885 = vmatmul.bf16.gmra.mxu3 %v9531_v59  ;;  %v12940_v18 = vld [vmem:[#allocation28_spill] sm:$0xff] }
 0x35d   : > { %v1598_v20 = vpop.f32.mrf.mxu0  ;;  %v2087_v28 = vmax.f32 %v2015_v47, 0.0  ;;  %v1834_v24 = vmax.f32 %v12940_v18, %v12939_v12  ;;  %v12951_v18 = vld [vmem:[#allocation147_spill] sm:$0xff] }
 0x35e   : > { %v2149_v34 = vpack.c.bf16 %v2086_v11, %v2085_v45  ;;  %v1823_v25 = vmax.f32 %v12933_v4, %v1598_v20  ;;  %v1727_v61 = vpop.f32.mrf.mxu1  ;;  %v12942_v45 = vld [vmem:[#allocation81_spill] sm:$0xff]  ;;  %v12943_v20 = vld [vmem:[#allocation146_spill] sm:$0xff]  ;;  %v9581_v60 = vpop.f32.mrf.mxu2 }
 0x35f   : > { %v1824_v7 = vmax.f32 %v12935_v33, %v1727_v61  ;;  %v2150_v41 = vpack.c.bf16 %v2087_v28, %v2087_v28  ;;  %v1827_v29 = vmax.f32 %v12942_v45, %v9309_v0  ;;  %v12944_v61 = vld [vmem:[#allocation92_spill] sm:$0xff]  ;;  %v6486_v0 = vld [vmem:[%s12668_s3 + $0x1c0] sm:$0xf] }
 0x360   : > { %v1937_v40 = vmax.f32 %v1820_v38, %v1823_v25  ;;  %v2313_v11 = vunpack.c.l.b16 %v2149_v34  ;;  %v2314_v16 = vunpack.c.h.b16 %v2149_v34  ;;  %v7660_v34 = vld [vmem:[%s12668_s3 + $0x1c4] sm:$0xf0] }
 0x361   : > { %v1938_v48 = vmax.f32 %v1821_v46, %v1824_v7  ;;  %v1831_v46 = vmax.f32 %v12945_v2, %v12944_v61  ;;  %v2315_v33 = vunpack.c.l.b16 %v2150_v41  ;;  %v6487_v51 = vor.u32 %v7660_v34, %v6486_v0 }
 0x362   : > { %v2017_v52 = vadd.f32 %v9225_v19, %v1937_v40 }
 0x363   : > { %v2018_v44 = vadd.f32 %v9246_v37, %v1938_v48  ;;  %3963 = vmatpush.bf16.msra.mxu3 %v6487_v51 }
 0x364   : > { %v2089_v27 = vmax.f32 %v2017_v52, 0.0 }
 0x365   : > { %v2090_v42 = vmax.f32 %v2018_v44, 0.0  ;;  %v1601_v53 = vpop.f32.mrf.mxu0  ;;  %v1942_v44 = vmax.f32 %v1831_v46, %v1834_v24 }
 0x366   : > { %v2151_v6 = vpack.c.bf16 %v2089_v27, %v2088_v31  ;;  %v1829_v35 = vmax.f32 %v12941_v50, %v1601_v53  ;;  %v1730_v1 = vpop.f32.mrf.mxu1  ;;  %v12950_v53 = vld [vmem:[#allocation31_spill] sm:$0xff]  ;;  %v9607_v34 = vpop.f32.mrf.mxu2 }
 0x367   : > { %v2152_v47 = vpack.c.bf16 %v2090_v42, %v2090_v42  ;;  %v1830_v39 = vmax.f32 %v12943_v20, %v1730_v1  ;;  %v12949_v42 = vld [vmem:[#allocation100_spill] sm:$0xff]  ;;  %v2022_v45 = vadd.f32 %v9220_v55, %v1942_v44 }
 0x368   : > { %v2316_v38 = vunpack.c.l.b16 %v2151_v6  ;;  %v2317_v4 = vunpack.c.h.b16 %v2151_v6  ;;  %v1940_v25 = vmax.f32 %v1826_v56, %v1829_v35  ;;  %4120 = vmatmul.bf16.gmra.mxu0 %v9471_v63  ;;  %v12948_v56 = vld [vmem:[#allocation27_spill] sm:$0xff]  ;;  %v1840_v58 = vmax.f32 %v12950_v53, %v12949_v42 }
 0x369   : > { %v2318_v7 = vunpack.c.l.b16 %v2152_v47  ;;  %v1941_v22 = vmax.f32 %v1827_v29, %v1830_v39  ;;  %4169 = vmatmul.bf16.gmra.mxu1 %v9473_v3  ;;  %v1832_v41 = vmax.f32 %v12948_v56, %v12947_v26  ;;  %v12952_v35 = vld [vmem:[#allocation87_spill] sm:$0xff]  ;;  %v12954_v29 = vld [vmem:[#allocation97_spill] sm:$0xff]  ;;  %v2094_v46 = vmax.f32 %v2022_v45, 0.0 }
 0x36a   : > { %v9576_v40 = vpack.c.b16 %v2316_v38, %v2313_v11  ;;  %v9578_v28 = vpack.c.b16 %v2317_v4, %v2314_v16  ;;  %v2020_v48 = vadd.f32 %v9225_v19, %v1940_v25  ;;  %v1833_v1 = vmax.f32 %v12952_v35, %v9366_v17  ;;  %v12955_v11 = vld [vmem:[#allocation29_spill] sm:$0xff]  ;;  %v6414_v38 = vld [vmem:[%s12668_s3 + $0x130] sm:$0xf]  ;;  %v12961_v53 = vld [vmem:[#allocation91_spill] sm:$0xff] }
 0x36b   : > { %v9583_v52 = vpack.c.b16 %v2318_v7, %v2315_v33  ;;  %v2021_v27 = vadd.f32 %v9246_v37, %v1941_v22  ;;  %v1837_v47 = vmax.f32 %v12955_v11, %v12954_v29  ;;  %v7642_v4 = vld [vmem:[%s12668_s3 + $0x134] sm:$0xf0]  ;;  %v12956_v7 = vld [vmem:[#allocation98_spill] sm:$0xff] }
 0x36c   : > { %12946 = vst [vmem:[#allocation9_spill] sm:$0xff] %v9578_v28  ;;  %v2092_v31 = vmax.f32 %v2020_v48, 0.0  ;;  %v6415_v61 = vor.u32 %v7642_v4, %v6414_v38  ;;  %v12957_v22 = vld [vmem:[#allocation30_spill] sm:$0xff]  ;;  %v12960_v56 = vld [vmem:[#allocation149_spill] sm:$0xff] }
 0x36d   : > { %v1603_v5 = vpop.f32.mrf.mxu0  ;;  %v2093_v39 = vmax.f32 %v2021_v27, 0.0  ;;  %v1945_v25 = vmax.f32 %v1837_v47, %v1840_v58  ;;  %v1838_v0 = vmax.f32 %v12957_v22, %v12956_v7  ;;  %v12959_v27 = vld [vmem:[#allocation34_spill] sm:$0xff]  ;;  %v1839_v58 = vmax.f32 %v12961_v53, %v9416_v54  ;;  %v12973_v53 = vld [vmem:[#allocation95_spill] sm:$0xff] }
 0x36e   : > { %v2153_v12 = vpack.c.bf16 %v2092_v31, %v2091_v21  ;;  %v1835_v6 = vmax.f32 %v12951_v18, %v1603_v5  ;;  %v1732_v50 = vpop.f32.mrf.mxu1  ;;  %3915 = vmatpush.bf16.msra.mxu2 %v6415_v61  ;;  %v12958_v31 = vld [vmem:[#allocation103_spill] sm:$0xff] }
 0x36f   : > { %v1836_v24 = vmax.f32 %v12953_v32, %v1732_v50  ;;  %v2154_v48 = vpack.c.bf16 %v2093_v39, %v2093_v39  ;;  %v2025_v44 = vadd.f32 %v9220_v55, %v1945_v25  ;;  %v1846_v5 = vmax.f32 %v12959_v27, %v12958_v31  ;;  %v12962_v50 = vld [vmem:[#allocation150_spill] sm:$0xff]  ;;  %v12964_v39 = vld [vmem:[#allocation32_spill] sm:$0xff]  ;;  %v7658_v25 = vld [vmem:[%s12668_s3 + $0x1b4] sm:$0xf0] }
 0x370   : > { %v1943_v20 = vmax.f32 %v1832_v41, %v1835_v6  ;;  %v2345_v18 = vunpack.c.l.b16 %v2153_v12  ;;  %v12971_v31 = vld [vmem:[#allocation37_spill] sm:$0xff] }
 0x371   : > { %v1944_v16 = vmax.f32 %v1833_v1, %v1836_v24  ;;  %v2346_v1 = vunpack.c.h.b16 %v2153_v12  ;;  %v2347_v29 = vunpack.c.l.b16 %v2154_v48  ;;  %v6478_v12 = vld [vmem:[%s12668_s3 + $0x1b0] sm:$0xf]  ;;  %v2097_v61 = vmax.f32 %v2025_v44, 0.0  ;;  %v12969_v48 = vld [vmem:[#allocation33_spill] sm:$0xff] }
 0x372   : > { %v2023_v17 = vadd.f32 %v9225_v19, %v1943_v20  ;;  %v12963_v20 = vld [vmem:[#allocation101_spill] sm:$0xff]  ;;  %v1845_v44 = vmax.f32 %v12973_v53, %v9455_v49  ;;  %v7640_v49 = vld [vmem:[%s12668_s3 + $0x124] sm:$0xf0] }
 0x373   : > { %v2024_v2 = vadd.f32 %v9246_v37, %v1944_v16  ;;  %v1843_v16 = vmax.f32 %v12964_v39, %v12963_v20 }
 0x374   : > { %v2095_v33 = vmax.f32 %v2023_v17, 0.0 }
 0x375   : > { %v2096_v51 = vmax.f32 %v2024_v2, 0.0  ;;  %v1606_v21 = vpop.f32.mrf.mxu0  ;;  %v1948_v2 = vmax.f32 %v1843_v16, %v1846_v5  ;;  %v9641_v5 = vpop.f32.mrf.mxu2 }
 0x376   : > { %v2155_v26 = vpack.c.bf16 %v2095_v33, %v2094_v46  ;;  %v1841_v41 = vmax.f32 %v12960_v56, %v1606_v21  ;;  %v1735_v42 = vpop.f32.mrf.mxu1  ;;  %v6479_v33 = vor.u32 %v7658_v25, %v6478_v12  ;;  %v12970_v21 = vld [vmem:[#allocation107_spill] sm:$0xff]  ;;  %v12977_v12 = vld [vmem:[#allocation106_spill] sm:$0xff]  ;;  %v12978_v25 = vld [vmem:[#allocation36_spill] sm:$0xff] }
 0x377   : > { %v2156_v6 = vpack.c.bf16 %v2096_v51, %v2096_v51  ;;  %v1842_v35 = vmax.f32 %v12962_v50, %v1735_v42  ;;  %v1852_v27 = vmax.f32 %v12971_v31, %v12970_v21  ;;  %v12972_v56 = vld [vmem:[#allocation151_spill] sm:$0xff]  ;;  %v12975_v50 = vld [vmem:[#allocation105_spill] sm:$0xff] }
 0x378   : > { %v1946_v32 = vmax.f32 %v1838_v0, %v1841_v41  ;;  %4125 = vmatmul.bf16.gmra.mxu0 %v9529_v57  ;;  %v2349_v24 = vunpack.c.h.b16 %v2155_v26  ;;  %v2348_v45 = vunpack.c.l.b16 %v2155_v26  ;;  %v12968_v0 = vld [vmem:[#allocation102_spill] sm:$0xff]  ;;  %3964 = vmatpush.bf16.msra.mxu3 %v6479_v33  ;;  %v12981_v21 = vld [vmem:[#allocation153_spill] sm:$0xff] }
 0x379   : > { %v2350_v11 = vunpack.c.l.b16 %v2156_v6  ;;  %v1947_v47 = vmax.f32 %v1839_v58, %v1842_v35  ;;  %4174 = vmatmul.bf16.gmra.mxu1 %v9531_v59  ;;  %v1844_v51 = vmax.f32 %v12969_v48, %v12968_v0  ;;  %v12974_v58 = vld [vmem:[#allocation152_spill] sm:$0xff]  ;;  %v2028_v6 = vadd.f32 %v9220_v55, %v1948_v2  ;;  %v12976_v35 = vld [vmem:[#allocation35_spill] sm:$0xff] }
 0x37a   : > { %v2026_v54 = vadd.f32 %v9225_v19, %v1946_v32  ;;  %v9621_v38 = vpack.c.b16 %v2349_v24, %v2346_v1  ;;  %v9623_v4 = vpack.c.b16 %v2348_v45, %v2345_v18  ;;  %v1849_v1 = vmax.f32 %v12976_v35, %v12975_v50  ;;  %v12980_v0 = vld [vmem:[#allocation40_spill] sm:$0xff] }
 0x37b   : > { %v9631_v17 = vpack.c.b16 %v2350_v11, %v2347_v29  ;;  %v2027_v7 = vadd.f32 %v9246_v37, %v1947_v47  ;;  %v6406_v29 = vld [vmem:[%s12668_s3 + $0x120] sm:$0xf]  ;;  %v2100_v16 = vmax.f32 %v2028_v6, 0.0 }
 0x37c   : > { %12965 = vst [vmem:[#allocation61_spill] sm:$0xff] %v9621_v38  ;;  %v2098_v46 = vmax.f32 %v2026_v54, 0.0  ;;  %v1951_v11 = vmax.f32 %v1849_v1, %v1852_v27  ;;  %v6407_v20 = vor.u32 %v7640_v49, %v6406_v29  ;;  %v12984_v29 = vld [vmem:[#allocation108_spill] sm:$0xff]  ;;  %v12985_v49 = vld [vmem:[#allocation38_spill] sm:$0xff] }
 0x37d   : > { %12966 = vst [vmem:[#allocation67_spill] sm:$0xff] %v9623_v4  ;;  %v1608_v22 = vpop.f32.mrf.mxu0  ;;  %v2099_v24 = vmax.f32 %v2027_v7, 0.0  ;;  %v9665_v1 = vpop.f32.mrf.mxu2 }
 0x37e   : > { %12967 = vst [vmem:[#allocation7_spill] sm:$0xff] %v9631_v17  ;;  %v2157_v26 = vpack.c.bf16 %v2098_v46, %v2097_v61  ;;  %v1847_v41 = vmax.f32 %v12972_v56, %v1608_v22  ;;  %v1737_v42 = vpop.f32.mrf.mxu1  ;;  %3916 = vmatpush.bf16.msra.mxu2 %v6407_v20  ;;  %v1850_v61 = vmax.f32 %v12978_v25, %v12977_v12  ;;  %v12979_v22 = vld [vmem:[#allocation111_spill] sm:$0xff]  ;;  %v6470_v20 = vld [vmem:[%s12668_s3 + $0x1a0] sm:$0xf] }
 0x37f   : > { %v1848_v18 = vmax.f32 %v12974_v58, %v1737_v42  ;;  %v2158_v2 = vpack.c.bf16 %v2099_v24, %v2099_v24  ;;  %v2031_v7 = vadd.f32 %v9220_v55, %v1951_v11  ;;  %v1858_v48 = vmax.f32 %v12980_v0, %v12979_v22  ;;  %v12982_v56 = vld [vmem:[#allocation99_spill] sm:$0xff] }
 0x380   : > { %v1949_v32 = vmax.f32 %v1844_v51, %v1847_v41  ;;  %v1851_v41 = vmax.f32 %v12982_v56, %v9486_v23  ;;  %v2261_v42 = vunpack.c.l.b16 %v2157_v26  ;;  %v1855_v23 = vmax.f32 %v12985_v49, %v12984_v29  ;;  %v12988_v22 = vld [vmem:[#allocation39_spill] sm:$0xff]  ;;  %v7638_v29 = vld [vmem:[%s12668_s3 + $0x114] sm:$0xf0] }
 0x381   : > { %v1950_v45 = vmax.f32 %v1845_v44, %v1848_v18  ;;  %v12983_v44 = vld [vmem:[#allocation154_spill] sm:$0xff]  ;;  %v2262_v18 = vunpack.c.h.b16 %v2157_v26  ;;  %v12991_v56 = vld [vmem:[#allocation155_spill] sm:$0xff] }
 0x382   : > { %v2029_v47 = vadd.f32 %v9225_v19, %v1949_v32  ;;  %v2263_v32 = vunpack.c.l.b16 %v2158_v2  ;;  %v1954_v12 = vmax.f32 %v1855_v23, %v1858_v48  ;;  %v12992_v48 = vld [vmem:[#allocation104_spill] sm:$0xff] }
 0x383   : > { %v2030_v39 = vadd.f32 %v9246_v37, %v1950_v45 }
 0x384   : > { %v2101_v54 = vmax.f32 %v2029_v47, 0.0 }
 0x385   : > { %v2102_v46 = vmax.f32 %v2030_v39, 0.0  ;;  %v1611_v33 = vpop.f32.mrf.mxu0  ;;  %v7656_v39 = vld [vmem:[%s12668_s3 + $0x1a4] sm:$0xf0] }
 0x386   : > { %v2159_v51 = vpack.c.bf16 %v2101_v54, %v2100_v16  ;;  %v1853_v31 = vmax.f32 %v12981_v21, %v1611_v33  ;;  %v1740_v27 = vpop.f32.mrf.mxu1  ;;  %v2103_v54 = vmax.f32 %v2031_v7, 0.0  ;;  %v12987_v33 = vld [vmem:[#allocation109_spill] sm:$0xff]  ;;  %v12990_v21 = vld [vmem:[#allocation43_spill] sm:$0xff] }
 0x387   : > { %v2160_v53 = vpack.c.bf16 %v2102_v46, %v2102_v46  ;;  %v1854_v58 = vmax.f32 %v12983_v44, %v1740_v27  ;;  %v1856_v0 = vmax.f32 %v12988_v22, %v12987_v33 }
 0x388   : > { %v1952_v6 = vmax.f32 %v1850_v61, %v1853_v31  ;;  %4130 = vmatmul.bf16.gmra.mxu0 %v9576_v40  ;;  %v2264_v50 = vunpack.c.l.b16 %v2159_v51  ;;  %v2265_v35 = vunpack.c.h.b16 %v2159_v51  ;;  %v6471_v61 = vor.u32 %v7656_v39, %v6470_v20  ;;  %v12989_v51 = vld [vmem:[#allocation115_spill] sm:$0xff] }
 0x389   : > { %v2266_v24 = vunpack.c.l.b16 %v2160_v53  ;;  %v1953_v45 = vmax.f32 %v1851_v41, %v1854_v58  ;;  %4179 = vmatmul.bf16.gmra.mxu1 %v9578_v28  ;;  %v1864_v31 = vmax.f32 %v12990_v21, %v12989_v51  ;;  %v12993_v53 = vld [vmem:[#allocation156_spill] sm:$0xff]  ;;  %v2034_v58 = vadd.f32 %v9220_v55, %v1954_v12  ;;  %v12996_v12 = vld [vmem:[#allocation113_spill] sm:$0xff]  ;;  %v12999_v51 = vld [vmem:[#allocation46_spill] sm:$0xff] }
 0x38a   : > { %v2032_v11 = vadd.f32 %v9225_v19, %v1952_v6  ;;  %v9671_v47 = vpack.c.b16 %v2264_v50, %v2261_v42  ;;  %v9673_v26 = vpack.c.b16 %v2265_v35, %v2262_v18  ;;  %3965 = vmatpush.bf16.msra.mxu3 %v6471_v61  ;;  %v1857_v42 = vmax.f32 %v12992_v48, %v9516_v30  ;;  %v12994_v18 = vld [vmem:[#allocation112_spill] sm:$0xff]  ;;  %v12995_v6 = vld [vmem:[#allocation41_spill] sm:$0xff]  ;;  %v13001_v48 = vld [vmem:[#allocation110_spill] sm:$0xff] }
 0x38b   : > { %v9681_v16 = vpack.c.b16 %v2266_v24, %v2263_v32  ;;  %v2033_v2 = vadd.f32 %v9246_v37, %v1953_v45  ;;  %v1861_v50 = vmax.f32 %v12995_v6, %v12994_v18  ;;  %v6398_v45 = vld [vmem:[%s12668_s3 + $0x110] sm:$0xf]  ;;  %v2106_v39 = vmax.f32 %v2034_v58, 0.0  ;;  %v13002_v58 = vld [vmem:[#allocation158_spill] sm:$0xff] }
 0x38c   : > { %v2104_v25 = vmax.f32 %v2032_v11, 0.0  ;;  %3841 = vmatmul.bf16.gmra.mxu2 %v9671_v47  ;;  %3890 = vmatmul.bf16.gmra.mxu3 %v9673_v26  ;;  %v6399_v23 = vor.u32 %v7638_v29, %v6398_v45  ;;  %v9704_v11 = vpop.f32.mrf.mxu2  ;;  %v13004_v45 = vld [vmem:[#allocation49_spill] sm:$0xff] }
 0x38d   : > { %12986 = vst [vmem:[#allocation69_spill] sm:$0xff] %v9681_v16  ;;  %v1613_v46 = vpop.f32.mrf.mxu0  ;;  %v2105_v32 = vmax.f32 %v2033_v2, 0.0  ;;  %v1957_v49 = vmax.f32 %v1861_v50, %v1864_v31 }
 0x38e   : > { %v2161_v27 = vpack.c.bf16 %v2104_v25, %v2103_v54  ;;  %v1859_v41 = vmax.f32 %v12991_v56, %v1613_v46  ;;  %v1742_v7 = vpop.f32.mrf.mxu1  ;;  %3917 = vmatpush.bf16.msra.mxu2 %v6399_v23  ;;  %v12997_v25 = vld [vmem:[#allocation42_spill] sm:$0xff]  ;;  %v13000_v56 = vld [vmem:[#allocation157_spill] sm:$0xff] }
 0x38f   : > { %v1860_v44 = vmax.f32 %v12993_v53, %v1742_v7  ;;  %v1862_v61 = vmax.f32 %v12997_v25, %v12996_v12  ;;  %v2162_v2 = vpack.c.bf16 %v2105_v32, %v2105_v32  ;;  %v2037_v22 = vadd.f32 %v9220_v55, %v1957_v49 }
 0x390   : > { %v1955_v35 = vmax.f32 %v1856_v0, %v1859_v41  ;;  %v12998_v0 = vld [vmem:[#allocation119_spill] sm:$0xff]  ;;  %v2267_v53 = vunpack.c.l.b16 %v2161_v27  ;;  %v2268_v6 = vunpack.c.h.b16 %v2161_v27 }
 0x391   : > { %v1956_v24 = vmax.f32 %v1857_v42, %v1860_v44  ;;  %v1870_v21 = vmax.f32 %v12999_v51, %v12998_v0  ;;  %v1863_v42 = vmax.f32 %v13001_v48, %v9546_v13  ;;  %v2269_v49 = vunpack.c.l.b16 %v2162_v2  ;;  %v13009_v27 = vld [vmem:[#allocation47_spill] sm:$0xff]  ;;  %v7654_v2 = vld [vmem:[%s12668_s3 + $0x194] sm:$0xf0]  ;;  %v6958_v51 = vld [vmem:[%s12668_s3 + $0x570] sm:$0xf] }
 0x392   : > { %v2035_v30 = vadd.f32 %v9225_v19, %v1955_v35  ;;  %v7778_v48 = vld [vmem:[%s12668_s3 + $0x574] sm:$0xf0] }
 0x393   : > { %v2036_v20 = vadd.f32 %v9246_v37, %v1956_v24  ;;  %v13003_v24 = vld [vmem:[#allocation122_spill] sm:$0xff] }
 0x394   : > { %v2107_v54 = vmax.f32 %v2035_v30, 0.0  ;;  %v1876_v29 = vmax.f32 %v13004_v45, %v13003_v24  ;;  %v13012_v24 = vld [vmem:[#allocation159_spill] sm:$0xff] }
 0x395   : > { %v2108_v46 = vmax.f32 %v2036_v20, 0.0  ;;  %v1616_v33 = vpop.f32.mrf.mxu0  ;;  %v13005_v20 = vld [vmem:[#allocation116_spill] sm:$0xff] }
 0x396   : > { %v2163_v31 = vpack.c.bf16 %v2107_v54, %v2106_v39  ;;  %v1865_v41 = vmax.f32 %v13000_v56, %v1616_v33  ;;  %v1745_v7 = vpop.f32.mrf.mxu1  ;;  %v13006_v39 = vld [vmem:[#allocation44_spill] sm:$0xff] }
 0x397   : > { %v2164_v44 = vpack.c.bf16 %v2108_v46, %v2108_v46  ;;  %v1866_v18 = vmax.f32 %v13002_v58, %v1745_v7  ;;  %v1867_v54 = vmax.f32 %v13006_v39, %v13005_v20  ;;  %v13008_v46 = vld [vmem:[#allocation120_spill] sm:$0xff]  ;;  %v6959_v58 = vor.u32 %v7778_v48, %v6958_v51 }
 0x398   : > { %v2270_v50 = vunpack.c.l.b16 %v2163_v31  ;;  %v2271_v35 = vunpack.c.h.b16 %v2163_v31  ;;  %v1958_v32 = vmax.f32 %v1862_v61, %v1865_v41  ;;  %v1873_v33 = vmax.f32 %v13009_v27, %v13008_v46  ;;  %v6462_v61 = vld [vmem:[%s12668_s3 + $0x190] sm:$0xf]  ;;  %v7014_v46 = vld [vmem:[%s12668_s3 + $0x5e0] sm:$0xf] }
 0x399   : > { %v2272_v30 = vunpack.c.l.b16 %v2164_v44  ;;  %v1959_v23 = vmax.f32 %v1863_v42, %v1866_v18  ;;  %v2109_v31 = vmax.f32 %v2037_v22, 0.0  ;;  %v1960_v56 = vmax.f32 %v1867_v54, %v1870_v21  ;;  %v7022_v42 = vld [vmem:[%s12668_s3 + $0x5f0] sm:$0xf]  ;;  %v9746_v44 = vpop.f32.mrf.mxu2  ;;  %v7794_v18 = vld [vmem:[%s12668_s3 + $0x5f4] sm:$0xf0]  ;;  %4303 = vmatpush.bf16.msrb.mxu0 %v6959_v58 }
 0x39a   : > { %v9720_v12 = vpack.c.b16 %v2270_v50, %v2267_v53  ;;  %v9722_v13 = vpack.c.b16 %v2271_v35, %v2268_v6  ;;  %v2038_v25 = vadd.f32 %v9225_v19, %v1958_v32  ;;  %v6463_v7 = vor.u32 %v7654_v2, %v6462_v61  ;;  %v13010_v6 = vld [vmem:[#allocation117_spill] sm:$0xff]  ;;  %v13014_v20 = vld [vmem:[#allocation160_spill] sm:$0xff]  ;;  %v6950_v54 = vld [vmem:[%s12668_s3 + $0x560] sm:$0xf] }
 0x39b   : > { %v9727_v0 = vpack.c.b16 %v2272_v30, %v2269_v49  ;;  %v1963_v53 = vmax.f32 %v1873_v33, %v1876_v29  ;;  %v2039_v22 = vadd.f32 %v9246_v37, %v1959_v23  ;;  %v13011_v50 = vld [vmem:[#allocation45_spill] sm:$0xff]  ;;  %v7023_v49 = vor.u32 %v7794_v18, %v7022_v42  ;;  %v13013_v30 = vld [vmem:[#allocation114_spill] sm:$0xff]  ;;  %v7792_v61 = vld [vmem:[%s12668_s3 + $0x5e4] sm:$0xf0] }
 0x39c   : > { %13007 = vst [vmem:[#allocation8_spill] sm:$0xff] %v9720_v12  ;;  %v2110_v41 = vmax.f32 %v2038_v25, 0.0  ;;  %3846 = vmatmul.bf16.gmra.mxu2 %v9720_v12  ;;  %3895 = vmatmul.bf16.gmra.mxu3 %v9722_v13  ;;  %v1868_v35 = vmax.f32 %v13011_v50, %v13010_v6  ;;  %v1869_v23 = vmax.f32 %v13013_v30, %v9581_v60  ;;  %v7776_v25 = vld [vmem:[%s12668_s3 + $0x564] sm:$0xf0]  ;;  %v13016_v58 = vld [vmem:[#allocation48_spill] sm:$0xff] }
 0x39d   : > { %4135 = vmatmul.bf16.gmra.mxu0 %v9720_v12  ;;  %4184 = vmatmul.bf16.gmra.mxu1 %v9722_v13  ;;  %v1618_v21 = vpop.f32.mrf.mxu0  ;;  %v2040_v27 = vadd.f32 %v9220_v55, %v1960_v56  ;;  %v6951_v60 = vor.u32 %v7776_v25, %v6950_v54  ;;  %v9776_v2 = vadd.f32 %v9220_v55, %v1963_v53  ;;  %v2111_v51 = vmax.f32 %v2039_v22, 0.0  ;;  %v7636_v56 = vld [vmem:[%s12668_s3 + $0x104] sm:$0xf0]  ;;  %v6942_v22 = vld [vmem:[%s12668_s3 + $0x550] sm:$0xf] }
 0x39e   : > { %v9756_v32 = vpack.c.bf16 %v2110_v41, %v2109_v31  ;;  %v1871_v45 = vmax.f32 %v13012_v24, %v1618_v21  ;;  %v1747_v29 = vpop.f32.mrf.mxu1  ;;  %3966 = vmatpush.bf16.msra.mxu3 %v6463_v7  ;;  %4352 = vmatpush.bf16.msrb.mxu1 %v7023_v49  ;;  %v6390_v41 = vld [vmem:[%s12668_s3 + $0x100] sm:$0xf]  ;;  %v7015_v7 = vor.u32 %v7792_v61, %v7014_v46  ;;  %v13015_v21 = vld [vmem:[#allocation121_spill] sm:$0xff]  ;;  %v7006_v50 = vld [vmem:[%s12668_s3 + $0x5d0] sm:$0xf] }
 0x39f   : > { %v1872_v39 = vmax.f32 %v13014_v20, %v1747_v29  ;;  %v6391_v42 = vor.u32 %v7636_v56, %v6390_v41  ;;  %v1874_v18 = vmax.f32 %v13016_v58, %v13015_v21  ;;  %4304 = vmatpush.bf16.msrb.mxu0 %v6951_v60  ;;  %v7774_v6 = vld [vmem:[%s12668_s3 + $0x554] sm:$0xf0]  ;;  %v13017_v24 = vld [vmem:[#allocation124_spill] sm:$0xff]  ;;  %v2115_v20 = vmax.f32 %v9776_v2, 0.0  ;;  %v13021_v61 = vld [vmem:[#allocation118_spill] sm:$0xff] }
 0x3a0   : > { %v1961_v33 = vmax.f32 %v1868_v35, %v1871_v45  ;;  %v2112_v35 = vmax.f32 %v2040_v27, 0.0  ;;  %v13018_v45 = vld [vmem:[#allocation50_spill] sm:$0xff]  ;;  %v6943_v30 = vor.u32 %v7774_v6, %v6942_v22  ;;  %v13020_v60 = vld [vmem:[#allocation52_spill] sm:$0xff]  ;;  %v13022_v56 = vld [vmem:[#allocation161_spill] sm:$0xff]  ;;  %v2273_v2 = vunpack.c.l.b16 %v9756_v32 }
 0x3a1   : > { %v1962_v31 = vmax.f32 %v1869_v23, %v1872_v39  ;;  %v1879_v29 = vmax.f32 %v13018_v45, %v13017_v24  ;;  %3918 = vmatpush.bf16.msra.mxu2 %v6391_v42  ;;  %v7790_v23 = vld [vmem:[%s12668_s3 + $0x5d4] sm:$0xf0]  ;;  %v2166_v39 = vpack.c.bf16 %v2111_v51, %v2111_v51  ;;  %v9808_v42 = vpop.f32.mrf.mxu3  ;;  %v9810_v21 = vpop.f32.mrf.mxu2  ;;  %v2274_v51 = vunpack.c.h.b16 %v9756_v32  ;;  %v6454_v6 = vld [vmem:[%s12668_s3 + $0x180] sm:$0xf] }
 0x3a2   : > { %v2041_v48 = vadd.f32 %v9225_v19, %v1961_v33  ;;  %4353 = vmatpush.bf16.msrb.mxu1 %v7015_v7  ;;  %v7007_v46 = vor.u32 %v7790_v23, %v7006_v50  ;;  %v13019_v33 = vld [vmem:[#allocation126_spill] sm:$0xff] }
 0x3a3   : > { %v2042_v53 = vadd.f32 %v9246_v37, %v1962_v31  ;;  %v1882_v27 = vmax.f32 %v13020_v60, %v13019_v33  ;;  %v1875_v31 = vmax.f32 %v13021_v61, %v9607_v34  ;;  %v7652_v34 = vld [vmem:[%s12668_s3 + $0x184] sm:$0xf0]  ;;  %4305 = vmatpush.bf16.msrb.mxu0 %v6943_v30  ;;  %v6934_v50 = vld [vmem:[%s12668_s3 + $0x540] sm:$0xf] }
 0x3a4   : > { %v2113_v49 = vmax.f32 %v2041_v48, 0.0  ;;  %v6455_v32 = vor.u32 %v7652_v34, %v6454_v6  ;;  %v6998_v23 = vld [vmem:[%s12668_s3 + $0x5c0] sm:$0xf]  ;;  %v7788_v30 = vld [vmem:[%s12668_s3 + $0x5c4] sm:$0xf0]  ;;  %v13027_v34 = vld [vmem:[#allocation125_spill] sm:$0xff] }
 0x3a5   : > { %v2114_v54 = vmax.f32 %v2042_v53, 0.0  ;;  %v1621_v25 = vpop.f32.mrf.mxu0  ;;  %v13023_v53 = vld [vmem:[#allocation162_spill] sm:$0xff]  ;;  %v7786_v6 = vld [vmem:[%s12668_s3 + $0x5b4] sm:$0xf0] }
 0x3a6   : > { %v2167_v41 = vpack.c.bf16 %v2113_v49, %v2112_v35  ;;  %v1877_v7 = vmax.f32 %v13022_v56, %v1621_v25  ;;  %v1750_v48 = vpop.f32.mrf.mxu1  ;;  %4354 = vmatpush.bf16.msrb.mxu1 %v7007_v46  ;;  %v7772_v49 = vld [vmem:[%s12668_s3 + $0x544] sm:$0xf0]  ;;  %3967 = vmatpush.bf16.msra.mxu3 %v6455_v32 }
 0x3a7   : > { %v2168_v58 = vpack.c.bf16 %v2114_v54, %v2114_v54  ;;  %v1878_v22 = vmax.f32 %v13023_v53, %v1750_v48  ;;  %v2275_v54 = vunpack.c.l.b16 %v2166_v39  ;;  %v6935_v60 = vor.u32 %v7772_v49, %v6934_v50  ;;  %v7770_v39 = vld [vmem:[%s12668_s3 + $0x534] sm:$0xf0]  ;;  %v13028_v50 = vld [vmem:[#allocation51_spill] sm:$0xff] }
 0x3a8   : > { %v2276_v35 = vunpack.c.l.b16 %v2167_v41  ;;  %v2277_v24 = vunpack.c.h.b16 %v2167_v41  ;;  %v1964_v45 = vmax.f32 %v1874_v18, %v1877_v7  ;;  %v6999_v41 = vor.u32 %v7788_v30, %v6998_v23  ;;  %v6926_v7 = vld [vmem:[%s12668_s3 + $0x530] sm:$0xf]  ;;  %v13031_v23 = vld [vmem:[#allocation163_spill] sm:$0xff] }
 0x3a9   : > { %v2278_v25 = vunpack.c.l.b16 %v2168_v58  ;;  %v1965_v33 = vmax.f32 %v1875_v31, %v1878_v22  ;;  %4306 = vmatpush.bf16.msrb.mxu0 %v6935_v60  ;;  %v6990_v31 = vld [vmem:[%s12668_s3 + $0x5b0] sm:$0xf]  ;;  %v1966_v48 = vmax.f32 %v1879_v29, %v1882_v27  ;;  %v6927_v22 = vor.u32 %v7770_v39, %v6926_v7  ;;  %v13029_v27 = vld [vmem:[#allocation127_spill] sm:$0xff] }
 0x3aa   : > { %v9833_v61 = vpack.c.b16 %v2276_v35, %v2273_v2  ;;  %v9835_v18 = vpack.c.b16 %v2277_v24, %v2274_v51  ;;  %v2044_v46 = vadd.f32 %v9225_v19, %v1964_v45  ;;  %v13025_v2 = vld [vmem:[#allocation130_spill] sm:$0xff]  ;;  %v13026_v51 = vld [vmem:[#allocation55_spill] sm:$0xff]  ;;  %v1880_v35 = vmax.f32 %v13028_v50, %v13027_v34  ;;  %v13030_v45 = vld [vmem:[#allocation53_spill] sm:$0xff]  ;;  %4355 = vmatpush.bf16.msrb.mxu1 %v6999_v41 }
 0x3ab   : > { %v9838_v56 = vpack.c.b16 %v2278_v25, %v2275_v54  ;;  %v1888_v58 = vmax.f32 %v13026_v51, %v13025_v2  ;;  %v2045_v24 = vadd.f32 %v9246_v37, %v1965_v33  ;;  %v1885_v32 = vmax.f32 %v13030_v45, %v13029_v27  ;;  %v13032_v60 = vld [vmem:[#allocation123_spill] sm:$0xff]  ;;  %v13033_v7 = vld [vmem:[#allocation164_spill] sm:$0xff]  ;;  %v6918_v41 = vld [vmem:[%s12668_s3 + $0x520] sm:$0xf] }
 0x3ac   : > { %v2116_v53 = vmax.f32 %v2044_v46, 0.0  ;;  %3851 = vmatmul.bf16.gmra.mxu2 %v9833_v61  ;;  %3900 = vmatmul.bf16.gmra.mxu3 %v9835_v18  ;;  %v6991_v25 = vor.u32 %v7786_v6, %v6990_v31  ;;  %v1881_v46 = vmax.f32 %v13032_v60, %v9641_v5  ;;  %v6574_v51 = vld [vmem:[%s12668_s3 + $0x270] sm:$0xf]  ;;  %v2046_v31 = vadd.f32 %v9220_v55, %v1966_v48  ;;  %v7768_v34 = vld [vmem:[%s12668_s3 + $0x524] sm:$0xf0] }
 0x3ad   : > { %13024 = vst [vmem:[#allocation74_spill] sm:$0xff] %v9838_v56  ;;  %4140 = vmatmul.bf16.gmra.mxu0 %v9833_v61  ;;  %4189 = vmatmul.bf16.gmra.mxu1 %v9835_v18  ;;  %v1623_v29 = vpop.f32.mrf.mxu0  ;;  %v1969_v5 = vmax.f32 %v1885_v32, %v1888_v58  ;;  %v6982_v50 = vld [vmem:[%s12668_s3 + $0x5a0] sm:$0xf]  ;;  %v6919_v48 = vor.u32 %v7768_v34, %v6918_v41  ;;  %v13034_v32 = vld [vmem:[#allocation128_spill] sm:$0xff] }
 0x3ae   : > { %v9863_v49 = vpack.c.bf16 %v2116_v53, %v2115_v20  ;;  %v1883_v30 = vmax.f32 %v13031_v23, %v1623_v29  ;;  %v1752_v54 = vpop.f32.mrf.mxu1  ;;  %v7682_v20 = vld [vmem:[%s12668_s3 + $0x274] sm:$0xf0]  ;;  %4307 = vmatpush.bf16.msrb.mxu0 %v6927_v22  ;;  %v7784_v22 = vld [vmem:[%s12668_s3 + $0x5a4] sm:$0xf0]  ;;  %v2117_v29 = vmax.f32 %v2045_v24, 0.0  ;;  %4356 = vmatpush.bf16.msrb.mxu1 %v6991_v25  ;;  %v13035_v23 = vld [vmem:[#allocation54_spill] sm:$0xff] }
 0x3af   : > { %v1884_v33 = vmax.f32 %v13033_v7, %v1752_v54  ;;  %v3822_v39 = vpop.f32.mrf.mxu2  ;;  %v3871_v2 = vpop.f32.mrf.mxu3  ;;  %v6575_v45 = vor.u32 %v7682_v20, %v6574_v51  ;;  %v6910_v60 = vld [vmem:[%s12668_s3 + $0x510] sm:$0xf]  ;;  %v7766_v24 = vld [vmem:[%s12668_s3 + $0x514] sm:$0xf0]  ;;  %v13036_v7 = vld [vmem:[#allocation131_spill] sm:$0xff]  ;;  %v2049_v41 = vadd.f32 %v9220_v55, %v1969_v5 }
 0x3b0   : > { %v1967_v53 = vmax.f32 %v1880_v35, %v1883_v30  ;;  %v9879_v6 = vadd.f32 %v3871_v2, %v3822_v39  ;;  %v6983_v35 = vor.u32 %v7784_v22, %v6982_v50  ;;  %v1886_v30 = vmax.f32 %v13035_v23, %v13034_v32  ;;  %v6974_v25 = vld [vmem:[%s12668_s3 + $0x590] sm:$0xf]  ;;  %v7782_v20 = vld [vmem:[%s12668_s3 + $0x594] sm:$0xf0]  ;;  %v13039_v34 = vld [vmem:[#allocation58_spill] sm:$0xff] }
 0x3b1   : > { %v1968_v27 = vmax.f32 %v1881_v46, %v1884_v33  ;;  %4009 = vmatpush.bf16.msrb.mxu2 %v6575_v45  ;;  %v2118_v46 = vmax.f32 %v2046_v31, 0.0  ;;  %v13037_v33 = vld [vmem:[#allocation56_spill] sm:$0xff]  ;;  %v6911_v51 = vor.u32 %v7766_v24, %v6910_v60  ;;  %v2170_v22 = vpack.c.bf16 %v2117_v29, %v2117_v29  ;;  %v13040_v32 = vld [vmem:[#allocation165_spill] sm:$0xff] }
 0x3b2   : > { %v2047_v58 = vadd.f32 %v9225_v19, %v1967_v53  ;;  %4308 = vmatpush.bf16.msrb.mxu0 %v6919_v48  ;;  %v1891_v39 = vmax.f32 %v13037_v33, %v13036_v7  ;;  %v13038_v53 = vld [vmem:[#allocation134_spill] sm:$0xff]  ;;  %v6638_v31 = vld [vmem:[%s12668_s3 + $0x2f0] sm:$0xf]  ;;  %v7698_v48 = vld [vmem:[%s12668_s3 + $0x2f4] sm:$0xf0]  ;;  %4357 = vmatpush.bf16.msrb.mxu1 %v6983_v35  ;;  %v6975_v5 = vor.u32 %v7782_v20, %v6974_v25  ;;  %v2280_v25 = vunpack.c.h.b16 %v9863_v49 }
 0x3b3   : > { %v2048_v54 = vadd.f32 %v9246_v37, %v1968_v27  ;;  %v1894_v50 = vmax.f32 %v13039_v34, %v13038_v53  ;;  %v6639_v24 = vor.u32 %v7698_v48, %v6638_v31  ;;  %v13041_v7 = vld [vmem:[#allocation129_spill] sm:$0xff]  ;;  %v13042_v53 = vld [vmem:[#allocation166_spill] sm:$0xff]  ;;  %v7764_v35 = vld [vmem:[%s12668_s3 + $0x504] sm:$0xf0] }
 0x3b4   : > { %v2119_v2 = vmax.f32 %v2047_v58, 0.0  ;;  %v1887_v29 = vmax.f32 %v13041_v7, %v9665_v1  ;;  %v6966_v1 = vld [vmem:[%s12668_s3 + $0x580] sm:$0xf] }
 0x3b5   : > { %v2120_v27 = vmax.f32 %v2048_v54, 0.0  ;;  %v1626_v45 = vpop.f32.mrf.mxu0  ;;  %v2279_v54 = vunpack.c.l.b16 %v9863_v49  ;;  %4058 = vmatpush.bf16.msrb.mxu3 %v6639_v24  ;;  %v7680_v24 = vld [vmem:[%s12668_s3 + $0x264] sm:$0xf0] }
 0x3b6   : > { %v2171_v58 = vpack.c.bf16 %v2119_v2, %v2118_v46  ;;  %v1889_v23 = vmax.f32 %v13040_v32, %v1626_v45  ;;  %v1755_v60 = vpop.f32.mrf.mxu1  ;;  %4309 = vmatpush.bf16.msrb.mxu0 %v6911_v51  ;;  %v6902_v46 = vld [vmem:[%s12668_s3 + $0x500] sm:$0xf]  ;;  %v7780_v51 = vld [vmem:[%s12668_s3 + $0x584] sm:$0xf0]  ;;  %v2281_v45 = vunpack.c.l.b16 %v2170_v22  ;;  %4358 = vmatpush.bf16.msrb.mxu1 %v6975_v5 }
 0x3b7   : > { %v2172_v33 = vpack.c.bf16 %v2120_v27, %v2120_v27  ;;  %v1890_v34 = vmax.f32 %v13042_v53, %v1755_v60  ;;  %v9922_v15 = vpop.f32.mrf.mxu2  ;;  %v9924_v4 = vpop.f32.mrf.mxu3  ;;  %v6903_v32 = vor.u32 %v7764_v35, %v6902_v46  ;;  %v6967_v49 = vor.u32 %v7780_v51, %v6966_v1  ;;  %v6566_v22 = vld [vmem:[%s12668_s3 + $0x260] sm:$0xf] }
 0x3b8   : > { %v2282_v2 = vunpack.c.l.b16 %v2171_v58  ;;  %v2283_v20 = vunpack.c.h.b16 %v2171_v58  ;;  %v1970_v27 = vmax.f32 %v1886_v30, %v1889_v23  ;;  %v2121_v30 = vmax.f32 %v2049_v41, 0.0  ;;  %v6630_v1 = vld [vmem:[%s12668_s3 + $0x2e0] sm:$0xf] }
 0x3b9   : > { %v2284_v31 = vunpack.c.l.b16 %v2172_v33  ;;  %v1971_v48 = vmax.f32 %v1887_v29, %v1890_v34  ;;  %v1972_v58 = vmax.f32 %v1891_v39, %v1894_v50  ;;  %v6567_v41 = vor.u32 %v7680_v24, %v6566_v22  ;;  %v13044_v50 = vld [vmem:[#allocation132_spill] sm:$0xff]  ;;  %v13045_v29 = vld [vmem:[#allocation57_spill] sm:$0xff]  ;;  %v13046_v34 = vld [vmem:[#allocation167_spill] sm:$0xff] }
 0x3ba   : > { %v9939_v60 = vpack.c.b16 %v2282_v2, %v2279_v54  ;;  %v9941_v7 = vpack.c.b16 %v2283_v20, %v2280_v25  ;;  %v2050_v53 = vadd.f32 %v9225_v19, %v1970_v27  ;;  %4310 = vmatpush.bf16.msrb.mxu0 %v6903_v32  ;;  %v1892_v54 = vmax.f32 %v13045_v29, %v13044_v50  ;;  %v7696_v25 = vld [vmem:[%s12668_s3 + $0x2e4] sm:$0xf0]  ;;  %v13047_v2 = vld [vmem:[#allocation133_spill] sm:$0xff]  ;;  %v13048_v27 = vld [vmem:[#allocation168_spill] sm:$0xff] }
 0x3bb   : > { %v9944_v36 = vpack.c.b16 %v2284_v31, %v2281_v45  ;;  %v2051_v5 = vadd.f32 %v9246_v37, %v1971_v48  ;;  %4359 = vmatpush.bf16.msrb.mxu1 %v6967_v49  ;;  %v1893_v20 = vmax.f32 %v13047_v2, %v9704_v11  ;;  %4010 = vmatpush.bf16.msrb.mxu2 %v6567_v41  ;;  %v13049_v50 = vld [vmem:[#allocation135_spill] sm:$0xff]  ;;  %v13053_v2 = vld [vmem:[#allocation169_spill] sm:$0xff] }
 0x3bc   : > { %v2122_v23 = vmax.f32 %v2050_v53, 0.0  ;;  %3856 = vmatmul.bf16.gmra.mxu2 %v9939_v60  ;;  %3905 = vmatmul.bf16.gmra.mxu3 %v9941_v7  ;;  %v6631_v48 = vor.u32 %v7696_v25, %v6630_v1  ;;  %v2052_v32 = vadd.f32 %v9220_v55, %v1972_v58  ;;  %v13050_v29 = vld [vmem:[#allocation59_spill] sm:$0xff] }
 0x3bd   : > { %13043 = vst [vmem:[#allocation12_spill] sm:$0xff] %v9944_v36  ;;  %4145 = vmatmul.bf16.gmra.mxu0 %v9939_v60  ;;  %4194 = vmatmul.bf16.gmra.mxu1 %v9941_v7  ;;  %v1628_v39 = vpop.f32.mrf.mxu0  ;;  %v13051_v25 = vld [vmem:[#allocation139_spill] sm:$0xff] }
 0x3be   : > { %v2173_v33 = vpack.c.bf16 %v2122_v23, %v2121_v30  ;;  %v1895_v46 = vmax.f32 %v13046_v34, %v1628_v39  ;;  %v1757_v35 = vpop.f32.mrf.mxu1  ;;  %v2123_v30 = vmax.f32 %v2051_v5, 0.0  ;;  %4059 = vmatpush.bf16.msrb.mxu3 %v6631_v48  ;;  %v2124_v39 = vmax.f32 %v2052_v32, 0.0  ;;  %v13055_v32 = vld [vmem:[#allocation170_spill] sm:$0xff] }
 0x3bf   : > { %v1896_v51 = vmax.f32 %v13048_v27, %v1757_v35  ;;  %v3827_v45 = vpop.f32.mrf.mxu2  ;;  %v3876_v31 = vpop.f32.mrf.mxu3  ;;  %v1898_v34 = vmax.f32 %v13050_v29, %v13049_v50  ;;  %v2055_v58 = vadd.f32 %v9220_v55, %v13051_v25  ;;  %v13057_v25 = vld [vmem:[#allocation60_spill] sm:$0xff] }
 0x3c0   : > { %v1973_v53 = vmax.f32 %v1892_v54, %v1895_v46  ;;  %v9970_v49 = vadd.f32 %v3876_v31, %v3827_v45  ;;  %v2174_v35 = vpack.c.bf16 %v2123_v30, %v2123_v30  ;;  %v13052_v54 = vld [vmem:[#allocation63_spill] sm:$0xff]  ;;  %v2329_v31 = vunpack.c.l.b16 %v2173_v33 }
 0x3c1   : > { %v1974_v23 = vmax.f32 %v1893_v20, %v1896_v51  ;;  %v1906_v5 = vmax.f32 %v13052_v54, %v9808_v42  ;;  %v13054_v51 = vld [vmem:[#allocation136_spill] sm:$0xff] }
 0x3c2   : > { %v2053_v22 = vadd.f32 %v9225_v19, %v1973_v53  ;;  %v1899_v45 = vmax.f32 %v13054_v51, %v9746_v44  ;;  %v2331_v42 = vunpack.c.l.b16 %v2174_v35  ;;  %v2127_v51 = vmax.f32 %v2055_v58, 0.0  ;;  %v7678_v35 = vld [vmem:[%s12668_s3 + $0x254] sm:$0xf0] }
 0x3c3   : > { %v2054_v24 = vadd.f32 %v9246_v37, %v1974_v23 }
 0x3c4   : > { %v2125_v11 = vmax.f32 %v2053_v22, 0.0  ;;  %v2330_v22 = vunpack.c.h.b16 %v2173_v33 }
 0x3c5   : > { %v2126_v41 = vmax.f32 %v2054_v24, 0.0  ;;  %v1631_v1 = vpop.f32.mrf.mxu0 }
 0x3c6   : > { %v2175_v46 = vpack.c.bf16 %v2125_v11, %v2124_v39  ;;  %v1901_v20 = vmax.f32 %v13053_v2, %v1631_v1  ;;  %v1760_v27 = vpop.f32.mrf.mxu1  ;;  %v13056_v1 = vld [vmem:[#allocation137_spill] sm:$0xff] }
 0x3c7   : > { %v2176_v48 = vpack.c.bf16 %v2126_v41, %v2126_v41  ;;  %v1902_v53 = vmax.f32 %v13055_v32, %v1760_v27  ;;  %v9984_v30 = vpop.f32.mrf.mxu2  ;;  %v9986_v23 = vpop.f32.mrf.mxu3  ;;  %v1903_v54 = vmax.f32 %v13057_v25, %v13056_v1 }
 0x3c8   : > { %v2332_v24 = vunpack.c.l.b16 %v2175_v46  ;;  %v2333_v50 = vunpack.c.h.b16 %v2175_v46  ;;  %v1976_v29 = vmax.f32 %v1898_v34, %v1901_v20  ;;  %v6558_v34 = vld [vmem:[%s12668_s3 + $0x250] sm:$0xf]  ;;  %v13060_v20 = vld [vmem:[#allocation138_spill] sm:$0xff] }
 0x3c9   : > { %v2334_v39 = vunpack.c.l.b16 %v2176_v48  ;;  %v1977_v11 = vmax.f32 %v1899_v45, %v1902_v53  ;;  %v1978_v32 = vmax.f32 %v1903_v54, %v1906_v5  ;;  %v6559_v5 = vor.u32 %v7678_v35, %v6558_v34  ;;  %v13061_v45 = vld [vmem:[#allocation62_spill] sm:$0xff]  ;;  %v13062_v53 = vld [vmem:[#allocation171_spill] sm:$0xff] }
 0x3ca   : > { %v9990_v2 = vpack.c.b16 %v2332_v24, %v2329_v31  ;;  %v9992_v44 = vpack.c.b16 %v2333_v50, %v2330_v22  ;;  %v2056_v41 = vadd.f32 %v9225_v19, %v1976_v29  ;;  %v1904_v31 = vmax.f32 %v13061_v45, %v13060_v20  ;;  %v6622_v50 = vld [vmem:[%s12668_s3 + $0x2d0] sm:$0xf]  ;;  %v7694_v29 = vld [vmem:[%s12668_s3 + $0x2d4] sm:$0xf0] }
 0x3cb   : > { %v9995_v27 = vpack.c.b16 %v2334_v39, %v2331_v42  ;;  %v2057_v46 = vadd.f32 %v9246_v37, %v1977_v11  ;;  %v13063_v42 = vld [vmem:[#allocation140_spill] sm:$0xff]  ;;  %4011 = vmatpush.bf16.msrb.mxu2 %v6559_v5 }
 0x3cc   : > { %13058 = vst [vmem:[#allocation64_spill] sm:$0xff] %v9992_v44  ;;  %v2128_v33 = vmax.f32 %v2056_v41, 0.0  ;;  %3919 = vmatmul.bf16.vlgmr.msra.gmra.mxu2 %v9340_v43  ;;  %3968 = vmatmul.bf16.vlgmr.msra.gmra.mxu3 %v9671_v47  ;;  %v1905_v39 = vmax.f32 %v13063_v42, %v9810_v21  ;;  %v13064_v11 = vld [vmem:[#allocation172_spill] sm:$0xff]  ;;  %v6623_v41 = vor.u32 %v7694_v29, %v6622_v50 }
 0x3cd   : > { %13059 = vst [vmem:[#allocation71_spill] sm:$0xff] %v9995_v27  ;;  %4150 = vmatmul.bf16.gmra.mxu0 %v9990_v2  ;;  %4199 = vmatmul.bf16.gmra.mxu1 %v9992_v44  ;;  %v1633_v58 = vpop.f32.mrf.mxu0  ;;  %v2129_v35 = vmax.f32 %v2057_v46, 0.0 }
 0x3ce   : > { %v2177_v48 = vpack.c.bf16 %v2128_v33, %v2127_v51  ;;  %v1907_v22 = vmax.f32 %v13062_v53, %v1633_v58  ;;  %v1762_v24 = vpop.f32.mrf.mxu1  ;;  %v2058_v51 = vadd.f32 %v9220_v55, %v1978_v32  ;;  %4060 = vmatpush.bf16.msrb.mxu3 %v6623_v41  ;;  %v6550_v41 = vld [vmem:[%s12668_s3 + $0x240] sm:$0xf] }
 0x3cf   : > { %v1908_v1 = vmax.f32 %v13064_v11, %v1762_v24  ;;  %v3832_v25 = vpop.f32.mrf.mxu2  ;;  %v3881_v54 = vpop.f32.mrf.mxu3  ;;  %v2178_v42 = vpack.c.bf16 %v2129_v35, %v2129_v35 }
 0x3d0   : > { %v1979_v33 = vmax.f32 %v1904_v31, %v1907_v22  ;;  %v10021_v34 = vadd.f32 %v3881_v54, %v3832_v25  ;;  %v2130_v53 = vmax.f32 %v2058_v51, 0.0  ;;  %v2361_v31 = vunpack.c.l.b16 %v2177_v48 }
 0x3d1   : > { %v1980_v58 = vmax.f32 %v1905_v39, %v1908_v1  ;;  %v2362_v29 = vunpack.c.h.b16 %v2177_v48  ;;  %v2363_v39 = vunpack.c.l.b16 %v2178_v42  ;;  %v7676_v48 = vld [vmem:[%s12668_s3 + $0x244] sm:$0xf0] }
 0x3d2   : > { %v2059_v20 = vadd.f32 %v9225_v19, %v1979_v33  ;;  %v6551_v33 = vor.u32 %v7676_v48, %v6550_v41 }
 0x3d3   : > { %v2060_v45 = vadd.f32 %v9246_v37, %v1980_v58  ;;  %v6614_v58 = vld [vmem:[%s12668_s3 + $0x2c0] sm:$0xf] }
 0x3d4   : > { %v2131_v21 = vmax.f32 %v2059_v20, 0.0  ;;  %v7692_v20 = vld [vmem:[%s12668_s3 + $0x2c4] sm:$0xf0]  ;;  %4012 = vmatpush.bf16.msrb.mxu2 %v6551_v33 }
 0x3d5   : > { %v2132_v24 = vmax.f32 %v2060_v45, 0.0  ;;  %v10025_v11 = vpop.f32.mrf.mxu0 }
 0x3d6   : > { %v10027_v5 = vpop.f32.mrf.mxu1  ;;  %v2179_v50 = vpack.c.bf16 %v2131_v21, %v2130_v53  ;;  %v6615_v21 = vor.u32 %v7692_v20, %v6614_v58  ;;  %v6534_v58 = vld [vmem:[%s12668_s3 + $0x220] sm:$0xf]  ;;  %v7672_v20 = vld [vmem:[%s12668_s3 + $0x224] sm:$0xf0] }
 0x3d7   : > { %v10029_v55 = vpop.f32.mrf.mxu2  ;;  %v10031_v32 = vpop.f32.mrf.mxu3  ;;  %v2180_v46 = vpack.c.bf16 %v2132_v24, %v2132_v24 }
 0x3d8   : > { %v2364_v22 = vunpack.c.l.b16 %v2179_v50  ;;  %v2365_v19 = vunpack.c.h.b16 %v2179_v50  ;;  %4061 = vmatpush.bf16.msrb.mxu3 %v6615_v21  ;;  %v7688_v21 = vld [vmem:[%s12668_s3 + $0x2a4] sm:$0xf0] }
 0x3d9   : > { %v2366_v37 = vunpack.c.l.b16 %v2180_v46  ;;  %v6542_v46 = vld [vmem:[%s12668_s3 + $0x230] sm:$0xf] }
 0x3da   : > { %v10033_v1 = vpack.c.b16 %v2364_v22, %v2361_v31  ;;  %v10035_v25 = vpack.c.b16 %v2365_v19, %v2362_v29  ;;  %v7674_v31 = vld [vmem:[%s12668_s3 + $0x234] sm:$0xf0] }
 0x3db   : > { %v10037_v54 = vpack.c.b16 %v2366_v37, %v2363_v39  ;;  %v6543_v29 = vor.u32 %v7674_v31, %v6542_v46  ;;  %v6606_v39 = vld [vmem:[%s12668_s3 + $0x2b0] sm:$0xf]  ;;  %v7690_v37 = vld [vmem:[%s12668_s3 + $0x2b4] sm:$0xf0] }
 0x3dc   : > { %13065 = vst [vmem:[#allocation10_spill] sm:$0xff] %v10033_v1  ;;  %3924 = vmatmul.bf16.gmra.mxu2 %v9426_v9  ;;  %3973 = vmatmul.bf16.gmra.mxu3 %v9720_v12  ;;  %v6607_v41 = vor.u32 %v7690_v37, %v6606_v39 }
 0x3dd   : > { %13066 = vst [vmem:[#allocation72_spill] sm:$0xff] %v10035_v25  ;;  %4311 = vmatmul.bf16.vlgmr.msrb.gmra.mxu0 %v9722_v13  ;;  %4360 = vmatmul.bf16.vlgmr.msrb.gmra.mxu1 %v9727_v0  ;;  %v10049_v51 = vpop.f32.mrf.mxu0 }
 0x3de   : > { %13067 = vst [vmem:[#allocation11_spill] sm:$0xff] %v10037_v54  ;;  %v10051_v35 = vpop.f32.mrf.mxu1  ;;  %4013 = vmatpush.bf16.msrb.mxu2 %v6543_v29  ;;  %4062 = vmatpush.bf16.msrb.mxu3 %v6607_v41 }
 0x3df   : > { %13068 = vst [vmem:[#allocation78_spill] sm:$0xff] %v10049_v51  ;;  %v3837_v45 = vpop.f32.mrf.mxu2  ;;  %v3886_v53 = vpop.f32.mrf.mxu3 }
 0x3e0   : > { %13069 = vst [vmem:[#allocation15_spill] sm:$0xff] %v10051_v35  ;;  %v10059_v42 = vadd.f32 %v3886_v53, %v3837_v45  ;;  %v6535_v45 = vor.u32 %v7672_v20, %v6534_v58  ;;  %v6598_v53 = vld [vmem:[%s12668_s3 + $0x2a0] sm:$0xf]  ;;  %v6526_v20 = vld [vmem:[%s12668_s3 + $0x210] sm:$0xf] }
 0x3e1   : > { %v6599_v29 = vor.u32 %v7688_v21, %v6598_v53  ;;  %v6590_v21 = vld [vmem:[%s12668_s3 + $0x290] sm:$0xf] }
 0x3e2   : > { %4014 = vmatpush.bf16.msrb.mxu2 %v6535_v45  ;;  %v7670_v45 = vld [vmem:[%s12668_s3 + $0x214] sm:$0xf0] }
 0x3e3   : > { %4063 = vmatpush.bf16.msrb.mxu3 %v6599_v29  ;;  %v6527_v53 = vor.u32 %v7670_v45, %v6526_v20  ;;  %v7686_v29 = vld [vmem:[%s12668_s3 + $0x294] sm:$0xf0] }
 0x3e4   : > { %v6591_v43 = vor.u32 %v7686_v29, %v6590_v21  ;;  %v7214_v21 = vld [vmem:[%s12668_s3 + $0x770] sm:$0xf] }
 0x3e5   : > { %v10061_v24 = vpop.f32.mrf.mxu0 }
 0x3e6   : > { %13070 = vst [vmem:[#allocation65_spill] sm:$0xff] %v10061_v24  ;;  %v10063_v50 = vpop.f32.mrf.mxu1  ;;  %4015 = vmatpush.bf16.msrb.mxu2 %v6527_v53  ;;  %v7668_v53 = vld [vmem:[%s12668_s3 + $0x204] sm:$0xf0] }
 0x3e7   : > { %13071 = vst [vmem:[#allocation75_spill] sm:$0xff] %v10063_v50  ;;  %v10109_v39 = vpop.f32.mrf.mxu2  ;;  %v10111_v37 = vpop.f32.mrf.mxu3  ;;  %4064 = vmatpush.bf16.msrb.mxu3 %v6591_v43  ;;  %v7842_v43 = vld [vmem:[%s12668_s3 + $0x774] sm:$0xf0] }
 0x3e8   : > { %v7215_v29 = vor.u32 %v7842_v43, %v7214_v21 }
 0x3ea   : > { %4499 = vmatpush.bf16.msra.mxu0 %v7215_v29 }
 0x3ec   : > { %3929 = vmatmul.bf16.gmra.mxu2 %v9476_v8  ;;  %3978 = vmatmul.bf16.gmra.mxu3 %v9833_v61 }
 0x3ed   : > { %4316 = vmatmul.bf16.gmra.mxu0 %v9835_v18  ;;  %4365 = vmatmul.bf16.gmra.mxu1 %v9838_v56  ;;  %v10075_v22 = vpop.f32.mrf.mxu0 }
 0x3ee   : > { %13072 = vst [vmem:[#allocation13_spill] sm:$0xff] %v10075_v22  ;;  %v10077_v19 = vpop.f32.mrf.mxu1  ;;  %v7174_v22 = vld [vmem:[%s12668_s3 + $0x720] sm:$0xf] }
 0x3ef   : > { %13073 = vst [vmem:[#allocation76_spill] sm:$0xff] %v10077_v19 }
 0x3f5   : > { %v10085_v48 = vpop.f32.mrf.mxu0 }
 0x3f6   : > { %13074 = vst [vmem:[#allocation14_spill] sm:$0xff] %v10085_v48  ;;  %v10087_v33 = vpop.f32.mrf.mxu1  ;;  %v7206_v48 = vld [vmem:[%s12668_s3 + $0x760] sm:$0xf] }
 0x3f7   : > { %13075 = vst [vmem:[#allocation82_spill] sm:$0xff] %v10087_v33 }
 0x3fc   : > { %3934 = vmatmul.bf16.gmra.mxu2 %v9534_v62  ;;  %3983 = vmatmul.bf16.gmra.mxu3 %v9939_v60 }
 0x3fd   : > { %4321 = vmatmul.bf16.gmra.mxu0 %v9941_v7  ;;  %4370 = vmatmul.bf16.gmra.mxu1 %v9944_v36  ;;  %v10105_v46 = vpop.f32.mrf.mxu0 }
 0x3fe   : > { %13076 = vst [vmem:[#allocation18_spill] sm:$0xff] %v10105_v46  ;;  %v10107_v31 = vpop.f32.mrf.mxu1 }
 0x3ff   : > { %13077 = vst [vmem:[#allocation66_spill] sm:$0xff] %v10107_v31 }
 0x405   : > { %v10113_v41 = vpop.f32.mrf.mxu0 }
 0x406   : > { %13078 = vst [vmem:[#allocation79_spill] sm:$0xff] %v10113_v41  ;;  %v10115_v58 = vpop.f32.mrf.mxu1 }
 0x407   : > { %13079 = vst [vmem:[#allocation16_spill] sm:$0xff] %v10115_v58 }
 0x40c   : > { %3939 = vmatmul.bf16.gmra.mxu2 %v9681_v16  ;;  %3988 = vmatmul.bf16.gmra.mxu3 %v9421_v10 }
 0x40d   : > { %4326 = vmatmul.bf16.gmra.mxu0 %v9992_v44  ;;  %4375 = vmatmul.bf16.gmra.mxu1 %v9995_v27  ;;  %v10135_v41 = vpop.f32.mrf.mxu0 }
 0x40e   : > { %13080 = vst [vmem:[#allocation80_spill] sm:$0xff] %v10135_v41  ;;  %v10137_v44 = vpop.f32.mrf.mxu1 }
 0x40f   : > { %v3842_v25 = vpop.f32.mrf.mxu2  ;;  %v3891_v1 = vpop.f32.mrf.mxu3  ;;  %13081 = vst [vmem:[#allocation17_spill] sm:$0xff] %v10137_v44  ;;  %v7684_v44 = vld [vmem:[%s12668_s3 + $0x284] sm:$0xf0] }
 0x410   : > { %v10133_v58 = vadd.f32 %v3891_v1, %v3842_v25  ;;  %v7617_v1 = vld [vmem:[%s12668_s3 + $0x74] sm:$0xf]  ;;  %v6518_v25 = vld [vmem:[%s12668_s3 + $0x200] sm:$0xf] }
 0x417   : > { %v3844_v20 = vpop.f32.mrf.mxu2  ;;  %v3893_v45 = vpop.f32.mrf.mxu3 }
 0x418   : > { %v10139_v31 = vadd.f32 %v3893_v45, %v3844_v20  ;;  %v6320_v20 = vld [vmem:[%s12668_s3 + $0x78] sm:$0xf0]  ;;  %v6519_v45 = vor.u32 %v7668_v53, %v6518_v25  ;;  %v7615_v25 = vld [vmem:[%s12668_s3 + $0x64] sm:$0xf] }
 0x41a   : > { %v10141_v46 = vpop.f32.mrf.mxu0  ;;  %v10143_v33 = vpop.f32.mrf.mxu1  ;;  %4016 = vmatpush.bf16.msrb.mxu2 %v6519_v45  ;;  %v7198_v45 = vld [vmem:[%s12668_s3 + $0x750] sm:$0xf] }
 0x41b   : > { %13082 = vst [vmem:[#allocation85_spill] sm:$0xff] %v10141_v46  ;;  %v6582_v46 = vld [vmem:[%s12668_s3 + $0x280] sm:$0xf] }
 0x41c   : > { %13083 = vst [vmem:[#allocation21_spill] sm:$0xff] %v10143_v33  ;;  %3944 = vmatmul.bf16.gmra.mxu2 %v9727_v0  ;;  %3993 = vmatmul.bf16.gmra.mxu3 %v9471_v63  ;;  %v6323_v33 = vor.u32 %v7617_v1, %v6320_v20  ;;  %v6583_v21 = vor.u32 %v7684_v44, %v6582_v46  ;;  %v7840_v1 = vld [vmem:[%s12668_s3 + $0x764] sm:$0xf0] }
 0x41d   : > { %4331 = vmatmul.bf16.gmra.mxu0 %v9473_v3  ;;  %4380 = vmatmul.bf16.gmra.mxu1 %v9476_v8  ;;  %v7207_v44 = vor.u32 %v7840_v1, %v7206_v48  ;;  %v7613_v48 = vld [vmem:[%s12668_s3 + $0x54] sm:$0xf] }
 0x41e   : > { %4548 = vmatpush.bf16.msra.mxu1 %v6323_v33  ;;  %4065 = vmatpush.bf16.msrb.mxu3 %v6583_v21  ;;  %v6312_v33 = vld [vmem:[%s12668_s3 + $0x68] sm:$0xf0] }
 0x41f   : > { %v3847_v43 = vpop.f32.mrf.mxu2  ;;  %v3896_v41 = vpop.f32.mrf.mxu3  ;;  %v6315_v46 = vor.u32 %v7615_v25, %v6312_v33  ;;  %4500 = vmatpush.bf16.msra.mxu0 %v7207_v44  ;;  %v7190_v33 = vld [vmem:[%s12668_s3 + $0x740] sm:$0xf] }
 0x420   : > { %v10182_v53 = vadd.f32 %v3896_v41, %v3847_v43  ;;  %v7838_v41 = vld [vmem:[%s12668_s3 + $0x754] sm:$0xf0]  ;;  %v6304_v43 = vld [vmem:[%s12668_s3 + $0x58] sm:$0xf0] }
 0x421   : > { %v7199_v21 = vor.u32 %v7838_v41, %v7198_v45  ;;  %v6307_v1 = vor.u32 %v7613_v48, %v6304_v43  ;;  %v6296_v48 = vld [vmem:[%s12668_s3 + $0x48] sm:$0xf0] }
 0x422   : > { %v10187_v29 = vpop.f32.mrf.mxu0  ;;  %v10189_v20 = vpop.f32.mrf.mxu1  ;;  %4549 = vmatpush.bf16.msra.mxu1 %v6315_v46  ;;  %v7611_v46 = vld [vmem:[%s12668_s3 + $0x44] sm:$0xf] }
 0x423   : > { %13084 = vst [vmem:[#allocation68_spill] sm:$0xff] %v10187_v29  ;;  %4501 = vmatpush.bf16.msra.mxu0 %v7199_v21  ;;  %v6299_v21 = vor.u32 %v7611_v46, %v6296_v48  ;;  %v7182_v29 = vld [vmem:[%s12668_s3 + $0x730] sm:$0xf] }
 0x424   : > { %13085 = vst [vmem:[#allocation83_spill] sm:$0xff] %v10189_v20  ;;  %v7836_v20 = vld [vmem:[%s12668_s3 + $0x744] sm:$0xf0] }
 0x425   : > { %v7191_v41 = vor.u32 %v7836_v20, %v7190_v33  ;;  %v7609_v20 = vld [vmem:[%s12668_s3 + $0x34] sm:$0xf]  ;;  %v7746_v33 = vld [vmem:[%s12668_s3 + $0x474] sm:$0xf0] }
 0x426   : > { %4550 = vmatpush.bf16.msra.mxu1 %v6307_v1 }
 0x427   : > { %v3849_v25 = vpop.f32.mrf.mxu2  ;;  %v3898_v44 = vpop.f32.mrf.mxu3  ;;  %4502 = vmatpush.bf16.msra.mxu0 %v7191_v41  ;;  %v6288_v41 = vld [vmem:[%s12668_s3 + $0x38] sm:$0xf0] }
 0x428   : > { %v10212_v45 = vadd.f32 %v3898_v44, %v3849_v25  ;;  %v7834_v25 = vld [vmem:[%s12668_s3 + $0x734] sm:$0xf0]  ;;  %v6830_v44 = vld [vmem:[%s12668_s3 + $0x470] sm:$0xf] }
 0x429   : > { %v7183_v46 = vor.u32 %v7834_v25, %v7182_v29  ;;  %v6831_v48 = vor.u32 %v7746_v33, %v6830_v44  ;;  %v7607_v44 = vld [vmem:[%s12668_s3 + $0x24] sm:$0xf] }
 0x42a   : > { %v10217_v43 = vpop.f32.mrf.mxu0  ;;  %v10219_v1 = vpop.f32.mrf.mxu1  ;;  %4551 = vmatpush.bf16.msra.mxu1 %v6299_v21  ;;  %v6291_v21 = vor.u32 %v7609_v20, %v6288_v41  ;;  %v7832_v20 = vld [vmem:[%s12668_s3 + $0x724] sm:$0xf0] }
 0x42b   : > { %13086 = vst [vmem:[#allocation19_spill] sm:$0xff] %v10217_v43  ;;  %v7762_v43 = vld [vmem:[%s12668_s3 + $0x4f4] sm:$0xf0]  ;;  %4503 = vmatpush.bf16.msra.mxu0 %v7183_v46  ;;  %4205 = vmatpush.bf16.msra.mxu2 %v6831_v48 }
 0x42c   : > { %13087 = vst [vmem:[#allocation84_spill] sm:$0xff] %v10219_v1  ;;  %3949 = vmatmul.bf16.gmra.mxu2 %v9838_v56  ;;  %3998 = vmatmul.bf16.gmra.mxu3 %v9529_v57  ;;  %v6894_v1 = vld [vmem:[%s12668_s3 + $0x4f0] sm:$0xf] }
 0x42d   : > { %4336 = vmatmul.bf16.gmra.mxu0 %v9531_v59  ;;  %4385 = vmatmul.bf16.gmra.mxu1 %v9534_v62  ;;  %v6895_v29 = vor.u32 %v7762_v43, %v6894_v1  ;;  %v7175_v43 = vor.u32 %v7832_v20, %v7174_v22  ;;  %v6280_v1 = vld [vmem:[%s12668_s3 + $0x28] sm:$0xf0]  ;;  %v7605_v22 = vld [vmem:[%s12668_s3 + $0x14] sm:$0xf] }
 0x42e   : > { %4552 = vmatpush.bf16.msra.mxu1 %v6291_v21  ;;  %v6283_v46 = vor.u32 %v7607_v44, %v6280_v1  ;;  %v7166_v21 = vld [vmem:[%s12668_s3 + $0x710] sm:$0xf]  ;;  %v7158_v1 = vld [vmem:[%s12668_s3 + $0x700] sm:$0xf] }
 0x42f   : > { %v3852_v25 = vpop.f32.mrf.mxu2  ;;  %v3901_v19 = vpop.f32.mrf.mxu3  ;;  %4254 = vmatpush.bf16.msra.mxu3 %v6895_v29  ;;  %4504 = vmatpush.bf16.msra.mxu0 %v7175_v43 }
 0x430   : > { %v10258_v33 = vadd.f32 %v3901_v19, %v3852_v25  ;;  %v7830_v19 = vld [vmem:[%s12668_s3 + $0x714] sm:$0xf0]  ;;  %v6272_v25 = vld [vmem:[%s12668_s3 + $0x18] sm:$0xf0] }
 0x431   : > { %v7167_v29 = vor.u32 %v7830_v19, %v7166_v21  ;;  %v6275_v20 = vor.u32 %v7605_v22, %v6272_v25  ;;  %v6264_v22 = vld [vmem:[%s12668_s3 + $0x8] sm:$0xf0] }
 0x432   : > { %v10263_v41 = vpop.f32.mrf.mxu0  ;;  %v10265_v48 = vpop.f32.mrf.mxu1  ;;  %4553 = vmatpush.bf16.msra.mxu1 %v6283_v46  ;;  %v7603_v46 = vld [vmem:[%s12668_s3 + $0x4] sm:$0xf] }
 0x433   : > { %13088 = vst [vmem:[#allocation20_spill] sm:$0xff] %v10263_v41  ;;  %4505 = vmatpush.bf16.msra.mxu0 %v7167_v29  ;;  %v6267_v29 = vor.u32 %v7603_v46, %v6264_v22  ;;  %v7760_v46 = vld [vmem:[%s12668_s3 + $0x4e4] sm:$0xf0] }
 0x434   : > { %13089 = vst [vmem:[#allocation89_spill] sm:$0xff] %v10265_v48  ;;  %v7828_v48 = vld [vmem:[%s12668_s3 + $0x704] sm:$0xf0] }
 0x435   : > { %v7159_v19 = vor.u32 %v7828_v48, %v7158_v1  ;;  %v7744_v48 = vld [vmem:[%s12668_s3 + $0x464] sm:$0xf0]  ;;  %v6886_v1 = vld [vmem:[%s12668_s3 + $0x4e0] sm:$0xf] }
 0x436   : > { %4554 = vmatpush.bf16.msra.mxu1 %v6275_v20 }
 0x437   : > { %v3854_v44 = vpop.f32.mrf.mxu2  ;;  %v3903_v43 = vpop.f32.mrf.mxu3  ;;  %4506 = vmatpush.bf16.msra.mxu0 %v7159_v19  ;;  %v6887_v19 = vor.u32 %v7760_v46, %v6886_v1  ;;  %v7742_v1 = vld [vmem:[%s12668_s3 + $0x454] sm:$0xf0] }
 0x438   : > { %v10288_v21 = vadd.f32 %v3903_v43, %v3854_v44  ;;  %v6822_v44 = vld [vmem:[%s12668_s3 + $0x460] sm:$0xf] }
 0x439   : > { %v6823_v43 = vor.u32 %v7744_v48, %v6822_v44  ;;  %4255 = vmatpush.bf16.msra.mxu3 %v6887_v19  ;;  %v6878_v19 = vld [vmem:[%s12668_s3 + $0x4d0] sm:$0xf] }
 0x43a   : > { %v10293_v25 = vpop.f32.mrf.mxu0  ;;  %v10295_v20 = vpop.f32.mrf.mxu1  ;;  %4555 = vmatpush.bf16.msra.mxu1 %v6267_v29 }
 0x43b   : > { %13090 = vst [vmem:[#allocation24_spill] sm:$0xff] %v10293_v25  ;;  %4206 = vmatpush.bf16.msra.mxu2 %v6823_v43  ;;  %v6814_v43 = vld [vmem:[%s12668_s3 + $0x450] sm:$0xf] }
 0x43c   : > { %13091 = vst [vmem:[#allocation141_spill] sm:$0xff] %v10295_v20  ;;  %3954 = vmatmul.bf16.gmra.mxu2 %v9944_v36  ;;  %4003 = vmatmul.bf16.gmra.mxu3 %v9576_v40  ;;  %v6815_v46 = vor.u32 %v7742_v1, %v6814_v43  ;;  %v3874_v1 = vadd.f32 %v9924_v4, %v9922_v15  ;;  %v7740_v15 = vld [vmem:[%s12668_s3 + $0x444] sm:$0xf0]  ;;  %v6870_v4 = vld [vmem:[%s12668_s3 + $0x4c0] sm:$0xf] }
 0x43d   : > { %4341 = vmatmul.bf16.gmra.mxu0 %v9578_v28  ;;  %4390 = vmatmul.bf16.gmra.mxu1 %v9583_v52 }
 0x43f   : > { %v3857_v22 = vpop.f32.mrf.mxu2  ;;  %v3906_v29 = vpop.f32.mrf.mxu3  ;;  %4207 = vmatpush.bf16.msra.mxu2 %v6815_v46 }
 0x440   : > { %v10313_v20 = vadd.f32 %v3906_v29, %v3857_v22  ;;  %v7758_v22 = vld [vmem:[%s12668_s3 + $0x4d4] sm:$0xf0] }
 0x441   : > { %v6879_v29 = vor.u32 %v7758_v22, %v6878_v19 }
 0x442   : > { %v10315_v25 = vpop.f32.mrf.mxu0  ;;  %v10317_v41 = vpop.f32.mrf.mxu1 }
 0x443   : > { %13092 = vst [vmem:[#allocation173_spill] sm:$0xff] %v10315_v25  ;;  %4256 = vmatpush.bf16.msra.mxu3 %v6879_v29 }
 0x444   : > { %13093 = vst [vmem:[#allocation73_spill] sm:$0xff] %v10317_v41 }
 0x447   : > { %v3859_v44 = vpop.f32.mrf.mxu2  ;;  %v3908_v48 = vpop.f32.mrf.mxu3 }
 0x448   : > { %v10319_v50 = vadd.f32 %v3908_v48, %v3859_v44 }
 0x44a   : > { %v10321_v24 = vpop.f32.mrf.mxu0  ;;  %v10323_v35 = vpop.f32.mrf.mxu1 }
 0x44b   : > { %13094 = vst [vmem:[#allocation142_spill] sm:$0xff] %v10321_v24 }
 0x44c   : > { %13095 = vst [vmem:[#allocation86_spill] sm:$0xff] %v10323_v35  ;;  %4017 = vmatmul.bf16.vlgmr.msrb.gmra.mxu2 %v9673_v26  ;;  %4066 = vmatmul.bf16.vlgmr.msrb.gmra.mxu3 %v9681_v16 }
 0x44d   : > { %4346 = vmatmul.bf16.gmra.mxu0 %v9621_v38  ;;  %4395 = vmatmul.bf16.gmra.mxu1 %v9631_v17 }
 0x44f   : > { %v3920_v44 = vpop.f32.mrf.mxu2  ;;  %v3969_v48 = vpop.f32.mrf.mxu3 }
 0x450   : > { %v3921_v16 = vadd.f32 %v3920_v44, %v9879_v6  ;;  %v7756_v6 = vld [vmem:[%s12668_s3 + $0x4c4] sm:$0xf0] }
 0x452   : > { %v10342_v35 = vadd.f32 %v3969_v48, %v3921_v16  ;;  %v10344_v24 = vpop.f32.mrf.mxu0  ;;  %v10346_v43 = vpop.f32.mrf.mxu1  ;;  %v6806_v16 = vld [vmem:[%s12668_s3 + $0x440] sm:$0xf] }
 0x457   : > { %v3922_v41 = vpop.f32.mrf.mxu2  ;;  %v3971_v25 = vpop.f32.mrf.mxu3 }
 0x458   : > { %v3923_v38 = vadd.f32 %v3922_v41, %v3874_v1  ;;  %v6871_v41 = vor.u32 %v7756_v6, %v6870_v4  ;;  %v3879_v1 = vadd.f32 %v9986_v23, %v9984_v30  ;;  %v7738_v30 = vld [vmem:[%s12668_s3 + $0x434] sm:$0xf0] }
 0x459   : > { %v7754_v6 = vld [vmem:[%s12668_s3 + $0x4b4] sm:$0xf0] }
 0x45a   : > { %v10350_v51 = vadd.f32 %v3971_v25, %v3923_v38  ;;  %v10352_v19 = vpop.f32.mrf.mxu0  ;;  %v10354_v46 = vpop.f32.mrf.mxu1  ;;  %v6807_v38 = vor.u32 %v7740_v15, %v6806_v16  ;;  %4257 = vmatpush.bf16.msra.mxu3 %v6871_v41 }
 0x45b   : > { %13096 = vst [vmem:[#allocation22_spill] sm:$0xff] %v10352_v19 }
 0x45c   : > { %13097 = vst [vmem:[#allocation88_spill] sm:$0xff] %v10354_v46  ;;  %4022 = vmatmul.bf16.gmra.mxu2 %v9722_v13  ;;  %4071 = vmatmul.bf16.gmra.mxu3 %v9727_v0 }
 0x45d   : > { %4507 = vmatmul.bf16.vlgmr.msra.gmra.mxu0 %v9476_v8  ;;  %4556 = vmatmul.bf16.vlgmr.msra.gmra.mxu1 %v9336_v14 }
 0x45e   : > { %4208 = vmatpush.bf16.msra.mxu2 %v6807_v38 }
 0x45f   : > { %v3925_v25 = vpop.f32.mrf.mxu2  ;;  %v3974_v22 = vpop.f32.mrf.mxu3 }
 0x460   : > { %v3926_v29 = vadd.f32 %v3925_v25, %v9970_v49  ;;  %v6798_v49 = vld [vmem:[%s12668_s3 + $0x430] sm:$0xf] }
 0x461   : > { %v6799_v23 = vor.u32 %v7738_v30, %v6798_v49  ;;  %v3884_v49 = vadd.f32 %v10031_v32, %v10029_v55  ;;  %v7736_v55 = vld [vmem:[%s12668_s3 + $0x424] sm:$0xf0] }
 0x462   : > { %v10373_v44 = vadd.f32 %v3974_v22, %v3926_v29  ;;  %v10375_v48 = vpop.f32.mrf.mxu0  ;;  %v10377_v14 = vpop.f32.mrf.mxu1 }
 0x463   : > { %13098 = vst [vmem:[#allocation23_spill] sm:$0xff] %v10377_v14  ;;  %4209 = vmatpush.bf16.msra.mxu2 %v6799_v23 }
 0x467   : > { %v3927_v16 = vpop.f32.mrf.mxu2  ;;  %v3976_v15 = vpop.f32.mrf.mxu3 }
 0x468   : > { %v3928_v46 = vadd.f32 %v3927_v16, %v3879_v1 }
 0x46a   : > { %v10381_v19 = vadd.f32 %v3976_v15, %v3928_v46  ;;  %v10383_v4 = vpop.f32.mrf.mxu0  ;;  %v10385_v38 = vpop.f32.mrf.mxu1  ;;  %v6862_v46 = vld [vmem:[%s12668_s3 + $0x4b0] sm:$0xf] }
 0x46b   : > { %13099 = vst [vmem:[#allocation143_spill] sm:$0xff] %v10383_v4  ;;  %v6863_v41 = vor.u32 %v7754_v6, %v6862_v46 }
 0x46c   : > { %13100 = vst [vmem:[#allocation77_spill] sm:$0xff] %v10385_v38  ;;  %4027 = vmatmul.bf16.gmra.mxu2 %v9835_v18  ;;  %4076 = vmatmul.bf16.gmra.mxu3 %v9838_v56 }
 0x46d   : > { %4512 = vmatmul.bf16.gmra.mxu0 %v9534_v62  ;;  %4561 = vmatmul.bf16.gmra.mxu1 %v9421_v10 }
 0x46e   : > { %4258 = vmatpush.bf16.msra.mxu3 %v6863_v41 }
 0x46f   : > { %v3930_v25 = vpop.f32.mrf.mxu2  ;;  %v3979_v22 = vpop.f32.mrf.mxu3 }
 0x470   : > { %v3931_v29 = vadd.f32 %v3930_v25, %v10021_v34  ;;  %v6790_v34 = vld [vmem:[%s12668_s3 + $0x420] sm:$0xf] }
 0x471   : > { %v6791_v32 = vor.u32 %v7736_v55, %v6790_v34  ;;  %v3889_v34 = vadd.f32 %v10111_v37, %v10109_v39  ;;  %v7734_v39 = vld [vmem:[%s12668_s3 + $0x414] sm:$0xf0] }
 0x472   : > { %v10404_v1 = vadd.f32 %v3979_v22, %v3931_v29  ;;  %v10406_v16 = vpop.f32.mrf.mxu0  ;;  %v10408_v15 = vpop.f32.mrf.mxu1 }
 0x473   : > { %13101 = vst [vmem:[#allocation144_spill] sm:$0xff] %v10408_v15  ;;  %4210 = vmatpush.bf16.msra.mxu2 %v6791_v32 }
 0x477   : > { %v3932_v30 = vpop.f32.mrf.mxu2  ;;  %v3981_v38 = vpop.f32.mrf.mxu3 }
 0x478   : > { %v3933_v4 = vadd.f32 %v3932_v30, %v3884_v49 }
 0x47a   : > { %v10412_v14 = vadd.f32 %v3981_v38, %v3933_v4  ;;  %v10414_v46 = vpop.f32.mrf.mxu0  ;;  %v10416_v23 = vpop.f32.mrf.mxu1  ;;  %v6854_v4 = vld [vmem:[%s12668_s3 + $0x4a0] sm:$0xf]  ;;  %v7752_v38 = vld [vmem:[%s12668_s3 + $0x4a4] sm:$0xf0] }
 0x47b   : > { %13102 = vst [vmem:[#allocation90_spill] sm:$0xff] %v10414_v46  ;;  %v6855_v6 = vor.u32 %v7752_v38, %v6854_v4  ;;  %v6782_v38 = vld [vmem:[%s12668_s3 + $0x410] sm:$0xf] }
 0x47c   : > { %13103 = vst [vmem:[#allocation25_spill] sm:$0xff] %v10416_v23  ;;  %4032 = vmatmul.bf16.gmra.mxu2 %v9941_v7  ;;  %4081 = vmatmul.bf16.gmra.mxu3 %v9944_v36  ;;  %v6783_v37 = vor.u32 %v7734_v39, %v6782_v38 }
 0x47d   : > { %4517 = vmatmul.bf16.gmra.mxu0 %v9583_v52  ;;  %4566 = vmatmul.bf16.gmra.mxu1 %v9471_v63 }
 0x47e   : > { %4259 = vmatpush.bf16.msra.mxu3 %v6855_v6  ;;  %4211 = vmatpush.bf16.msra.mxu2 %v6783_v37  ;;  %v6512_v37 = vld [vmem:[%s12668_s3 + $0x1f8] sm:$0xf0] }
 0x47f   : > { %v3935_v41 = vpop.f32.mrf.mxu2  ;;  %v3984_v25 = vpop.f32.mrf.mxu3 }
 0x480   : > { %v3936_v22 = vadd.f32 %v3935_v41, %v10059_v42  ;;  %v13107_v42 = vld [vmem:[#allocation70_spill] sm:$0xff] }
 0x482   : > { %v10435_v29 = vadd.f32 %v3984_v25, %v3936_v22  ;;  %v10437_v49 = vpop.f32.mrf.mxu0  ;;  %v10439_v30 = vpop.f32.mrf.mxu1 }
 0x483   : > { %13104 = vst [vmem:[#allocation94_spill] sm:$0xff] %v10439_v30 }
 0x487   : > { %v3937_v55 = vpop.f32.mrf.mxu2  ;;  %v3986_v23 = vpop.f32.mrf.mxu3 }
 0x488   : > { %v3938_v46 = vadd.f32 %v3937_v55, %v3889_v34 }
 0x48a   : > { %v10443_v15 = vadd.f32 %v3986_v23, %v3938_v46  ;;  %v10445_v4 = vpop.f32.mrf.mxu0  ;;  %v10447_v32 = vpop.f32.mrf.mxu1  ;;  %v6846_v46 = vld [vmem:[%s12668_s3 + $0x490] sm:$0xf]  ;;  %v7750_v23 = vld [vmem:[%s12668_s3 + $0x494] sm:$0xf0] }
 0x48b   : > { %13105 = vst [vmem:[#allocation96_spill] sm:$0xff] %v10445_v4  ;;  %v6847_v6 = vor.u32 %v7750_v23, %v6846_v46  ;;  %v7681_v23 = vld [vmem:[%s12668_s3 + $0x274] sm:$0xf] }
 0x48c   : > { %13106 = vst [vmem:[#allocation28_spill] sm:$0xff] %v10447_v32  ;;  %4037 = vmatmul.bf16.gmra.mxu2 %v13107_v42  ;;  %4086 = vmatmul.bf16.gmra.mxu3 %v9426_v9 }
 0x48d   : > { %4522 = vmatmul.bf16.gmra.mxu0 %v9631_v17  ;;  %4571 = vmatmul.bf16.gmra.mxu1 %v9529_v57 }
 0x48e   : > { %4260 = vmatpush.bf16.msra.mxu3 %v6847_v6  ;;  %v6576_v6 = vld [vmem:[%s12668_s3 + $0x278] sm:$0xf0] }
 0x48f   : > { %v3940_v41 = vpop.f32.mrf.mxu2  ;;  %v3989_v25 = vpop.f32.mrf.mxu3 }
 0x490   : > { %v3941_v22 = vadd.f32 %v3940_v41, %v10133_v58  ;;  %v7665_v58 = vld [vmem:[%s12668_s3 + $0x1f4] sm:$0xf] }
 0x492   : > { %v10466_v34 = vadd.f32 %v3989_v25, %v3941_v22  ;;  %v10468_v55 = vpop.f32.mrf.mxu0  ;;  %v10470_v38 = vpop.f32.mrf.mxu1  ;;  %v6579_v25 = vor.u32 %v7681_v23, %v6576_v6  ;;  %v6838_v22 = vld [vmem:[%s12668_s3 + $0x480] sm:$0xf]  ;;  %v6504_v23 = vld [vmem:[%s12668_s3 + $0x1e8] sm:$0xf0] }
 0x493   : > { %13108 = vst [vmem:[#allocation145_spill] sm:$0xff] %v10468_v55  ;;  %v6568_v6 = vld [vmem:[%s12668_s3 + $0x268] sm:$0xf0] }
 0x494   : > { %13109 = vst [vmem:[#allocation81_spill] sm:$0xff] %v10470_v38  ;;  %4744 = vmatpush.bf16.msrb.mxu1 %v6579_v25  ;;  %v7661_v38 = vld [vmem:[%s12668_s3 + $0x1d4] sm:$0xf] }
 0x497   : > { %v3942_v39 = vpop.f32.mrf.mxu2  ;;  %v3991_v17 = vpop.f32.mrf.mxu3 }
 0x498   : > { %v3943_v32 = vadd.f32 %v3942_v39, %v10139_v31  ;;  %v7732_v31 = vld [vmem:[%s12668_s3 + $0x404] sm:$0xf0] }
 0x499   : > { %v7748_v39 = vld [vmem:[%s12668_s3 + $0x484] sm:$0xf0] }
 0x49a   : > { %v10473_v4 = vadd.f32 %v3991_v17, %v3943_v32  ;;  %v10475_v30 = vpop.f32.mrf.mxu0  ;;  %v10477_v46 = vpop.f32.mrf.mxu1  ;;  %v6774_v17 = vld [vmem:[%s12668_s3 + $0x400] sm:$0xf]  ;;  %v6515_v32 = vor.u32 %v7665_v58, %v6512_v37  ;;  %v6839_v58 = vor.u32 %v7748_v39, %v6838_v22 }
 0x49b   : > { %13110 = vst [vmem:[#allocation146_spill] sm:$0xff] %v10475_v30  ;;  %v6775_v41 = vor.u32 %v7732_v31, %v6774_v17  ;;  %v7663_v30 = vld [vmem:[%s12668_s3 + $0x1e4] sm:$0xf] }
 0x49c   : > { %13111 = vst [vmem:[#allocation92_spill] sm:$0xff] %v10477_v46  ;;  %4042 = vmatmul.bf16.gmra.mxu2 %v9473_v3  ;;  %4091 = vmatmul.bf16.gmra.mxu3 %v9476_v8  ;;  %v7679_v17 = vld [vmem:[%s12668_s3 + $0x264] sm:$0xf] }
 0x49d   : > { %4527 = vmatmul.bf16.gmra.mxu0 %v9838_v56  ;;  %4576 = vmatmul.bf16.gmra.mxu1 %v9671_v47 }
 0x49e   : > { %4695 = vmatpush.bf16.msrb.mxu0 %v6515_v32  ;;  %4212 = vmatpush.bf16.msra.mxu2 %v6775_v41  ;;  %v6507_v32 = vor.u32 %v7663_v30, %v6504_v23  ;;  %v6571_v41 = vor.u32 %v7679_v17, %v6568_v6  ;;  %v7677_v30 = vld [vmem:[%s12668_s3 + $0x254] sm:$0xf] }
 0x49f   : > { %v3945_v37 = vpop.f32.mrf.mxu2  ;;  %v3994_v46 = vpop.f32.mrf.mxu3  ;;  %4261 = vmatpush.bf16.msra.mxu3 %v6839_v58  ;;  %v6560_v58 = vld [vmem:[%s12668_s3 + $0x258] sm:$0xf0] }
 0x4a0   : > { %v3946_v31 = vadd.f32 %v3945_v37, %v10182_v53  ;;  %v6496_v53 = vld [vmem:[%s12668_s3 + $0x1d8] sm:$0xf0]  ;;  %4745 = vmatpush.bf16.msrb.mxu1 %v6571_v41  ;;  %v6563_v37 = vor.u32 %v7677_v30, %v6560_v58 }
 0x4a2   : > { %v10520_v25 = vadd.f32 %v3994_v46, %v3946_v31  ;;  %v10522_v22 = vpop.f32.mrf.mxu0  ;;  %v10524_v39 = vpop.f32.mrf.mxu1  ;;  %4696 = vmatpush.bf16.msrb.mxu0 %v6507_v32  ;;  %v6499_v46 = vor.u32 %v7661_v38, %v6496_v53  ;;  %v7659_v31 = vld [vmem:[%s12668_s3 + $0x1c4] sm:$0xf]  ;;  %v6488_v32 = vld [vmem:[%s12668_s3 + $0x1c8] sm:$0xf0] }
 0x4a3   : > { %13112 = vst [vmem:[#allocation26_spill] sm:$0xff] %v10522_v22  ;;  %v7675_v38 = vld [vmem:[%s12668_s3 + $0x244] sm:$0xf]  ;;  %v6491_v41 = vor.u32 %v7659_v31, %v6488_v32  ;;  %v6552_v53 = vld [vmem:[%s12668_s3 + $0x248] sm:$0xf0] }
 0x4a4   : > { %13113 = vst [vmem:[#allocation93_spill] sm:$0xff] %v10524_v39  ;;  %4746 = vmatpush.bf16.msrb.mxu1 %v6563_v37  ;;  %v6555_v30 = vor.u32 %v7675_v38, %v6552_v53  ;;  %v7657_v39 = vld [vmem:[%s12668_s3 + $0x1b4] sm:$0xf]  ;;  %v7810_v31 = vld [vmem:[%s12668_s3 + $0x674] sm:$0xf0] }
 0x4a5   : > { %v6544_v38 = vld [vmem:[%s12668_s3 + $0x238] sm:$0xf0]  ;;  %v7150_v53 = vld [vmem:[%s12668_s3 + $0x6f0] sm:$0xf]  ;;  %v7653_v22 = vld [vmem:[%s12668_s3 + $0x194] sm:$0xf] }
 0x4a6   : > { %4697 = vmatpush.bf16.msrb.mxu0 %v6499_v46 }
 0x4a7   : > { %v3947_v23 = vpop.f32.mrf.mxu2  ;;  %v3996_v17 = vpop.f32.mrf.mxu3 }
 0x4a8   : > { %v3948_v6 = vadd.f32 %v3947_v23, %v10212_v45  ;;  %4747 = vmatpush.bf16.msrb.mxu1 %v6555_v30  ;;  %v6480_v45 = vld [vmem:[%s12668_s3 + $0x1b8] sm:$0xf0]  ;;  %v7673_v23 = vld [vmem:[%s12668_s3 + $0x234] sm:$0xf]  ;;  %v7826_v30 = vld [vmem:[%s12668_s3 + $0x6f4] sm:$0xf0] }
 0x4a9   : > { %v6483_v32 = vor.u32 %v7657_v39, %v6480_v45  ;;  %v7151_v39 = vor.u32 %v7826_v30, %v7150_v53 }
 0x4aa   : > { %v10551_v46 = vadd.f32 %v3996_v17, %v3948_v6  ;;  %v10553_v58 = vpop.f32.mrf.mxu0  ;;  %v10555_v37 = vpop.f32.mrf.mxu1  ;;  %4698 = vmatpush.bf16.msrb.mxu0 %v6491_v41  ;;  %v7086_v17 = vld [vmem:[%s12668_s3 + $0x670] sm:$0xf]  ;;  %v6547_v41 = vor.u32 %v7673_v23, %v6544_v38  ;;  %v6472_v23 = vld [vmem:[%s12668_s3 + $0x1a8] sm:$0xf0] }
 0x4ab   : > { %13114 = vst [vmem:[#allocation27_spill] sm:$0xff] %v10553_v58  ;;  %v7087_v6 = vor.u32 %v7810_v31, %v7086_v17  ;;  %v7655_v58 = vld [vmem:[%s12668_s3 + $0x1a4] sm:$0xf]  ;;  %4450 = vmatpush.bf16.msrb.mxu3 %v7151_v39  ;;  %v6536_v38 = vld [vmem:[%s12668_s3 + $0x228] sm:$0xf0] }
 0x4ac   : > { %13115 = vst [vmem:[#allocation100_spill] sm:$0xff] %v10555_v37  ;;  %4047 = vmatmul.bf16.gmra.mxu2 %v9531_v59  ;;  %4096 = vmatmul.bf16.gmra.mxu3 %v9534_v62  ;;  %v7671_v17 = vld [vmem:[%s12668_s3 + $0x224] sm:$0xf]  ;;  %v6528_v39 = vld [vmem:[%s12668_s3 + $0x218] sm:$0xf0] }
 0x4ad   : > { %4532 = vmatmul.bf16.gmra.mxu0 %v9944_v36  ;;  %4581 = vmatmul.bf16.gmra.mxu1 %v9720_v12 }
 0x4ae   : > { %4699 = vmatpush.bf16.msrb.mxu0 %v6483_v32  ;;  %4401 = vmatpush.bf16.msrb.mxu2 %v7087_v6  ;;  %v6475_v32 = vor.u32 %v7655_v58, %v6472_v23  ;;  %v6539_v6 = vor.u32 %v7671_v17, %v6536_v38  ;;  %v7669_v58 = vld [vmem:[%s12668_s3 + $0x214] sm:$0xf] }
 0x4af   : > { %v3950_v45 = vpop.f32.mrf.mxu2  ;;  %v3999_v37 = vpop.f32.mrf.mxu3  ;;  %4748 = vmatpush.bf16.msrb.mxu1 %v6547_v41 }
 0x4b0   : > { %v3951_v31 = vadd.f32 %v3950_v45, %v10258_v33  ;;  %v6464_v33 = vld [vmem:[%s12668_s3 + $0x198] sm:$0xf0]  ;;  %v6531_v45 = vor.u32 %v7669_v58, %v6528_v39 }
 0x4b2   : > { %v10598_v41 = vadd.f32 %v3999_v37, %v3951_v31  ;;  %v10600_v53 = vpop.f32.mrf.mxu0  ;;  %v10602_v30 = vpop.f32.mrf.mxu1  ;;  %4700 = vmatpush.bf16.msrb.mxu0 %v6475_v32  ;;  %v6467_v37 = vor.u32 %v7653_v22, %v6464_v33  ;;  %v7651_v31 = vld [vmem:[%s12668_s3 + $0x184] sm:$0xf]  ;;  %v6456_v32 = vld [vmem:[%s12668_s3 + $0x188] sm:$0xf0] }
 0x4b3   : > { %13116 = vst [vmem:[#allocation31_spill] sm:$0xff] %v10600_v53  ;;  %4749 = vmatpush.bf16.msrb.mxu1 %v6539_v6  ;;  %v7667_v22 = vld [vmem:[%s12668_s3 + $0x204] sm:$0xf]  ;;  %v6459_v6 = vor.u32 %v7651_v31, %v6456_v32  ;;  %v6520_v33 = vld [vmem:[%s12668_s3 + $0x208] sm:$0xf0] }
 0x4b4   : > { %13117 = vst [vmem:[#allocation147_spill] sm:$0xff] %v10602_v30  ;;  %v6523_v58 = vor.u32 %v7667_v22, %v6520_v33  ;;  %v7142_v31 = vld [vmem:[%s12668_s3 + $0x6e0] sm:$0xf]  ;;  %v7824_v32 = vld [vmem:[%s12668_s3 + $0x6e4] sm:$0xf0] }
 0x4b5   : > { %v7143_v22 = vor.u32 %v7824_v32, %v7142_v31 }
 0x4b6   : > { %4701 = vmatpush.bf16.msrb.mxu0 %v6467_v37 }
 0x4b7   : > { %v3952_v23 = vpop.f32.mrf.mxu2  ;;  %v4001_v17 = vpop.f32.mrf.mxu3  ;;  %4750 = vmatpush.bf16.msrb.mxu1 %v6531_v45  ;;  %4451 = vmatpush.bf16.msrb.mxu3 %v7143_v22 }
 0x4b8   : > { %v3953_v38 = vadd.f32 %v3952_v23, %v10288_v21  ;;  %v7078_v21 = vld [vmem:[%s12668_s3 + $0x660] sm:$0xf]  ;;  %v7808_v23 = vld [vmem:[%s12668_s3 + $0x664] sm:$0xf0] }
 0x4ba   : > { %v10629_v37 = vadd.f32 %v4001_v17, %v3953_v38  ;;  %v10631_v39 = vpop.f32.mrf.mxu0  ;;  %v10633_v45 = vpop.f32.mrf.mxu1  ;;  %4702 = vmatpush.bf16.msrb.mxu0 %v6459_v6  ;;  %v7079_v17 = vor.u32 %v7808_v23, %v7078_v21 }
 0x4bb   : > { %13118 = vst [vmem:[#allocation87_spill] sm:$0xff] %v10631_v39  ;;  %4751 = vmatpush.bf16.msrb.mxu1 %v6523_v58 }
 0x4bc   : > { %13119 = vst [vmem:[#allocation148_spill] sm:$0xff] %v10633_v45  ;;  %4052 = vmatmul.bf16.gmra.mxu2 %v9578_v28  ;;  %4101 = vmatmul.bf16.gmra.mxu3 %v9583_v52 }
 0x4bd   : > { %4537 = vmatmul.bf16.gmra.mxu0 %v9995_v27  ;;  %4586 = vmatmul.bf16.gmra.mxu1 %v9833_v61 }
 0x4be   : > { %4402 = vmatpush.bf16.msrb.mxu2 %v7079_v17  ;;  %v7806_v17 = vld [vmem:[%s12668_s3 + $0x654] sm:$0xf0] }
 0x4bf   : > { %v3955_v38 = vpop.f32.mrf.mxu2  ;;  %v4004_v6 = vpop.f32.mrf.mxu3 }
 0x4c0   : > { %v3956_v33 = vadd.f32 %v3955_v38, %v10313_v20  ;;  %v7070_v20 = vld [vmem:[%s12668_s3 + $0x650] sm:$0xf] }
 0x4c2   : > { %v10652_v58 = vadd.f32 %v4004_v6, %v3956_v33  ;;  %v10654_v45 = vpop.f32.mrf.mxu0  ;;  %v10656_v21 = vpop.f32.mrf.mxu1 }
 0x4c3   : > { %13120 = vst [vmem:[#allocation97_spill] sm:$0xff] %v10654_v45 }
 0x4c4   : > { %13121 = vst [vmem:[#allocation29_spill] sm:$0xff] %v10656_v21 }
 0x4c7   : > { %v3957_v23 = vpop.f32.mrf.mxu2  ;;  %v4006_v39 = vpop.f32.mrf.mxu3 }
 0x4c8   : > { %v3958_v30 = vadd.f32 %v3957_v23, %v10319_v50  ;;  %v7071_v50 = vor.u32 %v7806_v17, %v7070_v20 }
 0x4ca   : > { %v10659_v53 = vadd.f32 %v4006_v39, %v3958_v30  ;;  %v10661_v55 = vpop.f32.mrf.mxu0  ;;  %v10663_v31 = vpop.f32.mrf.mxu1  ;;  %v7134_v30 = vld [vmem:[%s12668_s3 + $0x6d0] sm:$0xf]  ;;  %v7822_v39 = vld [vmem:[%s12668_s3 + $0x6d4] sm:$0xf0]  ;;  %4403 = vmatpush.bf16.msrb.mxu2 %v7071_v50  ;;  %v7804_v50 = vld [vmem:[%s12668_s3 + $0x644] sm:$0xf0] }
 0x4cb   : > { %13122 = vst [vmem:[#allocation98_spill] sm:$0xff] %v10661_v55  ;;  %v7135_v32 = vor.u32 %v7822_v39, %v7134_v30 }
 0x4cc   : > { %13123 = vst [vmem:[#allocation30_spill] sm:$0xff] %v10663_v31  ;;  %4213 = vmatmul.bf16.vlgmr.msra.gmra.mxu2 %v9426_v9  ;;  %4262 = vmatmul.bf16.vlgmr.msra.gmra.mxu3 %v9720_v12 }
 0x4cd   : > { %4542 = vmatmul.bf16.gmra.mxu0 %v10037_v54  ;;  %4591 = vmatmul.bf16.gmra.mxu1 %v9939_v60 }
 0x4ce   : > { %4452 = vmatpush.bf16.msrb.mxu3 %v7135_v32 }
 0x4cf   : > { %v4018_v22 = vpop.f32.mrf.mxu2  ;;  %v4067_v38 = vpop.f32.mrf.mxu3 }
 0x4d0   : > { %v4019_v6 = vadd.f32 %v4018_v22, %v10342_v35  ;;  %v7062_v35 = vld [vmem:[%s12668_s3 + $0x640] sm:$0xf] }
 0x4d2   : > { %v10682_v33 = vadd.f32 %v4067_v38, %v4019_v6  ;;  %v10684_v23 = vpop.f32.mrf.mxu0  ;;  %v10686_v20 = vpop.f32.mrf.mxu1 }
 0x4d3   : > { %13124 = vst [vmem:[#allocation103_spill] sm:$0xff] %v10684_v23 }
 0x4d4   : > { %13125 = vst [vmem:[#allocation34_spill] sm:$0xff] %v10686_v20 }
 0x4d7   : > { %v4020_v17 = vpop.f32.mrf.mxu2  ;;  %v4069_v54 = vpop.f32.mrf.mxu3 }
 0x4d8   : > { %v4021_v31 = vadd.f32 %v4020_v17, %v10350_v51  ;;  %v7126_v51 = vld [vmem:[%s12668_s3 + $0x6c0] sm:$0xf] }
 0x4da   : > { %v10689_v55 = vadd.f32 %v4069_v54, %v4021_v31  ;;  %v10691_v21 = vpop.f32.mrf.mxu0  ;;  %v10693_v30 = vpop.f32.mrf.mxu1  ;;  %v7063_v54 = vor.u32 %v7804_v50, %v7062_v35  ;;  %v7820_v31 = vld [vmem:[%s12668_s3 + $0x6c4] sm:$0xf0] }
 0x4db   : > { %13126 = vst [vmem:[#allocation149_spill] sm:$0xff] %v10693_v30  ;;  %v7127_v39 = vor.u32 %v7820_v31, %v7126_v51  ;;  %v7818_v31 = vld [vmem:[%s12668_s3 + $0x6b4] sm:$0xf0] }
 0x4dc   : > { %4218 = vmatmul.bf16.gmra.mxu2 %v9476_v8  ;;  %4267 = vmatmul.bf16.gmra.mxu3 %v9833_v61 }
 0x4dd   : > { %4703 = vmatmul.bf16.vlgmr.msrb.gmra.mxu0 %v9671_v47  ;;  %4752 = vmatmul.bf16.vlgmr.msrb.gmra.mxu1 %v9673_v26 }
 0x4de   : > { %4404 = vmatpush.bf16.msrb.mxu2 %v7063_v54  ;;  %4453 = vmatpush.bf16.msrb.mxu3 %v7127_v39  ;;  %v7802_v54 = vld [vmem:[%s12668_s3 + $0x634] sm:$0xf0] }
 0x4df   : > { %v4023_v32 = vpop.f32.mrf.mxu2  ;;  %v4072_v22 = vpop.f32.mrf.mxu3 }
 0x4e0   : > { %v4024_v38 = vadd.f32 %v4023_v32, %v10373_v44  ;;  %v7054_v44 = vld [vmem:[%s12668_s3 + $0x630] sm:$0xf] }
 0x4e2   : > { %v10712_v6 = vadd.f32 %v4072_v22, %v4024_v38  ;;  %v10714_v47 = vpop.f32.mrf.mxu0  ;;  %v10716_v17 = vpop.f32.mrf.mxu1 }
 0x4e3   : > { %13127 = vst [vmem:[#allocation91_spill] sm:$0xff] %v10714_v47 }
 0x4e4   : > { %13128 = vst [vmem:[#allocation150_spill] sm:$0xff] %v10716_v17 }
 0x4e7   : > { %v4025_v35 = vpop.f32.mrf.mxu2  ;;  %v4074_v50 = vpop.f32.mrf.mxu3 }
 0x4e8   : > { %v4026_v30 = vadd.f32 %v4025_v35, %v10381_v19  ;;  %v7055_v19 = vor.u32 %v7802_v54, %v7054_v44 }
 0x4ea   : > { %v10719_v20 = vadd.f32 %v4074_v50, %v4026_v30  ;;  %v10721_v23 = vpop.f32.mrf.mxu0  ;;  %v10723_v51 = vpop.f32.mrf.mxu1  ;;  %v7118_v30 = vld [vmem:[%s12668_s3 + $0x6b0] sm:$0xf]  ;;  %4405 = vmatpush.bf16.msrb.mxu2 %v7055_v19  ;;  %v7800_v19 = vld [vmem:[%s12668_s3 + $0x624] sm:$0xf0] }
 0x4eb   : > { %13129 = vst [vmem:[#allocation101_spill] sm:$0xff] %v10721_v23  ;;  %v7119_v39 = vor.u32 %v7818_v31, %v7118_v30 }
 0x4ec   : > { %13130 = vst [vmem:[#allocation32_spill] sm:$0xff] %v10723_v51  ;;  %4223 = vmatmul.bf16.gmra.mxu2 %v9534_v62  ;;  %4272 = vmatmul.bf16.gmra.mxu3 %v9939_v60 }
 0x4ed   : > { %4708 = vmatmul.bf16.gmra.mxu0 %v9720_v12  ;;  %4757 = vmatmul.bf16.gmra.mxu1 %v9722_v13 }
 0x4ee   : > { %4454 = vmatpush.bf16.msrb.mxu3 %v7119_v39 }
 0x4ef   : > { %v4028_v32 = vpop.f32.mrf.mxu2  ;;  %v4077_v22 = vpop.f32.mrf.mxu3 }
 0x4f0   : > { %v4029_v38 = vadd.f32 %v4028_v32, %v10404_v1  ;;  %v7046_v1 = vld [vmem:[%s12668_s3 + $0x620] sm:$0xf] }
 0x4f2   : > { %v10742_v35 = vadd.f32 %v4077_v22, %v4029_v38  ;;  %v10744_v50 = vpop.f32.mrf.mxu0  ;;  %v10746_v44 = vpop.f32.mrf.mxu1 }
 0x4f3   : > { %13131 = vst [vmem:[#allocation102_spill] sm:$0xff] %v10744_v50 }
 0x4f4   : > { %13132 = vst [vmem:[#allocation33_spill] sm:$0xff] %v10746_v44 }
 0x4f7   : > { %v4030_v54 = vpop.f32.mrf.mxu2  ;;  %v4079_v12 = vpop.f32.mrf.mxu3 }
 0x4f8   : > { %v4031_v51 = vadd.f32 %v4030_v54, %v10412_v14  ;;  %v7110_v14 = vld [vmem:[%s12668_s3 + $0x6a0] sm:$0xf] }
 0x4fa   : > { %v10749_v17 = vadd.f32 %v4079_v12, %v4031_v51  ;;  %v10751_v45 = vpop.f32.mrf.mxu0  ;;  %v10753_v30 = vpop.f32.mrf.mxu1  ;;  %v7047_v12 = vor.u32 %v7800_v19, %v7046_v1  ;;  %v7816_v51 = vld [vmem:[%s12668_s3 + $0x6a4] sm:$0xf0] }
 0x4fb   : > { %13133 = vst [vmem:[#allocation107_spill] sm:$0xff] %v10751_v45  ;;  %v7111_v31 = vor.u32 %v7816_v51, %v7110_v14 }
 0x4fc   : > { %13134 = vst [vmem:[#allocation37_spill] sm:$0xff] %v10753_v30  ;;  %4228 = vmatmul.bf16.gmra.mxu2 %v9583_v52  ;;  %4277 = vmatmul.bf16.gmra.mxu3 %v9990_v2 }
 0x4fd   : > { %4713 = vmatmul.bf16.gmra.mxu0 %v9833_v61  ;;  %4762 = vmatmul.bf16.gmra.mxu1 %v9835_v18 }
 0x4fe   : > { %4406 = vmatpush.bf16.msrb.mxu2 %v7047_v12  ;;  %4455 = vmatpush.bf16.msrb.mxu3 %v7111_v31  ;;  %v7798_v12 = vld [vmem:[%s12668_s3 + $0x614] sm:$0xf0] }
 0x4ff   : > { %v4033_v39 = vpop.f32.mrf.mxu2  ;;  %v4082_v32 = vpop.f32.mrf.mxu3 }
 0x500   : > { %v4034_v22 = vadd.f32 %v4033_v39, %v10435_v29  ;;  %v7038_v29 = vld [vmem:[%s12668_s3 + $0x610] sm:$0xf] }
 0x502   : > { %v10772_v38 = vadd.f32 %v4082_v32, %v4034_v22  ;;  %v10774_v54 = vpop.f32.mrf.mxu0  ;;  %v10776_v1 = vpop.f32.mrf.mxu1 }
 0x503   : > { %13135 = vst [vmem:[#allocation151_spill] sm:$0xff] %v10774_v54 }
 0x504   : > { %13136 = vst [vmem:[#allocation95_spill] sm:$0xff] %v10776_v1 }
 0x507   : > { %v4035_v19 = vpop.f32.mrf.mxu2  ;;  %v4084_v30 = vpop.f32.mrf.mxu3 }
 0x508   : > { %v4036_v44 = vadd.f32 %v4035_v19, %v10443_v15  ;;  %v7039_v15 = vor.u32 %v7798_v12, %v7038_v29 }
 0x50a   : > { %v10779_v45 = vadd.f32 %v4084_v30, %v4036_v44  ;;  %v10781_v50 = vpop.f32.mrf.mxu0  ;;  %v10783_v14 = vpop.f32.mrf.mxu1  ;;  %v7102_v44 = vld [vmem:[%s12668_s3 + $0x690] sm:$0xf]  ;;  %v7814_v30 = vld [vmem:[%s12668_s3 + $0x694] sm:$0xf0]  ;;  %4407 = vmatpush.bf16.msrb.mxu2 %v7039_v15  ;;  %v6768_v15 = vld [vmem:[%s12668_s3 + $0x3f8] sm:$0xf0] }
 0x50b   : > { %13137 = vst [vmem:[#allocation152_spill] sm:$0xff] %v10781_v50  ;;  %v7103_v51 = vor.u32 %v7814_v30, %v7102_v44  ;;  %v7745_v30 = vld [vmem:[%s12668_s3 + $0x474] sm:$0xf] }
 0x50c   : > { %13138 = vst [vmem:[#allocation105_spill] sm:$0xff] %v10783_v14  ;;  %4233 = vmatmul.bf16.gmra.mxu2 %v9727_v0  ;;  %4282 = vmatmul.bf16.gmra.mxu3 %v9471_v63 }
 0x50d   : > { %4718 = vmatmul.bf16.gmra.mxu0 %v9939_v60  ;;  %4767 = vmatmul.bf16.gmra.mxu1 %v9941_v7 }
 0x50e   : > { %4456 = vmatpush.bf16.msrb.mxu3 %v7103_v51  ;;  %v6832_v51 = vld [vmem:[%s12668_s3 + $0x478] sm:$0xf0] }
 0x50f   : > { %v4038_v31 = vpop.f32.mrf.mxu2  ;;  %v4087_v39 = vpop.f32.mrf.mxu3 }
 0x510   : > { %v4039_v32 = vadd.f32 %v4038_v31, %v10466_v34  ;;  %v7729_v34 = vld [vmem:[%s12668_s3 + $0x3f4] sm:$0xf] }
 0x512   : > { %v10802_v22 = vadd.f32 %v4087_v39, %v4039_v32  ;;  %v10804_v19 = vpop.f32.mrf.mxu0  ;;  %v10806_v29 = vpop.f32.mrf.mxu1  ;;  %v6835_v39 = vor.u32 %v7745_v30, %v6832_v51  ;;  %v7094_v32 = vld [vmem:[%s12668_s3 + $0x680] sm:$0xf]  ;;  %v6760_v30 = vld [vmem:[%s12668_s3 + $0x3e8] sm:$0xf0] }
 0x513   : > { %13139 = vst [vmem:[#allocation35_spill] sm:$0xff] %v10804_v19  ;;  %v6824_v51 = vld [vmem:[%s12668_s3 + $0x468] sm:$0xf0]  ;;  %v7719_v19 = vld [vmem:[%s12668_s3 + $0x3a4] sm:$0xf] }
 0x514   : > { %13140 = vst [vmem:[#allocation106_spill] sm:$0xff] %v10806_v29  ;;  %4940 = vmatpush.bf16.msra.mxu1 %v6835_v39  ;;  %v7727_v29 = vld [vmem:[%s12668_s3 + $0x3e4] sm:$0xf] }
 0x517   : > { %v4040_v12 = vpop.f32.mrf.mxu2  ;;  %v4089_v14 = vpop.f32.mrf.mxu3 }
 0x518   : > { %v4041_v1 = vadd.f32 %v4040_v12, %v10473_v4  ;;  %v7030_v4 = vld [vmem:[%s12668_s3 + $0x600] sm:$0xf]  ;;  %v7812_v12 = vld [vmem:[%s12668_s3 + $0x684] sm:$0xf0] }
 0x51a   : > { %v10809_v50 = vadd.f32 %v4089_v14, %v4041_v1  ;;  %v10811_v54 = vpop.f32.mrf.mxu0  ;;  %v10813_v44 = vpop.f32.mrf.mxu1  ;;  %v7796_v1 = vld [vmem:[%s12668_s3 + $0x604] sm:$0xf0]  ;;  %v6771_v14 = vor.u32 %v7729_v34, %v6768_v15  ;;  %v7095_v34 = vor.u32 %v7812_v12, %v7094_v32 }
 0x51b   : > { %13141 = vst [vmem:[#allocation36_spill] sm:$0xff] %v10813_v44  ;;  %v7031_v31 = vor.u32 %v7796_v1, %v7030_v4  ;;  %v7743_v4 = vld [vmem:[%s12668_s3 + $0x464] sm:$0xf] }
 0x51c   : > { %4238 = vmatmul.bf16.gmra.mxu2 %v9838_v56  ;;  %4287 = vmatmul.bf16.gmra.mxu3 %v9529_v57 }
 0x51d   : > { %4723 = vmatmul.bf16.gmra.mxu0 %v9421_v10  ;;  %4772 = vmatmul.bf16.gmra.mxu1 %v13107_v42  ;;  %v7725_v10 = vld [vmem:[%s12668_s3 + $0x3d4] sm:$0xf] }
 0x51e   : > { %4891 = vmatpush.bf16.msra.mxu0 %v6771_v14  ;;  %4408 = vmatpush.bf16.msrb.mxu2 %v7031_v31  ;;  %v6763_v14 = vor.u32 %v7727_v29, %v6760_v30  ;;  %v6827_v31 = vor.u32 %v7743_v4, %v6824_v51  ;;  %v7741_v29 = vld [vmem:[%s12668_s3 + $0x454] sm:$0xf] }
 0x51f   : > { %v4043_v15 = vpop.f32.mrf.mxu2  ;;  %v4092_v44 = vpop.f32.mrf.mxu3  ;;  %4457 = vmatpush.bf16.msrb.mxu3 %v7095_v34  ;;  %v6816_v34 = vld [vmem:[%s12668_s3 + $0x458] sm:$0xf0] }
 0x520   : > { %v4044_v1 = vadd.f32 %v4043_v15, %v10520_v25  ;;  %4941 = vmatpush.bf16.msra.mxu1 %v6827_v31  ;;  %v6752_v25 = vld [vmem:[%s12668_s3 + $0x3d8] sm:$0xf0]  ;;  %v6819_v15 = vor.u32 %v7741_v29, %v6816_v34 }
 0x522   : > { %v10856_v39 = vadd.f32 %v4092_v44, %v4044_v1  ;;  %v10858_v32 = vpop.f32.mrf.mxu0  ;;  %v10860_v12 = vpop.f32.mrf.mxu1  ;;  %4892 = vmatpush.bf16.msra.mxu0 %v6763_v14  ;;  %v6755_v44 = vor.u32 %v7725_v10, %v6752_v25  ;;  %v7723_v1 = vld [vmem:[%s12668_s3 + $0x3c4] sm:$0xf]  ;;  %v6744_v14 = vld [vmem:[%s12668_s3 + $0x3c8] sm:$0xf0] }
 0x523   : > { %13142 = vst [vmem:[#allocation111_spill] sm:$0xff] %v10858_v32  ;;  %v7739_v10 = vld [vmem:[%s12668_s3 + $0x444] sm:$0xf]  ;;  %v6747_v31 = vor.u32 %v7723_v1, %v6744_v14  ;;  %v6808_v25 = vld [vmem:[%s12668_s3 + $0x448] sm:$0xf0] }
 0x524   : > { %13143 = vst [vmem:[#allocation40_spill] sm:$0xff] %v10860_v12  ;;  %4942 = vmatpush.bf16.msra.mxu1 %v6819_v15  ;;  %v6811_v29 = vor.u32 %v7739_v10, %v6808_v25  ;;  %v7721_v12 = vld [vmem:[%s12668_s3 + $0x3b4] sm:$0xf]  ;;  %v6384_v1 = vld [vmem:[%s12668_s3 + $0xf8] sm:$0xf0] }
 0x525   : > { %v6800_v10 = vld [vmem:[%s12668_s3 + $0x438] sm:$0xf0]  ;;  %v7649_v25 = vld [vmem:[%s12668_s3 + $0x174] sm:$0xf] }
 0x526   : > { %4893 = vmatpush.bf16.msra.mxu0 %v6755_v44 }
 0x527   : > { %v4045_v30 = vpop.f32.mrf.mxu2  ;;  %v4094_v4 = vpop.f32.mrf.mxu3 }
 0x528   : > { %v4046_v51 = vadd.f32 %v4045_v30, %v10551_v46  ;;  %4943 = vmatpush.bf16.msra.mxu1 %v6811_v29  ;;  %v6736_v46 = vld [vmem:[%s12668_s3 + $0x3b8] sm:$0xf0]  ;;  %v7737_v30 = vld [vmem:[%s12668_s3 + $0x434] sm:$0xf] }
 0x529   : > { %v6739_v14 = vor.u32 %v7721_v12, %v6736_v46  ;;  %v6448_v29 = vld [vmem:[%s12668_s3 + $0x178] sm:$0xf0] }
 0x52a   : > { %v10887_v44 = vadd.f32 %v4094_v4, %v4046_v51  ;;  %v10889_v34 = vpop.f32.mrf.mxu0  ;;  %v10891_v15 = vpop.f32.mrf.mxu1  ;;  %4894 = vmatpush.bf16.msra.mxu0 %v6747_v31  ;;  %v7633_v4 = vld [vmem:[%s12668_s3 + $0xf4] sm:$0xf]  ;;  %v6803_v31 = vor.u32 %v7737_v30, %v6800_v10  ;;  %v6451_v12 = vor.u32 %v7649_v25, %v6448_v29  ;;  %v6728_v30 = vld [vmem:[%s12668_s3 + $0x3a8] sm:$0xf0]  ;;  %v6720_v29 = vld [vmem:[%s12668_s3 + $0x398] sm:$0xf0] }
 0x52b   : > { %13144 = vst [vmem:[#allocation153_spill] sm:$0xff] %v10889_v34  ;;  %v6387_v51 = vor.u32 %v7633_v4, %v6384_v1  ;;  %v7735_v4 = vld [vmem:[%s12668_s3 + $0x424] sm:$0xf]  ;;  %v6792_v10 = vld [vmem:[%s12668_s3 + $0x428] sm:$0xf0] }
 0x52c   : > { %13145 = vst [vmem:[#allocation99_spill] sm:$0xff] %v10891_v15  ;;  %4243 = vmatmul.bf16.gmra.mxu2 %v9944_v36  ;;  %4292 = vmatmul.bf16.gmra.mxu3 %v9576_v40  ;;  %v7717_v25 = vld [vmem:[%s12668_s3 + $0x394] sm:$0xf] }
 0x52d   : > { %4728 = vmatmul.bf16.gmra.mxu0 %v9471_v63  ;;  %4777 = vmatmul.bf16.gmra.mxu1 %v9473_v3 }
 0x52e   : > { %4895 = vmatpush.bf16.msra.mxu0 %v6739_v14  ;;  %4597 = vmatpush.bf16.msra.mxu2 %v6387_v51  ;;  %v6731_v14 = vor.u32 %v7719_v19, %v6728_v30  ;;  %v6795_v51 = vor.u32 %v7735_v4, %v6792_v10  ;;  %v6712_v10 = vld [vmem:[%s12668_s3 + $0x388] sm:$0xf0] }
 0x52f   : > { %v4048_v46 = vpop.f32.mrf.mxu2  ;;  %v4097_v15 = vpop.f32.mrf.mxu3  ;;  %4944 = vmatpush.bf16.msra.mxu1 %v6803_v31  ;;  %4646 = vmatpush.bf16.msra.mxu3 %v6451_v12 }
 0x530   : > { %v4049_v1 = vadd.f32 %v4048_v46, %v10598_v41  ;;  %v7733_v41 = vld [vmem:[%s12668_s3 + $0x414] sm:$0xf]  ;;  %v6784_v46 = vld [vmem:[%s12668_s3 + $0x418] sm:$0xf0] }
 0x531   : > { %v6787_v30 = vor.u32 %v7733_v41, %v6784_v46  ;;  %v6776_v41 = vld [vmem:[%s12668_s3 + $0x408] sm:$0xf0] }
 0x532   : > { %v10934_v31 = vadd.f32 %v4097_v15, %v4049_v1  ;;  %4896 = vmatpush.bf16.msra.mxu0 %v6731_v14  ;;  %v10945_v19 = vpop.f32.mrf.mxu0  ;;  %v10947_v12 = vpop.f32.mrf.mxu1  ;;  %v6723_v15 = vor.u32 %v7717_v25, %v6720_v29  ;;  %v7715_v14 = vld [vmem:[%s12668_s3 + $0x384] sm:$0xf] }
 0x533   : > { %4945 = vmatpush.bf16.msra.mxu1 %v6795_v51  ;;  %13146 = vst [vmem:[#allocation154_spill] sm:$0xff] %v10945_v19  ;;  %v7731_v51 = vld [vmem:[%s12668_s3 + $0x404] sm:$0xf]  ;;  %v6715_v29 = vor.u32 %v7715_v14, %v6712_v10  ;;  %v6440_v14 = vld [vmem:[%s12668_s3 + $0x168] sm:$0xf0] }
 0x534   : > { %13147 = vst [vmem:[#allocation108_spill] sm:$0xff] %v10947_v12  ;;  %v7631_v12 = vld [vmem:[%s12668_s3 + $0xe4] sm:$0xf] }
 0x536   : > { %4897 = vmatpush.bf16.msra.mxu0 %v6723_v15  ;;  %v6779_v15 = vor.u32 %v7731_v51, %v6776_v41 }
 0x537   : > { %v4050_v4 = vpop.f32.mrf.mxu2  ;;  %v4099_v1 = vpop.f32.mrf.mxu3  ;;  %4946 = vmatpush.bf16.msra.mxu1 %v6787_v30  ;;  %v13148_v30 = vld [vmem:[#allocation67_spill] sm:$0xff] }
 0x538   : > { %v4051_v25 = vadd.f32 %v4050_v4, %v10629_v37  ;;  %v6376_v37 = vld [vmem:[%s12668_s3 + $0xe8] sm:$0xf0] }
 0x539   : > { %v6379_v4 = vor.u32 %v7631_v12, %v6376_v37 }
 0x53a   : > { %v10965_v46 = vadd.f32 %v4099_v1, %v4051_v25  ;;  %4898 = vmatpush.bf16.msra.mxu0 %v6715_v29  ;;  %v7647_v1 = vld [vmem:[%s12668_s3 + $0x164] sm:$0xf]  ;;  %v10983_v10 = vpop.f32.mrf.mxu0  ;;  %v10985_v51 = vpop.f32.mrf.mxu1 }
 0x53b   : > { %4947 = vmatpush.bf16.msra.mxu1 %v6779_v15  ;;  %13149 = vst [vmem:[#allocation38_spill] sm:$0xff] %v10983_v10  ;;  %v6443_v25 = vor.u32 %v7647_v1, %v6440_v14  ;;  %4598 = vmatpush.bf16.msra.mxu2 %v6379_v4  ;;  %v6368_v4 = vld [vmem:[%s12668_s3 + $0xd8] sm:$0xf0] }
 0x53c   : > { %4248 = vmatmul.bf16.gmra.mxu2 %v9995_v27  ;;  %4297 = vmatmul.bf16.gmra.mxu3 %v13148_v30  ;;  %13150 = vst [vmem:[#allocation109_spill] sm:$0xff] %v10985_v51  ;;  %v4117_v51 = vadd.f32 %v10025_v11, %v10682_v33  ;;  %v7645_v11 = vld [vmem:[%s12668_s3 + $0x154] sm:$0xf]  ;;  %v6432_v33 = vld [vmem:[%s12668_s3 + $0x158] sm:$0xf0] }
 0x53d   : > { %4733 = vmatmul.bf16.gmra.mxu0 %v9529_v57  ;;  %4782 = vmatmul.bf16.gmra.mxu1 %v9531_v59 }
 0x53e   : > { %4647 = vmatpush.bf16.msra.mxu3 %v6443_v25 }
 0x53f   : > { %v4053_v29 = vpop.f32.mrf.mxu2  ;;  %v4102_v41 = vpop.f32.mrf.mxu3 }
 0x540   : > { %v4054_v15 = vadd.f32 %v4053_v29, %v10652_v58  ;;  %v7629_v58 = vld [vmem:[%s12668_s3 + $0xd4] sm:$0xf] }
 0x542   : > { %v10988_v12 = vadd.f32 %v4102_v41, %v4054_v15  ;;  %v10990_v34 = vpop.f32.mrf.mxu0  ;;  %v10992_v23 = vpop.f32.mrf.mxu1  ;;  %v13153_v41 = vld [vmem:[#allocation78_spill] sm:$0xff] }
 0x543   : > { %13151 = vst [vmem:[#allocation39_spill] sm:$0xff] %v10990_v34  ;;  %v4119_v15 = vadd.f32 %v13153_v41, %v10689_v55  ;;  %v7627_v55 = vld [vmem:[%s12668_s3 + $0xc4] sm:$0xf] }
 0x544   : > { %13152 = vst [vmem:[#allocation115_spill] sm:$0xff] %v10992_v23  ;;  %v13156_v23 = vld [vmem:[#allocation15_spill] sm:$0xff] }
 0x545   : > { %v4168_v34 = vadd.f32 %v13156_v23, %v4119_v15  ;;  %v6360_v23 = vld [vmem:[%s12668_s3 + $0xc8] sm:$0xf0]  ;;  %v13161_v15 = vld [vmem:[#allocation13_spill] sm:$0xff] }
 0x547   : > { %v4055_v37 = vpop.f32.mrf.mxu2  ;;  %v4104_v19 = vpop.f32.mrf.mxu3 }
 0x548   : > { %v4056_v32 = vadd.f32 %v4055_v37, %v10659_v53  ;;  %v6371_v53 = vor.u32 %v7629_v58, %v6368_v4 }
 0x54a   : > { %v10997_v1 = vadd.f32 %v4104_v19, %v4056_v32  ;;  %v4166_v32 = vadd.f32 %v10027_v5, %v4117_v51  ;;  %v6435_v19 = vor.u32 %v7645_v11, %v6432_v33  ;;  %4599 = vmatpush.bf16.msra.mxu2 %v6371_v53  ;;  %v11018_v37 = vpop.f32.mrf.mxu0  ;;  %v11020_v58 = vpop.f32.mrf.mxu1  ;;  %v13157_v51 = vld [vmem:[#allocation65_spill] sm:$0xff] }
 0x54b   : > { %13154 = vst [vmem:[#allocation43_spill] sm:$0xff] %v11018_v37  ;;  %v4122_v11 = vadd.f32 %v13157_v51, %v10712_v6  ;;  %v6363_v6 = vor.u32 %v7627_v55, %v6360_v23 }
 0x54c   : > { %4409 = vmatmul.bf16.vlgmr.msrb.gmra.mxu2 %v9471_v63  ;;  %4458 = vmatmul.bf16.vlgmr.msrb.gmra.mxu3 %v9473_v3  ;;  %13155 = vst [vmem:[#allocation155_spill] sm:$0xff] %v11020_v58 }
 0x54d   : > { %4738 = vmatmul.bf16.gmra.mxu0 %v9576_v40  ;;  %4787 = vmatmul.bf16.gmra.mxu1 %v9578_v28 }
 0x54e   : > { %4648 = vmatpush.bf16.msra.mxu3 %v6435_v19  ;;  %4600 = vmatpush.bf16.msra.mxu2 %v6363_v6 }
 0x54f   : > { %v4214_v14 = vpop.f32.mrf.mxu2  ;;  %v4263_v25 = vpop.f32.mrf.mxu3 }
 0x550   : > { %v4215_v29 = vadd.f32 %v4214_v14, %v4166_v32 }
 0x552   : > { %v11022_v4 = vadd.f32 %v4263_v25, %v4215_v29  ;;  %v11029_v33 = vpop.f32.mrf.mxu0  ;;  %v11031_v32 = vpop.f32.mrf.mxu1 }
 0x553   : > { %13158 = vst [vmem:[#allocation104_spill] sm:$0xff] %v11029_v33 }
 0x554   : > { %13159 = vst [vmem:[#allocation156_spill] sm:$0xff] %v11031_v32  ;;  %v13164_v32 = vld [vmem:[#allocation76_spill] sm:$0xff] }
 0x557   : > { %v4216_v10 = vpop.f32.mrf.mxu2  ;;  %v4265_v47 = vpop.f32.mrf.mxu3 }
 0x558   : > { %v4217_v5 = vadd.f32 %v4216_v10, %v4168_v34  ;;  %v6424_v34 = vld [vmem:[%s12668_s3 + $0x148] sm:$0xf0] }
 0x559   : > { %v13160_v10 = vld [vmem:[#allocation75_spill] sm:$0xff] }
 0x55a   : > { %v11027_v53 = vadd.f32 %v4265_v47, %v4217_v5  ;;  %v7643_v47 = vld [vmem:[%s12668_s3 + $0x144] sm:$0xf]  ;;  %v4171_v19 = vadd.f32 %v13160_v10, %v4122_v11  ;;  %v4124_v5 = vadd.f32 %v13161_v15, %v10719_v20  ;;  %v11054_v55 = vpop.f32.mrf.mxu0  ;;  %v11056_v23 = vpop.f32.mrf.mxu1  ;;  %v7625_v20 = vld [vmem:[%s12668_s3 + $0xb4] sm:$0xf] }
 0x55b   : > { %v6427_v14 = vor.u32 %v7643_v47, %v6424_v34  ;;  %13162 = vst [vmem:[#allocation112_spill] sm:$0xff] %v11054_v55  ;;  %v13165_v47 = vld [vmem:[#allocation14_spill] sm:$0xff] }
 0x55c   : > { %4414 = vmatmul.bf16.gmra.mxu2 %v9529_v57  ;;  %4463 = vmatmul.bf16.gmra.mxu3 %v9531_v59  ;;  %13163 = vst [vmem:[#allocation41_spill] sm:$0xff] %v11056_v23  ;;  %v4173_v58 = vadd.f32 %v13164_v32, %v4124_v5  ;;  %v4127_v34 = vadd.f32 %v13165_v47, %v10742_v35  ;;  %v6352_v32 = vld [vmem:[%s12668_s3 + $0xb8] sm:$0xf0]  ;;  %v7641_v35 = vld [vmem:[%s12668_s3 + $0x134] sm:$0xf]  ;;  %v13169_v5 = vld [vmem:[#allocation18_spill] sm:$0xff] }
 0x55d   : > { %4899 = vmatmul.bf16.vlgmr.msra.gmra.mxu0 %v13107_v42  ;;  %4948 = vmatmul.bf16.vlgmr.msra.gmra.mxu1 %v9426_v9 }
 0x55e   : > { %4649 = vmatpush.bf16.msra.mxu3 %v6427_v14 }
 0x55f   : > { %v4219_v25 = vpop.f32.mrf.mxu2  ;;  %v4268_v29 = vpop.f32.mrf.mxu3 }
 0x560   : > { %v4220_v41 = vadd.f32 %v4219_v25, %v4171_v19 }
 0x562   : > { %v11052_v51 = vadd.f32 %v4268_v29, %v4220_v41  ;;  %v11080_v29 = vpop.f32.mrf.mxu0  ;;  %v11082_v41 = vpop.f32.mrf.mxu1 }
 0x563   : > { %13167 = vst [vmem:[#allocation113_spill] sm:$0xff] %v11080_v29 }
 0x564   : > { %13168 = vst [vmem:[#allocation42_spill] sm:$0xff] %v11082_v41 }
 0x567   : > { %v4221_v33 = vpop.f32.mrf.mxu2  ;;  %v4270_v37 = vpop.f32.mrf.mxu3 }
 0x568   : > { %v4222_v11 = vadd.f32 %v4221_v33, %v4173_v58  ;;  %v6355_v58 = vor.u32 %v7625_v20, %v6352_v32  ;;  %v13166_v33 = vld [vmem:[#allocation82_spill] sm:$0xff] }
 0x569   : > { %v4176_v10 = vadd.f32 %v13166_v33, %v4127_v34  ;;  %v13170_v20 = vld [vmem:[#allocation66_spill] sm:$0xff] }
 0x56a   : > { %v11061_v6 = vadd.f32 %v4270_v37, %v4222_v11  ;;  %v6416_v37 = vld [vmem:[%s12668_s3 + $0x138] sm:$0xf0]  ;;  %4601 = vmatpush.bf16.msra.mxu2 %v6355_v58  ;;  %v4129_v11 = vadd.f32 %v13169_v5, %v10749_v17  ;;  %v11091_v58 = vpop.f32.mrf.mxu0  ;;  %v11093_v33 = vpop.f32.mrf.mxu1  ;;  %v7623_v17 = vld [vmem:[%s12668_s3 + $0xa4] sm:$0xf] }
 0x56b   : > { %v6419_v19 = vor.u32 %v7641_v35, %v6416_v37  ;;  %v13171_v35 = vld [vmem:[#allocation79_spill] sm:$0xff]  ;;  %13172 = vst [vmem:[#allocation119_spill] sm:$0xff] %v11091_v58 }
 0x56c   : > { %4419 = vmatmul.bf16.gmra.mxu2 %v9576_v40  ;;  %4468 = vmatmul.bf16.gmra.mxu3 %v9578_v28  ;;  %v4178_v32 = vadd.f32 %v13170_v20, %v4129_v11  ;;  %v4132_v37 = vadd.f32 %v13171_v35, %v10772_v38  ;;  %13173 = vst [vmem:[#allocation46_spill] sm:$0xff] %v11093_v33 }
 0x56d   : > { %4904 = vmatmul.bf16.gmra.mxu0 %v9473_v3  ;;  %4953 = vmatmul.bf16.gmra.mxu1 %v9476_v8 }
 0x56e   : > { %4650 = vmatpush.bf16.msra.mxu3 %v6419_v19  ;;  %v6408_v19 = vld [vmem:[%s12668_s3 + $0x128] sm:$0xf0] }
 0x56f   : > { %v4224_v14 = vpop.f32.mrf.mxu2  ;;  %v4273_v25 = vpop.f32.mrf.mxu3 }
 0x570   : > { %v4225_v15 = vadd.f32 %v4224_v14, %v4176_v10  ;;  %v13174_v10 = vld [vmem:[#allocation61_spill] sm:$0xff]  ;;  %v13175_v14 = vld [vmem:[#allocation16_spill] sm:$0xff] }
 0x572   : > { %v11086_v47 = vadd.f32 %v4273_v25, %v4225_v15  ;;  %v4181_v25 = vadd.f32 %v13175_v14, %v4132_v37 }
 0x577   : > { %v4226_v23 = vpop.f32.mrf.mxu2  ;;  %v4275_v55 = vpop.f32.mrf.mxu3 }
 0x578   : > { %v4227_v34 = vadd.f32 %v4226_v23, %v4178_v32  ;;  %v6344_v23 = vld [vmem:[%s12668_s3 + $0xa8] sm:$0xf0]  ;;  %v13176_v32 = vld [vmem:[#allocation80_spill] sm:$0xff] }
 0x579   : > { %v6347_v38 = vor.u32 %v7623_v17, %v6344_v23  ;;  %v11118_v17 = vpop.f32.mrf.mxu0  ;;  %v11120_v23 = vpop.f32.mrf.mxu1 }
 0x57a   : > { %v11095_v41 = vadd.f32 %v4275_v55, %v4227_v34  ;;  %v7639_v55 = vld [vmem:[%s12668_s3 + $0x124] sm:$0xf]  ;;  %v4134_v34 = vadd.f32 %v13176_v32, %v10779_v45  ;;  %13177 = vst [vmem:[#allocation157_spill] sm:$0xff] %v11120_v23  ;;  %v7621_v45 = vld [vmem:[%s12668_s3 + $0x94] sm:$0xf] }
 0x57b   : > { %v6411_v15 = vor.u32 %v7639_v55, %v6408_v19  ;;  %4602 = vmatpush.bf16.msra.mxu2 %v6347_v38  ;;  %v13179_v55 = vld [vmem:[#allocation85_spill] sm:$0xff] }
 0x57c   : > { %4424 = vmatmul.bf16.gmra.mxu2 %v13148_v30  ;;  %4473 = vmatmul.bf16.gmra.mxu3 %v13174_v10  ;;  %v13178_v10 = vld [vmem:[#allocation17_spill] sm:$0xff]  ;;  %v4137_v19 = vadd.f32 %v13179_v55, %v10802_v22  ;;  %v7637_v22 = vld [vmem:[%s12668_s3 + $0x114] sm:$0xf] }
 0x57d   : > { %4909 = vmatmul.bf16.gmra.mxu0 %v9531_v59  ;;  %4958 = vmatmul.bf16.gmra.mxu1 %v9534_v62  ;;  %v4183_v33 = vadd.f32 %v13178_v10, %v4134_v34  ;;  %v6336_v10 = vld [vmem:[%s12668_s3 + $0x98] sm:$0xf0]  ;;  %v13183_v34 = vld [vmem:[#allocation68_spill] sm:$0xff] }
 0x57e   : > { %4651 = vmatpush.bf16.msra.mxu3 %v6411_v15 }
 0x57f   : > { %v4229_v5 = vpop.f32.mrf.mxu2  ;;  %v4278_v11 = vpop.f32.mrf.mxu3 }
 0x580   : > { %v4230_v20 = vadd.f32 %v4229_v5, %v4181_v25  ;;  %v13182_v25 = vld [vmem:[#allocation21_spill] sm:$0xff] }
 0x581   : > { %v11145_v14 = vpop.f32.mrf.mxu1  ;;  %v4186_v15 = vadd.f32 %v13182_v25, %v4137_v19  ;;  %v7024_v25 = vld [vmem:[%s12668_s3 + $0x5f8] sm:$0xf0] }
 0x582   : > { %v11116_v35 = vadd.f32 %v4278_v11, %v4230_v20  ;;  %13181 = vst [vmem:[#allocation158_spill] sm:$0xff] %v11145_v14 }
 0x587   : > { %v4231_v58 = vpop.f32.mrf.mxu2  ;;  %v4280_v29 = vpop.f32.mrf.mxu3 }
 0x588   : > { %v4232_v37 = vadd.f32 %v4231_v58, %v4183_v33  ;;  %v6339_v58 = vor.u32 %v7621_v45, %v6336_v10  ;;  %v11143_v33 = vpop.f32.mrf.mxu0  ;;  %v13184_v45 = vld [vmem:[#allocation83_spill] sm:$0xff] }
 0x589   : > { %13180 = vst [vmem:[#allocation110_spill] sm:$0xff] %v11143_v33  ;;  %v11155_v14 = vpop.f32.mrf.mxu1 }
 0x58a   : > { %v11125_v38 = vadd.f32 %v4280_v29, %v4232_v37  ;;  %v6400_v29 = vld [vmem:[%s12668_s3 + $0x118] sm:$0xf0]  ;;  %4603 = vmatpush.bf16.msra.mxu2 %v6339_v58  ;;  %v4139_v37 = vadd.f32 %v13183_v34, %v10809_v50  ;;  %13186 = vst [vmem:[#allocation49_spill] sm:$0xff] %v11155_v14  ;;  %v7793_v50 = vld [vmem:[%s12668_s3 + $0x5f4] sm:$0xf] }
 0x58b   : > { %v6403_v5 = vor.u32 %v7637_v22, %v6400_v29  ;;  %v13187_v22 = vld [vmem:[#allocation19_spill] sm:$0xff] }
 0x58c   : > { %4429 = vmatmul.bf16.gmra.mxu2 %v9833_v61  ;;  %4478 = vmatmul.bf16.gmra.mxu3 %v9835_v18  ;;  %v4188_v10 = vadd.f32 %v13184_v45, %v4139_v37  ;;  %v4142_v29 = vadd.f32 %v13187_v22, %v10856_v39  ;;  %v6328_v39 = vld [vmem:[%s12668_s3 + $0x88] sm:$0xf0]  ;;  %v13188_v37 = vld [vmem:[#allocation84_spill] sm:$0xff] }
 0x58d   : > { %4914 = vmatmul.bf16.gmra.mxu0 %v9578_v28  ;;  %4963 = vmatmul.bf16.gmra.mxu1 %v9583_v52  ;;  %v6392_v34 = vld [vmem:[%s12668_s3 + $0x108] sm:$0xf0] }
 0x58e   : > { %4652 = vmatpush.bf16.msra.mxu3 %v6403_v5  ;;  %v7088_v5 = vld [vmem:[%s12668_s3 + $0x678] sm:$0xf0]  ;;  %v4191_v45 = vadd.f32 %v13188_v37, %v4142_v29  ;;  %v7789_v37 = vld [vmem:[%s12668_s3 + $0x5d4] sm:$0xf] }
 0x58f   : > { %v4234_v11 = vpop.f32.mrf.mxu2  ;;  %v4283_v20 = vpop.f32.mrf.mxu3 }
 0x590   : > { %v4235_v32 = vadd.f32 %v4234_v11, %v4186_v15  ;;  %v11153_v33 = vpop.f32.mrf.mxu0  ;;  %v7809_v15 = vld [vmem:[%s12668_s3 + $0x674] sm:$0xf] }
 0x591   : > { %13185 = vst [vmem:[#allocation122_spill] sm:$0xff] %v11153_v33 }
 0x592   : > { %v11150_v55 = vadd.f32 %v4283_v20, %v4235_v32  ;;  %v7091_v20 = vor.u32 %v7809_v15, %v7088_v5  ;;  %v7635_v32 = vld [vmem:[%s12668_s3 + $0x104] sm:$0xf]  ;;  %v13189_v5 = vld [vmem:[#allocation20_spill] sm:$0xff] }
 0x593   : > { %v7807_v15 = vld [vmem:[%s12668_s3 + $0x664] sm:$0xf] }
 0x594   : > { %5136 = vmatpush.bf16.msrb.mxu1 %v7091_v20 }
 0x597   : > { %v4236_v28 = vpop.f32.mrf.mxu2  ;;  %v4285_v23 = vpop.f32.mrf.mxu3 }
 0x598   : > { %v4237_v19 = vadd.f32 %v4236_v28, %v4188_v10  ;;  %v7619_v28 = vld [vmem:[%s12668_s3 + $0x84] sm:$0xf]  ;;  %v6395_v10 = vor.u32 %v7635_v32, %v6392_v34  ;;  %v11204_v20 = vpop.f32.mrf.mxu0  ;;  %v11206_v32 = vpop.f32.mrf.mxu1 }
 0x599   : > { %v6331_v11 = vor.u32 %v7619_v28, %v6328_v39  ;;  %v7080_v39 = vld [vmem:[%s12668_s3 + $0x668] sm:$0xf0]  ;;  %13190 = vst [vmem:[#allocation116_spill] sm:$0xff] %v11204_v20 }
 0x59a   : > { %v11159_v58 = vadd.f32 %v4285_v23, %v4237_v19  ;;  %v7027_v23 = vor.u32 %v7793_v50, %v7024_v25  ;;  %v7791_v50 = vld [vmem:[%s12668_s3 + $0x5e4] sm:$0xf]  ;;  %v7016_v25 = vld [vmem:[%s12668_s3 + $0x5e8] sm:$0xf0]  ;;  %4653 = vmatpush.bf16.msra.mxu3 %v6395_v10  ;;  %13191 = vst [vmem:[#allocation44_spill] sm:$0xff] %v11206_v32 }
 0x59b   : > { %4604 = vmatpush.bf16.msra.mxu2 %v6331_v11  ;;  %v7019_v29 = vor.u32 %v7791_v50, %v7016_v25  ;;  %v4144_v11 = vadd.f32 %v13189_v5, %v10887_v44  ;;  %v7805_v44 = vld [vmem:[%s12668_s3 + $0x654] sm:$0xf]  ;;  %v13192_v50 = vld [vmem:[#allocation89_spill] sm:$0xff] }
 0x59c   : > { %4434 = vmatmul.bf16.gmra.mxu2 %v9939_v60  ;;  %4483 = vmatmul.bf16.gmra.mxu3 %v9941_v7 }
 0x59d   : > { %4919 = vmatmul.bf16.gmra.mxu0 %v9722_v13  ;;  %4968 = vmatmul.bf16.gmra.mxu1 %v9727_v0  ;;  %v4193_v25 = vadd.f32 %v13192_v50, %v4144_v11  ;;  %v7064_v11 = vld [vmem:[%s12668_s3 + $0x648] sm:$0xf0]  ;;  %v6992_v50 = vld [vmem:[%s12668_s3 + $0x5b8] sm:$0xf0] }
 0x59e   : > { %5087 = vmatpush.bf16.msrb.mxu0 %v7027_v23  ;;  %v7083_v23 = vor.u32 %v7807_v15, %v7080_v39  ;;  %v7000_v39 = vld [vmem:[%s12668_s3 + $0x5c8] sm:$0xf0] }
 0x59f   : > { %v4239_v19 = vpop.f32.mrf.mxu2  ;;  %v4288_v22 = vpop.f32.mrf.mxu3 }
 0x5a0   : > { %v4240_v28 = vadd.f32 %v4239_v19, %v4191_v45  ;;  %5137 = vmatpush.bf16.msrb.mxu1 %v7083_v23  ;;  %v7008_v45 = vld [vmem:[%s12668_s3 + $0x5d8] sm:$0xf0]  ;;  %v7803_v23 = vld [vmem:[%s12668_s3 + $0x644] sm:$0xf] }
 0x5a1   : > { %v7011_v10 = vor.u32 %v7789_v37, %v7008_v45  ;;  %v7072_v19 = vld [vmem:[%s12668_s3 + $0x658] sm:$0xf0]  ;;  %v7067_v45 = vor.u32 %v7803_v23, %v7064_v11 }
 0x5a2   : > { %v11208_v34 = vadd.f32 %v4288_v22, %v4240_v28  ;;  %5088 = vmatpush.bf16.msrb.mxu0 %v7019_v29  ;;  %v7075_v22 = vor.u32 %v7805_v44, %v7072_v19  ;;  %v7787_v29 = vld [vmem:[%s12668_s3 + $0x5c4] sm:$0xf]  ;;  %v13193_v44 = vld [vmem:[#allocation24_spill] sm:$0xff] }
 0x5a3   : > { %v7003_v37 = vor.u32 %v7787_v29, %v7000_v39  ;;  %v11250_v29 = vpop.f32.mrf.mxu1  ;;  %v6640_v39 = vld [vmem:[%s12668_s3 + $0x2f8] sm:$0xf0] }
 0x5a4   : > { %5138 = vmatpush.bf16.msrb.mxu1 %v7075_v22  ;;  %v7785_v22 = vld [vmem:[%s12668_s3 + $0x5b4] sm:$0xf]  ;;  %13195 = vst [vmem:[#allocation47_spill] sm:$0xff] %v11250_v29  ;;  %v13197_v29 = vld [vmem:[#allocation141_spill] sm:$0xff] }
 0x5a5   : > { %v6995_v23 = vor.u32 %v7785_v22, %v6992_v50 }
 0x5a6   : > { %5089 = vmatpush.bf16.msrb.mxu0 %v7011_v10  ;;  %v4147_v10 = vadd.f32 %v13193_v44, %v10934_v31  ;;  %v13196_v31 = vld [vmem:[#allocation64_spill] sm:$0xff]  ;;  %v6704_v44 = vld [vmem:[%s12668_s3 + $0x378] sm:$0xf0] }
 0x5a7   : > { %v4241_v15 = vpop.f32.mrf.mxu2  ;;  %v4290_v28 = vpop.f32.mrf.mxu3 }
 0x5a8   : > { %v4242_v5 = vadd.f32 %v4241_v15, %v4193_v25  ;;  %5139 = vmatpush.bf16.msrb.mxu1 %v7067_v45  ;;  %v7801_v25 = vld [vmem:[%s12668_s3 + $0x634] sm:$0xf]  ;;  %v11248_v15 = vpop.f32.mrf.mxu0  ;;  %v4196_v22 = vadd.f32 %v13197_v29, %v4147_v10  ;;  %v7048_v29 = vld [vmem:[%s12668_s3 + $0x628] sm:$0xf0] }
 0x5a9   : > { %13194 = vst [vmem:[#allocation120_spill] sm:$0xff] %v11248_v15  ;;  %v7713_v45 = vld [vmem:[%s12668_s3 + $0x374] sm:$0xf] }
 0x5aa   : > { %v11237_v19 = vadd.f32 %v4290_v28, %v4242_v5  ;;  %5090 = vmatpush.bf16.msrb.mxu0 %v7003_v37  ;;  %v7697_v28 = vld [vmem:[%s12668_s3 + $0x2f4] sm:$0xf]  ;;  %v7056_v5 = vld [vmem:[%s12668_s3 + $0x638] sm:$0xf0]  ;;  %v6707_v50 = vor.u32 %v7713_v45, %v6704_v44 }
 0x5ab   : > { %v6643_v37 = vor.u32 %v7697_v28, %v6640_v39  ;;  %v7059_v11 = vor.u32 %v7801_v25, %v7056_v5  ;;  %v7783_v25 = vld [vmem:[%s12668_s3 + $0x5a4] sm:$0xf]  ;;  %v6984_v28 = vld [vmem:[%s12668_s3 + $0x5a8] sm:$0xf0]  ;;  %v7781_v44 = vld [vmem:[%s12668_s3 + $0x594] sm:$0xf] }
 0x5ac   : > { %4439 = vmatmul.bf16.gmra.mxu2 %v9990_v2  ;;  %4488 = vmatmul.bf16.gmra.mxu3 %v13196_v31  ;;  %v7799_v39 = vld [vmem:[%s12668_s3 + $0x624] sm:$0xf]  ;;  %v6987_v10 = vor.u32 %v7783_v25, %v6984_v28  ;;  %v11302_v28 = vpop.f32.mrf.mxu1 }
 0x5ad   : > { %4924 = vmatmul.bf16.gmra.mxu0 %v9835_v18  ;;  %4973 = vmatmul.bf16.gmra.mxu1 %v9838_v56  ;;  %13200 = vst [vmem:[#allocation45_spill] sm:$0xff] %v11302_v28  ;;  %v13203_v28 = vld [vmem:[#allocation10_spill] sm:$0xff] }
 0x5ae   : > { %5091 = vmatpush.bf16.msrb.mxu0 %v6995_v23  ;;  %4793 = vmatpush.bf16.msrb.mxu2 %v6643_v37  ;;  %v7051_v23 = vor.u32 %v7799_v39, %v7048_v29  ;;  %v13198_v37 = vld [vmem:[#allocation173_spill] sm:$0xff] }
 0x5af   : > { %v4244_v15 = vpop.f32.mrf.mxu2  ;;  %v4293_v32 = vpop.f32.mrf.mxu3  ;;  %5140 = vmatpush.bf16.msrb.mxu1 %v7059_v11  ;;  %4842 = vmatpush.bf16.msrb.mxu3 %v6707_v50  ;;  %v4149_v11 = vadd.f32 %v13198_v37, %v10965_v46  ;;  %v7040_v46 = vld [vmem:[%s12668_s3 + $0x618] sm:$0xf0]  ;;  %v6968_v37 = vld [vmem:[%s12668_s3 + $0x588] sm:$0xf0] }
 0x5b0   : > { %v4245_v5 = vadd.f32 %v4244_v15, %v4196_v22  ;;  %v6976_v15 = vld [vmem:[%s12668_s3 + $0x598] sm:$0xf0]  ;;  %v7797_v22 = vld [vmem:[%s12668_s3 + $0x614] sm:$0xf]  ;;  %v11300_v25 = vpop.f32.mrf.mxu0 }
 0x5b1   : > { %v6979_v50 = vor.u32 %v7781_v44, %v6976_v15  ;;  %13199 = vst [vmem:[#allocation117_spill] sm:$0xff] %v11300_v25  ;;  %v13201_v39 = vld [vmem:[#allocation73_spill] sm:$0xff]  ;;  %v7795_v44 = vld [vmem:[%s12668_s3 + $0x604] sm:$0xf]  ;;  %v13204_v25 = vld [vmem:[#allocation72_spill] sm:$0xff] }
 0x5b2   : > { %v11286_v45 = vadd.f32 %v4293_v32, %v4245_v5  ;;  %5092 = vmatpush.bf16.msrb.mxu0 %v6987_v10  ;;  %v7043_v32 = vor.u32 %v7797_v22, %v7040_v46  ;;  %v4198_v5 = vadd.f32 %v13201_v39, %v4149_v11  ;;  %v7032_v11 = vld [vmem:[%s12668_s3 + $0x608] sm:$0xf0]  ;;  %v13202_v46 = vld [vmem:[#allocation142_spill] sm:$0xff] }
 0x5b3   : > { %5141 = vmatpush.bf16.msrb.mxu1 %v7051_v23  ;;  %v7779_v23 = vld [vmem:[%s12668_s3 + $0x584] sm:$0xf] }
 0x5b4   : > { %v6971_v22 = vor.u32 %v7779_v23, %v6968_v37  ;;  %v6696_v23 = vld [vmem:[%s12668_s3 + $0x368] sm:$0xf0]  ;;  %v13205_v37 = vld [vmem:[#allocation86_spill] sm:$0xff] }
 0x5b6   : > { %5093 = vmatpush.bf16.msrb.mxu0 %v6979_v50  ;;  %v7035_v50 = vor.u32 %v7795_v44, %v7032_v11 }
 0x5b7   : > { %v4246_v10 = vpop.f32.mrf.mxu2  ;;  %v4295_v29 = vpop.f32.mrf.mxu3  ;;  %5142 = vmatpush.bf16.msrb.mxu1 %v7043_v32  ;;  %v4152_v32 = vadd.f32 %v13202_v46, %v10988_v12 }
 0x5b8   : > { %v4247_v15 = vadd.f32 %v4246_v10, %v4198_v5  ;;  %v7695_v5 = vld [vmem:[%s12668_s3 + $0x2e4] sm:$0xf]  ;;  %v6632_v10 = vld [vmem:[%s12668_s3 + $0x2e8] sm:$0xf0]  ;;  %v11340_v46 = vpop.f32.mrf.mxu1 }
 0x5b9   : > { %v6635_v12 = vor.u32 %v7695_v5, %v6632_v10  ;;  %v4201_v44 = vadd.f32 %v13205_v37, %v4152_v32  ;;  %13206 = vst [vmem:[#allocation159_spill] sm:$0xff] %v11340_v46  ;;  %v4154_v5 = vadd.f32 %v10344_v24, %v10997_v1  ;;  %v7693_v24 = vld [vmem:[%s12668_s3 + $0x2d4] sm:$0xf] }
 0x5ba   : > { %v11319_v39 = vadd.f32 %v4295_v29, %v4247_v15  ;;  %5094 = vmatpush.bf16.msrb.mxu0 %v6971_v22  ;;  %v7711_v29 = vld [vmem:[%s12668_s3 + $0x364] sm:$0xf] }
 0x5bb   : > { %5143 = vmatpush.bf16.msrb.mxu1 %v7035_v50  ;;  %v6699_v15 = vor.u32 %v7711_v29, %v6696_v23  ;;  %4794 = vmatpush.bf16.msrb.mxu2 %v6635_v12  ;;  %v11338_v50 = vpop.f32.mrf.mxu0  ;;  %v4203_v20 = vadd.f32 %v10346_v43, %v4154_v5  ;;  %v13207_v29 = vld [vmem:[#allocation22_spill] sm:$0xff]  ;;  %v6624_v43 = vld [vmem:[%s12668_s3 + $0x2d8] sm:$0xf0] }
 0x5bc   : > { %4444 = vmatmul.bf16.gmra.mxu2 %v13203_v28  ;;  %4493 = vmatmul.bf16.gmra.mxu3 %v13204_v25  ;;  %v4313_v23 = vadd.f32 %v13207_v29, %v11022_v4  ;;  %v6627_v1 = vor.u32 %v7693_v24, %v6624_v43  ;;  %v7709_v4 = vld [vmem:[%s12668_s3 + $0x354] sm:$0xf]  ;;  %v13213_v24 = vld [vmem:[#allocation23_spill] sm:$0xff] }
 0x5bd   : > { %4929 = vmatmul.bf16.gmra.mxu0 %v9941_v7  ;;  %4978 = vmatmul.bf16.gmra.mxu1 %v9944_v36 }
 0x5be   : > { %4843 = vmatpush.bf16.msrb.mxu3 %v6699_v15  ;;  %v13211_v15 = vld [vmem:[#allocation175_spill] sm:$0xff] }
 0x5bf   : > { %v4249_v22 = vpop.f32.mrf.mxu2  ;;  %v4298_v11 = vpop.f32.mrf.mxu3  ;;  %4795 = vmatpush.bf16.msrb.mxu2 %v6627_v1 }
 0x5c0   : > { %v4250_v25 = vadd.f32 %v4249_v22, %v4201_v44  ;;  %v11351_v37 = vpop.f32.mrf.mxu1  ;;  %v13210_v44 = vld [vmem:[#allocation174_spill] sm:$0xff] }
 0x5c1   : > { %13209 = vst [vmem:[#allocation160_spill] sm:$0xff] %v11351_v37 }
 0x5c2   : > { %v11344_v10 = vadd.f32 %v4298_v11, %v4250_v25 }
 0x5c3   : > { %v11349_v12 = vpop.f32.mrf.mxu0 }
 0x5c4   : > { %13208 = vst [vmem:[#allocation114_spill] sm:$0xff] %v11349_v12 }
 0x5c7   : > { %v4251_v14 = vpop.f32.mrf.mxu2  ;;  %v4300_v33 = vpop.f32.mrf.mxu3 }
 0x5c8   : > { %v4252_v32 = vadd.f32 %v4251_v14, %v4203_v20  ;;  %v13212_v14 = vld [vmem:[#allocation88_spill] sm:$0xff] }
 0x5c9   : > { %v4362_v20 = vadd.f32 %v13212_v14, %v4313_v23 }
 0x5ca   : > { %v11353_v46 = vadd.f32 %v4300_v33, %v4252_v32  ;;  %v6688_v33 = vld [vmem:[%s12668_s3 + $0x358] sm:$0xf0]  ;;  %v4315_v32 = vadd.f32 %v10375_v48, %v11027_v53  ;;  %v7691_v48 = vld [vmem:[%s12668_s3 + $0x2c4] sm:$0xf]  ;;  %v6616_v53 = vld [vmem:[%s12668_s3 + $0x2c8] sm:$0xf0] }
 0x5cb   : > { %v6691_v25 = vor.u32 %v7709_v4, %v6688_v33  ;;  %v13214_v4 = vld [vmem:[#allocation143_spill] sm:$0xff] }
 0x5cc   : > { %4605 = vmatmul.bf16.vlgmr.msra.gmra.mxu2 %v13210_v44  ;;  %4654 = vmatmul.bf16.vlgmr.msra.gmra.mxu3 %v13211_v15  ;;  %v11376_v44 = vpop.f32.mrf.mxu0  ;;  %v11378_v15 = vpop.f32.mrf.mxu1  ;;  %v4364_v43 = vadd.f32 %v13213_v24, %v4315_v32  ;;  %v4318_v33 = vadd.f32 %v13214_v4, %v11052_v51  ;;  %v7707_v51 = vld [vmem:[%s12668_s3 + $0x344] sm:$0xf]  ;;  %v4320_v24 = vadd.f32 %v10406_v16, %v11061_v6  ;;  %v7689_v16 = vld [vmem:[%s12668_s3 + $0x2b4] sm:$0xf]  ;;  %v6608_v6 = vld [vmem:[%s12668_s3 + $0x2b8] sm:$0xf0] }
 0x5cd   : > { %4934 = vmatmul.bf16.gmra.mxu0 %v13196_v31  ;;  %4983 = vmatmul.bf16.gmra.mxu1 %v9995_v27 }
 0x5ce   : > { %4844 = vmatpush.bf16.msrb.mxu3 %v6691_v25 }
 0x5cf   : > { %v4410_v22 = vpop.f32.mrf.mxu2  ;;  %v4459_v11 = vpop.f32.mrf.mxu3 }
 0x5d0   : > { %v4411_v5 = vadd.f32 %v4410_v22, %v4362_v20  ;;  %v13217_v20 = vld [vmem:[#allocation77_spill] sm:$0xff] }
 0x5d1   : > { %v4367_v25 = vadd.f32 %v13217_v20, %v4318_v33  ;;  %v6611_v20 = vor.u32 %v7689_v16, %v6608_v6 }
 0x5d2   : > { %v11374_v29 = vadd.f32 %v4459_v11, %v4411_v5 }
 0x5d4   : > { %v11403_v14 = vpop.f32.mrf.mxu1 }
 0x5d5   : > { %13216 = vst [vmem:[#allocation48_spill] sm:$0xff] %v11403_v14 }
 0x5d7   : > { %v4412_v37 = vpop.f32.mrf.mxu2  ;;  %v4461_v12 = vpop.f32.mrf.mxu3 }
 0x5d8   : > { %v4413_v23 = vadd.f32 %v4412_v37, %v4364_v43  ;;  %v6619_v37 = vor.u32 %v7691_v48, %v6616_v53 }
 0x5da   : > { %v11383_v1 = vadd.f32 %v4461_v12, %v4413_v23  ;;  %v11401_v12 = vpop.f32.mrf.mxu0  ;;  %4796 = vmatpush.bf16.msrb.mxu2 %v6619_v37  ;;  %v13218_v23 = vld [vmem:[#allocation144_spill] sm:$0xff] }
 0x5db   : > { %13215 = vst [vmem:[#allocation121_spill] sm:$0xff] %v11401_v12  ;;  %v4369_v4 = vadd.f32 %v13218_v23, %v4320_v24 }
 0x5dc   : > { %4610 = vmatmul.bf16.gmra.mxu2 %v13107_v42  ;;  %4659 = vmatmul.bf16.gmra.mxu3 %v9426_v9  ;;  %v6680_v42 = vld [vmem:[%s12668_s3 + $0x348] sm:$0xf0]  ;;  %v11413_v14 = vpop.f32.mrf.mxu1 }
 0x5dd   : > { %5095 = vmatmul.bf16.vlgmr.msrb.gmra.mxu0 %v9727_v0  ;;  %5144 = vmatmul.bf16.vlgmr.msrb.gmra.mxu1 %v9471_v63  ;;  %v6683_v22 = vor.u32 %v7707_v51, %v6680_v42  ;;  %13219 = vst [vmem:[#allocation124_spill] sm:$0xff] %v11413_v14  ;;  %v13220_v51 = vld [vmem:[#allocation90_spill] sm:$0xff] }
 0x5de   : > { %v4323_v42 = vadd.f32 %v13220_v51, %v11086_v47  ;;  %v7705_v47 = vld [vmem:[%s12668_s3 + $0x334] sm:$0xf]  ;;  %4797 = vmatpush.bf16.msrb.mxu2 %v6611_v20  ;;  %v13224_v51 = vld [vmem:[#allocation94_spill] sm:$0xff] }
 0x5df   : > { %v4415_v11 = vpop.f32.mrf.mxu2  ;;  %v4464_v5 = vpop.f32.mrf.mxu3  ;;  %4845 = vmatpush.bf16.msrb.mxu3 %v6683_v22  ;;  %v13221_v22 = vld [vmem:[#allocation25_spill] sm:$0xff] }
 0x5e0   : > { %v4416_v32 = vadd.f32 %v4415_v11, %v4367_v25  ;;  %v6672_v25 = vld [vmem:[%s12668_s3 + $0x338] sm:$0xf0]  ;;  %v4372_v11 = vadd.f32 %v13221_v22, %v4323_v42 }
 0x5e2   : > { %v11408_v43 = vadd.f32 %v4464_v5, %v4416_v32  ;;  %v11411_v12 = vpop.f32.mrf.mxu0  ;;  %v6675_v5 = vor.u32 %v7705_v47, %v6672_v25  ;;  %v13225_v47 = vld [vmem:[#allocation96_spill] sm:$0xff] }
 0x5e3   : > { %v4328_v25 = vadd.f32 %v13225_v47, %v11116_v35  ;;  %v7687_v35 = vld [vmem:[%s12668_s3 + $0x2a4] sm:$0xf] }
 0x5e4   : > { %4846 = vmatpush.bf16.msrb.mxu3 %v6675_v5  ;;  %v7703_v5 = vld [vmem:[%s12668_s3 + $0x324] sm:$0xf] }
 0x5e7   : > { %v4417_v48 = vpop.f32.mrf.mxu2  ;;  %v4466_v53 = vpop.f32.mrf.mxu3 }
 0x5e8   : > { %v4418_v33 = vadd.f32 %v4417_v48, %v4369_v4  ;;  %v4325_v4 = vadd.f32 %v10437_v49, %v11095_v41  ;;  %v13228_v49 = vld [vmem:[#allocation28_spill] sm:$0xff] }
 0x5e9   : > { %v4377_v41 = vadd.f32 %v13228_v49, %v4328_v25 }
 0x5ea   : > { %v11417_v37 = vadd.f32 %v4466_v53, %v4418_v33  ;;  %v11438_v48 = vpop.f32.mrf.mxu0  ;;  %v11440_v53 = vpop.f32.mrf.mxu1  ;;  %v4374_v16 = vadd.f32 %v13224_v51, %v4325_v4  ;;  %v6664_v4 = vld [vmem:[%s12668_s3 + $0x328] sm:$0xf0] }
 0x5eb   : > { %13222 = vst [vmem:[#allocation50_spill] sm:$0xff] %v11438_v48  ;;  %v13231_v48 = vld [vmem:[#allocation146_spill] sm:$0xff] }
 0x5ec   : > { %4615 = vmatmul.bf16.gmra.mxu2 %v9473_v3  ;;  %4664 = vmatmul.bf16.gmra.mxu3 %v9476_v8  ;;  %13223 = vst [vmem:[#allocation126_spill] sm:$0xff] %v11440_v53 }
 0x5ed   : > { %5100 = vmatmul.bf16.gmra.mxu0 %v9838_v56  ;;  %5149 = vmatmul.bf16.gmra.mxu1 %v9529_v57 }
 0x5ef   : > { %v4420_v32 = vpop.f32.mrf.mxu2  ;;  %v4469_v24 = vpop.f32.mrf.mxu3 }
 0x5f0   : > { %v4421_v23 = vadd.f32 %v4420_v32, %v4372_v11 }
 0x5f2   : > { %v11442_v33 = vadd.f32 %v4469_v24, %v4421_v23  ;;  %v11449_v22 = vpop.f32.mrf.mxu0  ;;  %v11451_v11 = vpop.f32.mrf.mxu1 }
 0x5f3   : > { %13226 = vst [vmem:[#allocation52_spill] sm:$0xff] %v11449_v22 }
 0x5f4   : > { %13227 = vst [vmem:[#allocation118_spill] sm:$0xff] %v11451_v11  ;;  %v13230_v11 = vld [vmem:[#allocation81_spill] sm:$0xff] }
 0x5f7   : > { %v4422_v6 = vpop.f32.mrf.mxu2  ;;  %v4471_v14 = vpop.f32.mrf.mxu3 }
 0x5f8   : > { %v4423_v42 = vadd.f32 %v4422_v6, %v4374_v16  ;;  %v6667_v16 = vor.u32 %v7703_v5, %v6664_v4  ;;  %v13229_v6 = vld [vmem:[#allocation145_spill] sm:$0xff] }
 0x5fa   : > { %v11447_v20 = vadd.f32 %v4471_v14, %v4423_v42  ;;  %v6600_v14 = vld [vmem:[%s12668_s3 + $0x2a8] sm:$0xf0]  ;;  %v4330_v42 = vadd.f32 %v13229_v6, %v11125_v38  ;;  %4847 = vmatpush.bf16.msrb.mxu3 %v6667_v16  ;;  %v11474_v25 = vpop.f32.mrf.mxu0  ;;  %v11476_v49 = vpop.f32.mrf.mxu1  ;;  %v13232_v38 = vld [vmem:[#allocation69_spill] sm:$0xff] }
 0x5fb   : > { %v6603_v23 = vor.u32 %v7687_v35, %v6600_v14 }
 0x5fc   : > { %4620 = vmatmul.bf16.gmra.mxu2 %v9531_v59  ;;  %4669 = vmatmul.bf16.gmra.mxu3 %v9534_v62  ;;  %v4379_v22 = vadd.f32 %v13230_v11, %v4330_v42  ;;  %v7685_v11 = vld [vmem:[%s12668_s3 + $0x294] sm:$0xf]  ;;  %v13234_v42 = vld [vmem:[#allocation26_spill] sm:$0xff] }
 0x5fd   : > { %5105 = vmatmul.bf16.gmra.mxu0 %v9944_v36  ;;  %5154 = vmatmul.bf16.gmra.mxu1 %v9576_v40 }
 0x5fe   : > { %4798 = vmatpush.bf16.msrb.mxu2 %v6603_v23  ;;  %v6656_v23 = vld [vmem:[%s12668_s3 + $0x318] sm:$0xf0] }
 0x5ff   : > { %v4425_v32 = vpop.f32.mrf.mxu2  ;;  %v4474_v24 = vpop.f32.mrf.mxu3 }
 0x600   : > { %v4426_v51 = vadd.f32 %v4425_v32, %v4377_v41  ;;  %v4333_v41 = vadd.f32 %v13231_v48, %v11150_v55  ;;  %v13233_v32 = vld [vmem:[#allocation92_spill] sm:$0xff]  ;;  %v6592_v55 = vld [vmem:[%s12668_s3 + $0x298] sm:$0xf0] }
 0x602   : > { %v11472_v47 = vadd.f32 %v4474_v24, %v4426_v51  ;;  %v4382_v24 = vadd.f32 %v13233_v32, %v4333_v41  ;;  %v11500_v4 = vpop.f32.mrf.mxu0  ;;  %v11502_v51 = vpop.f32.mrf.mxu1  ;;  %v11508_v41 = vadd.f32 %v10691_v21, %v11374_v29  ;;  %v13239_v29 = vld [vmem:[#allocation91_spill] sm:$0xff] }
 0x604   : > { %13235 = vst [vmem:[#allocation161_spill] sm:$0xff] %v11508_v41 }
 0x607   : > { %v4427_v35 = vpop.f32.mrf.mxu2  ;;  %v4476_v14 = vpop.f32.mrf.mxu3 }
 0x608   : > { %v4428_v53 = vadd.f32 %v4427_v35, %v4379_v22  ;;  %v6595_v22 = vor.u32 %v7685_v11, %v6592_v55  ;;  %v4335_v35 = vadd.f32 %v13234_v42, %v11159_v58  ;;  %v13237_v55 = vld [vmem:[#allocation93_spill] sm:$0xff] }
 0x60a   : > { %v11481_v5 = vadd.f32 %v4476_v14, %v4428_v53  ;;  %4799 = vmatpush.bf16.msrb.mxu2 %v6595_v22  ;;  %v13238_v22 = vld [vmem:[#allocation27_spill] sm:$0xff] }
 0x60b   : > { %v4338_v58 = vadd.f32 %v13238_v22, %v11208_v34  ;;  %v13243_v34 = vld [vmem:[#allocation100_spill] sm:$0xff] }
 0x60c   : > { %4625 = vmatmul.bf16.gmra.mxu2 %v9673_v26  ;;  %4674 = vmatmul.bf16.gmra.mxu3 %v13232_v38  ;;  %v7701_v26 = vld [vmem:[%s12668_s3 + $0x314] sm:$0xf] }
 0x60d   : > { %5110 = vmatmul.bf16.gmra.mxu0 %v9995_v27  ;;  %5159 = vmatmul.bf16.gmra.mxu1 %v13148_v30  ;;  %v6659_v6 = vor.u32 %v7701_v26, %v6656_v23  ;;  %v4384_v27 = vadd.f32 %v13237_v55, %v4335_v35  ;;  %v11520_v23 = vpop.f32.mrf.mxu1  ;;  %v4387_v42 = vadd.f32 %v13243_v34, %v4338_v58  ;;  %v6584_v35 = vld [vmem:[%s12668_s3 + $0x288] sm:$0xf0]  ;;  %v13245_v34 = vld [vmem:[#allocation101_spill] sm:$0xff] }
 0x60f   : > { %v4430_v48 = vpop.f32.mrf.mxu2  ;;  %v4479_v53 = vpop.f32.mrf.mxu3  ;;  %4848 = vmatpush.bf16.msrb.mxu3 %v6659_v6 }
 0x610   : > { %v4431_v16 = vadd.f32 %v4430_v48, %v4382_v24 }
 0x612   : > { %v4480_v14 = vadd.f32 %v4479_v53, %v4431_v16  ;;  %v11518_v53 = vpop.f32.mrf.mxu0  ;;  %v13241_v16 = vld [vmem:[#allocation111_spill] sm:$0xff] }
 0x614   : > { %v11511_v32 = vadd.f32 %v10811_v54, %v4480_v14  ;;  %v11524_v54 = vadd.f32 %v13239_v29, %v11383_v1  ;;  %v7683_v1 = vld [vmem:[%s12668_s3 + $0x284] sm:$0xf] }
 0x615   : > { %v7699_v14 = vld [vmem:[%s12668_s3 + $0x304] sm:$0xf] }
 0x616   : > { %13236 = vst [vmem:[#allocation162_spill] sm:$0xff] %v11511_v32 }
 0x617   : > { %v4432_v24 = vpop.f32.mrf.mxu2  ;;  %v4481_v26 = vpop.f32.mrf.mxu3  ;;  %13240 = vst [vmem:[#allocation130_spill] sm:$0xff] %v11524_v54 }
 0x618   : > { %v4433_v48 = vadd.f32 %v4432_v24, %v4384_v27  ;;  %v11552_v27 = vadd.f32 %v13245_v34, %v11408_v43  ;;  %v13253_v34 = vld [vmem:[#allocation154_spill] sm:$0xff] }
 0x61a   : > { %v4482_v21 = vadd.f32 %v4481_v26, %v4433_v48  ;;  %v6587_v26 = vor.u32 %v7683_v1, %v6584_v35  ;;  %v6648_v48 = vld [vmem:[%s12668_s3 + $0x308] sm:$0xf0]  ;;  %13246 = vst [vmem:[#allocation125_spill] sm:$0xff] %v11552_v27  ;;  %v11554_v11 = vpop.f32.mrf.mxu0  ;;  %v13247_v1 = vld [vmem:[#allocation153_spill] sm:$0xff] }
 0x61b   : > { %v6651_v58 = vor.u32 %v7699_v14, %v6648_v48  ;;  %v13249_v14 = vld [vmem:[#allocation147_spill] sm:$0xff] }
 0x61c   : > { %v11527_v6 = vadd.f32 %v13241_v16, %v4482_v21  ;;  %4630 = vmatmul.bf16.gmra.mxu2 %v9722_v13  ;;  %4679 = vmatmul.bf16.gmra.mxu3 %v9727_v0  ;;  %v13244_v21 = vld [vmem:[#allocation31_spill] sm:$0xff] }
 0x61d   : > { %5115 = vmatmul.bf16.gmra.mxu0 %v9476_v8  ;;  %5164 = vmatmul.bf16.gmra.mxu1 %v9833_v61  ;;  %v4340_v29 = vadd.f32 %v13244_v21, %v11237_v19  ;;  %v13250_v48 = vld [vmem:[#allocation87_spill] sm:$0xff] }
 0x61e   : > { %13242 = vst [vmem:[#allocation55_spill] sm:$0xff] %v11527_v6  ;;  %4800 = vmatpush.bf16.msrb.mxu2 %v6587_v26  ;;  %4849 = vmatpush.bf16.msrb.mxu3 %v6651_v58  ;;  %v11556_v6 = vpop.f32.mrf.mxu1  ;;  %v13251_v58 = vld [vmem:[#allocation102_spill] sm:$0xff] }
 0x61f   : > { %v4435_v55 = vpop.f32.mrf.mxu2  ;;  %v4484_v24 = vpop.f32.mrf.mxu3  ;;  %v11568_v21 = vadd.f32 %v13251_v58, %v11417_v37  ;;  %v13256_v37 = vld [vmem:[#allocation148_spill] sm:$0xff] }
 0x620   : > { %v4436_v22 = vadd.f32 %v4435_v55, %v4387_v42  ;;  %v4389_v55 = vadd.f32 %v13249_v14, %v4340_v29  ;;  %v7761_v14 = vld [vmem:[%s12668_s3 + $0x4f4] sm:$0xf]  ;;  %v13258_v42 = vld [vmem:[#allocation107_spill] sm:$0xff] }
 0x621   : > { %13252 = vst [vmem:[#allocation127_spill] sm:$0xff] %v11568_v21  ;;  %v13260_v21 = vld [vmem:[#allocation38_spill] sm:$0xff] }
 0x622   : > { %v4485_v16 = vadd.f32 %v4484_v24, %v4436_v22  ;;  %v4343_v22 = vadd.f32 %v13250_v48, %v11286_v45  ;;  %v11577_v29 = vpop.f32.mrf.mxu0 }
 0x624   : > { %v11559_v35 = vadd.f32 %v13247_v1, %v4485_v16  ;;  %v4392_v1 = vadd.f32 %v13256_v37, %v4343_v22 }
 0x626   : > { %13248 = vst [vmem:[#allocation51_spill] sm:$0xff] %v11559_v35  ;;  %v11579_v16 = vpop.f32.mrf.mxu1 }
 0x627   : > { %v4437_v26 = vpop.f32.mrf.mxu2  ;;  %v4486_v19 = vpop.f32.mrf.mxu3  ;;  %13255 = vst [vmem:[#allocation163_spill] sm:$0xff] %v11579_v16 }
 0x628   : > { %v4438_v24 = vadd.f32 %v4437_v26, %v4389_v55  ;;  %v6896_v55 = vld [vmem:[%s12668_s3 + $0x4f8] sm:$0xf0]  ;;  %v7777_v26 = vld [vmem:[%s12668_s3 + $0x574] sm:$0xf] }
 0x629   : > { %v6899_v48 = vor.u32 %v7761_v14, %v6896_v55  ;;  %v13262_v55 = vld [vmem:[#allocation29_spill] sm:$0xff] }
 0x62a   : > { %v4487_v43 = vadd.f32 %v4486_v19, %v4438_v24 }
 0x62b   : > { %4989 = vmatpush.bf16.msra.mxu2 %v6899_v48  ;;  %v11608_v48 = vpop.f32.mrf.mxu0 }
 0x62c   : > { %v11571_v54 = vadd.f32 %v13253_v34, %v4487_v43  ;;  %4635 = vmatmul.bf16.gmra.mxu2 %v9835_v18  ;;  %4684 = vmatmul.bf16.gmra.mxu3 %v9838_v56  ;;  %v6960_v43 = vld [vmem:[%s12668_s3 + $0x578] sm:$0xf0]  ;;  %13263 = vst [vmem:[#allocation128_spill] sm:$0xff] %v11608_v48  ;;  %v13308_v48 = vld [vmem:[#allocation119_spill] sm:$0xff] }
 0x62d   : > { %5120 = vmatmul.bf16.gmra.mxu0 %v9534_v62  ;;  %5169 = vmatmul.bf16.gmra.mxu1 %v9939_v60  ;;  %v6963_v58 = vor.u32 %v7777_v26, %v6960_v43  ;;  %v13257_v34 = vld [vmem:[#allocation97_spill] sm:$0xff] }
 0x62e   : > { %13254 = vst [vmem:[#allocation53_spill] sm:$0xff] %v11571_v54  ;;  %v4345_v37 = vadd.f32 %v13257_v34, %v11319_v39  ;;  %v11600_v54 = vadd.f32 %v13258_v42, %v11442_v33  ;;  %v11610_v39 = vpop.f32.mrf.mxu1  ;;  %v13266_v42 = vld [vmem:[#allocation151_spill] sm:$0xff] }
 0x62f   : > { %v4440_v19 = vpop.f32.mrf.mxu2  ;;  %v4489_v24 = vpop.f32.mrf.mxu3  ;;  %5038 = vmatpush.bf16.msra.mxu3 %v6963_v58  ;;  %13264 = vst [vmem:[#allocation54_spill] sm:$0xff] %v11610_v39  ;;  %v6952_v34 = vld [vmem:[%s12668_s3 + $0x568] sm:$0xf0] }
 0x630   : > { %v4441_v22 = vadd.f32 %v4440_v19, %v4392_v1  ;;  %13259 = vst [vmem:[#allocation123_spill] sm:$0xff] %v11600_v54  ;;  %v4394_v27 = vadd.f32 %v13262_v55, %v4345_v37  ;;  %v13270_v55 = vld [vmem:[#allocation30_spill] sm:$0xff]  ;;  %v13276_v37 = vld [vmem:[#allocation43_spill] sm:$0xff] }
 0x632   : > { %v4490_v45 = vadd.f32 %v4489_v24, %v4441_v22  ;;  %v13265_v24 = vld [vmem:[#allocation98_spill] sm:$0xff] }
 0x633   : > { %v4348_v43 = vadd.f32 %v13265_v24, %v11344_v10  ;;  %v6888_v10 = vld [vmem:[%s12668_s3 + $0x4e8] sm:$0xf0] }
 0x634   : > { %v11603_v35 = vadd.f32 %v13260_v21, %v4490_v45  ;;  %v11616_v21 = vadd.f32 %v13266_v42, %v11447_v20  ;;  %v13268_v45 = vld [vmem:[#allocation39_spill] sm:$0xff]  ;;  %v7775_v20 = vld [vmem:[%s12668_s3 + $0x564] sm:$0xf] }
 0x635   : > { %v13271_v42 = vld [vmem:[#allocation103_spill] sm:$0xff] }
 0x636   : > { %13261 = vst [vmem:[#allocation164_spill] sm:$0xff] %v11603_v35  ;;  %v13274_v35 = vld [vmem:[#allocation152_spill] sm:$0xff] }
 0x637   : > { %v4442_v1 = vpop.f32.mrf.mxu2  ;;  %v4491_v26 = vpop.f32.mrf.mxu3  ;;  %13267 = vst [vmem:[#allocation131_spill] sm:$0xff] %v11616_v21  ;;  %v11648_v54 = vadd.f32 %v13274_v35, %v11472_v47  ;;  %v13283_v47 = vld [vmem:[#allocation6_spill] sm:$0xff]  ;;  %v7757_v35 = vld [vmem:[%s12668_s3 + $0x4d4] sm:$0xf] }
 0x638   : > { %v4443_v19 = vadd.f32 %v4442_v1, %v4394_v27  ;;  %v7759_v27 = vld [vmem:[%s12668_s3 + $0x4e4] sm:$0xf]  ;;  %v4397_v1 = vadd.f32 %v13270_v55, %v4348_v43 }
 0x639   : > { %v6891_v58 = vor.u32 %v7759_v27, %v6888_v10  ;;  %v11642_v27 = vpop.f32.mrf.mxu0  ;;  %v11644_v10 = vpop.f32.mrf.mxu1  ;;  %13275 = vst [vmem:[#allocation165_spill] sm:$0xff] %v11648_v54 }
 0x63a   : > { %v4492_v33 = vadd.f32 %v4491_v26, %v4443_v19  ;;  %v6955_v26 = vor.u32 %v7775_v20, %v6952_v34  ;;  %13272 = vst [vmem:[#allocation134_spill] sm:$0xff] %v11642_v27  ;;  %v13304_v27 = vld [vmem:[#allocation112_spill] sm:$0xff] }
 0x63b   : > { %4990 = vmatpush.bf16.msra.mxu2 %v6891_v58  ;;  %13273 = vst [vmem:[#allocation58_spill] sm:$0xff] %v11644_v10  ;;  %v13278_v58 = vld [vmem:[#allocation34_spill] sm:$0xff] }
 0x63c   : > { %v11619_v22 = vadd.f32 %v13268_v45, %v4492_v33  ;;  %4640 = vmatmul.bf16.gmra.mxu2 %v9941_v7  ;;  %4689 = vmatmul.bf16.gmra.mxu3 %v9944_v36  ;;  %v4350_v45 = vadd.f32 %v13271_v42, %v11353_v46 }
 0x63d   : > { %5125 = vmatmul.bf16.gmra.mxu0 %v9583_v52  ;;  %5174 = vmatmul.bf16.gmra.mxu1 %v9990_v2 }
 0x63e   : > { %13269 = vst [vmem:[#allocation56_spill] sm:$0xff] %v11619_v22  ;;  %5039 = vmatpush.bf16.msra.mxu3 %v6955_v26  ;;  %v4399_v34 = vadd.f32 %v13278_v58, %v4350_v45  ;;  %v13286_v58 = vld [vmem:[#allocation7_spill] sm:$0xff] }
 0x63f   : > { %v4445_v19 = vpop.f32.mrf.mxu2  ;;  %v4494_v24 = vpop.f32.mrf.mxu3 }
 0x640   : > { %v4446_v33 = vadd.f32 %v4445_v19, %v4397_v1  ;;  %v13279_v19 = vld [vmem:[#allocation35_spill] sm:$0xff] }
 0x641   : > { %v11676_v45 = vpop.f32.mrf.mxu1 }
 0x642   : > { %v4495_v14 = vadd.f32 %v4494_v24, %v4446_v33  ;;  %v11658_v24 = vadd.f32 %v13279_v19, %v11481_v5  ;;  %v13281_v33 = vld [vmem:[#allocation104_spill] sm:$0xff]  ;;  %13285 = vst [vmem:[#allocation167_spill] sm:$0xff] %v11676_v45  ;;  %v13287_v19 = vld [vmem:[#allocation149_spill] sm:$0xff] }
 0x643   : > { %v7773_v5 = vld [vmem:[%s12668_s3 + $0x554] sm:$0xf] }
 0x644   : > { %v11651_v43 = vadd.f32 %v13276_v37, %v4495_v14  ;;  %13280 = vst [vmem:[#allocation166_spill] sm:$0xff] %v11658_v24  ;;  %v6880_v14 = vld [vmem:[%s12668_s3 + $0x4d8] sm:$0xf0]  ;;  %v11674_v37 = vpop.f32.mrf.mxu0 }
 0x645   : > { %13284 = vst [vmem:[#allocation57_spill] sm:$0xff] %v11674_v37 }
 0x646   : > { %13277 = vst [vmem:[#allocation129_spill] sm:$0xff] %v11651_v43 }
 0x647   : > { %v4447_v55 = vpop.f32.mrf.mxu2  ;;  %v4496_v1 = vpop.f32.mrf.mxu3 }
 0x648   : > { %v4448_v46 = vadd.f32 %v4447_v55, %v4399_v34  ;;  %v6944_v34 = vld [vmem:[%s12668_s3 + $0x558] sm:$0xf0] }
 0x649   : > { %v13290_v55 = vld [vmem:[#allocation33_spill] sm:$0xff] }
 0x64a   : > { %v4497_v26 = vadd.f32 %v4496_v1, %v4448_v46  ;;  %v6947_v1 = vor.u32 %v7773_v5, %v6944_v34  ;;  %v7755_v5 = vld [vmem:[%s12668_s3 + $0x4c4] sm:$0xf] }
 0x64b   : > { %v7771_v34 = vld [vmem:[%s12668_s3 + $0x544] sm:$0xf] }
 0x64c   : > { %v11661_v42 = vadd.f32 %v13281_v33, %v4497_v26  ;;  %4801 = vmatmul.bf16.vlgmr.msrb.gmra.mxu2 %v13232_v38  ;;  %4850 = vmatmul.bf16.vlgmr.msrb.gmra.mxu3 %v13283_v47  ;;  %v6883_v38 = vor.u32 %v7757_v35, %v6880_v14 }
 0x64d   : > { %5130 = vmatmul.bf16.gmra.mxu0 %v13286_v58  ;;  %5179 = vmatmul.bf16.gmra.mxu1 %v13203_v28  ;;  %v13288_v28 = vld [vmem:[#allocation150_spill] sm:$0xff] }
 0x64e   : > { %13282 = vst [vmem:[#allocation132_spill] sm:$0xff] %v11661_v42  ;;  %4991 = vmatpush.bf16.msra.mxu2 %v6883_v38  ;;  %5040 = vmatpush.bf16.msra.mxu3 %v6947_v1  ;;  %v6872_v38 = vld [vmem:[%s12668_s3 + $0x4c8] sm:$0xf0] }
 0x64f   : > { %v4606_v46 = vpop.f32.mrf.mxu2  ;;  %v4655_v26 = vpop.f32.mrf.mxu3  ;;  %v6875_v1 = vor.u32 %v7755_v5, %v6872_v38  ;;  %v7753_v5 = vld [vmem:[%s12668_s3 + $0x4b4] sm:$0xf]  ;;  %v6864_v38 = vld [vmem:[%s12668_s3 + $0x4b8] sm:$0xf0] }
 0x650   : > { %v4607_v33 = vadd.f32 %v4606_v46, %v13287_v19 }
 0x652   : > { %v11686_v47 = vadd.f32 %v4655_v26, %v4607_v33  ;;  %4992 = vmatpush.bf16.msra.mxu2 %v6875_v1  ;;  %v13289_v26 = vld [vmem:[#allocation32_spill] sm:$0xff]  ;;  %v6867_v1 = vor.u32 %v7753_v5, %v6864_v38  ;;  %v7751_v5 = vld [vmem:[%s12668_s3 + $0x4a4] sm:$0xf]  ;;  %v6856_v38 = vld [vmem:[%s12668_s3 + $0x4a8] sm:$0xf0] }
 0x656   : > { %4993 = vmatpush.bf16.msra.mxu2 %v6867_v1  ;;  %v6859_v1 = vor.u32 %v7751_v5, %v6856_v38  ;;  %v13295_v5 = vld [vmem:[#allocation8_spill] sm:$0xff] }
 0x657   : > { %v4608_v20 = vpop.f32.mrf.mxu2  ;;  %v4657_v43 = vpop.f32.mrf.mxu3  ;;  %v7749_v38 = vld [vmem:[%s12668_s3 + $0x494] sm:$0xf] }
 0x658   : > { %v4609_v35 = vadd.f32 %v4608_v20, %v13288_v28 }
 0x65a   : > { %v11689_v14 = vadd.f32 %v4657_v43, %v4609_v35  ;;  %v6936_v43 = vld [vmem:[%s12668_s3 + $0x548] sm:$0xf0]  ;;  %4994 = vmatpush.bf16.msra.mxu2 %v6859_v1  ;;  %v7765_v1 = vld [vmem:[%s12668_s3 + $0x514] sm:$0xf] }
 0x65c   : > { %4806 = vmatmul.bf16.gmra.mxu2 %v9727_v0  ;;  %4855 = vmatmul.bf16.gmra.mxu3 %v9471_v63  ;;  %v6939_v0 = vor.u32 %v7771_v34, %v6936_v43  ;;  %v7769_v34 = vld [vmem:[%s12668_s3 + $0x534] sm:$0xf] }
 0x65e   : > { %5041 = vmatpush.bf16.msra.mxu3 %v6939_v0 }
 0x65f   : > { %v4611_v20 = vpop.f32.mrf.mxu2  ;;  %v4660_v46 = vpop.f32.mrf.mxu3 }
 0x660   : > { %v4612_v19 = vadd.f32 %v4611_v20, %v13289_v26  ;;  %v13291_v20 = vld [vmem:[#allocation37_spill] sm:$0xff] }
 0x662   : > { %v11706_v33 = vadd.f32 %v4660_v46, %v4612_v19 }
 0x664   : > { %v4710_v16 = vadd.f32 %v13308_v48, %v11706_v33  ;;  %v7192_v48 = vld [vmem:[%s12668_s3 + $0x748] sm:$0xf0] }
 0x667   : > { %v4613_v28 = vpop.f32.mrf.mxu2  ;;  %v4662_v35 = vpop.f32.mrf.mxu3 }
 0x668   : > { %v4614_v42 = vadd.f32 %v4613_v28, %v13290_v55 }
 0x66a   : > { %v11709_v24 = vadd.f32 %v4662_v35, %v4614_v42  ;;  %v6928_v42 = vld [vmem:[%s12668_s3 + $0x538] sm:$0xf0]  ;;  %v13292_v35 = vld [vmem:[#allocation95_spill] sm:$0xff] }
 0x66b   : > { %v6931_v55 = vor.u32 %v7769_v34, %v6928_v42  ;;  %v7767_v34 = vld [vmem:[%s12668_s3 + $0x524] sm:$0xf] }
 0x66c   : > { %4811 = vmatmul.bf16.gmra.mxu2 %v9838_v56  ;;  %4860 = vmatmul.bf16.gmra.mxu3 %v9529_v57 }
 0x66d   : > { %5042 = vmatpush.bf16.msra.mxu3 %v6931_v55 }
 0x66f   : > { %v4616_v43 = vpop.f32.mrf.mxu2  ;;  %v4665_v0 = vpop.f32.mrf.mxu3 }
 0x670   : > { %v4617_v46 = vadd.f32 %v4616_v43, %v13291_v20 }
 0x672   : > { %v11726_v26 = vadd.f32 %v4665_v0, %v4617_v46  ;;  %v13293_v0 = vld [vmem:[#allocation105_spill] sm:$0xff] }
 0x677   : > { %v4618_v19 = vpop.f32.mrf.mxu2  ;;  %v4667_v28 = vpop.f32.mrf.mxu3 }
 0x678   : > { %v4619_v54 = vadd.f32 %v4618_v19, %v13292_v35  ;;  %v13294_v35 = vld [vmem:[#allocation106_spill] sm:$0xff] }
 0x67a   : > { %v11729_v22 = vadd.f32 %v4667_v28, %v4619_v54  ;;  %v6920_v54 = vld [vmem:[%s12668_s3 + $0x528] sm:$0xf0] }
 0x67b   : > { %v6923_v42 = vor.u32 %v7767_v34, %v6920_v54  ;;  %v6848_v34 = vld [vmem:[%s12668_s3 + $0x498] sm:$0xf0] }
 0x67c   : > { %4816 = vmatmul.bf16.gmra.mxu2 %v9944_v36  ;;  %4865 = vmatmul.bf16.gmra.mxu3 %v9576_v40  ;;  %v6851_v54 = vor.u32 %v7749_v38, %v6848_v34  ;;  %v7747_v38 = vld [vmem:[%s12668_s3 + $0x484] sm:$0xf]  ;;  %v6840_v34 = vld [vmem:[%s12668_s3 + $0x488] sm:$0xf0] }
 0x67d   : > { %5043 = vmatpush.bf16.msra.mxu3 %v6923_v42 }
 0x67e   : > { %4995 = vmatpush.bf16.msra.mxu2 %v6851_v54  ;;  %v6843_v54 = vor.u32 %v7747_v38, %v6840_v34  ;;  %v7825_v38 = vld [vmem:[%s12668_s3 + $0x6f4] sm:$0xf]  ;;  %v7152_v34 = vld [vmem:[%s12668_s3 + $0x6f8] sm:$0xf0] }
 0x67f   : > { %v4621_v55 = vpop.f32.mrf.mxu2  ;;  %v4670_v43 = vpop.f32.mrf.mxu3 }
 0x680   : > { %v4622_v20 = vadd.f32 %v4621_v55, %v13293_v0 }
 0x682   : > { %v11746_v46 = vadd.f32 %v4670_v43, %v4622_v20  ;;  %v13296_v43 = vld [vmem:[#allocation36_spill] sm:$0xff]  ;;  %4996 = vmatpush.bf16.msra.mxu2 %v6843_v54  ;;  %v7155_v54 = vor.u32 %v7825_v38, %v7152_v34  ;;  %v7823_v38 = vld [vmem:[%s12668_s3 + $0x6e4] sm:$0xf]  ;;  %v7144_v34 = vld [vmem:[%s12668_s3 + $0x6e8] sm:$0xf0] }
 0x686   : > { %5185 = vmatpush.bf16.msrb.mxu2 %v7155_v54  ;;  %v7147_v54 = vor.u32 %v7823_v38, %v7144_v34  ;;  %v4705_v38 = vadd.f32 %v13304_v27, %v11686_v47  ;;  %v7200_v27 = vld [vmem:[%s12668_s3 + $0x758] sm:$0xf0] }
 0x687   : > { %v4623_v19 = vpop.f32.mrf.mxu2  ;;  %v4672_v28 = vpop.f32.mrf.mxu3 }
 0x688   : > { %v4624_v21 = vadd.f32 %v4623_v19, %v13294_v35  ;;  %v13297_v35 = vld [vmem:[#allocation40_spill] sm:$0xff] }
 0x68a   : > { %v11749_v32 = vadd.f32 %v4672_v28, %v4624_v21  ;;  %v6912_v21 = vld [vmem:[%s12668_s3 + $0x518] sm:$0xf0]  ;;  %5186 = vmatpush.bf16.msrb.mxu2 %v7147_v54 }
 0x68b   : > { %v7136_v54 = vld [vmem:[%s12668_s3 + $0x6d8] sm:$0xf0] }
 0x68c   : > { %4821 = vmatmul.bf16.gmra.mxu2 %v9426_v9  ;;  %4870 = vmatmul.bf16.gmra.mxu3 %v13295_v5  ;;  %v6915_v9 = vor.u32 %v7765_v1, %v6912_v21  ;;  %v7763_v1 = vld [vmem:[%s12668_s3 + $0x504] sm:$0xf] }
 0x68e   : > { %5044 = vmatpush.bf16.msra.mxu3 %v6915_v9 }
 0x68f   : > { %v4626_v42 = vpop.f32.mrf.mxu2  ;;  %v4675_v55 = vpop.f32.mrf.mxu3 }
 0x690   : > { %v4627_v0 = vadd.f32 %v4626_v42, %v13296_v43 }
 0x692   : > { %v11766_v20 = vadd.f32 %v4675_v55, %v4627_v0  ;;  %v13298_v55 = vld [vmem:[#allocation99_spill] sm:$0xff] }
 0x697   : > { %v4628_v19 = vpop.f32.mrf.mxu2  ;;  %v4677_v28 = vpop.f32.mrf.mxu3 }
 0x698   : > { %v4629_v41 = vadd.f32 %v4628_v19, %v13297_v35  ;;  %v13299_v35 = vld [vmem:[#allocation108_spill] sm:$0xff] }
 0x69a   : > { %v11769_v36 = vadd.f32 %v4677_v28, %v4629_v41  ;;  %v6904_v41 = vld [vmem:[%s12668_s3 + $0x508] sm:$0xf0] }
 0x69b   : > { %v6907_v21 = vor.u32 %v7763_v1, %v6904_v41  ;;  %v7841_v1 = vld [vmem:[%s12668_s3 + $0x774] sm:$0xf] }
 0x69c   : > { %4826 = vmatmul.bf16.gmra.mxu2 %v9476_v8  ;;  %4875 = vmatmul.bf16.gmra.mxu3 %v9833_v61 }
 0x69d   : > { %5045 = vmatpush.bf16.msra.mxu3 %v6907_v21 }
 0x69f   : > { %v4631_v9 = vpop.f32.mrf.mxu2  ;;  %v4680_v42 = vpop.f32.mrf.mxu3 }
 0x6a0   : > { %v4632_v43 = vadd.f32 %v4631_v9, %v13298_v55 }
 0x6a2   : > { %v11786_v0 = vadd.f32 %v4680_v42, %v4632_v43  ;;  %v13300_v42 = vld [vmem:[#allocation109_spill] sm:$0xff] }
 0x6a7   : > { %v4633_v19 = vpop.f32.mrf.mxu2  ;;  %v4682_v28 = vpop.f32.mrf.mxu3 }
 0x6a8   : > { %v4634_v56 = vadd.f32 %v4633_v19, %v13299_v35  ;;  %v13301_v35 = vld [vmem:[#allocation115_spill] sm:$0xff] }
 0x6aa   : > { %v11789_v45 = vadd.f32 %v4682_v28, %v4634_v56  ;;  %v7216_v56 = vld [vmem:[%s12668_s3 + $0x778] sm:$0xf0] }
 0x6ab   : > { %v7219_v41 = vor.u32 %v7841_v1, %v7216_v56  ;;  %v7839_v1 = vld [vmem:[%s12668_s3 + $0x764] sm:$0xf] }
 0x6ac   : > { %4831 = vmatmul.bf16.gmra.mxu2 %v9534_v62  ;;  %4880 = vmatmul.bf16.gmra.mxu3 %v9939_v60 }
 0x6ad   : > { %5234 = vmatpush.bf16.msrb.mxu3 %v7219_v41 }
 0x6af   : > { %v4636_v21 = vpop.f32.mrf.mxu2  ;;  %v4685_v9 = vpop.f32.mrf.mxu3 }
 0x6b0   : > { %v4637_v55 = vadd.f32 %v4636_v21, %v13300_v42 }
 0x6b2   : > { %v11806_v43 = vadd.f32 %v4685_v9, %v4637_v55  ;;  %v13302_v9 = vld [vmem:[#allocation155_spill] sm:$0xff] }
 0x6b7   : > { %v4638_v19 = vpop.f32.mrf.mxu2  ;;  %v4687_v28 = vpop.f32.mrf.mxu3 }
 0x6b8   : > { %v4639_v37 = vadd.f32 %v4638_v19, %v13301_v35  ;;  %v13303_v35 = vld [vmem:[#allocation156_spill] sm:$0xff] }
 0x6ba   : > { %v11809_v10 = vadd.f32 %v4687_v28, %v4639_v37  ;;  %v7208_v37 = vld [vmem:[%s12668_s3 + $0x768] sm:$0xf0] }
 0x6bb   : > { %v7211_v56 = vor.u32 %v7839_v1, %v7208_v37  ;;  %v7821_v1 = vld [vmem:[%s12668_s3 + $0x6d4] sm:$0xf] }
 0x6bc   : > { %4836 = vmatmul.bf16.gmra.mxu2 %v9583_v52  ;;  %4885 = vmatmul.bf16.gmra.mxu3 %v9990_v2  ;;  %v7837_v37 = vld [vmem:[%s12668_s3 + $0x754] sm:$0xf] }
 0x6bd   : > { %5235 = vmatpush.bf16.msrb.mxu3 %v7211_v56  ;;  %v7139_v56 = vor.u32 %v7821_v1, %v7136_v54 }
 0x6bf   : > { %v4641_v41 = vpop.f32.mrf.mxu2  ;;  %v4690_v21 = vpop.f32.mrf.mxu3  ;;  %5187 = vmatpush.bf16.msrb.mxu2 %v7139_v56  ;;  %v7835_v56 = vld [vmem:[%s12668_s3 + $0x744] sm:$0xf] }
 0x6c0   : > { %v4642_v42 = vadd.f32 %v4641_v41, %v13302_v9  ;;  %v13306_v9 = vld [vmem:[#allocation113_spill] sm:$0xff]  ;;  %v7195_v33 = vor.u32 %v7835_v56, %v7192_v48 }
 0x6c2   : > { %v11826_v55 = vadd.f32 %v4690_v21, %v4642_v42  ;;  %v4707_v42 = vadd.f32 %v13306_v9, %v11689_v14  ;;  %v7819_v14 = vld [vmem:[%s12668_s3 + $0x6c4] sm:$0xf] }
 0x6c7   : > { %v4643_v19 = vpop.f32.mrf.mxu2  ;;  %v4692_v28 = vpop.f32.mrf.mxu3 }
 0x6c8   : > { %v4644_v58 = vadd.f32 %v4643_v19, %v13303_v35 }
 0x6ca   : > { %v11831_v34 = vadd.f32 %v4692_v28, %v4644_v58  ;;  %v13305_v58 = vld [vmem:[#allocation41_spill] sm:$0xff]  ;;  %v13307_v28 = vld [vmem:[#allocation42_spill] sm:$0xff] }
 0x6cb   : > { %v4754_v47 = vadd.f32 %v13305_v58, %v4705_v38  ;;  %v4756_v35 = vadd.f32 %v13307_v28, %v4707_v42 }
 0x6cc   : > { %4997 = vmatmul.bf16.vlgmr.msra.gmra.mxu2 %v13295_v5  ;;  %5046 = vmatmul.bf16.vlgmr.msra.gmra.mxu3 %v9722_v13  ;;  %v7203_v13 = vor.u32 %v7837_v37, %v7200_v27  ;;  %v7128_v37 = vld [vmem:[%s12668_s3 + $0x6c8] sm:$0xf0] }
 0x6cd   : > { %v7131_v27 = vor.u32 %v7819_v14, %v7128_v37  ;;  %v7833_v14 = vld [vmem:[%s12668_s3 + $0x734] sm:$0xf] }
 0x6ce   : > { %5236 = vmatpush.bf16.msrb.mxu3 %v7203_v13 }
 0x6cf   : > { %v4802_v5 = vpop.f32.mrf.mxu2  ;;  %v4851_v41 = vpop.f32.mrf.mxu3  ;;  %5188 = vmatpush.bf16.msrb.mxu2 %v7131_v27 }
 0x6d0   : > { %v4803_v21 = vadd.f32 %v4802_v5, %v4754_v47  ;;  %v4712_v5 = vadd.f32 %v11118_v17, %v11709_v24  ;;  %v7817_v17 = vld [vmem:[%s12668_s3 + $0x6b4] sm:$0xf]  ;;  %v7120_v24 = vld [vmem:[%s12668_s3 + $0x6b8] sm:$0xf0] }
 0x6d1   : > { %v7123_v37 = vor.u32 %v7817_v17, %v7120_v24  ;;  %v7112_v24 = vld [vmem:[%s12668_s3 + $0x6a8] sm:$0xf0] }
 0x6d2   : > { %v11850_v19 = vadd.f32 %v4851_v41, %v4803_v21  ;;  %5237 = vmatpush.bf16.msrb.mxu3 %v7195_v33  ;;  %v13310_v21 = vld [vmem:[#allocation157_spill] sm:$0xff]  ;;  %v13313_v33 = vld [vmem:[#allocation122_spill] sm:$0xff] }
 0x6d3   : > { %v4761_v9 = vadd.f32 %v13310_v21, %v4712_v5  ;;  %5189 = vmatpush.bf16.msrb.mxu2 %v7123_v37  ;;  %v11902_v5 = vpop.f32.mrf.mxu1  ;;  %v13314_v21 = vld [vmem:[#allocation49_spill] sm:$0xff] }
 0x6d7   : > { %v4804_v1 = vpop.f32.mrf.mxu2  ;;  %v4853_v54 = vpop.f32.mrf.mxu3 }
 0x6d8   : > { %v4805_v39 = vadd.f32 %v4804_v1, %v4756_v35  ;;  %v13311_v1 = vld [vmem:[#allocation110_spill] sm:$0xff] }
 0x6da   : > { %v11855_v38 = vadd.f32 %v4853_v54, %v4805_v39  ;;  %v4715_v54 = vadd.f32 %v13311_v1, %v11726_v26  ;;  %v7184_v26 = vld [vmem:[%s12668_s3 + $0x738] sm:$0xf0]  ;;  %v13315_v1 = vld [vmem:[#allocation116_spill] sm:$0xff] }
 0x6db   : > { %v7187_v27 = vor.u32 %v7833_v14, %v7184_v26  ;;  %v7831_v14 = vld [vmem:[%s12668_s3 + $0x724] sm:$0xf]  ;;  %v13316_v26 = vld [vmem:[#allocation44_spill] sm:$0xff] }
 0x6dc   : > { %5002 = vmatmul.bf16.gmra.mxu2 %v9833_v61  ;;  %5051 = vmatmul.bf16.gmra.mxu3 %v9835_v18  ;;  %v13309_v61 = vld [vmem:[#allocation46_spill] sm:$0xff] }
 0x6dd   : > { %v4759_v39 = vadd.f32 %v13309_v61, %v4710_v16  ;;  %5238 = vmatpush.bf16.msrb.mxu3 %v7187_v27 }
 0x6df   : > { %v4807_v58 = vpop.f32.mrf.mxu2  ;;  %v4856_v47 = vpop.f32.mrf.mxu3 }
 0x6e0   : > { %v4808_v13 = vadd.f32 %v4807_v58, %v4759_v39  ;;  %v4717_v58 = vadd.f32 %v13313_v33, %v11729_v22  ;;  %v7815_v22 = vld [vmem:[%s12668_s3 + $0x6a4] sm:$0xf]  ;;  %v13317_v33 = vld [vmem:[#allocation120_spill] sm:$0xff] }
 0x6e1   : > { %v7115_v37 = vor.u32 %v7815_v22, %v7112_v24  ;;  %v13319_v24 = vld [vmem:[#allocation117_spill] sm:$0xff] }
 0x6e2   : > { %v11874_v41 = vadd.f32 %v4856_v47, %v4808_v13  ;;  %v11900_v13 = vpop.f32.mrf.mxu0 }
 0x6e3   : > { %5190 = vmatpush.bf16.msrb.mxu2 %v7115_v37 }
 0x6e7   : > { %v4809_v42 = vpop.f32.mrf.mxu2  ;;  %v4858_v28 = vpop.f32.mrf.mxu3 }
 0x6e8   : > { %v4810_v35 = vadd.f32 %v4809_v42, %v4761_v9  ;;  %v4766_v9 = vadd.f32 %v13314_v21, %v4717_v58  ;;  %v4722_v58 = vadd.f32 %v13317_v33, %v11749_v32  ;;  %v7813_v32 = vld [vmem:[%s12668_s3 + $0x694] sm:$0xf] }
 0x6ea   : > { %v11879_v16 = vadd.f32 %v4858_v28, %v4810_v35 }
 0x6ec   : > { %5007 = vmatmul.bf16.gmra.mxu2 %v9939_v60  ;;  %5056 = vmatmul.bf16.gmra.mxu3 %v9941_v7  ;;  %v13312_v60 = vld [vmem:[#allocation158_spill] sm:$0xff] }
 0x6ed   : > { %v4764_v56 = vadd.f32 %v13312_v60, %v4715_v54  ;;  %v4720_v54 = vadd.f32 %v13315_v1, %v11746_v46  ;;  %v7176_v46 = vld [vmem:[%s12668_s3 + $0x728] sm:$0xf0] }
 0x6ef   : > { %v4812_v48 = vpop.f32.mrf.mxu2  ;;  %v4861_v61 = vpop.f32.mrf.mxu3  ;;  %v4769_v60 = vadd.f32 %v13316_v26, %v4720_v54  ;;  %v7829_v26 = vld [vmem:[%s12668_s3 + $0x714] sm:$0xf] }
 0x6f0   : > { %v4813_v39 = vadd.f32 %v4812_v48, %v4764_v56  ;;  %v7179_v56 = vor.u32 %v7831_v14, %v7176_v46  ;;  %v4725_v14 = vadd.f32 %v13319_v24, %v11766_v20  ;;  %v7104_v46 = vld [vmem:[%s12668_s3 + $0x698] sm:$0xf0] }
 0x6f1   : > { %v7168_v20 = vld [vmem:[%s12668_s3 + $0x718] sm:$0xf0] }
 0x6f2   : > { %v11898_v47 = vadd.f32 %v4861_v61, %v4813_v39  ;;  %v11926_v61 = vpop.f32.mrf.mxu1  ;;  %5239 = vmatpush.bf16.msrb.mxu3 %v7179_v56 }
 0x6f7   : > { %v4814_v42 = vpop.f32.mrf.mxu2  ;;  %v4863_v28 = vpop.f32.mrf.mxu3 }
 0x6f8   : > { %v4815_v35 = vadd.f32 %v4814_v42, %v4766_v9  ;;  %v13318_v9 = vld [vmem:[#allocation47_spill] sm:$0xff] }
 0x6f9   : > { %v4771_v42 = vadd.f32 %v13318_v9, %v4722_v58  ;;  %v4727_v9 = vadd.f32 %v11338_v50, %v11769_v36  ;;  %v7811_v36 = vld [vmem:[%s12668_s3 + $0x684] sm:$0xf]  ;;  %v7096_v50 = vld [vmem:[%s12668_s3 + $0x688] sm:$0xf0] }
 0x6fa   : > { %v11907_v17 = vadd.f32 %v4863_v28, %v4815_v35  ;;  %v11935_v22 = vpop.f32.mrf.mxu1 }
 0x6fc   : > { %5012 = vmatmul.bf16.gmra.mxu2 %v9990_v2  ;;  %5061 = vmatmul.bf16.gmra.mxu3 %v13196_v31  ;;  %v11923_v2 = vpop.f32.mrf.mxu0 }
 0x6ff   : > { %v4817_v27 = vpop.f32.mrf.mxu2  ;;  %v4866_v48 = vpop.f32.mrf.mxu3 }
 0x700   : > { %v4818_v39 = vadd.f32 %v4817_v27, %v4769_v60  ;;  %v7107_v60 = vor.u32 %v7813_v32, %v7104_v46  ;;  %v7171_v27 = vor.u32 %v7829_v26, %v7168_v20  ;;  %v13324_v46 = vld [vmem:[#allocation114_spill] sm:$0xff] }
 0x701   : > { %v4730_v26 = vadd.f32 %v13324_v46, %v11786_v0  ;;  %v7827_v0 = vld [vmem:[%s12668_s3 + $0x704] sm:$0xf] }
 0x702   : > { %v11930_v21 = vadd.f32 %v4866_v48, %v4818_v39  ;;  %5191 = vmatpush.bf16.msrb.mxu2 %v7107_v60  ;;  %5240 = vmatpush.bf16.msrb.mxu3 %v7171_v27  ;;  %v13325_v27 = vld [vmem:[#allocation160_spill] sm:$0xff] }
 0x704   : > { %v11933_v1 = vpop.f32.mrf.mxu0 }
 0x707   : > { %v4819_v28 = vpop.f32.mrf.mxu2  ;;  %v4868_v35 = vpop.f32.mrf.mxu3 }
 0x708   : > { %v4820_v54 = vadd.f32 %v4819_v28, %v4771_v42  ;;  %v11962_v28 = vpop.f32.mrf.mxu1 }
 0x709   : > { %13322 = vst [vmem:[#allocation168_spill] sm:$0xff] %v11962_v28 }
 0x70a   : > { %v11939_v37 = vadd.f32 %v4868_v35, %v4820_v54  ;;  %v13323_v35 = vld [vmem:[#allocation159_spill] sm:$0xff] }
 0x70b   : > { %v4776_v54 = vadd.f32 %v13323_v35, %v4727_v9 }
 0x70c   : > { %5017 = vmatmul.bf16.gmra.mxu2 %v9471_v63  ;;  %5066 = vmatmul.bf16.gmra.mxu3 %v9473_v3  ;;  %v13320_v63 = vld [vmem:[#allocation45_spill] sm:$0xff]  ;;  %v11956_v58 = vpop.f32.mrf.mxu0 }
 0x70d   : > { %v4774_v56 = vadd.f32 %v13320_v63, %v4725_v14  ;;  %13321 = vst [vmem:[#allocation133_spill] sm:$0xff] %v11956_v58  ;;  %v7099_v63 = vor.u32 %v7811_v36, %v7096_v50 }
 0x70f   : > { %v4822_v48 = vpop.f32.mrf.mxu2  ;;  %v4871_v39 = vpop.f32.mrf.mxu3  ;;  %5192 = vmatpush.bf16.msrb.mxu2 %v7099_v63 }
 0x710   : > { %v4823_v33 = vadd.f32 %v4822_v48, %v4774_v56  ;;  %v7160_v56 = vld [vmem:[%s12668_s3 + $0x708] sm:$0xf0]  ;;  %v4779_v48 = vadd.f32 %v13325_v27, %v4730_v26  ;;  %v13327_v27 = vld [vmem:[#allocation9_spill] sm:$0xff] }
 0x712   : > { %v11960_v42 = vadd.f32 %v4871_v39, %v4823_v33  ;;  %v7163_v39 = vor.u32 %v7827_v0, %v7160_v56  ;;  %v13326_v0 = vld [vmem:[#allocation121_spill] sm:$0xff] }
 0x713   : > { %v4735_v56 = vadd.f32 %v13326_v0, %v11806_v43  ;;  %v13329_v43 = vld [vmem:[#allocation124_spill] sm:$0xff]  ;;  %v13330_v0 = vld [vmem:[#allocation50_spill] sm:$0xff] }
 0x714   : > { %v11969_v20 = vpop.f32.mrf.mxu0  ;;  %5241 = vmatpush.bf16.msrb.mxu3 %v7163_v39 }
 0x717   : > { %v4824_v24 = vpop.f32.mrf.mxu2  ;;  %v4873_v32 = vpop.f32.mrf.mxu3 }
 0x718   : > { %v4825_v14 = vadd.f32 %v4824_v24, %v4776_v54  ;;  %v4732_v54 = vadd.f32 %v11376_v44, %v11789_v45  ;;  %v13328_v44 = vld [vmem:[#allocation48_spill] sm:$0xff] }
 0x719   : > { %v4784_v45 = vadd.f32 %v13328_v44, %v4735_v56  ;;  %v4740_v56 = vadd.f32 %v13330_v0, %v11826_v55 }
 0x71a   : > { %v11967_v60 = vadd.f32 %v4873_v32, %v4825_v14  ;;  %v4781_v14 = vadd.f32 %v11378_v15, %v4732_v54 }
 0x71c   : > { %5022 = vmatmul.bf16.gmra.mxu2 %v9529_v57  ;;  %5071 = vmatmul.bf16.gmra.mxu3 %v9531_v59  ;;  %v11985_v57 = vpop.f32.mrf.mxu1  ;;  %v11992_v32 = vpop.f32.mrf.mxu0 }
 0x71f   : > { %v4827_v33 = vpop.f32.mrf.mxu2  ;;  %v4876_v9 = vpop.f32.mrf.mxu3 }
 0x720   : > { %v4828_v35 = vadd.f32 %v4827_v33, %v4779_v48 }
 0x722   : > { %v11990_v24 = vadd.f32 %v4876_v9, %v4828_v35  ;;  %v4737_v35 = vadd.f32 %v11411_v12, %v11809_v10  ;;  %v13332_v12 = vld [vmem:[#allocation126_spill] sm:$0xff] }
 0x723   : > { %v4789_v10 = vadd.f32 %v13332_v12, %v4740_v56  ;;  %v4901_v56 = vadd.f32 %v11474_v25, %v11850_v19 }
 0x724   : > { %v11995_v50 = vpop.f32.mrf.mxu1  ;;  %v12004_v33 = vpop.f32.mrf.mxu0 }
 0x727   : > { %v4829_v46 = vpop.f32.mrf.mxu2  ;;  %v4878_v36 = vpop.f32.mrf.mxu3 }
 0x728   : > { %v4830_v26 = vadd.f32 %v4829_v46, %v4781_v14  ;;  %v4786_v14 = vadd.f32 %v13329_v43, %v4737_v35  ;;  %v13333_v43 = vld [vmem:[#allocation52_spill] sm:$0xff] }
 0x72a   : > { %v11999_v63 = vadd.f32 %v4878_v36, %v4830_v26 }
 0x72c   : > { %5027 = vmatmul.bf16.gmra.mxu2 %v9576_v40  ;;  %5076 = vmatmul.bf16.gmra.mxu3 %v13327_v27  ;;  %v12006_v9 = vpop.f32.mrf.mxu1  ;;  %v12013_v26 = vpop.f32.mrf.mxu0 }
 0x72f   : > { %v4832_v48 = vpop.f32.mrf.mxu2  ;;  %v4881_v39 = vpop.f32.mrf.mxu3 }
 0x730   : > { %v4833_v15 = vadd.f32 %v4832_v48, %v4784_v45  ;;  %v13331_v48 = vld [vmem:[#allocation61_spill] sm:$0xff] }
 0x732   : > { %v12010_v54 = vadd.f32 %v4881_v39, %v4833_v15 }
 0x734   : > { %v12019_v45 = vpop.f32.mrf.mxu1  ;;  %v12028_v28 = vpop.f32.mrf.mxu0 }
 0x737   : > { %v4834_v46 = vpop.f32.mrf.mxu2  ;;  %v4883_v40 = vpop.f32.mrf.mxu3 }
 0x738   : > { %v4835_v36 = vadd.f32 %v4834_v46, %v4786_v14  ;;  %v4742_v14 = vadd.f32 %v13333_v43, %v11831_v34 }
 0x73a   : > { %v12017_v44 = vadd.f32 %v4883_v40, %v4835_v36  ;;  %v13334_v40 = vld [vmem:[#allocation118_spill] sm:$0xff] }
 0x73b   : > { %v4791_v36 = vadd.f32 %v13334_v40, %v4742_v14  ;;  %v4903_v14 = vadd.f32 %v11500_v4, %v11855_v38 }
 0x73c   : > { %5032 = vmatmul.bf16.gmra.mxu2 %v13148_v30  ;;  %5081 = vmatmul.bf16.gmra.mxu3 %v13331_v48  ;;  %v12030_v55 = vpop.f32.mrf.mxu1  ;;  %v5098_v34 = vpop.f32.mrf.mxu0 }
 0x73d   : > { %v4952_v25 = vadd.f32 %v11502_v51, %v4903_v14 }
 0x73f   : > { %v4837_v39 = vpop.f32.mrf.mxu2  ;;  %v4886_v15 = vpop.f32.mrf.mxu3 }
 0x740   : > { %v4838_v35 = vadd.f32 %v4837_v39, %v4789_v10  ;;  %v4950_v10 = vadd.f32 %v11476_v49, %v4901_v56  ;;  %v4906_v49 = vadd.f32 %v11518_v53, %v11874_v41 }
 0x742   : > { %v12026_v46 = vadd.f32 %v4886_v15, %v4838_v35  ;;  %v4955_v4 = vadd.f32 %v11520_v23, %v4906_v49 }
 0x744   : > { %v5147_v35 = vpop.f32.mrf.mxu1 }
 0x747   : > { %v4839_v0 = vpop.f32.mrf.mxu2  ;;  %v4888_v30 = vpop.f32.mrf.mxu3 }
 0x748   : > { %v4840_v58 = vadd.f32 %v4839_v0, %v4791_v36  ;;  %v12045_v36 = vpop.f32.mrf.mxu0 }
 0x74a   : > { %v12035_v12 = vadd.f32 %v4888_v30, %v4840_v58 }
 0x74c   : > { %5193 = vmatmul.bf16.vlgmr.msrb.gmra.mxu2 %v9473_v3  ;;  %5242 = vmatmul.bf16.vlgmr.msrb.gmra.mxu3 %v9476_v8  ;;  %v12047_v8 = vpop.f32.mrf.mxu1 }
 0x74f   : > { %v4998_v39 = vpop.f32.mrf.mxu2  ;;  %v5047_v15 = vpop.f32.mrf.mxu3 }
 0x750   : > { %v4999_v43 = vadd.f32 %v4998_v39, %v4950_v10  ;;  %v5103_v39 = vpop.f32.mrf.mxu0 }
 0x752   : > { %v12042_v40 = vadd.f32 %v5047_v15, %v4999_v43  ;;  %v4908_v15 = vadd.f32 %v11554_v11, %v11879_v16  ;;  %v13335_v16 = vld [vmem:[#allocation163_spill] sm:$0xff] }
 0x754   : > { %v5152_v53 = vpop.f32.mrf.mxu1  ;;  %v4957_v41 = vadd.f32 %v11556_v6, %v4908_v15 }
 0x757   : > { %v5000_v19 = vpop.f32.mrf.mxu2  ;;  %v5049_v58 = vpop.f32.mrf.mxu3 }
 0x758   : > { %v5001_v3 = vadd.f32 %v5000_v19, %v4952_v25 }
 0x75a   : > { %v5050_v0 = vadd.f32 %v5049_v58, %v5001_v3 }
 0x75c   : > { %v5099_v30 = vadd.f32 %v5098_v34, %v5050_v0  ;;  %5198 = vmatmul.bf16.gmra.mxu2 %v9531_v59  ;;  %5247 = vmatmul.bf16.gmra.mxu3 %v9534_v62  ;;  %v4911_v62 = vadd.f32 %v11577_v29, %v11898_v47  ;;  %v12067_v11 = vpop.f32.mrf.mxu1  ;;  %v13336_v0 = vld [vmem:[#allocation128_spill] sm:$0xff] }
 0x75d   : > { %v4913_v29 = vadd.f32 %v13336_v0, %v11907_v17 }
 0x75e   : > { %v12054_v38 = vadd.f32 %v5147_v35, %v5099_v30  ;;  %v12063_v35 = vpop.f32.mrf.mxu0  ;;  %v4960_v19 = vadd.f32 %v13335_v16, %v4911_v62 }
 0x75f   : > { %v5003_v51 = vpop.f32.mrf.mxu2  ;;  %v5052_v56 = vpop.f32.mrf.mxu3 }
 0x760   : > { %v5004_v10 = vadd.f32 %v5003_v51, %v4955_v4  ;;  %v13337_v4 = vld [vmem:[#allocation54_spill] sm:$0xff] }
 0x761   : > { %v4962_v51 = vadd.f32 %v13337_v4, %v4913_v29  ;;  %v4921_v4 = vadd.f32 %v11900_v13, %v11960_v42  ;;  %v4926_v42 = vadd.f32 %v11933_v1, %v11990_v24  ;;  %v13345_v1 = vld [vmem:[#allocation71_spill] sm:$0xff]  ;;  %v7857_v24 = vld [vmem:[%s12670_s5 + $0x74] sm:$0xf] }
 0x762   : > { %v12058_v43 = vadd.f32 %v5052_v56, %v5004_v10 }
 0x764   : > { %v5157_v10 = vpop.f32.mrf.mxu1 }
 0x766   : > { %v5108_v30 = vpop.f32.mrf.mxu0 }
 0x767   : > { %v5005_v34 = vpop.f32.mrf.mxu2  ;;  %v5054_v59 = vpop.f32.mrf.mxu3 }
 0x768   : > { %v5006_v14 = vadd.f32 %v5005_v34, %v4957_v41  ;;  %v13339_v34 = vld [vmem:[#allocation7_spill] sm:$0xff] }
 0x76a   : > { %v5055_v23 = vadd.f32 %v5054_v59, %v5006_v14  ;;  %v13340_v59 = vld [vmem:[#allocation58_spill] sm:$0xff] }
 0x76c   : > { %v5104_v25 = vadd.f32 %v5103_v39, %v5055_v23  ;;  %5203 = vmatmul.bf16.gmra.mxu2 %v13327_v27  ;;  %5252 = vmatmul.bf16.gmra.mxu3 %v9583_v52  ;;  %v13338_v39 = vld [vmem:[#allocation134_spill] sm:$0xff] }
 0x76d   : > { %v4916_v15 = vadd.f32 %v13338_v39, %v11930_v21  ;;  %v12090_v21 = vpop.f32.mrf.mxu1 }
 0x76e   : > { %v12070_v58 = vadd.f32 %v5152_v53, %v5104_v25  ;;  %v12084_v16 = vpop.f32.mrf.mxu0 }
 0x76f   : > { %v5008_v6 = vpop.f32.mrf.mxu2  ;;  %v5057_v3 = vpop.f32.mrf.mxu3  ;;  %v4965_v17 = vadd.f32 %v13340_v59, %v4916_v15 }
 0x770   : > { %v5009_v49 = vadd.f32 %v5008_v6, %v4960_v19  ;;  %v13341_v19 = vld [vmem:[#allocation57_spill] sm:$0xff] }
 0x771   : > { %v4918_v6 = vadd.f32 %v13341_v19, %v11939_v37 }
 0x772   : > { %v12074_v47 = vadd.f32 %v5057_v3, %v5009_v49  ;;  %v13342_v49 = vld [vmem:[#allocation167_spill] sm:$0xff] }
 0x775   : > { %v5162_v37 = vpop.f32.mrf.mxu1 }
 0x777   : > { %v5010_v27 = vpop.f32.mrf.mxu2  ;;  %v5059_v56 = vpop.f32.mrf.mxu3 }
 0x778   : > { %v5011_v52 = vadd.f32 %v5010_v27, %v4962_v51  ;;  %v5113_v27 = vpop.f32.mrf.mxu0 }
 0x77a   : > { %v5060_v53 = vadd.f32 %v5059_v56, %v5011_v52  ;;  %v13343_v52 = vld [vmem:[#allocation74_spill] sm:$0xff] }
 0x77c   : > { %v5109_v41 = vadd.f32 %v5108_v30, %v5060_v53  ;;  %5208 = vmatmul.bf16.gmra.mxu2 %v13331_v48  ;;  %5257 = vmatmul.bf16.gmra.mxu3 %v13339_v34  ;;  %v4967_v48 = vadd.f32 %v13342_v49, %v4918_v6  ;;  %v4931_v49 = vadd.f32 %v11969_v20, %v12010_v54  ;;  %v7360_v20 = vld [vmem:[%s12670_s5 + $0x78] sm:$0xf0]  ;;  %v7874_v54 = vld [vmem:[%s12670_s5 + $0xf4] sm:$0xf0] }
 0x77e   : > { %v12082_v14 = vadd.f32 %v5157_v10, %v5109_v41  ;;  %v4970_v10 = vadd.f32 %v11902_v5, %v4921_v4  ;;  %v4975_v5 = vadd.f32 %v11935_v22, %v4926_v42  ;;  %v7858_v22 = vld [vmem:[%s12670_s5 + $0x74] sm:$0xf0]  ;;  %v7873_v4 = vld [vmem:[%s12670_s5 + $0xf4] sm:$0xf] }
 0x77f   : > { %v5013_v62 = vpop.f32.mrf.mxu2  ;;  %v5062_v23 = vpop.f32.mrf.mxu3 }
 0x780   : > { %v5014_v25 = vadd.f32 %v5013_v62, %v4965_v17 }
 0x782   : > { %v12088_v3 = vadd.f32 %v5062_v23, %v5014_v25 }
 0x787   : > { %v5015_v0 = vpop.f32.mrf.mxu2  ;;  %v5064_v29 = vpop.f32.mrf.mxu3 }
 0x788   : > { %v5016_v30 = vadd.f32 %v5015_v0, %v4967_v48  ;;  %v4980_v0 = vadd.f32 %v11985_v57, %v4931_v49  ;;  %v4933_v57 = vadd.f32 %v11992_v32, %v12017_v44  ;;  %v7856_v32 = vld [vmem:[%s12670_s5 + $0x64] sm:$0xf0] }
 0x789   : > { %v13347_v49 = vld [vmem:[#allocation11_spill] sm:$0xff] }
 0x78a   : > { %v5065_v51 = vadd.f32 %v5064_v29, %v5016_v30  ;;  %v7363_v29 = vor.u32 %v7857_v24, %v7360_v20  ;;  %v7288_v24 = vld [vmem:[%s12670_s5 + $0xe8] sm:$0xf0] }
 0x78c   : > { %v5114_v56 = vadd.f32 %v5113_v27, %v5065_v51  ;;  %5213 = vmatmul.bf16.gmra.mxu2 %v9835_v18  ;;  %5262 = vmatmul.bf16.gmra.mxu3 %v13343_v52  ;;  %v13344_v18 = vld [vmem:[#allocation12_spill] sm:$0xff]  ;;  %v7296_v51 = vld [vmem:[%s12670_s5 + $0xf8] sm:$0xf0] }
 0x78d   : > { %v7299_v52 = vor.u32 %v7873_v4, %v7296_v51  ;;  %5582 = vmatpush.bf16.msra.mxu3 %v7363_v29  ;;  %v4938_v29 = vadd.f32 %v12013_v26, %v12035_v12  ;;  %v7854_v26 = vld [vmem:[%s12670_s5 + $0x54] sm:$0xf0] }
 0x78e   : > { %v12098_v39 = vadd.f32 %v5162_v37, %v5114_v56 }
 0x78f   : > { %v5018_v15 = vpop.f32.mrf.mxu2  ;;  %v5067_v53 = vpop.f32.mrf.mxu3  ;;  %5468 = vmatpush.bf16.msra.mxu1 %v7299_v52  ;;  %v4987_v4 = vadd.f32 %v12019_v45, %v4938_v29  ;;  %v5097_v52 = vadd.f32 %v12028_v28, %v12042_v40  ;;  %v7853_v45 = vld [vmem:[%s12670_s5 + $0x54] sm:$0xf]  ;;  %v7278_v28 = vld [vmem:[%s12670_s5 + $0xd0] sm:$0xf]  ;;  %v7870_v40 = vld [vmem:[%s12670_s5 + $0xd4] sm:$0xf0] }
 0x790   : > { %v5019_v41 = vadd.f32 %v5018_v15, %v4970_v10  ;;  %v4982_v15 = vadd.f32 %v11995_v50, %v4933_v57  ;;  %v7855_v50 = vld [vmem:[%s12670_s5 + $0x64] sm:$0xf]  ;;  %v7344_v57 = vld [vmem:[%s12670_s5 + $0x58] sm:$0xf0] }
 0x792   : > { %v12100_v34 = vadd.f32 %v5067_v53, %v5019_v41 }
 0x797   : > { %v12102_v59 = vpop.f32.mrf.mxu2  ;;  %v12104_v13 = vpop.f32.mrf.mxu3 }
 0x79c   : > { %5218 = vmatmul.bf16.gmra.mxu2 %v9941_v7  ;;  %5267 = vmatmul.bf16.gmra.mxu3 %v13344_v18  ;;  %v7358_v7 = vld [vmem:[%s12670_s5 + $0x70] sm:$0xf]  ;;  %v4936_v18 = vadd.f32 %v12004_v33, %v12026_v46  ;;  %v7286_v33 = vld [vmem:[%s12670_s5 + $0xe0] sm:$0xf]  ;;  %v7872_v46 = vld [vmem:[%s12670_s5 + $0xe4] sm:$0xf0] }
 0x79d   : > { %v7359_v48 = vor.u32 %v7858_v22, %v7358_v7  ;;  %v7287_v7 = vor.u32 %v7872_v46, %v7286_v33  ;;  %v7871_v22 = vld [vmem:[%s12670_s5 + $0xe4] sm:$0xf] }
 0x79e   : > { %v4985_v20 = vadd.f32 %v12006_v9, %v4936_v18 }
 0x79f   : > { %v5023_v17 = vpop.f32.mrf.mxu2  ;;  %v5072_v62 = vpop.f32.mrf.mxu3  ;;  %5568 = vmatpush.bf16.msra.mxu2 %v7359_v48  ;;  %v7291_v48 = vor.u32 %v7871_v22, %v7288_v24  ;;  %v7851_v22 = vld [vmem:[%s12670_s5 + $0x44] sm:$0xf] }
 0x7a0   : > { %v5024_v23 = vadd.f32 %v5023_v17, %v4975_v5  ;;  %v7350_v17 = vld [vmem:[%s12670_s5 + $0x60] sm:$0xf] }
 0x7a1   : > { %v7351_v44 = vor.u32 %v7856_v32, %v7350_v17  ;;  %5469 = vmatpush.bf16.msra.mxu1 %v7291_v48  ;;  %v5146_v17 = vadd.f32 %v12030_v55, %v5097_v52  ;;  %v7334_v55 = vld [vmem:[%s12670_s5 + $0x40] sm:$0xf] }
 0x7a2   : > { %v12111_v25 = vadd.f32 %v5072_v62, %v5024_v23  ;;  %v7352_v62 = vld [vmem:[%s12670_s5 + $0x68] sm:$0xf0]  ;;  %v13346_v23 = vld [vmem:[#allocation72_spill] sm:$0xff] }
 0x7a3   : > { %5569 = vmatpush.bf16.msra.mxu2 %v7351_v44 }
 0x7a7   : > { %v12113_v19 = vpop.f32.mrf.mxu2  ;;  %v12115_v6 = vpop.f32.mrf.mxu3 }
 0x7ac   : > { %5223 = vmatmul.bf16.gmra.mxu2 %v13196_v31  ;;  %5272 = vmatmul.bf16.gmra.mxu3 %v13345_v1  ;;  %v7294_v31 = vld [vmem:[%s12670_s5 + $0xf0] sm:$0xf]  ;;  %v7355_v1 = vor.u32 %v7855_v50, %v7352_v62 }
 0x7ad   : > { %v7295_v30 = vor.u32 %v7874_v54, %v7294_v31 }
 0x7ae   : > { %5583 = vmatpush.bf16.msra.mxu3 %v7355_v1 }
 0x7af   : > { %v5028_v27 = vpop.f32.mrf.mxu2  ;;  %v5077_v56 = vpop.f32.mrf.mxu3  ;;  %5454 = vmatpush.bf16.msra.mxu0 %v7295_v30 }
 0x7b0   : > { %v5029_v37 = vadd.f32 %v5028_v27, %v4980_v0 }
 0x7b2   : > { %v12148_v10 = vadd.f32 %v5077_v56, %v5029_v37  ;;  %v7342_v37 = vld [vmem:[%s12670_s5 + $0x50] sm:$0xf] }
 0x7b3   : > { %5455 = vmatpush.bf16.msra.mxu0 %v7287_v7  ;;  %v7343_v12 = vor.u32 %v7854_v26, %v7342_v37  ;;  %v7852_v7 = vld [vmem:[%s12670_s5 + $0x44] sm:$0xf0] }
 0x7b4   : > { %v7335_v24 = vor.u32 %v7852_v7, %v7334_v55  ;;  %v5116_v55 = vpop.f32.mrf.mxu0  ;;  %v5112_v7 = vadd.f32 %v12084_v16, %v12088_v3  ;;  %v7320_v16 = vld [vmem:[%s12670_s5 + $0x28] sm:$0xf0] }
 0x7b5   : > { %5570 = vmatpush.bf16.msra.mxu2 %v7343_v12 }
 0x7b7   : > { %v5030_v53 = vpop.f32.mrf.mxu2  ;;  %v5079_v41 = vpop.f32.mrf.mxu3 }
 0x7b8   : > { %v5031_v42 = vadd.f32 %v5030_v53, %v4982_v15  ;;  %v7347_v15 = vor.u32 %v7853_v45, %v7344_v57  ;;  %v7279_v53 = vor.u32 %v7870_v40, %v7278_v28  ;;  %v5107_v45 = vadd.f32 %v12063_v35, %v12074_v47  ;;  %v7850_v57 = vld [vmem:[%s12670_s5 + $0x34] sm:$0xf0]  ;;  %v7849_v28 = vld [vmem:[%s12670_s5 + $0x34] sm:$0xf]  ;;  %v7262_v35 = vld [vmem:[%s12670_s5 + $0xb0] sm:$0xf] }
 0x7b9   : > { %5571 = vmatpush.bf16.msra.mxu2 %v7335_v24  ;;  %v7866_v47 = vld [vmem:[%s12670_s5 + $0xb4] sm:$0xf0]  ;;  %v7848_v24 = vld [vmem:[%s12670_s5 + $0x24] sm:$0xf0] }
 0x7ba   : > { %v12153_v5 = vadd.f32 %v5079_v41, %v5031_v42  ;;  %v7869_v41 = vld [vmem:[%s12670_s5 + $0xd4] sm:$0xf]  ;;  %v7280_v42 = vld [vmem:[%s12670_s5 + $0xd8] sm:$0xf0]  ;;  %5584 = vmatpush.bf16.msra.mxu3 %v7347_v15  ;;  %5456 = vmatpush.bf16.msra.mxu0 %v7279_v53  ;;  %v7263_v53 = vor.u32 %v7866_v47, %v7262_v35  ;;  %v7862_v35 = vld [vmem:[%s12670_s5 + $0x94] sm:$0xf0] }
 0x7bb   : > { %v7283_v18 = vor.u32 %v7869_v41, %v7280_v42  ;;  %v7865_v41 = vld [vmem:[%s12670_s5 + $0xb4] sm:$0xf]  ;;  %v7264_v42 = vld [vmem:[%s12670_s5 + $0xb8] sm:$0xf0] }
 0x7bc   : > { %5228 = vmatmul.bf16.gmra.mxu2 %v13346_v23  ;;  %5277 = vmatmul.bf16.gmra.mxu3 %v13347_v49  ;;  %v5102_v49 = vadd.f32 %v12045_v36, %v12058_v43  ;;  %v7270_v36 = vld [vmem:[%s12670_s5 + $0xc0] sm:$0xf]  ;;  %v7868_v43 = vld [vmem:[%s12670_s5 + $0xc4] sm:$0xf0]  ;;  %v7861_v47 = vld [vmem:[%s12670_s5 + $0x94] sm:$0xf] }
 0x7bd   : > { %5470 = vmatpush.bf16.msra.mxu1 %v7283_v18  ;;  %v7267_v18 = vor.u32 %v7865_v41, %v7264_v42 }
 0x7be   : > { %v5151_v29 = vadd.f32 %v12047_v8, %v5102_v49  ;;  %v7326_v8 = vld [vmem:[%s12670_s5 + $0x30] sm:$0xf] }
 0x7bf   : > { %v5033_v31 = vpop.f32.mrf.mxu2  ;;  %v5082_v54 = vpop.f32.mrf.mxu3  ;;  %v7327_v40 = vor.u32 %v7850_v57, %v7326_v8  ;;  %v7312_v8 = vld [vmem:[%s12670_s5 + $0x18] sm:$0xf0] }
 0x7c0   : > { %v5034_v0 = vadd.f32 %v5033_v31, %v4985_v20  ;;  %v7271_v20 = vor.u32 %v7868_v43, %v7270_v36  ;;  %v7867_v31 = vld [vmem:[%s12670_s5 + $0xc4] sm:$0xf]  ;;  %v12296_v36 = vpop.f32.mrf.mxu1 }
 0x7c1   : > { %5572 = vmatpush.bf16.msra.mxu2 %v7327_v40  ;;  %v4923_v40 = vadd.f32 %v11923_v2, %v11967_v60  ;;  %v7248_v2 = vld [vmem:[%s12670_s5 + $0x98] sm:$0xf0]  ;;  %v7302_v60 = vld [vmem:[%s12670_s5] sm:$0xf] }
 0x7c2   : > { %v12184_v30 = vadd.f32 %v5082_v54, %v5034_v0  ;;  %v7272_v54 = vld [vmem:[%s12670_s5 + $0xc8] sm:$0xf0]  ;;  %5457 = vmatpush.bf16.msra.mxu0 %v7271_v20  ;;  %v7251_v41 = vor.u32 %v7861_v47, %v7248_v2  ;;  %v13348_v2 = vld [vmem:[#allocation133_spill] sm:$0xff] }
 0x7c3   : > { %v7275_v0 = vor.u32 %v7867_v31, %v7272_v54  ;;  %v7254_v54 = vld [vmem:[%s12670_s5 + $0xa0] sm:$0xf] }
 0x7c5   : > { %5471 = vmatpush.bf16.msra.mxu1 %v7275_v0  ;;  %v7864_v0 = vld [vmem:[%s12670_s5 + $0xa4] sm:$0xf0] }
 0x7c6   : > { %5458 = vmatpush.bf16.msra.mxu0 %v7263_v53  ;;  %v7844_v53 = vld [vmem:[%s12670_s5 + $0x4] sm:$0xf0] }
 0x7c7   : > { %v5035_v51 = vpop.f32.mrf.mxu2  ;;  %v5084_v27 = vpop.f32.mrf.mxu3  ;;  %v7303_v42 = vor.u32 %v7844_v53, %v7302_v60  ;;  %v4928_v60 = vadd.f32 %v13348_v2, %v11999_v63  ;;  %v7883_v63 = vld [vmem:[%s12670_s5 + $0x144] sm:$0xf]  ;;  %v7904_v2 = vld [vmem:[%s12670_s5 + $0x1e4] sm:$0xf0] }
 0x7c8   : > { %v5036_v56 = vadd.f32 %v5035_v51, %v4987_v4 }
 0x7c9   : > { %5472 = vmatpush.bf16.msra.mxu1 %v7267_v18  ;;  %v7843_v18 = vld [vmem:[%s12670_s5 + $0x4] sm:$0xf] }
 0x7ca   : > { %v12189_v9 = vadd.f32 %v5084_v27, %v5036_v56 }
 0x7cf   : > { %v5194_v32 = vpop.f32.mrf.mxu2  ;;  %v5243_v50 = vpop.f32.mrf.mxu3 }
 0x7d0   : > { %v5195_v44 = vadd.f32 %v5194_v32, %v5146_v17  ;;  %v5156_v17 = vadd.f32 %v12067_v11, %v5107_v45  ;;  %v7318_v11 = vld [vmem:[%s12670_s5 + $0x20] sm:$0xf]  ;;  %v7845_v45 = vld [vmem:[%s12670_s5 + $0x14] sm:$0xf] }
 0x7d1   : > { %v7319_v43 = vor.u32 %v7848_v24, %v7318_v11  ;;  %v7315_v57 = vor.u32 %v7845_v45, %v7312_v8  ;;  %v7860_v11 = vld [vmem:[%s12670_s5 + $0x84] sm:$0xf0]  ;;  %v7859_v24 = vld [vmem:[%s12670_s5 + $0x84] sm:$0xf] }
 0x7d2   : > { %v12216_v62 = vadd.f32 %v5243_v50, %v5195_v44 }
 0x7d3   : > { %5573 = vmatpush.bf16.msra.mxu2 %v7319_v43  ;;  %v7890_v43 = vld [vmem:[%s12670_s5 + $0x174] sm:$0xf0] }
 0x7d7   : > { %v5196_v33 = vpop.f32.mrf.mxu2  ;;  %v5245_v46 = vpop.f32.mrf.mxu3 }
 0x7d8   : > { %v5197_v23 = vadd.f32 %v5196_v33, %v12054_v38  ;;  %v7336_v38 = vld [vmem:[%s12670_s5 + $0x48] sm:$0xf0] }
 0x7d9   : > { %v7339_v48 = vor.u32 %v7851_v22, %v7336_v38  ;;  %v7847_v38 = vld [vmem:[%s12670_s5 + $0x24] sm:$0xf] }
 0x7da   : > { %v12221_v1 = vadd.f32 %v5245_v46, %v5197_v23  ;;  %v7323_v20 = vor.u32 %v7847_v38, %v7320_v16  ;;  %v5117_v38 = vadd.f32 %v5116_v55, %v12100_v34  ;;  %v7889_v55 = vld [vmem:[%s12670_s5 + $0x174] sm:$0xf] }
 0x7db   : > { %5585 = vmatpush.bf16.msra.mxu3 %v7339_v48 }
 0x7df   : > { %v5199_v4 = vpop.f32.mrf.mxu2  ;;  %v5248_v51 = vpop.f32.mrf.mxu3 }
 0x7e0   : > { %v5200_v27 = vadd.f32 %v5199_v4, %v5151_v29  ;;  %v7255_v29 = vor.u32 %v7864_v0, %v7254_v54  ;;  %v7256_v4 = vld [vmem:[%s12670_s5 + $0xa8] sm:$0xf0]  ;;  %v7888_v54 = vld [vmem:[%s12670_s5 + $0x164] sm:$0xf0]  ;;  %v7887_v0 = vld [vmem:[%s12670_s5 + $0x164] sm:$0xf] }
 0x7e2   : > { %v12248_v56 = vadd.f32 %v5248_v51, %v5200_v27  ;;  %v7310_v51 = vld [vmem:[%s12670_s5 + $0x10] sm:$0xf]  ;;  %v7846_v27 = vld [vmem:[%s12670_s5 + $0x14] sm:$0xf0]  ;;  %5459 = vmatpush.bf16.msra.mxu0 %v7255_v29 }
 0x7e7   : > { %v5201_v52 = vpop.f32.mrf.mxu2  ;;  %v5250_v37 = vpop.f32.mrf.mxu3 }
 0x7e8   : > { %v5202_v26 = vadd.f32 %v5201_v52, %v12070_v58  ;;  %v7328_v58 = vld [vmem:[%s12670_s5 + $0x38] sm:$0xf0] }
 0x7e9   : > { %v7331_v15 = vor.u32 %v7849_v28, %v7328_v58  ;;  %v12328_v28 = vpop.f32.mrf.mxu0  ;;  %v7246_v58 = vld [vmem:[%s12670_s5 + $0x90] sm:$0xf] }
 0x7ea   : > { %v12253_v12 = vadd.f32 %v5250_v37, %v5202_v26  ;;  %v7311_v26 = vor.u32 %v7846_v27, %v7310_v51  ;;  %v7432_v27 = vld [vmem:[%s12670_s5 + $0x168] sm:$0xf0] }
 0x7eb   : > { %5586 = vmatpush.bf16.msra.mxu3 %v7331_v15  ;;  %v7247_v15 = vor.u32 %v7862_v35, %v7246_v58  ;;  %v7435_v45 = vor.u32 %v7887_v0, %v7432_v27  ;;  %v7906_v0 = vld [vmem:[%s12670_s5 + $0x1f4] sm:$0xf0] }
 0x7ec   : > { %5574 = vmatpush.bf16.msra.mxu2 %v7311_v26 }
 0x7ed   : > { %5460 = vmatpush.bf16.msra.mxu0 %v7247_v15  ;;  %v7424_v15 = vld [vmem:[%s12670_s5 + $0x158] sm:$0xf0] }
 0x7ef   : > { %v5204_v32 = vpop.f32.mrf.mxu2  ;;  %v5253_v50 = vpop.f32.mrf.mxu3  ;;  %5587 = vmatpush.bf16.msra.mxu3 %v7323_v20  ;;  %v7440_v20 = vld [vmem:[%s12670_s5 + $0x178] sm:$0xf0] }
 0x7f0   : > { %v5205_v44 = vadd.f32 %v5204_v32, %v5156_v17  ;;  %v7304_v17 = vld [vmem:[%s12670_s5 + $0x8] sm:$0xf0]  ;;  %5575 = vmatpush.bf16.msra.mxu2 %v7303_v42  ;;  %v12419_v42 = vld [vmem:[%s12669_s4] ss:$0 sm:$0xff] }
 0x7f2   : > { %v12280_v33 = vadd.f32 %v5253_v50, %v5205_v44  ;;  %v7307_v44 = vor.u32 %v7843_v18, %v7304_v17  ;;  %v7884_v18 = vld [vmem:[%s12670_s5 + $0x144] sm:$0xf0]  ;;  %v13350_v17 = vld [vmem:[#allocation162_spill] sm:$0xff] }
 0x7f3   : > { %5588 = vmatpush.bf16.msra.mxu3 %v7315_v57  ;;  %v7422_v57 = vld [vmem:[%s12670_s5 + $0x150] sm:$0xf] }
 0x7f7   : > { %v5206_v46 = vpop.f32.mrf.mxu2  ;;  %v5255_v23 = vpop.f32.mrf.mxu3  ;;  %5589 = vmatpush.bf16.msra.mxu3 %v7307_v44 }
 0x7f8   : > { %v5207_v49 = vadd.f32 %v5206_v46, %v12082_v14  ;;  %v5161_v14 = vadd.f32 %v12090_v21, %v5112_v7  ;;  %v7863_v21 = vld [vmem:[%s12670_s5 + $0xa4] sm:$0xf]  ;;  %v5167_v46 = vpop.f32.mrf.mxu1  ;;  %v7238_v7 = vld [vmem:[%s12670_s5 + $0x80] sm:$0xf] }
 0x7f9   : > { %v7259_v37 = vor.u32 %v7863_v21, %v7256_v4  ;;  %v5121_v21 = vpop.f32.mrf.mxu0  ;;  %v5166_v4 = vadd.f32 %v12296_v36, %v5117_v38  ;;  %v7885_v36 = vld [vmem:[%s12670_s5 + $0x154] sm:$0xf] }
 0x7fa   : > { %v12285_v22 = vadd.f32 %v5255_v23, %v5207_v49  ;;  %v4972_v23 = vadd.f32 %v11926_v61, %v4923_v40  ;;  %v7239_v61 = vor.u32 %v7860_v11, %v7238_v7  ;;  %v7427_v53 = vor.u32 %v7885_v36, %v7424_v15  ;;  %v13352_v7 = vld [vmem:[#allocation168_spill] sm:$0xff]  ;;  %v7510_v15 = vld [vmem:[%s12670_s5 + $0x1e0] sm:$0xf] }
 0x7fb   : > { %5473 = vmatpush.bf16.msra.mxu1 %v7259_v37  ;;  %v4977_v11 = vadd.f32 %v13352_v7, %v4928_v60 }
 0x7fc   : > { %v5021_v16 = vadd.f32 %v12102_v59, %v4972_v23  ;;  %5461 = vmatpush.bf16.msra.mxu0 %v7239_v61  ;;  %v7430_v59 = vld [vmem:[%s12670_s5 + $0x160] sm:$0xf] }
 0x7fd   : > { %v7431_v51 = vor.u32 %v7888_v54, %v7430_v59  ;;  %v7518_v59 = vld [vmem:[%s12670_s5 + $0x1f0] sm:$0xf] }
 0x7fe   : > { %v5070_v29 = vadd.f32 %v12104_v13, %v5021_v16  ;;  %v7886_v13 = vld [vmem:[%s12670_s5 + $0x154] sm:$0xf0]  ;;  %v5026_v16 = vadd.f32 %v12113_v19, %v4977_v11  ;;  %v7408_v19 = vld [vmem:[%s12670_s5 + $0x138] sm:$0xf0]  ;;  %v7519_v27 = vor.u32 %v7906_v0, %v7518_v59  ;;  %v7876_v59 = vld [vmem:[%s12670_s5 + $0x104] sm:$0xf0] }
 0x7ff   : > { %v5209_v3 = vpop.f32.mrf.mxu2  ;;  %v5258_v48 = vpop.f32.mrf.mxu3  ;;  %5474 = vmatpush.bf16.msra.mxu1 %v7251_v41  ;;  %v7423_v47 = vor.u32 %v7886_v13, %v7422_v57  ;;  %v7879_v57 = vld [vmem:[%s12670_s5 + $0x124] sm:$0xf] }
 0x800   : > { %v5210_v31 = vadd.f32 %v5209_v3, %v5161_v14  ;;  %v7438_v14 = vld [vmem:[%s12670_s5 + $0x170] sm:$0xf]  ;;  %v5170_v40 = vpop.f32.mrf.mxu1  ;;  %v5119_v58 = vadd.f32 %v12328_v28, %v5070_v29  ;;  %v7414_v28 = vld [vmem:[%s12670_s5 + $0x140] sm:$0xf]  ;;  %v7905_v29 = vld [vmem:[%s12670_s5 + $0x1f4] sm:$0xf]  ;;  %5834 = vmatpush.bf16.msrb.mxu2 %v7519_v27 }
 0x801   : > { %v7439_v34 = vor.u32 %v7890_v43, %v7438_v14  ;;  %v7415_v23 = vor.u32 %v7884_v18, %v7414_v28  ;;  %v13353_v13 = vld [vmem:[#allocation130_spill] sm:$0xff]  ;;  %v7511_v28 = vor.u32 %v7904_v2, %v7510_v15  ;;  %v7512_v18 = vld [vmem:[%s12670_s5 + $0x1e8] sm:$0xf0]  ;;  %v7486_v15 = vld [vmem:[%s12670_s5 + $0x1b0] sm:$0xf] }
 0x802   : > { %v12320_v52 = vadd.f32 %v5258_v48, %v5210_v31  ;;  %v7443_v31 = vor.u32 %v7889_v55, %v7440_v20  ;;  %v5168_v44 = vadd.f32 %v5167_v46, %v5119_v58  ;;  %v7406_v46 = vld [vmem:[%s12670_s5 + $0x130] sm:$0xf]  ;;  %v5122_v55 = vadd.f32 %v5121_v21, %v12111_v25  ;;  %v7520_v25 = vld [vmem:[%s12670_s5 + $0x1f8] sm:$0xf0]  ;;  %v7898_v2 = vld [vmem:[%s12670_s5 + $0x1b4] sm:$0xf0] }
 0x803   : > { %5699 = vmatpush.bf16.msrb.mxu0 %v7439_v34  ;;  %v7881_v34 = vld [vmem:[%s12670_s5 + $0x134] sm:$0xf] }
 0x804   : > { %v7411_v54 = vor.u32 %v7881_v34, %v7408_v19  ;;  %5835 = vmatpush.bf16.msrb.mxu2 %v7511_v28  ;;  %v7382_v19 = vld [vmem:[%s12670_s5 + $0x100] sm:$0xf] }
 0x805   : > { %v7383_v27 = vor.u32 %v7876_v59, %v7382_v19 }
 0x807   : > { %v5211_v32 = vpop.f32.mrf.mxu2  ;;  %v5260_v50 = vpop.f32.mrf.mxu3  ;;  %5700 = vmatpush.bf16.msrb.mxu0 %v7431_v51 }
 0x808   : > { %v5212_v49 = vadd.f32 %v5211_v32, %v12098_v39  ;;  %v7240_v39 = vld [vmem:[%s12670_s5 + $0x88] sm:$0xf0]  ;;  %v5172_v21 = vpop.f32.mrf.mxu1 }
 0x809   : > { %v7243_v48 = vor.u32 %v7859_v24, %v7240_v39  ;;  %v5123_v39 = vpop.f32.mrf.mxu0 }
 0x80a   : > { %v12378_v3 = vadd.f32 %v5260_v50, %v5212_v49  ;;  %v7416_v49 = vld [vmem:[%s12670_s5 + $0x148] sm:$0xf0] }
 0x80b   : > { %5475 = vmatpush.bf16.msra.mxu1 %v7243_v48  ;;  %5701 = vmatpush.bf16.msrb.mxu0 %v7423_v47  ;;  %v7419_v61 = vor.u32 %v7883_v63, %v7416_v49  ;;  %v7882_v48 = vld [vmem:[%s12670_s5 + $0x134] sm:$0xf0]  ;;  %v7400_v47 = vld [vmem:[%s12670_s5 + $0x128] sm:$0xf0] }
 0x80f   : > { %5713 = vmatpush.bf16.msrb.mxu1 %v7443_v31  ;;  %v5214_v37 = vpop.f32.mrf.mxu2  ;;  %v5263_v26 = vpop.f32.mrf.mxu3  ;;  %5702 = vmatpush.bf16.msrb.mxu0 %v7415_v23  ;;  %v7407_v31 = vor.u32 %v7882_v48, %v7406_v46  ;;  %v7877_v23 = vld [vmem:[%s12670_s5 + $0x114] sm:$0xf]  ;;  %v7504_v46 = vld [vmem:[%s12670_s5 + $0x1d8] sm:$0xf0] }
 0x810   : > { %v5215_v8 = vadd.f32 %v5214_v37, %v5166_v4  ;;  %v7523_v37 = vor.u32 %v7905_v29, %v7520_v25  ;;  %v5175_v0 = vpop.f32.mrf.mxu1  ;;  %v13356_v25 = vld [vmem:[#allocation125_spill] sm:$0xff] }
 0x811   : > { %v5126_v49 = vpop.f32.mrf.mxu0 }
 0x812   : > { %v5264_v35 = vadd.f32 %v5263_v26, %v5215_v8  ;;  %v5075_v26 = vadd.f32 %v12115_v6, %v5026_v16  ;;  %v7880_v8 = vld [vmem:[%s12670_s5 + $0x124] sm:$0xf0]  ;;  %5848 = vmatpush.bf16.msrb.mxu3 %v7523_v37  ;;  %v7901_v16 = vld [vmem:[%s12670_s5 + $0x1d4] sm:$0xf]  ;;  %v7384_v37 = vld [vmem:[%s12670_s5 + $0x108] sm:$0xf0] }
 0x813   : > { %5714 = vmatpush.bf16.msrb.mxu1 %v7435_v45  ;;  %5703 = vmatpush.bf16.msrb.mxu0 %v7407_v31  ;;  %v7398_v45 = vld [vmem:[%s12670_s5 + $0x120] sm:$0xf] }
 0x814   : > { %v5284_v41 = vmax.f32 %v12216_v62, %v5264_v35  ;;  %v13349_v62 = vld [vmem:[#allocation161_spill] sm:$0xff]  ;;  %v5171_v35 = vadd.f32 %v5170_v40, %v5122_v55  ;;  %v7399_v6 = vor.u32 %v7880_v8, %v7398_v45  ;;  %v7903_v40 = vld [vmem:[%s12670_s5 + $0x1e4] sm:$0xf]  ;;  %v7900_v45 = vld [vmem:[%s12670_s5 + $0x1c4] sm:$0xf0] }
 0x815   : > { %v13351_v32 = vmax.f32 %v13349_v62, %v13350_v17  ;;  %v7515_v17 = vor.u32 %v7903_v40, %v7512_v18  ;;  %v7488_v40 = vld [vmem:[%s12670_s5 + $0x1b8] sm:$0xf0]  ;;  %v7487_v18 = vor.u32 %v7898_v2, %v7486_v15 }
 0x817   : > { %5715 = vmatpush.bf16.msrb.mxu1 %v7427_v53  ;;  %v5299_v50 = vmax.f32 %v13351_v32, %v5284_v41  ;;  %v5216_v24 = vpop.f32.mrf.mxu2  ;;  %v5265_v38 = vpop.f32.mrf.mxu3  ;;  %v7403_v41 = vor.u32 %v7879_v57, %v7400_v47  ;;  %5704 = vmatpush.bf16.msrb.mxu0 %v7399_v6  ;;  %v5124_v32 = vadd.f32 %v5123_v39, %v5075_v26  ;;  %v7502_v39 = vld [vmem:[%s12670_s5 + $0x1d0] sm:$0xf]  ;;  %v7494_v26 = vld [vmem:[%s12670_s5 + $0x1c0] sm:$0xf] }
 0x818   : > { %v5217_v43 = vadd.f32 %v5216_v24, %v5168_v44  ;;  %v7878_v44 = vld [vmem:[%s12670_s5 + $0x114] sm:$0xf0]  ;;  %5849 = vmatpush.bf16.msrb.mxu3 %v7515_v17 }
 0x819   : > { %v5311_v14 = vadd.f32 %v12419_v42, %v5299_v50  ;;  %v7390_v50 = vld [vmem:[%s12670_s5 + $0x110] sm:$0xf]  ;;  %v5173_v31 = vadd.f32 %v5172_v21, %v5124_v32  ;;  %v7896_v32 = vld [vmem:[%s12670_s5 + $0x1a4] sm:$0xf0] }
 0x81a   : > { %v5266_v20 = vadd.f32 %v5265_v38, %v5217_v43  ;;  %v7391_v38 = vor.u32 %v7878_v44, %v7390_v50  ;;  %v7902_v43 = vld [vmem:[%s12670_s5 + $0x1d4] sm:$0xf0]  ;;  %v7895_v50 = vld [vmem:[%s12670_s5 + $0x1a4] sm:$0xf] }
 0x81b   : > { %5716 = vmatpush.bf16.msrb.mxu1 %v7419_v61  ;;  %v5319_v4 = vmax.f32 %v5311_v14, 0.0  ;;  %v7392_v61 = vld [vmem:[%s12670_s5 + $0x118] sm:$0xf0]  ;;  %v7503_v55 = vor.u32 %v7902_v43, %v7502_v39 }
 0x81c   : > { %v5286_v51 = vmax.f32 %v12221_v1, %v5266_v20  ;;  %v13354_v1 = vld [vmem:[#allocation55_spill] sm:$0xff]  ;;  %v7395_v14 = vor.u32 %v7877_v23, %v7392_v61  ;;  %5705 = vmatpush.bf16.msrb.mxu0 %v7391_v38  ;;  %v7507_v20 = vor.u32 %v7901_v16, %v7504_v46  ;;  %v5177_v46 = vpop.f32.mrf.mxu1 }
 0x81d   : > { %v13355_v36 = vmax.f32 %v13353_v13, %v13354_v1  ;;  %v5327_v7 = vpack.c.bf16 %v5319_v4, %v5319_v4  ;;  %v13357_v4 = vld [vmem:[#allocation51_spill] sm:$0xff]  ;;  %5836 = vmatpush.bf16.msrb.mxu2 %v7503_v55  ;;  %v7495_v1 = vor.u32 %v7900_v45, %v7494_v26  ;;  %v7893_v55 = vld [vmem:[%s12670_s5 + $0x194] sm:$0xf] }
 0x81e   : > { %5850 = vmatpush.bf16.msrb.mxu3 %v7507_v20  ;;  %v13359_v23 = vld [vmem:[#allocation127_spill] sm:$0xff]  ;;  %v13363_v45 = vld [vmem:[#allocation164_spill] sm:$0xff] }
 0x81f   : > { %5717 = vmatpush.bf16.msrb.mxu1 %v7411_v54  ;;  %v5300_v58 = vmax.f32 %v13355_v36, %v5286_v51  ;;  %v5219_v60 = vpop.f32.mrf.mxu2  ;;  %v5268_v53 = vpop.f32.mrf.mxu3  ;;  %v7875_v54 = vld [vmem:[%s12670_s5 + $0x104] sm:$0xf]  ;;  %v5484_v29 = vunpack.c.l.b16 %v5327_v7  ;;  %v13358_v51 = vmax.f32 %v13356_v25, %v13357_v4  ;;  %v7462_v4 = vld [vmem:[%s12670_s5 + $0x180] sm:$0xf]  ;;  %v13362_v26 = vld [vmem:[#allocation123_spill] sm:$0xff] }
 0x820   : > { %v5220_v62 = vadd.f32 %v5219_v60, %v5171_v35  ;;  %v7387_v13 = vor.u32 %v7875_v54, %v7384_v37  ;;  %v7899_v36 = vld [vmem:[%s12670_s5 + $0x1c4] sm:$0xf]  ;;  %5706 = vmatpush.bf16.msrb.mxu0 %v7383_v27  ;;  %v7897_v60 = vld [vmem:[%s12670_s5 + $0x1b4] sm:$0xf]  ;;  %v7472_v54 = vld [vmem:[%s12670_s5 + $0x198] sm:$0xf0] }
 0x821   : > { %v5312_v63 = vadd.f32 %v12419_v42, %v5300_v58  ;;  %v7496_v58 = vld [vmem:[%s12670_s5 + $0x1c8] sm:$0xf0]  ;;  %5837 = vmatpush.bf16.msrb.mxu2 %v7495_v1 }
 0x822   : > { %v5269_v24 = vadd.f32 %v5268_v53, %v5220_v62  ;;  %v7499_v47 = vor.u32 %v7899_v36, %v7496_v58  ;;  %v5127_v53 = vadd.f32 %v5126_v49, %v12148_v10  ;;  %v5128_v62 = vpop.f32.mrf.mxu0  ;;  %v7478_v10 = vld [vmem:[%s12670_s5 + $0x1a0] sm:$0xf]  ;;  %v13360_v49 = vld [vmem:[#allocation53_spill] sm:$0xff] }
 0x823   : > { %5718 = vmatpush.bf16.msrb.mxu1 %v7403_v41  ;;  %v5320_v11 = vmax.f32 %v5312_v63, 0.0  ;;  %v7491_v63 = vor.u32 %v7897_v60, %v7488_v40  ;;  %v13361_v7 = vmax.f32 %v13359_v23, %v13360_v49  ;;  %v7479_v39 = vor.u32 %v7896_v32, %v7478_v10  ;;  %v13365_v40 = vld [vmem:[#allocation131_spill] sm:$0xff] }
 0x824   : > { %v5288_v34 = vmax.f32 %v12248_v56, %v5269_v24  ;;  %5851 = vmatpush.bf16.msrb.mxu3 %v7499_v47  ;;  %v5176_v24 = vadd.f32 %v5175_v0, %v5127_v53  ;;  %v5129_v20 = vadd.f32 %v5128_v62, %v12153_v5  ;;  %v7892_v5 = vld [vmem:[%s12670_s5 + $0x184] sm:$0xf0]  ;;  %v5180_v53 = vpop.f32.mrf.mxu1 }
 0x825   : > { %v5328_v48 = vpack.c.bf16 %v5320_v11, %v5320_v11  ;;  %5838 = vmatpush.bf16.msrb.mxu2 %v7487_v18  ;;  %v7463_v58 = vor.u32 %v7892_v5, %v7462_v4  ;;  %v13366_v18 = vld [vmem:[#allocation56_spill] sm:$0xff] }
 0x826   : > { %v5301_v21 = vmax.f32 %v13358_v51, %v5288_v34  ;;  %v7894_v34 = vld [vmem:[%s12670_s5 + $0x194] sm:$0xf0]  ;;  %v7891_v51 = vld [vmem:[%s12670_s5 + $0x184] sm:$0xf] }
 0x827   : > { %5719 = vmatpush.bf16.msrb.mxu1 %v7395_v14  ;;  %v5485_v56 = vunpack.c.l.b16 %v5328_v48  ;;  %v5221_v8 = vpop.f32.mrf.mxu2  ;;  %v5270_v57 = vpop.f32.mrf.mxu3  ;;  %v7470_v48 = vld [vmem:[%s12670_s5 + $0x190] sm:$0xf] }
 0x828   : > { %v5222_v6 = vadd.f32 %v5221_v8, %v5173_v31  ;;  %v5313_v41 = vadd.f32 %v12419_v42, %v5301_v21  ;;  %5852 = vmatpush.bf16.msrb.mxu3 %v7491_v63  ;;  %v7471_v0 = vor.u32 %v7894_v34, %v7470_v48  ;;  %v13364_v8 = vmax.f32 %v13362_v26, %v13363_v45 }
 0x829   : > { %v5486_v35 = vpack.c.b16 %v5485_v56, %v5484_v29  ;;  %5839 = vmatpush.bf16.msrb.mxu2 %v7479_v39  ;;  %v7475_v29 = vor.u32 %v7893_v55, %v7472_v54  ;;  %v13367_v63 = vmax.f32 %v13365_v40, %v13366_v18  ;;  %v13368_v39 = vld [vmem:[#allocation165_spill] sm:$0xff]  ;;  %v13372_v54 = vld [vmem:[#allocation132_spill] sm:$0xff] }
 0x82a   : > { %v5271_v28 = vadd.f32 %v5270_v57, %v5222_v6  ;;  %v5321_v44 = vmax.f32 %v5313_v41, 0.0  ;;  %v5131_v21 = vpop.f32.mrf.mxu0 }
 0x82b   : > { %5720 = vmatpush.bf16.msrb.mxu1 %v7387_v13  ;;  %5576 = vmatmul.bf16.vlgmr.msra.gmra.mxu2 %v5486_v35  ;;  %v7464_v13 = vld [vmem:[%s12670_s5 + $0x188] sm:$0xf0]  ;;  %v5132_v15 = vadd.f32 %v5131_v21, %v12184_v30 }
 0x82c   : > { %5590 = vmatmul.bf16.vlgmr.msra.gmra.mxu3 %v5486_v35  ;;  %v5290_v17 = vmax.f32 %v12253_v12, %v5271_v28  ;;  %v7480_v12 = vld [vmem:[%s12670_s5 + $0x1a8] sm:$0xf0]  ;;  %v5329_v31 = vpack.c.bf16 %v5321_v44, %v5321_v44  ;;  %v7467_v35 = vor.u32 %v7891_v51, %v7464_v13 }
 0x82d   : > { %v7483_v14 = vor.u32 %v7895_v50, %v7480_v12  ;;  %5840 = vmatpush.bf16.msrb.mxu2 %v7471_v0  ;;  %v5182_v12 = vpop.f32.mrf.mxu1 }
 0x82e   : > { %v5302_v11 = vmax.f32 %v13361_v7, %v5290_v17  ;;  %v5370_v27 = vunpack.c.l.b16 %v5329_v31  ;;  %v5181_v17 = vadd.f32 %v5180_v53, %v5132_v15 }
 0x82f   : > { %v5224_v38 = vpop.f32.mrf.mxu2  ;;  %v5273_v61 = vpop.f32.mrf.mxu3  ;;  %5853 = vmatpush.bf16.msrb.mxu3 %v7483_v14  ;;  %v13369_v14 = vld [vmem:[#allocation129_spill] sm:$0xff] }
 0x830   : > { %v5314_v43 = vadd.f32 %v12419_v42, %v5302_v11  ;;  %v5225_v16 = vadd.f32 %v5224_v38, %v5176_v24 }
 0x831   : > { %5841 = vmatpush.bf16.msrb.mxu2 %v7463_v58 }
 0x832   : > { %v5322_v19 = vmax.f32 %v5314_v43, 0.0  ;;  %v5274_v59 = vadd.f32 %v5273_v61, %v5225_v16  ;;  %v5133_v44 = vpop.f32.mrf.mxu0  ;;  %v13370_v43 = vmax.f32 %v13368_v39, %v13369_v14 }
 0x833   : > { %5854 = vmatpush.bf16.msrb.mxu3 %v7475_v29  ;;  %v5134_v23 = vadd.f32 %v5133_v44, %v12189_v9 }
 0x834   : > { %v5330_v56 = vpack.c.bf16 %v5322_v19, %v5322_v19  ;;  %v5292_v25 = vmax.f32 %v12280_v33, %v5274_v59  ;;  %v5178_v33 = vadd.f32 %v5177_v46, %v5129_v20  ;;  %v13371_v59 = vld [vmem:[#allocation166_spill] sm:$0xff] }
 0x835   : > { %v5183_v46 = vadd.f32 %v5182_v12, %v5134_v23  ;;  %v13373_v0 = vmax.f32 %v13371_v59, %v13372_v54 }
 0x836   : > { %v5371_v37 = vunpack.c.l.b16 %v5330_v56  ;;  %v5303_v57 = vmax.f32 %v13364_v8, %v5292_v25 }
 0x837   : > { %v5226_v1 = vpop.f32.mrf.mxu2  ;;  %v5275_v36 = vpop.f32.mrf.mxu3  ;;  %5855 = vmatpush.bf16.msrb.mxu3 %v7467_v35 }
 0x838   : > { %v5372_v6 = vpack.c.b16 %v5371_v37, %v5370_v27  ;;  %v5227_v47 = vadd.f32 %v5226_v1, %v5178_v33  ;;  %v5315_v2 = vadd.f32 %v12419_v42, %v5303_v57 }
 0x83a   : > { %v5276_v60 = vadd.f32 %v5275_v36, %v5227_v47  ;;  %5462 = vmatmul.bf16.vlgmr.msra.gmra.mxu0 %v5372_v6  ;;  %5476 = vmatmul.bf16.vlgmr.msra.gmra.mxu1 %v5372_v6  ;;  %v5323_v28 = vmax.f32 %v5315_v2, 0.0  ;;  %v5866_v36 = vld [vmem:[%s12671_s6] sm:$0x3] }
 0x83b   : > { %v5868_v15 = vperm.slane %v5866_v36, 0  ;;  %v5869_v2 = vperm.slane %v5866_v36, 1 }
 0x83c   : > { %v5294_v41 = vmax.f32 %v12285_v22, %v5276_v60  ;;  %v5331_v49 = vpack.c.bf16 %v5323_v28, %v5323_v28 }
 0x83e   : > { %v5304_v62 = vmax.f32 %v13367_v63, %v5294_v41  ;;  %v5615_v38 = vunpack.c.l.b16 %v5331_v49 }
 0x83f   : > { %v5229_v10 = vpop.f32.mrf.mxu2  ;;  %v5278_v32 = vpop.f32.mrf.mxu3 }
 0x840   : > { %v5316_v30 = vadd.f32 %v12419_v42, %v5304_v62  ;;  %v5230_v50 = vadd.f32 %v5229_v10, %v5181_v17 }
 0x842   : > { %v5324_v7 = vmax.f32 %v5316_v30, 0.0  ;;  %v5279_v11 = vadd.f32 %v5278_v32, %v5230_v50 }
 0x844   : > { %v5332_v24 = vpack.c.bf16 %v5324_v7, %v5324_v7  ;;  %v5296_v22 = vmax.f32 %v12320_v52, %v5279_v11 }
 0x846   : > { %v5616_v61 = vunpack.c.l.b16 %v5332_v24  ;;  %v5305_v16 = vmax.f32 %v13370_v43, %v5296_v22 }
 0x847   : > { %v5231_v48 = vpop.f32.mrf.mxu2  ;;  %v5280_v20 = vpop.f32.mrf.mxu3 }
 0x848   : > { %v5617_v34 = vpack.c.b16 %v5616_v61, %v5615_v38  ;;  %v5232_v55 = vadd.f32 %v5231_v48, %v5183_v46  ;;  %v5317_v9 = vadd.f32 %v12419_v42, %v5305_v16 }
 0x84a   : > { %v5281_v31 = vadd.f32 %v5280_v20, %v5232_v55  ;;  %5707 = vmatmul.bf16.vlgmr.msrb.gmra.mxu0 %v5617_v34  ;;  %5721 = vmatmul.bf16.vlgmr.msrb.gmra.mxu1 %v5617_v34  ;;  %v5325_v52 = vmax.f32 %v5317_v9, 0.0 }
 0x84c   : > { %v5298_v19 = vmax.f32 %v12378_v3, %v5281_v31  ;;  %v5333_v25 = vpack.c.bf16 %v5325_v52, %v5325_v52 }
 0x84e   : > { %v5306_v29 = vmax.f32 %v13373_v0, %v5298_v19  ;;  %v5750_v51 = vunpack.c.l.b16 %v5333_v25 }
 0x850   : > { %v5318_v56 = vadd.f32 %v12419_v42, %v5306_v29 }
 0x852   : > { %v5326_v4 = vmax.f32 %v5318_v56, 0.0 }
 0x854   : > { %v5334_v5 = vpack.c.bf16 %v5326_v4, %v5326_v4 }
 0x856   : > { %v5751_v21 = vunpack.c.l.b16 %v5334_v5 }
 0x858   : > { %v5752_v27 = vpack.c.b16 %v5751_v21, %v5750_v51 }
 0x85a   : > { %5842 = vmatmul.bf16.vlgmr.msrb.gmra.mxu2 %v5752_v27  ;;  %5856 = vmatmul.bf16.vlgmr.msrb.gmra.mxu3 %v5752_v27 }
 0x8ae   : > { %v5577_v45 = vpop.f32.mrf.mxu2 }
 0x8af   : > { %v5591_v3 = vpop.f32.mrf.mxu3 }
 0x8b6   : > { %v5579_v33 = vpop.f32.mrf.mxu2 }
 0x8b7   : > { %v5463_v37 = vpop.f32.mrf.mxu0  ;;  %v5477_v26 = vpop.f32.mrf.mxu1 }
 0x8b8   : > { %v5593_v13 = vpop.f32.mrf.mxu3  ;;  %v5578_v58 = vadd.f32 %v5577_v45, %v5463_v37  ;;  %v5592_v35 = vadd.f32 %v5591_v3, %v5477_v26 }
 0x8bf   : > { %v5465_v8 = vpop.f32.mrf.mxu0  ;;  %v5479_v57 = vpop.f32.mrf.mxu1 }
 0x8c0   : > { %v5580_v17 = vadd.f32 %v5579_v33, %v5465_v8  ;;  %v5594_v10 = vadd.f32 %v5593_v13, %v5479_v57 }
 0x8c7   : > { %v5708_v1 = vpop.f32.mrf.mxu0  ;;  %v5722_v42 = vpop.f32.mrf.mxu1 }
 0x8c8   : > { %v5727_v6 = vadd.f32 %v5708_v1, %v5578_v58  ;;  %v5728_v47 = vadd.f32 %v5722_v42, %v5592_v35 }
 0x8cf   : > { %v5710_v63 = vpop.f32.mrf.mxu0  ;;  %v5724_v62 = vpop.f32.mrf.mxu1 }
 0x8d0   : > { %v5729_v32 = vadd.f32 %v5710_v63, %v5580_v17  ;;  %v5730_v30 = vadd.f32 %v5724_v62, %v5594_v10 }
 0x8dd   : > { %v5843_v60 = vpop.f32.mrf.mxu2  ;;  %v5857_v53 = vpop.f32.mrf.mxu3 }
 0x8de   : > { %v5862_v41 = vadd.f32 %v5843_v60, %v5727_v6  ;;  %v5863_v28 = vadd.f32 %v5857_v53, %v5728_v47 }
 0x8e0   : > { %v5872_v40 = vadd.f32 %v5868_v15, %v5862_v41  ;;  %v5873_v18 = vadd.f32 %v5869_v2, %v5863_v28 }
 0x8e2   : > { %5876 = vst [vmem:[%s508_s29] sm:$0xff] %v5872_v40 }
 0x8e3   : > { %5877 = vst [vmem:[%s508_s29 + $0x8] sm:$0xff] %v5873_v18 }
 0x8e5   : > { %v5845_v50 = vpop.f32.mrf.mxu2  ;;  %v5859_v44 = vpop.f32.mrf.mxu3 }
 0x8e6   : > { %v5864_v23 = vadd.f32 %v5845_v50, %v5729_v32  ;;  %v5865_v49 = vadd.f32 %v5859_v44, %v5730_v30 }
 0x8e8   : > { %v5874_v7 = vadd.f32 %v5868_v15, %v5864_v23  ;;  %v5875_v11 = vadd.f32 %v5869_v2, %v5865_v49 }
 0x8ea   : > { %5878 = vst [vmem:[%s508_s29 + $0x10] sm:$0xff] %v5874_v7 }
 0x8eb   : > { %5879 = vst [vmem:[%s508_s29 + $0x18] sm:$0xff] %v5875_v11 }
 0x8ec   : > { %7980 = shalt.err (!%p7977_p5)
}
 0x8ed   : > { %s8017_s14 = smov 256   ;;  %s8018_s29 = smov 16  }
 0x8ee   : > { %7911 = dma.vmem_to_hbm [thread:$0]  (%p8097_p6), %s5895_s15, 512, %s5897_s28, %s5881_s16, %s8017_s14, %s8017_s14, %s8018_s29  }
 0x8ef PF: > { %s5911_s8 = sand.u32 1, %s8003_s24   ;;  %p7914_p7 = pnand %p5967_p9, %p8101_p8 }
 0x8f0   : > { %s5912_s21 = scalar_lea.sflag [#allocation4], %s5911_s8 }
 0x8f1   : > { %p7915_p10 = pneg %p7914_p7 }
 0x8f3   : > { %7998 = dma.done.wait (%p7915_p10), %s5912_s21, 512  }
 0x8f4   : > { %8000 = vsyncadd (%p7915_p10), %s5912_s21, 4294966784  ;;  %p17_p11 = scmp.ge.s32.totalorder %s8082_s30, 4   ;;  %s13374_s24 = smov %s8007_s25 }
 0x8f5   : > { %s13375_s25 = smov %s8011_s26  ;;  %s13376_s26 = smov %s8095_s10 }
 0x8f6   : > { %s13377_s27 = smov %s8082_s30  ;;  %19 = sbr.rel (!%p17_p11) target bundleno = 3 (0x3), region = 132 }
 0x8fb   :  { %5918 = vsyncpa [#allocation4], 1 }
 0x8fc   :  { %5920 = vsyncpa [#allocation4 + $0x1], 1 }

</bundles_post_ra>
